<compile_context>
chip_gen: v5e
topology: v5e:2x2
jax: 0.10.0
libtpu: 0.0.40
codegen_flags: <defaults>
</compile_context>

<pallas_src>
import functools
import numpy as np

import jax
import jax.numpy as jnp
from jax.experimental import pallas as pl
from jax.experimental.pallas import tpu as pltpu

BN_EPS = 1e-5


# ---------------------------------------------------------------------------
# Trace-time (host) helpers: tap metadata, boundary masks, pool / upsample ops.
# ---------------------------------------------------------------------------
def _conv_taps(H, W, dirate):
    """Included taps of a 3x3 conv (padding = dilation = dirate) on an HxW map.

    Returns [(tap_index, flat_offset, needs_mask)] where flat_offset is the
    shift in the flattened (n, y, x) index space and needs_mask says whether
    the tap ever reaches the zero-padded border.
    """
    taps = []
    for dy in range(3):
        for dx in range(3):
            oy, ox = (dy - 1) * dirate, (dx - 1) * dirate
            if abs(oy) > H - 1 or abs(ox) > W - 1:
                continue  # tap never overlaps the valid map -> contributes 0
            taps.append((dy * 3 + dx, oy * W + ox, not (oy == 0 and ox == 0)))
    return taps


def _conv_masks_np(N, H, W, dirate):
    """(9, N*H*W) f32 validity masks (1 inside the map, 0 in the padding)."""
    y = np.arange(H)[:, None]
    x = np.arange(W)[None, :]
    m = np.zeros((9, N, H, W), np.float32)
    for dy in range(3):
        for dx in range(3):
            oy, ox = (dy - 1) * dirate, (dx - 1) * dirate
            valid = ((y + oy >= 0) & (y + oy < H) &
                     (x + ox >= 0) & (x + ox < W)).astype(np.float32)
            m[dy * 3 + dx] = valid[None]
    return m.reshape(9, N * H * W)


def _pool_select_np(N, H, W):
    """Four (N*H*W, N*Ho*Wo) 0/1 selection matrices for MaxPool2d(2, 2,
    ceil_mode=True).  Edge windows replicate the border element (equivalent
    for a max)."""
    Ho, Wo = -(-H // 2), -(-W // 2)
    eye = np.eye(N, dtype=np.float32)
    mats = []
    for dy in range(2):
        for dx in range(2):
            S = np.zeros((H * W, Ho * Wo), np.float32)
            for yo in range(Ho):
                yi = min(2 * yo + dy, H - 1)
                for xo in range(Wo):
                    xi = min(2 * xo + dx, W - 1)
                    S[yi * W + xi, yo * Wo + xo] = 1.0
            mats.append(np.kron(eye, S))
    return mats


def _upsample_mat_np(N, h, w, H, W):
    """(N*h*w, N*H*W) bilinear, align_corners=True interpolation matrix."""
    def lin(insz, outsz):
        M = np.zeros((insz, outsz), np.float64)
        if outsz == 1:
            coords = np.zeros((1,))
        else:
            coords = np.arange(outsz) * (insz - 1) / (outsz - 1)
        i0 = np.clip(np.floor(coords).astype(np.int64), 0, insz - 1)
        i1 = np.minimum(i0 + 1, insz - 1)
        t = coords - i0
        for o in range(outsz):
            M[i0[o], o] += 1.0 - t[o]
            M[i1[o], o] += t[o]
        return M

    U = np.kron(lin(h, H), lin(w, W))
    return np.kron(np.eye(N), U).astype(np.float32)


# ---------------------------------------------------------------------------
# Fused Pallas kernel: [pool | upsample+concat | concat] + conv + BN + ReLU
# (+ optional residual add), all on (C, N*H*W) lane-dense tiles in VMEM.
# ---------------------------------------------------------------------------
def _make_rebnconv_kernel(mode, src_chs, taps, nhw, has_residual):
    n_src = len(src_chs)
    ktot = len(taps) * sum(src_chs)

    def kernel(*args):
        col_ref = args[-1]     # VMEM scratch: (Ktot, NHW) f32 im2col buffer
        out_ref = args[-2]     # (Cout, NHW) f32
        ins = list(args[:-2])
        pos = n_src
        src_refs = ins[:n_src]

        # ---- fused pre-op --------------------------------------------------
        if mode == 'pool':
            sel_refs = ins[pos:pos + 4]
            pos += 4
            xa = src_refs[0][...].astype(jnp.bfloat16)
            pooled = None
            for s in sel_refs:        # 4 selection matmuls + elementwise max
                cand = jnp.dot(xa, s[...], preferred_element_type=jnp.float32)
                pooled = cand if pooled is None else jnp.maximum(pooled, cand)
            sources = [pooled]
        elif mode == 'up_concat':
            u_ref = ins[pos]
            pos += 1
            up = jnp.dot(src_refs[0][...], u_ref[...],
                         preferred_element_type=jnp.float32)
            sources = [up, src_refs[1]]       # concat handled by im2col rows
        else:                                 # 'plain' or 'concat'
            sources = list(src_refs)

        mask_ref = ins[pos]; pos += 1
        w_ref = ins[pos]; pos += 1            # (Cout, Ktot) bf16
        b_ref = ins[pos]; pos += 1            # (Cout, 1) f32
        g_ref = ins[pos]; pos += 1
        beta_ref = ins[pos]; pos += 1
        res_ref = ins[pos] if has_residual else None

        # ---- im2col: statically shifted (and masked) slices written straight
        #      into the VMEM scratch; the zero fill covers the shift tails. ---
        col_ref[...] = jnp.zeros((ktot, nhw), jnp.float32)
        row = 0
        for (k, off, needs_mask) in taps:
            for src, c in zip(sources, src_chs):
                if off >= 0:
                    piece = src[:, off:nhw]
                    if needs_mask:
                        piece = piece * mask_ref[k:k + 1, 0:nhw - off]
                    col_ref[row:row + c, 0:nhw - off] = piece
                else:
                    piece = src[:, 0:nhw + off]
                    if needs_mask:
                        piece = piece * mask_ref[k:k + 1, -off:nhw]
                    col_ref[row:row + c, -off:nhw] = piece
                row += c

        # ---- single MXU matmul (bf16 operands, f32 accumulate) + bias ------
        acc = jnp.dot(w_ref[...], col_ref[...].astype(jnp.bfloat16),
                      preferred_element_type=jnp.float32)
        acc = acc + b_ref[...]

        # ---- BatchNorm2d (training-mode batch stats, single pass) + ReLU ---
        inv_n = 1.0 / nhw
        mean = jnp.sum(acc, axis=1, keepdims=True) * inv_n
        ex2 = jnp.sum(acc * acc, axis=1, keepdims=True) * inv_n
        var = jnp.maximum(ex2 - mean * mean, 0.0)
        y = (acc - mean) * jax.lax.rsqrt(var + BN_EPS)
        y = y * g_ref[...] + beta_ref[...]
        y = jnp.maximum(y, 0.0)
        if has_residual:
            y = y + res_ref[...]
        out_ref[...] = y

    return kernel


def _rebnconv_stage(sources, src_chs, params, *, mode, N, H, W, dirate,
                    in_hw=None, residual=None):
    """One fused stage.  `sources` are (C, N*h*w) f32 arrays.  For 'pool' the
    single source is at the pre-pool resolution `in_hw`; for 'up_concat'
    sources[0] is at the coarse resolution `in_hw`, sources[1] at (H, W)."""
    w, b, gamma, beta = params
    Cout = w.shape[0]
    NHW = N * H * W
    taps = _conv_taps(H, W, dirate)
    ktot = len(taps) * sum(src_chs)

    # Weights packed to (Cout, n_taps * Cin_total), bf16; column order is
    # tap-major then concatenated-channel order (matches the im2col rows).
    w2 = jnp.concatenate([w[:, :, k // 3, k % 3] for (k, _, _) in taps],
                         axis=1).astype(jnp.bfloat16)
    masks = jnp.asarray(_conv_masks_np(N, H, W, dirate))

    inputs = list(sources)
    if mode == 'pool':
        inputs += [jnp.asarray(s, jnp.bfloat16)
                   for s in _pool_select_np(N, *in_hw)]
    elif mode == 'up_concat':
        inputs.append(jnp.asarray(_upsample_mat_np(N, *in_hw, H, W)))
    inputs += [masks, w2,
               b.reshape(Cout, 1).astype(jnp.float32),
               gamma.reshape(Cout, 1).astype(jnp.float32),
               beta.reshape(Cout, 1).astype(jnp.float32)]
    if residual is not None:
        inputs.append(residual)

    kernel = _make_rebnconv_kernel(mode, tuple(src_chs), tuple(taps), NHW,
                                   residual is not None)
    return pl.pallas_call(
        kernel,
        out_shape=jax.ShapeDtypeStruct((Cout, NHW), jnp.float32),
        scratch_shapes=[pltpu.VMEM((ktot, NHW), jnp.float32)],
    )(*inputs)


# ---------------------------------------------------------------------------
# Parameter init (deterministic, synthetic, torch-like OIHW conv weights).
# ---------------------------------------------------------------------------
def init_rebnconv(key, in_ch, out_ch):
    k1, k2, k3, k4 = jax.random.split(key, 4)
    fan_in = in_ch * 9
    w = jax.random.normal(k1, (out_ch, in_ch, 3, 3), jnp.float32) * (2.0 / fan_in) ** 0.5
    b = 0.05 * jax.random.normal(k2, (out_ch,), jnp.float32)
    gamma = 1.0 + 0.1 * jax.random.normal(k3, (out_ch,), jnp.float32)
    beta = 0.1 * jax.random.normal(k4, (out_ch,), jnp.float32)
    return (w, b, gamma, beta)


def init_rsu6(key, in_ch=3, mid_ch=12, out_ch=3):
    chans = {
        'in': (in_ch, out_ch), '1': (out_ch, mid_ch), '2': (mid_ch, mid_ch),
        '3': (mid_ch, mid_ch), '4': (mid_ch, mid_ch), '5': (mid_ch, mid_ch),
        '6': (mid_ch, mid_ch), '5d': (2 * mid_ch, mid_ch), '4d': (2 * mid_ch, mid_ch),
        '3d': (2 * mid_ch, mid_ch), '2d': (2 * mid_ch, mid_ch), '1d': (2 * mid_ch, out_ch),
    }
    keys = jax.random.split(key, len(chans))
    return {name: init_rebnconv(k, *io) for (name, io), k in zip(chans.items(), keys)}


# ---------------------------------------------------------------------------
# RSU6 forward (12 fused Pallas kernels, no XLA glue in between).
# ---------------------------------------------------------------------------
def rsu6_forward(params, x_nchw):
    N, in_ch, H1, W1 = x_nchw.shape
    out_ch = params['in'][0].shape[0]
    mid_ch = params['1'][0].shape[0]

    ceil2 = lambda v: -(-v // 2)
    H2, W2 = ceil2(H1), ceil2(W1)
    H3, W3 = ceil2(H2), ceil2(W2)
    H4, W4 = ceil2(H3), ceil2(W3)
    H5, W5 = ceil2(H4), ceil2(W4)

    # NCHW -> lane-dense (C, N*H*W) at the boundary only.
    x2d = jnp.transpose(x_nchw, (1, 0, 2, 3)).reshape(in_ch, N * H1 * W1)

    st = functools.partial(_rebnconv_stage, N=N)

    hxin = st([x2d], [in_ch], params['in'], mode='plain', H=H1, W=W1, dirate=1)
    hx1 = st([hxin], [out_ch], params['1'], mode='plain', H=H1, W=W1, dirate=1)
    hx2 = st([hx1], [mid_ch], params['2'], mode='pool', H=H2, W=W2, dirate=1,
             in_hw=(H1, W1))
    hx3 = st([hx2], [mid_ch], params['3'], mode='pool', H=H3, W=W3, dirate=1,
             in_hw=(H2, W2))
    hx4 = st([hx3], [mid_ch], params['4'], mode='pool', H=H4, W=W4, dirate=1,
             in_hw=(H3, W3))
    hx5 = st([hx4], [mid_ch], params['5'], mode='pool', H=H5, W=W5, dirate=1,
             in_hw=(H4, W4))
    hx6 = st([hx5], [mid_ch], params['6'], mode='plain', H=H5, W=W5, dirate=2)

    hx5d = st([hx6, hx5], [mid_ch, mid_ch], params['5d'], mode='concat',
              H=H5, W=W5, dirate=1)
    hx4d = st([hx5d, hx4], [mid_ch, mid_ch], params['4d'], mode='up_concat',
              H=H4, W=W4, dirate=1, in_hw=(H5, W5))
    hx3d = st([hx4d, hx3], [mid_ch, mid_ch], params['3d'], mode='up_concat',
              H=H3, W=W3, dirate=1, in_hw=(H4, W4))
    hx2d = st([hx3d, hx2], [mid_ch, mid_ch], params['2d'], mode='up_concat',
              H=H2, W=W2, dirate=1, in_hw=(H3, W3))
    out = st([hx2d, hx1], [mid_ch, mid_ch], params['1d'], mode='up_concat',
             H=H1, W=W1, dirate=1, in_hw=(H2, W2), residual=hxin)

    return jnp.transpose(out.reshape(out_ch, N, H1, W1), (1, 0, 2, 3))


if __name__ == "__main__":
    key = jax.random.PRNGKey(0)
    k_param, k_x = jax.random.split(key)

    IN_CH, MID_CH, OUT_CH = 3, 4, 3
    params = init_rsu6(k_param, in_ch=IN_CH, mid_ch=MID_CH, out_ch=OUT_CH)

    x = jax.random.normal(k_x, (2, IN_CH, 16, 16), jnp.float32)   # NCHW, torch-like

    fwd = jax.jit(rsu6_forward)
    out = fwd(params, x)
    jax.block_until_ready(out)

    assert out.shape == (2, OUT_CH, 16, 16), out.shape
    assert bool(jnp.all(jnp.isfinite(out)))
    print("KERNEL_OK")
</pallas_src>

<mosaic_0001>
module attributes {stable_mosaic.version = 11 : i64} {
  func.func @kernel(%arg0: memref<3x512xf32, #tpu.memory_space<vmem>>, %arg1: memref<9x512xf32, #tpu.memory_space<vmem>>, %arg2: memref<3x27xbf16, #tpu.memory_space<vmem>>, %arg3: memref<3x1xf32, #tpu.memory_space<vmem>>, %arg4: memref<3x1xf32, #tpu.memory_space<vmem>>, %arg5: memref<3x1xf32, #tpu.memory_space<vmem>>, %arg6: memref<3x512xf32, #tpu.memory_space<vmem>>, %arg7: memref<27x512xf32, #tpu.memory_space<vmem>>) attributes {dimension_semantics = [], scalar_prefetch = 0 : i64, scratch_operands = 1 : i64, tpu.core_type = #tpu.core_type<tc>} {
    %cst = arith.constant 0.000000e+00 : f32
    %0 = vector.broadcast %cst : f32 to vector<27x512xf32>
    %c0 = arith.constant 0 : index
    %c0_0 = arith.constant 0 : index
    %1 = vector.load %arg7[%c0, %c0_0] : memref<27x512xf32, #tpu.memory_space<vmem>>, vector<27x512xf32>
    tpu.vector_store %arg7[%c0, %c0_0], %0 {strides = array<i32>} : memref<27x512xf32, #tpu.memory_space<vmem>>, vector<27x512xf32>,
    %c0_1 = arith.constant 0 : index
    %c0_2 = arith.constant 0 : index
    %2 = vector.load %arg0[%c0_1, %c0_2] : memref<3x512xf32, #tpu.memory_space<vmem>>, vector<3x495xf32>
    %c0_3 = arith.constant 0 : index
    %c17 = arith.constant 17 : index
    %3 = vector.load %arg1[%c0_3, %c17] : memref<9x512xf32, #tpu.memory_space<vmem>>, vector<1x495xf32>
    %4 = vector.broadcast %3 : vector<1x495xf32> to vector<3x495xf32>
    %5 = arith.mulf %2, %4 : vector<3x495xf32>
    %c0_4 = arith.constant 0 : index
    %c17_5 = arith.constant 17 : index
    %6 = vector.load %arg7[%c0_4, %c17_5] : memref<27x512xf32, #tpu.memory_space<vmem>>, vector<3x495xf32>
    tpu.vector_store %arg7[%c0_4, %c17_5], %5 {strides = array<i32>} : memref<27x512xf32, #tpu.memory_space<vmem>>, vector<3x495xf32>,
    %c0_6 = arith.constant 0 : index
    %c0_7 = arith.constant 0 : index
    %7 = vector.load %arg0[%c0_6, %c0_7] : memref<3x512xf32, #tpu.memory_space<vmem>>, vector<3x496xf32>
    %c1 = arith.constant 1 : index
    %c16 = arith.constant 16 : index
    %8 = vector.load %arg1[%c1, %c16] : memref<9x512xf32, #tpu.memory_space<vmem>>, vector<1x496xf32>
    %9 = vector.broadcast %8 : vector<1x496xf32> to vector<3x496xf32>
    %10 = arith.mulf %7, %9 : vector<3x496xf32>
    %c3 = arith.constant 3 : index
    %c16_8 = arith.constant 16 : index
    %11 = vector.load %arg7[%c3, %c16_8] : memref<27x512xf32, #tpu.memory_space<vmem>>, vector<3x496xf32>
    tpu.vector_store %arg7[%c3, %c16_8], %10 {strides = array<i32>} : memref<27x512xf32, #tpu.memory_space<vmem>>, vector<3x496xf32>,
    %c0_9 = arith.constant 0 : index
    %c0_10 = arith.constant 0 : index
    %12 = vector.load %arg0[%c0_9, %c0_10] : memref<3x512xf32, #tpu.memory_space<vmem>>, vector<3x497xf32>
    %c2 = arith.constant 2 : index
    %c15 = arith.constant 15 : index
    %13 = vector.load %arg1[%c2, %c15] : memref<9x512xf32, #tpu.memory_space<vmem>>, vector<1x497xf32>
    %14 = vector.broadcast %13 : vector<1x497xf32> to vector<3x497xf32>
    %15 = arith.mulf %12, %14 : vector<3x497xf32>
    %c6 = arith.constant 6 : index
    %c15_11 = arith.constant 15 : index
    %16 = vector.load %arg7[%c6, %c15_11] : memref<27x512xf32, #tpu.memory_space<vmem>>, vector<3x497xf32>
    tpu.vector_store %arg7[%c6, %c15_11], %15 {strides = array<i32>} : memref<27x512xf32, #tpu.memory_space<vmem>>, vector<3x497xf32>,
    %c0_12 = arith.constant 0 : index
    %c0_13 = arith.constant 0 : index
    %17 = vector.load %arg0[%c0_12, %c0_13] : memref<3x512xf32, #tpu.memory_space<vmem>>, vector<3x511xf32>
    %c3_14 = arith.constant 3 : index
    %c1_15 = arith.constant 1 : index
    %18 = vector.load %arg1[%c3_14, %c1_15] : memref<9x512xf32, #tpu.memory_space<vmem>>, vector<1x511xf32>
    %19 = vector.broadcast %18 : vector<1x511xf32> to vector<3x511xf32>
    %20 = arith.mulf %17, %19 : vector<3x511xf32>
    %c9 = arith.constant 9 : index
    %c1_16 = arith.constant 1 : index
    %21 = vector.load %arg7[%c9, %c1_16] : memref<27x512xf32, #tpu.memory_space<vmem>>, vector<3x511xf32>
    tpu.vector_store %arg7[%c9, %c1_16], %20 {strides = array<i32>} : memref<27x512xf32, #tpu.memory_space<vmem>>, vector<3x511xf32>,
    %c0_17 = arith.constant 0 : index
    %c0_18 = arith.constant 0 : index
    %22 = vector.load %arg0[%c0_17, %c0_18] : memref<3x512xf32, #tpu.memory_space<vmem>>, vector<3x512xf32>
    %c12 = arith.constant 12 : index
    %c0_19 = arith.constant 0 : index
    %23 = vector.load %arg7[%c12, %c0_19] : memref<27x512xf32, #tpu.memory_space<vmem>>, vector<3x512xf32>
    tpu.vector_store %arg7[%c12, %c0_19], %22 {strides = array<i32>} : memref<27x512xf32, #tpu.memory_space<vmem>>, vector<3x512xf32>,
    %c0_20 = arith.constant 0 : index
    %c1_21 = arith.constant 1 : index
    %24 = vector.load %arg0[%c0_20, %c1_21] : memref<3x512xf32, #tpu.memory_space<vmem>>, vector<3x511xf32>
    %c5 = arith.constant 5 : index
    %c0_22 = arith.constant 0 : index
    %25 = vector.load %arg1[%c5, %c0_22] : memref<9x512xf32, #tpu.memory_space<vmem>>, vector<1x511xf32>
    %26 = vector.broadcast %25 : vector<1x511xf32> to vector<3x511xf32>
    %27 = arith.mulf %24, %26 : vector<3x511xf32>
    %c15_23 = arith.constant 15 : index
    %c0_24 = arith.constant 0 : index
    %28 = vector.load %arg7[%c15_23, %c0_24] : memref<27x512xf32, #tpu.memory_space<vmem>>, vector<3x511xf32>
    tpu.vector_store %arg7[%c15_23, %c0_24], %27 {strides = array<i32>} : memref<27x512xf32, #tpu.memory_space<vmem>>, vector<3x511xf32>,
    %c0_25 = arith.constant 0 : index
    %c15_26 = arith.constant 15 : index
    %29 = vector.load %arg0[%c0_25, %c15_26] : memref<3x512xf32, #tpu.memory_space<vmem>>, vector<3x497xf32>
    %c6_27 = arith.constant 6 : index
    %c0_28 = arith.constant 0 : index
    %30 = vector.load %arg1[%c6_27, %c0_28] : memref<9x512xf32, #tpu.memory_space<vmem>>, vector<1x497xf32>
    %31 = vector.broadcast %30 : vector<1x497xf32> to vector<3x497xf32>
    %32 = arith.mulf %29, %31 : vector<3x497xf32>
    %c18 = arith.constant 18 : index
    %c0_29 = arith.constant 0 : index
    %33 = vector.load %arg7[%c18, %c0_29] : memref<27x512xf32, #tpu.memory_space<vmem>>, vector<3x497xf32>
    tpu.vector_store %arg7[%c18, %c0_29], %32 {strides = array<i32>} : memref<27x512xf32, #tpu.memory_space<vmem>>, vector<3x497xf32>,
    %c0_30 = arith.constant 0 : index
    %c16_31 = arith.constant 16 : index
    %34 = vector.load %arg0[%c0_30, %c16_31] : memref<3x512xf32, #tpu.memory_space<vmem>>, vector<3x496xf32>
    %c7 = arith.constant 7 : index
    %c0_32 = arith.constant 0 : index
    %35 = vector.load %arg1[%c7, %c0_32] : memref<9x512xf32, #tpu.memory_space<vmem>>, vector<1x496xf32>
    %36 = vector.broadcast %35 : vector<1x496xf32> to vector<3x496xf32>
    %37 = arith.mulf %34, %36 : vector<3x496xf32>
    %c21 = arith.constant 21 : index
    %c0_33 = arith.constant 0 : index
    %38 = vector.load %arg7[%c21, %c0_33] : memref<27x512xf32, #tpu.memory_space<vmem>>, vector<3x496xf32>
    tpu.vector_store %arg7[%c21, %c0_33], %37 {strides = array<i32>} : memref<27x512xf32, #tpu.memory_space<vmem>>, vector<3x496xf32>,
    %c0_34 = arith.constant 0 : index
    %c17_35 = arith.constant 17 : index
    %39 = vector.load %arg0[%c0_34, %c17_35] : memref<3x512xf32, #tpu.memory_space<vmem>>, vector<3x495xf32>
    %c8 = arith.constant 8 : index
    %c0_36 = arith.constant 0 : index
    %40 = vector.load %arg1[%c8, %c0_36] : memref<9x512xf32, #tpu.memory_space<vmem>>, vector<1x495xf32>
    %41 = vector.broadcast %40 : vector<1x495xf32> to vector<3x495xf32>
    %42 = arith.mulf %39, %41 : vector<3x495xf32>
    %c24 = arith.constant 24 : index
    %c0_37 = arith.constant 0 : index
    %43 = vector.load %arg7[%c24, %c0_37] : memref<27x512xf32, #tpu.memory_space<vmem>>, vector<3x495xf32>
    tpu.vector_store %arg7[%c24, %c0_37], %42 {strides = array<i32>} : memref<27x512xf32, #tpu.memory_space<vmem>>, vector<3x495xf32>,
    %c0_38 = arith.constant 0 : index
    %c0_39 = arith.constant 0 : index
    %44 = vector.load %arg2[%c0_38, %c0_39] : memref<3x27xbf16, #tpu.memory_space<vmem>>, vector<3x27xbf16>
    %c0_40 = arith.constant 0 : index
    %c0_41 = arith.constant 0 : index
    %45 = vector.load %arg7[%c0_40, %c0_41] : memref<27x512xf32, #tpu.memory_space<vmem>>, vector<27x512xf32>
    %46 = arith.truncf %45 : vector<27x512xf32> to vector<27x512xbf16>
    %cst_42 = arith.constant dense<0.000000e+00> : vector<3x512xf32>
    %47 = tpu.matmul %44, %46, %cst_42 {dimension_numbers = #tpu.dot_dimension_numbers<[1], [0], [0], [1], [0, 0, 1, 1], [], []>} : vector<3x27xbf16>, vector<27x512xbf16>, vector<3x512xf32> -> vector<3x512xf32>
    %c0_43 = arith.constant 0 : index
    %c0_44 = arith.constant 0 : index
    %48 = vector.load %arg3[%c0_43, %c0_44] : memref<3x1xf32, #tpu.memory_space<vmem>>, vector<3x1xf32>
    %49 = vector.broadcast %48 : vector<3x1xf32> to vector<3x512xf32>
    %50 = arith.addf %47, %49 : vector<3x512xf32>
    %cst_45 = arith.constant dense<0.000000e+00> : vector<3xf32>
    %51 = vector.multi_reduction <add>, %50, %cst_45 [1] : vector<3x512xf32> to vector<3xf32>
    %52 = vector.shape_cast %51 : vector<3xf32> to vector<3x1xf32>
    %cst_46 = arith.constant 0.001953125 : f32
    %53 = vector.broadcast %cst_46 : f32 to vector<3x1xf32>
    %54 = arith.mulf %52, %53 : vector<3x1xf32>
    %55 = arith.mulf %50, %50 : vector<3x512xf32>
    %cst_47 = arith.constant dense<0.000000e+00> : vector<3xf32>
    %56 = vector.multi_reduction <add>, %55, %cst_47 [1] : vector<3x512xf32> to vector<3xf32>
    %57 = vector.shape_cast %56 : vector<3xf32> to vector<3x1xf32>
    %cst_48 = arith.constant 0.001953125 : f32
    %58 = vector.broadcast %cst_48 : f32 to vector<3x1xf32>
    %59 = arith.mulf %57, %58 : vector<3x1xf32>
    %60 = arith.mulf %54, %54 : vector<3x1xf32>
    %61 = arith.subf %59, %60 : vector<3x1xf32>
    %cst_49 = arith.constant 0.000000e+00 : f32
    %62 = vector.broadcast %cst_49 : f32 to vector<3x1xf32>
    %63 = arith.maximumf %61, %62 : vector<3x1xf32>
    %64 = vector.broadcast %54 : vector<3x1xf32> to vector<3x512xf32>
    %65 = arith.subf %50, %64 : vector<3x512xf32>
    %cst_50 = arith.constant 9.99999974E-6 : f32
    %66 = vector.broadcast %cst_50 : f32 to vector<3x1xf32>
    %67 = arith.addf %63, %66 : vector<3x1xf32>
    %68 = math.rsqrt %67 : vector<3x1xf32>
    %69 = vector.broadcast %68 : vector<3x1xf32> to vector<3x512xf32>
    %70 = arith.mulf %65, %69 : vector<3x512xf32>
    %c0_51 = arith.constant 0 : index
    %c0_52 = arith.constant 0 : index
    %71 = vector.load %arg4[%c0_51, %c0_52] : memref<3x1xf32, #tpu.memory_space<vmem>>, vector<3x1xf32>
    %72 = vector.broadcast %71 : vector<3x1xf32> to vector<3x512xf32>
    %73 = arith.mulf %70, %72 : vector<3x512xf32>
    %c0_53 = arith.constant 0 : index
    %c0_54 = arith.constant 0 : index
    %74 = vector.load %arg5[%c0_53, %c0_54] : memref<3x1xf32, #tpu.memory_space<vmem>>, vector<3x1xf32>
    %75 = vector.broadcast %74 : vector<3x1xf32> to vector<3x512xf32>
    %76 = arith.addf %73, %75 : vector<3x512xf32>
    %cst_55 = arith.constant 0.000000e+00 : f32
    %77 = vector.broadcast %cst_55 : f32 to vector<3x512xf32>
    %78 = arith.maximumf %76, %77 : vector<3x512xf32>
    %c0_56 = arith.constant 0 : index
    %c0_57 = arith.constant 0 : index
    %79 = vector.load %arg6[%c0_56, %c0_57] : memref<3x512xf32, #tpu.memory_space<vmem>>, vector<3x512xf32>
    tpu.vector_store %arg6[%c0_56, %c0_57], %78 {strides = array<i32>} : memref<3x512xf32, #tpu.memory_space<vmem>>, vector<3x512xf32>,
    return
  }
}

module attributes {stable_mosaic.version = 11 : i64} {
  func.func @kernel(%arg0: memref<3x512xf32, #tpu.memory_space<vmem>>, %arg1: memref<9x512xf32, #tpu.memory_space<vmem>>, %arg2: memref<4x27xbf16, #tpu.memory_space<vmem>>, %arg3: memref<4x1xf32, #tpu.memory_space<vmem>>, %arg4: memref<4x1xf32, #tpu.memory_space<vmem>>, %arg5: memref<4x1xf32, #tpu.memory_space<vmem>>, %arg6: memref<4x512xf32, #tpu.memory_space<vmem>>, %arg7: memref<27x512xf32, #tpu.memory_space<vmem>>) attributes {dimension_semantics = [], scalar_prefetch = 0 : i64, scratch_operands = 1 : i64, tpu.core_type = #tpu.core_type<tc>} {
    %cst = arith.constant 0.000000e+00 : f32
    %0 = vector.broadcast %cst : f32 to vector<27x512xf32>
    %c0 = arith.constant 0 : index
    %c0_0 = arith.constant 0 : index
    %1 = vector.load %arg7[%c0, %c0_0] : memref<27x512xf32, #tpu.memory_space<vmem>>, vector<27x512xf32>
    tpu.vector_store %arg7[%c0, %c0_0], %0 {strides = array<i32>} : memref<27x512xf32, #tpu.memory_space<vmem>>, vector<27x512xf32>,
    %c0_1 = arith.constant 0 : index
    %c0_2 = arith.constant 0 : index
    %2 = vector.load %arg0[%c0_1, %c0_2] : memref<3x512xf32, #tpu.memory_space<vmem>>, vector<3x495xf32>
    %c0_3 = arith.constant 0 : index
    %c17 = arith.constant 17 : index
    %3 = vector.load %arg1[%c0_3, %c17] : memref<9x512xf32, #tpu.memory_space<vmem>>, vector<1x495xf32>
    %4 = vector.broadcast %3 : vector<1x495xf32> to vector<3x495xf32>
    %5 = arith.mulf %2, %4 : vector<3x495xf32>
    %c0_4 = arith.constant 0 : index
    %c17_5 = arith.constant 17 : index
    %6 = vector.load %arg7[%c0_4, %c17_5] : memref<27x512xf32, #tpu.memory_space<vmem>>, vector<3x495xf32>
    tpu.vector_store %arg7[%c0_4, %c17_5], %5 {strides = array<i32>} : memref<27x512xf32, #tpu.memory_space<vmem>>, vector<3x495xf32>,
    %c0_6 = arith.constant 0 : index
    %c0_7 = arith.constant 0 : index
    %7 = vector.load %arg0[%c0_6, %c0_7] : memref<3x512xf32, #tpu.memory_space<vmem>>, vector<3x496xf32>
    %c1 = arith.constant 1 : index
    %c16 = arith.constant 16 : index
    %8 = vector.load %arg1[%c1, %c16] : memref<9x512xf32, #tpu.memory_space<vmem>>, vector<1x496xf32>
    %9 = vector.broadcast %8 : vector<1x496xf32> to vector<3x496xf32>
    %10 = arith.mulf %7, %9 : vector<3x496xf32>
    %c3 = arith.constant 3 : index
    %c16_8 = arith.constant 16 : index
    %11 = vector.load %arg7[%c3, %c16_8] : memref<27x512xf32, #tpu.memory_space<vmem>>, vector<3x496xf32>
    tpu.vector_store %arg7[%c3, %c16_8], %10 {strides = array<i32>} : memref<27x512xf32, #tpu.memory_space<vmem>>, vector<3x496xf32>,
    %c0_9 = arith.constant 0 : index
    %c0_10 = arith.constant 0 : index
    %12 = vector.load %arg0[%c0_9, %c0_10] : memref<3x512xf32, #tpu.memory_space<vmem>>, vector<3x497xf32>
    %c2 = arith.constant 2 : index
    %c15 = arith.constant 15 : index
    %13 = vector.load %arg1[%c2, %c15] : memref<9x512xf32, #tpu.memory_space<vmem>>, vector<1x497xf32>
    %14 = vector.broadcast %13 : vector<1x497xf32> to vector<3x497xf32>
    %15 = arith.mulf %12, %14 : vector<3x497xf32>
    %c6 = arith.constant 6 : index
    %c15_11 = arith.constant 15 : index
    %16 = vector.load %arg7[%c6, %c15_11] : memref<27x512xf32, #tpu.memory_space<vmem>>, vector<3x497xf32>
    tpu.vector_store %arg7[%c6, %c15_11], %15 {strides = array<i32>} : memref<27x512xf32, #tpu.memory_space<vmem>>, vector<3x497xf32>,
    %c0_12 = arith.constant 0 : index
    %c0_13 = arith.constant 0 : index
    %17 = vector.load %arg0[%c0_12, %c0_13] : memref<3x512xf32, #tpu.memory_space<vmem>>, vector<3x511xf32>
    %c3_14 = arith.constant 3 : index
    %c1_15 = arith.constant 1 : index
    %18 = vector.load %arg1[%c3_14, %c1_15] : memref<9x512xf32, #tpu.memory_space<vmem>>, vector<1x511xf32>
    %19 = vector.broadcast %18 : vector<1x511xf32> to vector<3x511xf32>
    %20 = arith.mulf %17, %19 : vector<3x511xf32>
    %c9 = arith.constant 9 : index
    %c1_16 = arith.constant 1 : index
    %21 = vector.load %arg7[%c9, %c1_16] : memref<27x512xf32, #tpu.memory_space<vmem>>, vector<3x511xf32>
    tpu.vector_store %arg7[%c9, %c1_16], %20 {strides = array<i32>} : memref<27x512xf32, #tpu.memory_space<vmem>>, vector<3x511xf32>,
    %c0_17 = arith.constant 0 : index
    %c0_18 = arith.constant 0 : index
    %22 = vector.load %arg0[%c0_17, %c0_18] : memref<3x512xf32, #tpu.memory_space<vmem>>, vector<3x512xf32>
    %c12 = arith.constant 12 : index
    %c0_19 = arith.constant 0 : index
    %23 = vector.load %arg7[%c12, %c0_19] : memref<27x512xf32, #tpu.memory_space<vmem>>, vector<3x512xf32>
    tpu.vector_store %arg7[%c12, %c0_19], %22 {strides = array<i32>} : memref<27x512xf32, #tpu.memory_space<vmem>>, vector<3x512xf32>,
    %c0_20 = arith.constant 0 : index
    %c1_21 = arith.constant 1 : index
    %24 = vector.load %arg0[%c0_20, %c1_21] : memref<3x512xf32, #tpu.memory_space<vmem>>, vector<3x511xf32>
    %c5 = arith.constant 5 : index
    %c0_22 = arith.constant 0 : index
    %25 = vector.load %arg1[%c5, %c0_22] : memref<9x512xf32, #tpu.memory_space<vmem>>, vector<1x511xf32>
    %26 = vector.broadcast %25 : vector<1x511xf32> to vector<3x511xf32>
    %27 = arith.mulf %24, %26 : vector<3x511xf32>
    %c15_23 = arith.constant 15 : index
    %c0_24 = arith.constant 0 : index
    %28 = vector.load %arg7[%c15_23, %c0_24] : memref<27x512xf32, #tpu.memory_space<vmem>>, vector<3x511xf32>
    tpu.vector_store %arg7[%c15_23, %c0_24], %27 {strides = array<i32>} : memref<27x512xf32, #tpu.memory_space<vmem>>, vector<3x511xf32>,
    %c0_25 = arith.constant 0 : index
    %c15_26 = arith.constant 15 : index
    %29 = vector.load %arg0[%c0_25, %c15_26] : memref<3x512xf32, #tpu.memory_space<vmem>>, vector<3x497xf32>
    %c6_27 = arith.constant 6 : index
    %c0_28 = arith.constant 0 : index
    %30 = vector.load %arg1[%c6_27, %c0_28] : memref<9x512xf32, #tpu.memory_space<vmem>>, vector<1x497xf32>
    %31 = vector.broadcast %30 : vector<1x497xf32> to vector<3x497xf32>
    %32 = arith.mulf %29, %31 : vector<3x497xf32>
    %c18 = arith.constant 18 : index
    %c0_29 = arith.constant 0 : index
    %33 = vector.load %arg7[%c18, %c0_29] : memref<27x512xf32, #tpu.memory_space<vmem>>, vector<3x497xf32>
    tpu.vector_store %arg7[%c18, %c0_29], %32 {strides = array<i32>} : memref<27x512xf32, #tpu.memory_space<vmem>>, vector<3x497xf32>,
    %c0_30 = arith.constant 0 : index
    %c16_31 = arith.constant 16 : index
    %34 = vector.load %arg0[%c0_30, %c16_31] : memref<3x512xf32, #tpu.memory_space<vmem>>, vector<3x496xf32>
    %c7 = arith.constant 7 : index
    %c0_32 = arith.constant 0 : index
    %35 = vector.load %arg1[%c7, %c0_32] : memref<9x512xf32, #tpu.memory_space<vmem>>, vector<1x496xf32>
    %36 = vector.broadcast %35 : vector<1x496xf32> to vector<3x496xf32>
    %37 = arith.mulf %34, %36 : vector<3x496xf32>
    %c21 = arith.constant 21 : index
    %c0_33 = arith.constant 0 : index
    %38 = vector.load %arg7[%c21, %c0_33] : memref<27x512xf32, #tpu.memory_space<vmem>>, vector<3x496xf32>
    tpu.vector_store %arg7[%c21, %c0_33], %37 {strides = array<i32>} : memref<27x512xf32, #tpu.memory_space<vmem>>, vector<3x496xf32>,
    %c0_34 = arith.constant 0 : index
    %c17_35 = arith.constant 17 : index
    %39 = vector.load %arg0[%c0_34, %c17_35] : memref<3x512xf32, #tpu.memory_space<vmem>>, vector<3x495xf32>
    %c8 = arith.constant 8 : index
    %c0_36 = arith.constant 0 : index
    %40 = vector.load %arg1[%c8, %c0_36] : memref<9x512xf32, #tpu.memory_space<vmem>>, vector<1x495xf32>
    %41 = vector.broadcast %40 : vector<1x495xf32> to vector<3x495xf32>
    %42 = arith.mulf %39, %41 : vector<3x495xf32>
    %c24 = arith.constant 24 : index
    %c0_37 = arith.constant 0 : index
    %43 = vector.load %arg7[%c24, %c0_37] : memref<27x512xf32, #tpu.memory_space<vmem>>, vector<3x495xf32>
    tpu.vector_store %arg7[%c24, %c0_37], %42 {strides = array<i32>} : memref<27x512xf32, #tpu.memory_space<vmem>>, vector<3x495xf32>,
    %c0_38 = arith.constant 0 : index
    %c0_39 = arith.constant 0 : index
    %44 = vector.load %arg2[%c0_38, %c0_39] : memref<4x27xbf16, #tpu.memory_space<vmem>>, vector<4x27xbf16>
    %c0_40 = arith.constant 0 : index
    %c0_41 = arith.constant 0 : index
    %45 = vector.load %arg7[%c0_40, %c0_41] : memref<27x512xf32, #tpu.memory_space<vmem>>, vector<27x512xf32>
    %46 = arith.truncf %45 : vector<27x512xf32> to vector<27x512xbf16>
    %cst_42 = arith.constant dense<0.000000e+00> : vector<4x512xf32>
    %47 = tpu.matmul %44, %46, %cst_42 {dimension_numbers = #tpu.dot_dimension_numbers<[1], [0], [0], [1], [0, 0, 1, 1], [], []>} : vector<4x27xbf16>, vector<27x512xbf16>, vector<4x512xf32> -> vector<4x512xf32>
    %c0_43 = arith.constant 0 : index
    %c0_44 = arith.constant 0 : index
    %48 = vector.load %arg3[%c0_43, %c0_44] : memref<4x1xf32, #tpu.memory_space<vmem>>, vector<4x1xf32>
    %49 = vector.broadcast %48 : vector<4x1xf32> to vector<4x512xf32>
    %50 = arith.addf %47, %49 : vector<4x512xf32>
    %cst_45 = arith.constant dense<0.000000e+00> : vector<4xf32>
    %51 = vector.multi_reduction <add>, %50, %cst_45 [1] : vector<4x512xf32> to vector<4xf32>
    %52 = vector.shape_cast %51 : vector<4xf32> to vector<4x1xf32>
    %cst_46 = arith.constant 0.001953125 : f32
    %53 = vector.broadcast %cst_46 : f32 to vector<4x1xf32>
    %54 = arith.mulf %52, %53 : vector<4x1xf32>
    %55 = arith.mulf %50, %50 : vector<4x512xf32>
    %cst_47 = arith.constant dense<0.000000e+00> : vector<4xf32>
    %56 = vector.multi_reduction <add>, %55, %cst_47 [1] : vector<4x512xf32> to vector<4xf32>
    %57 = vector.shape_cast %56 : vector<4xf32> to vector<4x1xf32>
    %cst_48 = arith.constant 0.001953125 : f32
    %58 = vector.broadcast %cst_48 : f32 to vector<4x1xf32>
    %59 = arith.mulf %57, %58 : vector<4x1xf32>
    %60 = arith.mulf %54, %54 : vector<4x1xf32>
    %61 = arith.subf %59, %60 : vector<4x1xf32>
    %cst_49 = arith.constant 0.000000e+00 : f32
    %62 = vector.broadcast %cst_49 : f32 to vector<4x1xf32>
    %63 = arith.maximumf %61, %62 : vector<4x1xf32>
    %64 = vector.broadcast %54 : vector<4x1xf32> to vector<4x512xf32>
    %65 = arith.subf %50, %64 : vector<4x512xf32>
    %cst_50 = arith.constant 9.99999974E-6 : f32
    %66 = vector.broadcast %cst_50 : f32 to vector<4x1xf32>
    %67 = arith.addf %63, %66 : vector<4x1xf32>
    %68 = math.rsqrt %67 : vector<4x1xf32>
    %69 = vector.broadcast %68 : vector<4x1xf32> to vector<4x512xf32>
    %70 = arith.mulf %65, %69 : vector<4x512xf32>
    %c0_51 = arith.constant 0 : index
    %c0_52 = arith.constant 0 : index
    %71 = vector.load %arg4[%c0_51, %c0_52] : memref<4x1xf32, #tpu.memory_space<vmem>>, vector<4x1xf32>
    %72 = vector.broadcast %71 : vector<4x1xf32> to vector<4x512xf32>
    %73 = arith.mulf %70, %72 : vector<4x512xf32>
    %c0_53 = arith.constant 0 : index
    %c0_54 = arith.constant 0 : index
    %74 = vector.load %arg5[%c0_53, %c0_54] : memref<4x1xf32, #tpu.memory_space<vmem>>, vector<4x1xf32>
    %75 = vector.broadcast %74 : vector<4x1xf32> to vector<4x512xf32>
    %76 = arith.addf %73, %75 : vector<4x512xf32>
    %cst_55 = arith.constant 0.000000e+00 : f32
    %77 = vector.broadcast %cst_55 : f32 to vector<4x512xf32>
    %78 = arith.maximumf %76, %77 : vector<4x512xf32>
    %c0_56 = arith.constant 0 : index
    %c0_57 = arith.constant 0 : index
    %79 = vector.load %arg6[%c0_56, %c0_57] : memref<4x512xf32, #tpu.memory_space<vmem>>, vector<4x512xf32>
    tpu.vector_store %arg6[%c0_56, %c0_57], %78 {strides = array<i32>} : memref<4x512xf32, #tpu.memory_space<vmem>>, vector<4x512xf32>,
    return
  }
}

module attributes {stable_mosaic.version = 11 : i64} {
  func.func @kernel(%arg0: memref<4x512xf32, #tpu.memory_space<vmem>>, %arg1: memref<512x128xbf16, #tpu.memory_space<vmem>>, %arg2: memref<512x128xbf16, #tpu.memory_space<vmem>>, %arg3: memref<512x128xbf16, #tpu.memory_space<vmem>>, %arg4: memref<512x128xbf16, #tpu.memory_space<vmem>>, %arg5: memref<9x128xf32, #tpu.memory_space<vmem>>, %arg6: memref<4x36xbf16, #tpu.memory_space<vmem>>, %arg7: memref<4x1xf32, #tpu.memory_space<vmem>>, %arg8: memref<4x1xf32, #tpu.memory_space<vmem>>, %arg9: memref<4x1xf32, #tpu.memory_space<vmem>>, %arg10: memref<4x128xf32, #tpu.memory_space<vmem>>, %arg11: memref<36x128xf32, #tpu.memory_space<vmem>>) attributes {dimension_semantics = [], scalar_prefetch = 0 : i64, scratch_operands = 1 : i64, tpu.core_type = #tpu.core_type<tc>} {
    %c0 = arith.constant 0 : index
    %c0_0 = arith.constant 0 : index
    %0 = vector.load %arg0[%c0, %c0_0] : memref<4x512xf32, #tpu.memory_space<vmem>>, vector<4x512xf32>
    %1 = arith.truncf %0 : vector<4x512xf32> to vector<4x512xbf16>
    %c0_1 = arith.constant 0 : index
    %c0_2 = arith.constant 0 : index
    %2 = vector.load %arg1[%c0_1, %c0_2] : memref<512x128xbf16, #tpu.memory_space<vmem>>, vector<512x128xbf16>
    %cst = arith.constant dense<0.000000e+00> : vector<4x128xf32>
    %3 = tpu.matmul %1, %2, %cst {dimension_numbers = #tpu.dot_dimension_numbers<[1], [0], [0], [1], [0, 0, 1, 1], [], []>} : vector<4x512xbf16>, vector<512x128xbf16>, vector<4x128xf32> -> vector<4x128xf32>
    %c0_3 = arith.constant 0 : index
    %c0_4 = arith.constant 0 : index
    %4 = vector.load %arg2[%c0_3, %c0_4] : memref<512x128xbf16, #tpu.memory_space<vmem>>, vector<512x128xbf16>
    %cst_5 = arith.constant dense<0.000000e+00> : vector<4x128xf32>
    %5 = tpu.matmul %1, %4, %cst_5 {dimension_numbers = #tpu.dot_dimension_numbers<[1], [0], [0], [1], [0, 0, 1, 1], [], []>} : vector<4x512xbf16>, vector<512x128xbf16>, vector<4x128xf32> -> vector<4x128xf32>
    %6 = arith.maximumf %3, %5 : vector<4x128xf32>
    %c0_6 = arith.constant 0 : index
    %c0_7 = arith.constant 0 : index
    %7 = vector.load %arg3[%c0_6, %c0_7] : memref<512x128xbf16, #tpu.memory_space<vmem>>, vector<512x128xbf16>
    %cst_8 = arith.constant dense<0.000000e+00> : vector<4x128xf32>
    %8 = tpu.matmul %1, %7, %cst_8 {dimension_numbers = #tpu.dot_dimension_numbers<[1], [0], [0], [1], [0, 0, 1, 1], [], []>} : vector<4x512xbf16>, vector<512x128xbf16>, vector<4x128xf32> -> vector<4x128xf32>
    %9 = arith.maximumf %6, %8 : vector<4x128xf32>
    %c0_9 = arith.constant 0 : index
    %c0_10 = arith.constant 0 : index
    %10 = vector.load %arg4[%c0_9, %c0_10] : memref<512x128xbf16, #tpu.memory_space<vmem>>, vector<512x128xbf16>
    %cst_11 = arith.constant dense<0.000000e+00> : vector<4x128xf32>
    %11 = tpu.matmul %1, %10, %cst_11 {dimension_numbers = #tpu.dot_dimension_numbers<[1], [0], [0], [1], [0, 0, 1, 1], [], []>} : vector<4x512xbf16>, vector<512x128xbf16>, vector<4x128xf32> -> vector<4x128xf32>
    %12 = arith.maximumf %9, %11 : vector<4x128xf32>
    %cst_12 = arith.constant 0.000000e+00 : f32
    %13 = vector.broadcast %cst_12 : f32 to vector<36x128xf32>
    %c0_13 = arith.constant 0 : index
    %c0_14 = arith.constant 0 : index
    %14 = vector.load %arg11[%c0_13, %c0_14] : memref<36x128xf32, #tpu.memory_space<vmem>>, vector<36x128xf32>
    tpu.vector_store %arg11[%c0_13, %c0_14], %13 {strides = array<i32>} : memref<36x128xf32, #tpu.memory_space<vmem>>, vector<36x128xf32>,
    %15 = vector.extract_strided_slice %12 {offsets = [0, 0], sizes = [4, 119], strides = [1, 1]} : vector<4x128xf32> to vector<4x119xf32>
    %c0_15 = arith.constant 0 : index
    %c9 = arith.constant 9 : index
    %16 = vector.load %arg5[%c0_15, %c9] : memref<9x128xf32, #tpu.memory_space<vmem>>, vector<1x119xf32>
    %17 = vector.broadcast %16 : vector<1x119xf32> to vector<4x119xf32>
    %18 = arith.mulf %15, %17 : vector<4x119xf32>
    %c0_16 = arith.constant 0 : index
    %c9_17 = arith.constant 9 : index
    %19 = vector.load %arg11[%c0_16, %c9_17] : memref<36x128xf32, #tpu.memory_space<vmem>>, vector<4x119xf32>
    tpu.vector_store %arg11[%c0_16, %c9_17], %18 {strides = array<i32>} : memref<36x128xf32, #tpu.memory_space<vmem>>, vector<4x119xf32>,
    %20 = vector.extract_strided_slice %12 {offsets = [0, 0], sizes = [4, 120], strides = [1, 1]} : vector<4x128xf32> to vector<4x120xf32>
    %c1 = arith.constant 1 : index
    %c8 = arith.constant 8 : index
    %21 = vector.load %arg5[%c1, %c8] : memref<9x128xf32, #tpu.memory_space<vmem>>, vector<1x120xf32>
    %22 = vector.broadcast %21 : vector<1x120xf32> to vector<4x120xf32>
    %23 = arith.mulf %20, %22 : vector<4x120xf32>
    %c4 = arith.constant 4 : index
    %c8_18 = arith.constant 8 : index
    %24 = vector.load %arg11[%c4, %c8_18] : memref<36x128xf32, #tpu.memory_space<vmem>>, vector<4x120xf32>
    tpu.vector_store %arg11[%c4, %c8_18], %23 {strides = array<i32>} : memref<36x128xf32, #tpu.memory_space<vmem>>, vector<4x120xf32>,
    %25 = vector.extract_strided_slice %12 {offsets = [0, 0], sizes = [4, 121], strides = [1, 1]} : vector<4x128xf32> to vector<4x121xf32>
    %c2 = arith.constant 2 : index
    %c7 = arith.constant 7 : index
    %26 = vector.load %arg5[%c2, %c7] : memref<9x128xf32, #tpu.memory_space<vmem>>, vector<1x121xf32>
    %27 = vector.broadcast %26 : vector<1x121xf32> to vector<4x121xf32>
    %28 = arith.mulf %25, %27 : vector<4x121xf32>
    %c8_19 = arith.constant 8 : index
    %c7_20 = arith.constant 7 : index
    %29 = vector.load %arg11[%c8_19, %c7_20] : memref<36x128xf32, #tpu.memory_space<vmem>>, vector<4x121xf32>
    tpu.vector_store %arg11[%c8_19, %c7_20], %28 {strides = array<i32>} : memref<36x128xf32, #tpu.memory_space<vmem>>, vector<4x121xf32>,
    %30 = vector.extract_strided_slice %12 {offsets = [0, 0], sizes = [4, 127], strides = [1, 1]} : vector<4x128xf32> to vector<4x127xf32>
    %c3 = arith.constant 3 : index
    %c1_21 = arith.constant 1 : index
    %31 = vector.load %arg5[%c3, %c1_21] : memref<9x128xf32, #tpu.memory_space<vmem>>, vector<1x127xf32>
    %32 = vector.broadcast %31 : vector<1x127xf32> to vector<4x127xf32>
    %33 = arith.mulf %30, %32 : vector<4x127xf32>
    %c12 = arith.constant 12 : index
    %c1_22 = arith.constant 1 : index
    %34 = vector.load %arg11[%c12, %c1_22] : memref<36x128xf32, #tpu.memory_space<vmem>>, vector<4x127xf32>
    tpu.vector_store %arg11[%c12, %c1_22], %33 {strides = array<i32>} : memref<36x128xf32, #tpu.memory_space<vmem>>, vector<4x127xf32>,
    %c16 = arith.constant 16 : index
    %c0_23 = arith.constant 0 : index
    %35 = vector.load %arg11[%c16, %c0_23] : memref<36x128xf32, #tpu.memory_space<vmem>>, vector<4x128xf32>
    tpu.vector_store %arg11[%c16, %c0_23], %12 {strides = array<i32>} : memref<36x128xf32, #tpu.memory_space<vmem>>, vector<4x128xf32>,
    %36 = vector.extract_strided_slice %12 {offsets = [0, 1], sizes = [4, 127], strides = [1, 1]} : vector<4x128xf32> to vector<4x127xf32>
    %c5 = arith.constant 5 : index
    %c0_24 = arith.constant 0 : index
    %37 = vector.load %arg5[%c5, %c0_24] : memref<9x128xf32, #tpu.memory_space<vmem>>, vector<1x127xf32>
    %38 = vector.broadcast %37 : vector<1x127xf32> to vector<4x127xf32>
    %39 = arith.mulf %36, %38 : vector<4x127xf32>
    %c20 = arith.constant 20 : index
    %c0_25 = arith.constant 0 : index
    %40 = vector.load %arg11[%c20, %c0_25] : memref<36x128xf32, #tpu.memory_space<vmem>>, vector<4x127xf32>
    tpu.vector_store %arg11[%c20, %c0_25], %39 {strides = array<i32>} : memref<36x128xf32, #tpu.memory_space<vmem>>, vector<4x127xf32>,
    %41 = vector.extract_strided_slice %12 {offsets = [0, 7], sizes = [4, 121], strides = [1, 1]} : vector<4x128xf32> to vector<4x121xf32>
    %c6 = arith.constant 6 : index
    %c0_26 = arith.constant 0 : index
    %42 = vector.load %arg5[%c6, %c0_26] : memref<9x128xf32, #tpu.memory_space<vmem>>, vector<1x121xf32>
    %43 = vector.broadcast %42 : vector<1x121xf32> to vector<4x121xf32>
    %44 = arith.mulf %41, %43 : vector<4x121xf32>
    %c24 = arith.constant 24 : index
    %c0_27 = arith.constant 0 : index
    %45 = vector.load %arg11[%c24, %c0_27] : memref<36x128xf32, #tpu.memory_space<vmem>>, vector<4x121xf32>
    tpu.vector_store %arg11[%c24, %c0_27], %44 {strides = array<i32>} : memref<36x128xf32, #tpu.memory_space<vmem>>, vector<4x121xf32>,
    %46 = vector.extract_strided_slice %12 {offsets = [0, 8], sizes = [4, 120], strides = [1, 1]} : vector<4x128xf32> to vector<4x120xf32>
    %c7_28 = arith.constant 7 : index
    %c0_29 = arith.constant 0 : index
    %47 = vector.load %arg5[%c7_28, %c0_29] : memref<9x128xf32, #tpu.memory_space<vmem>>, vector<1x120xf32>
    %48 = vector.broadcast %47 : vector<1x120xf32> to vector<4x120xf32>
    %49 = arith.mulf %46, %48 : vector<4x120xf32>
    %c28 = arith.constant 28 : index
    %c0_30 = arith.constant 0 : index
    %50 = vector.load %arg11[%c28, %c0_30] : memref<36x128xf32, #tpu.memory_space<vmem>>, vector<4x120xf32>
    tpu.vector_store %arg11[%c28, %c0_30], %49 {strides = array<i32>} : memref<36x128xf32, #tpu.memory_space<vmem>>, vector<4x120xf32>,
    %51 = vector.extract_strided_slice %12 {offsets = [0, 9], sizes = [4, 119], strides = [1, 1]} : vector<4x128xf32> to vector<4x119xf32>
    %c8_31 = arith.constant 8 : index
    %c0_32 = arith.constant 0 : index
    %52 = vector.load %arg5[%c8_31, %c0_32] : memref<9x128xf32, #tpu.memory_space<vmem>>, vector<1x119xf32>
    %53 = vector.broadcast %52 : vector<1x119xf32> to vector<4x119xf32>
    %54 = arith.mulf %51, %53 : vector<4x119xf32>
    %c32 = arith.constant 32 : index
    %c0_33 = arith.constant 0 : index
    %55 = vector.load %arg11[%c32, %c0_33] : memref<36x128xf32, #tpu.memory_space<vmem>>, vector<4x119xf32>
    tpu.vector_store %arg11[%c32, %c0_33], %54 {strides = array<i32>} : memref<36x128xf32, #tpu.memory_space<vmem>>, vector<4x119xf32>,
    %c0_34 = arith.constant 0 : index
    %c0_35 = arith.constant 0 : index
    %56 = vector.load %arg6[%c0_34, %c0_35] : memref<4x36xbf16, #tpu.memory_space<vmem>>, vector<4x36xbf16>
    %c0_36 = arith.constant 0 : index
    %c0_37 = arith.constant 0 : index
    %57 = vector.load %arg11[%c0_36, %c0_37] : memref<36x128xf32, #tpu.memory_space<vmem>>, vector<36x128xf32>
    %58 = arith.truncf %57 : vector<36x128xf32> to vector<36x128xbf16>
    %cst_38 = arith.constant dense<0.000000e+00> : vector<4x128xf32>
    %59 = tpu.matmul %56, %58, %cst_38 {dimension_numbers = #tpu.dot_dimension_numbers<[1], [0], [0], [1], [0, 0, 1, 1], [], []>} : vector<4x36xbf16>, vector<36x128xbf16>, vector<4x128xf32> -> vector<4x128xf32>
    %c0_39 = arith.constant 0 : index
    %c0_40 = arith.constant 0 : index
    %60 = vector.load %arg7[%c0_39, %c0_40] : memref<4x1xf32, #tpu.memory_space<vmem>>, vector<4x1xf32>
    %61 = vector.broadcast %60 : vector<4x1xf32> to vector<4x128xf32>
    %62 = arith.addf %59, %61 : vector<4x128xf32>
    %cst_41 = arith.constant dense<0.000000e+00> : vector<4xf32>
    %63 = vector.multi_reduction <add>, %62, %cst_41 [1] : vector<4x128xf32> to vector<4xf32>
    %64 = vector.shape_cast %63 : vector<4xf32> to vector<4x1xf32>
    %cst_42 = arith.constant 7.812500e-03 : f32
    %65 = vector.broadcast %cst_42 : f32 to vector<4x1xf32>
    %66 = arith.mulf %64, %65 : vector<4x1xf32>
    %67 = arith.mulf %62, %62 : vector<4x128xf32>
    %cst_43 = arith.constant dense<0.000000e+00> : vector<4xf32>
    %68 = vector.multi_reduction <add>, %67, %cst_43 [1] : vector<4x128xf32> to vector<4xf32>
    %69 = vector.shape_cast %68 : vector<4xf32> to vector<4x1xf32>
    %cst_44 = arith.constant 7.812500e-03 : f32
    %70 = vector.broadcast %cst_44 : f32 to vector<4x1xf32>
    %71 = arith.mulf %69, %70 : vector<4x1xf32>
    %72 = arith.mulf %66, %66 : vector<4x1xf32>
    %73 = arith.subf %71, %72 : vector<4x1xf32>
    %cst_45 = arith.constant 0.000000e+00 : f32
    %74 = vector.broadcast %cst_45 : f32 to vector<4x1xf32>
    %75 = arith.maximumf %73, %74 : vector<4x1xf32>
    %76 = vector.broadcast %66 : vector<4x1xf32> to vector<4x128xf32>
    %77 = arith.subf %62, %76 : vector<4x128xf32>
    %cst_46 = arith.constant 9.99999974E-6 : f32
    %78 = vector.broadcast %cst_46 : f32 to vector<4x1xf32>
    %79 = arith.addf %75, %78 : vector<4x1xf32>
    %80 = math.rsqrt %79 : vector<4x1xf32>
    %81 = vector.broadcast %80 : vector<4x1xf32> to vector<4x128xf32>
    %82 = arith.mulf %77, %81 : vector<4x128xf32>
    %c0_47 = arith.constant 0 : index
    %c0_48 = arith.constant 0 : index
    %83 = vector.load %arg8[%c0_47, %c0_48] : memref<4x1xf32, #tpu.memory_space<vmem>>, vector<4x1xf32>
    %84 = vector.broadcast %83 : vector<4x1xf32> to vector<4x128xf32>
    %85 = arith.mulf %82, %84 : vector<4x128xf32>
    %c0_49 = arith.constant 0 : index
    %c0_50 = arith.constant 0 : index
    %86 = vector.load %arg9[%c0_49, %c0_50] : memref<4x1xf32, #tpu.memory_space<vmem>>, vector<4x1xf32>
    %87 = vector.broadcast %86 : vector<4x1xf32> to vector<4x128xf32>
    %88 = arith.addf %85, %87 : vector<4x128xf32>
    %cst_51 = arith.constant 0.000000e+00 : f32
    %89 = vector.broadcast %cst_51 : f32 to vector<4x128xf32>
    %90 = arith.maximumf %88, %89 : vector<4x128xf32>
    %c0_52 = arith.constant 0 : index
    %c0_53 = arith.constant 0 : index
    %91 = vector.load %arg10[%c0_52, %c0_53] : memref<4x128xf32, #tpu.memory_space<vmem>>, vector<4x128xf32>
    tpu.vector_store %arg10[%c0_52, %c0_53], %90 {strides = array<i32>} : memref<4x128xf32, #tpu.memory_space<vmem>>, vector<4x128xf32>,
    return
  }
}

module attributes {stable_mosaic.version = 11 : i64} {
  func.func @kernel(%arg0: memref<4x128xf32, #tpu.memory_space<vmem>>, %arg1: memref<128x32xbf16, #tpu.memory_space<vmem>>, %arg2: memref<128x32xbf16, #tpu.memory_space<vmem>>, %arg3: memref<128x32xbf16, #tpu.memory_space<vmem>>, %arg4: memref<128x32xbf16, #tpu.memory_space<vmem>>, %arg5: memref<9x32xf32, #tpu.memory_space<vmem>>, %arg6: memref<4x36xbf16, #tpu.memory_space<vmem>>, %arg7: memref<4x1xf32, #tpu.memory_space<vmem>>, %arg8: memref<4x1xf32, #tpu.memory_space<vmem>>, %arg9: memref<4x1xf32, #tpu.memory_space<vmem>>, %arg10: memref<4x32xf32, #tpu.memory_space<vmem>>, %arg11: memref<36x32xf32, #tpu.memory_space<vmem>>) attributes {dimension_semantics = [], scalar_prefetch = 0 : i64, scratch_operands = 1 : i64, tpu.core_type = #tpu.core_type<tc>} {
    %c0 = arith.constant 0 : index
    %c0_0 = arith.constant 0 : index
    %0 = vector.load %arg0[%c0, %c0_0] : memref<4x128xf32, #tpu.memory_space<vmem>>, vector<4x128xf32>
    %1 = arith.truncf %0 : vector<4x128xf32> to vector<4x128xbf16>
    %c0_1 = arith.constant 0 : index
    %c0_2 = arith.constant 0 : index
    %2 = vector.load %arg1[%c0_1, %c0_2] : memref<128x32xbf16, #tpu.memory_space<vmem>>, vector<128x32xbf16>
    %cst = arith.constant dense<0.000000e+00> : vector<4x32xf32>
    %3 = tpu.matmul %1, %2, %cst {dimension_numbers = #tpu.dot_dimension_numbers<[1], [0], [0], [1], [0, 0, 1, 1], [], []>} : vector<4x128xbf16>, vector<128x32xbf16>, vector<4x32xf32> -> vector<4x32xf32>
    %c0_3 = arith.constant 0 : index
    %c0_4 = arith.constant 0 : index
    %4 = vector.load %arg2[%c0_3, %c0_4] : memref<128x32xbf16, #tpu.memory_space<vmem>>, vector<128x32xbf16>
    %cst_5 = arith.constant dense<0.000000e+00> : vector<4x32xf32>
    %5 = tpu.matmul %1, %4, %cst_5 {dimension_numbers = #tpu.dot_dimension_numbers<[1], [0], [0], [1], [0, 0, 1, 1], [], []>} : vector<4x128xbf16>, vector<128x32xbf16>, vector<4x32xf32> -> vector<4x32xf32>
    %6 = arith.maximumf %3, %5 : vector<4x32xf32>
    %c0_6 = arith.constant 0 : index
    %c0_7 = arith.constant 0 : index
    %7 = vector.load %arg3[%c0_6, %c0_7] : memref<128x32xbf16, #tpu.memory_space<vmem>>, vector<128x32xbf16>
    %cst_8 = arith.constant dense<0.000000e+00> : vector<4x32xf32>
    %8 = tpu.matmul %1, %7, %cst_8 {dimension_numbers = #tpu.dot_dimension_numbers<[1], [0], [0], [1], [0, 0, 1, 1], [], []>} : vector<4x128xbf16>, vector<128x32xbf16>, vector<4x32xf32> -> vector<4x32xf32>
    %9 = arith.maximumf %6, %8 : vector<4x32xf32>
    %c0_9 = arith.constant 0 : index
    %c0_10 = arith.constant 0 : index
    %10 = vector.load %arg4[%c0_9, %c0_10] : memref<128x32xbf16, #tpu.memory_space<vmem>>, vector<128x32xbf16>
    %cst_11 = arith.constant dense<0.000000e+00> : vector<4x32xf32>
    %11 = tpu.matmul %1, %10, %cst_11 {dimension_numbers = #tpu.dot_dimension_numbers<[1], [0], [0], [1], [0, 0, 1, 1], [], []>} : vector<4x128xbf16>, vector<128x32xbf16>, vector<4x32xf32> -> vector<4x32xf32>
    %12 = arith.maximumf %9, %11 : vector<4x32xf32>
    %cst_12 = arith.constant 0.000000e+00 : f32
    %13 = vector.broadcast %cst_12 : f32 to vector<36x32xf32>
    %c0_13 = arith.constant 0 : index
    %c0_14 = arith.constant 0 : index
    %14 = vector.load %arg11[%c0_13, %c0_14] : memref<36x32xf32, #tpu.memory_space<vmem>>, vector<36x32xf32>
    tpu.vector_store %arg11[%c0_13, %c0_14], %13 {strides = array<i32>} : memref<36x32xf32, #tpu.memory_space<vmem>>, vector<36x32xf32>,
    %15 = vector.extract_strided_slice %12 {offsets = [0, 0], sizes = [4, 27], strides = [1, 1]} : vector<4x32xf32> to vector<4x27xf32>
    %c0_15 = arith.constant 0 : index
    %c5 = arith.constant 5 : index
    %16 = vector.load %arg5[%c0_15, %c5] : memref<9x32xf32, #tpu.memory_space<vmem>>, vector<1x27xf32>
    %17 = vector.broadcast %16 : vector<1x27xf32> to vector<4x27xf32>
    %18 = arith.mulf %15, %17 : vector<4x27xf32>
    %c0_16 = arith.constant 0 : index
    %c5_17 = arith.constant 5 : index
    %19 = vector.load %arg11[%c0_16, %c5_17] : memref<36x32xf32, #tpu.memory_space<vmem>>, vector<4x27xf32>
    tpu.vector_store %arg11[%c0_16, %c5_17], %18 {strides = array<i32>} : memref<36x32xf32, #tpu.memory_space<vmem>>, vector<4x27xf32>,
    %20 = vector.extract_strided_slice %12 {offsets = [0, 0], sizes = [4, 28], strides = [1, 1]} : vector<4x32xf32> to vector<4x28xf32>
    %c1 = arith.constant 1 : index
    %c4 = arith.constant 4 : index
    %21 = vector.load %arg5[%c1, %c4] : memref<9x32xf32, #tpu.memory_space<vmem>>, vector<1x28xf32>
    %22 = vector.broadcast %21 : vector<1x28xf32> to vector<4x28xf32>
    %23 = arith.mulf %20, %22 : vector<4x28xf32>
    %c4_18 = arith.constant 4 : index
    %c4_19 = arith.constant 4 : index
    %24 = vector.load %arg11[%c4_18, %c4_19] : memref<36x32xf32, #tpu.memory_space<vmem>>, vector<4x28xf32>
    tpu.vector_store %arg11[%c4_18, %c4_19], %23 {strides = array<i32>} : memref<36x32xf32, #tpu.memory_space<vmem>>, vector<4x28xf32>,
    %25 = vector.extract_strided_slice %12 {offsets = [0, 0], sizes = [4, 29], strides = [1, 1]} : vector<4x32xf32> to vector<4x29xf32>
    %c2 = arith.constant 2 : index
    %c3 = arith.constant 3 : index
    %26 = vector.load %arg5[%c2, %c3] : memref<9x32xf32, #tpu.memory_space<vmem>>, vector<1x29xf32>
    %27 = vector.broadcast %26 : vector<1x29xf32> to vector<4x29xf32>
    %28 = arith.mulf %25, %27 : vector<4x29xf32>
    %c8 = arith.constant 8 : index
    %c3_20 = arith.constant 3 : index
    %29 = vector.load %arg11[%c8, %c3_20] : memref<36x32xf32, #tpu.memory_space<vmem>>, vector<4x29xf32>
    tpu.vector_store %arg11[%c8, %c3_20], %28 {strides = array<i32>} : memref<36x32xf32, #tpu.memory_space<vmem>>, vector<4x29xf32>,
    %30 = vector.extract_strided_slice %12 {offsets = [0, 0], sizes = [4, 31], strides = [1, 1]} : vector<4x32xf32> to vector<4x31xf32>
    %c3_21 = arith.constant 3 : index
    %c1_22 = arith.constant 1 : index
    %31 = vector.load %arg5[%c3_21, %c1_22] : memref<9x32xf32, #tpu.memory_space<vmem>>, vector<1x31xf32>
    %32 = vector.broadcast %31 : vector<1x31xf32> to vector<4x31xf32>
    %33 = arith.mulf %30, %32 : vector<4x31xf32>
    %c12 = arith.constant 12 : index
    %c1_23 = arith.constant 1 : index
    %34 = vector.load %arg11[%c12, %c1_23] : memref<36x32xf32, #tpu.memory_space<vmem>>, vector<4x31xf32>
    tpu.vector_store %arg11[%c12, %c1_23], %33 {strides = array<i32>} : memref<36x32xf32, #tpu.memory_space<vmem>>, vector<4x31xf32>,
    %c16 = arith.constant 16 : index
    %c0_24 = arith.constant 0 : index
    %35 = vector.load %arg11[%c16, %c0_24] : memref<36x32xf32, #tpu.memory_space<vmem>>, vector<4x32xf32>
    tpu.vector_store %arg11[%c16, %c0_24], %12 {strides = array<i32>} : memref<36x32xf32, #tpu.memory_space<vmem>>, vector<4x32xf32>,
    %36 = vector.extract_strided_slice %12 {offsets = [0, 1], sizes = [4, 31], strides = [1, 1]} : vector<4x32xf32> to vector<4x31xf32>
    %c5_25 = arith.constant 5 : index
    %c0_26 = arith.constant 0 : index
    %37 = vector.load %arg5[%c5_25, %c0_26] : memref<9x32xf32, #tpu.memory_space<vmem>>, vector<1x31xf32>
    %38 = vector.broadcast %37 : vector<1x31xf32> to vector<4x31xf32>
    %39 = arith.mulf %36, %38 : vector<4x31xf32>
    %c20 = arith.constant 20 : index
    %c0_27 = arith.constant 0 : index
    %40 = vector.load %arg11[%c20, %c0_27] : memref<36x32xf32, #tpu.memory_space<vmem>>, vector<4x31xf32>
    tpu.vector_store %arg11[%c20, %c0_27], %39 {strides = array<i32>} : memref<36x32xf32, #tpu.memory_space<vmem>>, vector<4x31xf32>,
    %41 = vector.extract_strided_slice %12 {offsets = [0, 3], sizes = [4, 29], strides = [1, 1]} : vector<4x32xf32> to vector<4x29xf32>
    %c6 = arith.constant 6 : index
    %c0_28 = arith.constant 0 : index
    %42 = vector.load %arg5[%c6, %c0_28] : memref<9x32xf32, #tpu.memory_space<vmem>>, vector<1x29xf32>
    %43 = vector.broadcast %42 : vector<1x29xf32> to vector<4x29xf32>
    %44 = arith.mulf %41, %43 : vector<4x29xf32>
    %c24 = arith.constant 24 : index
    %c0_29 = arith.constant 0 : index
    %45 = vector.load %arg11[%c24, %c0_29] : memref<36x32xf32, #tpu.memory_space<vmem>>, vector<4x29xf32>
    tpu.vector_store %arg11[%c24, %c0_29], %44 {strides = array<i32>} : memref<36x32xf32, #tpu.memory_space<vmem>>, vector<4x29xf32>,
    %46 = vector.extract_strided_slice %12 {offsets = [0, 4], sizes = [4, 28], strides = [1, 1]} : vector<4x32xf32> to vector<4x28xf32>
    %c7 = arith.constant 7 : index
    %c0_30 = arith.constant 0 : index
    %47 = vector.load %arg5[%c7, %c0_30] : memref<9x32xf32, #tpu.memory_space<vmem>>, vector<1x28xf32>
    %48 = vector.broadcast %47 : vector<1x28xf32> to vector<4x28xf32>
    %49 = arith.mulf %46, %48 : vector<4x28xf32>
    %c28 = arith.constant 28 : index
    %c0_31 = arith.constant 0 : index
    %50 = vector.load %arg11[%c28, %c0_31] : memref<36x32xf32, #tpu.memory_space<vmem>>, vector<4x28xf32>
    tpu.vector_store %arg11[%c28, %c0_31], %49 {strides = array<i32>} : memref<36x32xf32, #tpu.memory_space<vmem>>, vector<4x28xf32>,
    %51 = vector.extract_strided_slice %12 {offsets = [0, 5], sizes = [4, 27], strides = [1, 1]} : vector<4x32xf32> to vector<4x27xf32>
    %c8_32 = arith.constant 8 : index
    %c0_33 = arith.constant 0 : index
    %52 = vector.load %arg5[%c8_32, %c0_33] : memref<9x32xf32, #tpu.memory_space<vmem>>, vector<1x27xf32>
    %53 = vector.broadcast %52 : vector<1x27xf32> to vector<4x27xf32>
    %54 = arith.mulf %51, %53 : vector<4x27xf32>
    %c32 = arith.constant 32 : index
    %c0_34 = arith.constant 0 : index
    %55 = vector.load %arg11[%c32, %c0_34] : memref<36x32xf32, #tpu.memory_space<vmem>>, vector<4x27xf32>
    tpu.vector_store %arg11[%c32, %c0_34], %54 {strides = array<i32>} : memref<36x32xf32, #tpu.memory_space<vmem>>, vector<4x27xf32>,
    %c0_35 = arith.constant 0 : index
    %c0_36 = arith.constant 0 : index
    %56 = vector.load %arg6[%c0_35, %c0_36] : memref<4x36xbf16, #tpu.memory_space<vmem>>, vector<4x36xbf16>
    %c0_37 = arith.constant 0 : index
    %c0_38 = arith.constant 0 : index
    %57 = vector.load %arg11[%c0_37, %c0_38] : memref<36x32xf32, #tpu.memory_space<vmem>>, vector<36x32xf32>
    %58 = arith.truncf %57 : vector<36x32xf32> to vector<36x32xbf16>
    %cst_39 = arith.constant dense<0.000000e+00> : vector<4x32xf32>
    %59 = tpu.matmul %56, %58, %cst_39 {dimension_numbers = #tpu.dot_dimension_numbers<[1], [0], [0], [1], [0, 0, 1, 1], [], []>} : vector<4x36xbf16>, vector<36x32xbf16>, vector<4x32xf32> -> vector<4x32xf32>
    %c0_40 = arith.constant 0 : index
    %c0_41 = arith.constant 0 : index
    %60 = vector.load %arg7[%c0_40, %c0_41] : memref<4x1xf32, #tpu.memory_space<vmem>>, vector<4x1xf32>
    %61 = vector.broadcast %60 : vector<4x1xf32> to vector<4x32xf32>
    %62 = arith.addf %59, %61 : vector<4x32xf32>
    %cst_42 = arith.constant dense<0.000000e+00> : vector<4xf32>
    %63 = vector.multi_reduction <add>, %62, %cst_42 [1] : vector<4x32xf32> to vector<4xf32>
    %64 = vector.shape_cast %63 : vector<4xf32> to vector<4x1xf32>
    %cst_43 = arith.constant 3.125000e-02 : f32
    %65 = vector.broadcast %cst_43 : f32 to vector<4x1xf32>
    %66 = arith.mulf %64, %65 : vector<4x1xf32>
    %67 = arith.mulf %62, %62 : vector<4x32xf32>
    %cst_44 = arith.constant dense<0.000000e+00> : vector<4xf32>
    %68 = vector.multi_reduction <add>, %67, %cst_44 [1] : vector<4x32xf32> to vector<4xf32>
    %69 = vector.shape_cast %68 : vector<4xf32> to vector<4x1xf32>
    %cst_45 = arith.constant 3.125000e-02 : f32
    %70 = vector.broadcast %cst_45 : f32 to vector<4x1xf32>
    %71 = arith.mulf %69, %70 : vector<4x1xf32>
    %72 = arith.mulf %66, %66 : vector<4x1xf32>
    %73 = arith.subf %71, %72 : vector<4x1xf32>
    %cst_46 = arith.constant 0.000000e+00 : f32
    %74 = vector.broadcast %cst_46 : f32 to vector<4x1xf32>
    %75 = arith.maximumf %73, %74 : vector<4x1xf32>
    %76 = vector.broadcast %66 : vector<4x1xf32> to vector<4x32xf32>
    %77 = arith.subf %62, %76 : vector<4x32xf32>
    %cst_47 = arith.constant 9.99999974E-6 : f32
    %78 = vector.broadcast %cst_47 : f32 to vector<4x1xf32>
    %79 = arith.addf %75, %78 : vector<4x1xf32>
    %80 = math.rsqrt %79 : vector<4x1xf32>
    %81 = vector.broadcast %80 : vector<4x1xf32> to vector<4x32xf32>
    %82 = arith.mulf %77, %81 : vector<4x32xf32>
    %c0_48 = arith.constant 0 : index
    %c0_49 = arith.constant 0 : index
    %83 = vector.load %arg8[%c0_48, %c0_49] : memref<4x1xf32, #tpu.memory_space<vmem>>, vector<4x1xf32>
    %84 = vector.broadcast %83 : vector<4x1xf32> to vector<4x32xf32>
    %85 = arith.mulf %82, %84 : vector<4x32xf32>
    %c0_50 = arith.constant 0 : index
    %c0_51 = arith.constant 0 : index
    %86 = vector.load %arg9[%c0_50, %c0_51] : memref<4x1xf32, #tpu.memory_space<vmem>>, vector<4x1xf32>
    %87 = vector.broadcast %86 : vector<4x1xf32> to vector<4x32xf32>
    %88 = arith.addf %85, %87 : vector<4x32xf32>
    %cst_52 = arith.constant 0.000000e+00 : f32
    %89 = vector.broadcast %cst_52 : f32 to vector<4x32xf32>
    %90 = arith.maximumf %88, %89 : vector<4x32xf32>
    %c0_53 = arith.constant 0 : index
    %c0_54 = arith.constant 0 : index
    %91 = vector.load %arg10[%c0_53, %c0_54] : memref<4x32xf32, #tpu.memory_space<vmem>>, vector<4x32xf32>
    tpu.vector_store %arg10[%c0_53, %c0_54], %90 {strides = array<i32>} : memref<4x32xf32, #tpu.memory_space<vmem>>, vector<4x32xf32>,
    return
  }
}

module attributes {stable_mosaic.version = 11 : i64} {
  func.func @kernel(%arg0: memref<4x32xf32, #tpu.memory_space<vmem>>, %arg1: memref<32x8xbf16, #tpu.memory_space<vmem>>, %arg2: memref<32x8xbf16, #tpu.memory_space<vmem>>, %arg3: memref<32x8xbf16, #tpu.memory_space<vmem>>, %arg4: memref<32x8xbf16, #tpu.memory_space<vmem>>, %arg5: memref<9x8xf32, #tpu.memory_space<vmem>>, %arg6: memref<4x36xbf16, #tpu.memory_space<vmem>>, %arg7: memref<4x1xf32, #tpu.memory_space<vmem>>, %arg8: memref<4x1xf32, #tpu.memory_space<vmem>>, %arg9: memref<4x1xf32, #tpu.memory_space<vmem>>, %arg10: memref<4x8xf32, #tpu.memory_space<vmem>>, %arg11: memref<36x8xf32, #tpu.memory_space<vmem>>) attributes {dimension_semantics = [], scalar_prefetch = 0 : i64, scratch_operands = 1 : i64, tpu.core_type = #tpu.core_type<tc>} {
    %c0 = arith.constant 0 : index
    %c0_0 = arith.constant 0 : index
    %0 = vector.load %arg0[%c0, %c0_0] : memref<4x32xf32, #tpu.memory_space<vmem>>, vector<4x32xf32>
    %1 = arith.truncf %0 : vector<4x32xf32> to vector<4x32xbf16>
    %c0_1 = arith.constant 0 : index
    %c0_2 = arith.constant 0 : index
    %2 = vector.load %arg1[%c0_1, %c0_2] : memref<32x8xbf16, #tpu.memory_space<vmem>>, vector<32x8xbf16>
    %cst = arith.constant dense<0.000000e+00> : vector<4x8xf32>
    %3 = tpu.matmul %1, %2, %cst {dimension_numbers = #tpu.dot_dimension_numbers<[1], [0], [0], [1], [0, 0, 1, 1], [], []>} : vector<4x32xbf16>, vector<32x8xbf16>, vector<4x8xf32> -> vector<4x8xf32>
    %c0_3 = arith.constant 0 : index
    %c0_4 = arith.constant 0 : index
    %4 = vector.load %arg2[%c0_3, %c0_4] : memref<32x8xbf16, #tpu.memory_space<vmem>>, vector<32x8xbf16>
    %cst_5 = arith.constant dense<0.000000e+00> : vector<4x8xf32>
    %5 = tpu.matmul %1, %4, %cst_5 {dimension_numbers = #tpu.dot_dimension_numbers<[1], [0], [0], [1], [0, 0, 1, 1], [], []>} : vector<4x32xbf16>, vector<32x8xbf16>, vector<4x8xf32> -> vector<4x8xf32>
    %6 = arith.maximumf %3, %5 : vector<4x8xf32>
    %c0_6 = arith.constant 0 : index
    %c0_7 = arith.constant 0 : index
    %7 = vector.load %arg3[%c0_6, %c0_7] : memref<32x8xbf16, #tpu.memory_space<vmem>>, vector<32x8xbf16>
    %cst_8 = arith.constant dense<0.000000e+00> : vector<4x8xf32>
    %8 = tpu.matmul %1, %7, %cst_8 {dimension_numbers = #tpu.dot_dimension_numbers<[1], [0], [0], [1], [0, 0, 1, 1], [], []>} : vector<4x32xbf16>, vector<32x8xbf16>, vector<4x8xf32> -> vector<4x8xf32>
    %9 = arith.maximumf %6, %8 : vector<4x8xf32>
    %c0_9 = arith.constant 0 : index
    %c0_10 = arith.constant 0 : index
    %10 = vector.load %arg4[%c0_9, %c0_10] : memref<32x8xbf16, #tpu.memory_space<vmem>>, vector<32x8xbf16>
    %cst_11 = arith.constant dense<0.000000e+00> : vector<4x8xf32>
    %11 = tpu.matmul %1, %10, %cst_11 {dimension_numbers = #tpu.dot_dimension_numbers<[1], [0], [0], [1], [0, 0, 1, 1], [], []>} : vector<4x32xbf16>, vector<32x8xbf16>, vector<4x8xf32> -> vector<4x8xf32>
    %12 = arith.maximumf %9, %11 : vector<4x8xf32>
    %cst_12 = arith.constant 0.000000e+00 : f32
    %13 = vector.broadcast %cst_12 : f32 to vector<36x8xf32>
    %c0_13 = arith.constant 0 : index
    %c0_14 = arith.constant 0 : index
    %14 = vector.load %arg11[%c0_13, %c0_14] : memref<36x8xf32, #tpu.memory_space<vmem>>, vector<36x8xf32>
    tpu.vector_store %arg11[%c0_13, %c0_14], %13 {strides = array<i32>} : memref<36x8xf32, #tpu.memory_space<vmem>>, vector<36x8xf32>,
    %15 = vector.extract_strided_slice %12 {offsets = [0, 0], sizes = [4, 5], strides = [1, 1]} : vector<4x8xf32> to vector<4x5xf32>
    %c0_15 = arith.constant 0 : index
    %c3 = arith.constant 3 : index
    %16 = vector.load %arg5[%c0_15, %c3] : memref<9x8xf32, #tpu.memory_space<vmem>>, vector<1x5xf32>
    %17 = vector.broadcast %16 : vector<1x5xf32> to vector<4x5xf32>
    %18 = arith.mulf %15, %17 : vector<4x5xf32>
    %c0_16 = arith.constant 0 : index
    %c3_17 = arith.constant 3 : index
    %19 = vector.load %arg11[%c0_16, %c3_17] : memref<36x8xf32, #tpu.memory_space<vmem>>, vector<4x5xf32>
    tpu.vector_store %arg11[%c0_16, %c3_17], %18 {strides = array<i32>} : memref<36x8xf32, #tpu.memory_space<vmem>>, vector<4x5xf32>,
    %20 = vector.extract_strided_slice %12 {offsets = [0, 0], sizes = [4, 6], strides = [1, 1]} : vector<4x8xf32> to vector<4x6xf32>
    %c1 = arith.constant 1 : index
    %c2 = arith.constant 2 : index
    %21 = vector.load %arg5[%c1, %c2] : memref<9x8xf32, #tpu.memory_space<vmem>>, vector<1x6xf32>
    %22 = vector.broadcast %21 : vector<1x6xf32> to vector<4x6xf32>
    %23 = arith.mulf %20, %22 : vector<4x6xf32>
    %c4 = arith.constant 4 : index
    %c2_18 = arith.constant 2 : index
    %24 = vector.load %arg11[%c4, %c2_18] : memref<36x8xf32, #tpu.memory_space<vmem>>, vector<4x6xf32>
    tpu.vector_store %arg11[%c4, %c2_18], %23 {strides = array<i32>} : memref<36x8xf32, #tpu.memory_space<vmem>>, vector<4x6xf32>,
    %25 = vector.extract_strided_slice %12 {offsets = [0, 0], sizes = [4, 7], strides = [1, 1]} : vector<4x8xf32> to vector<4x7xf32>
    %c2_19 = arith.constant 2 : index
    %c1_20 = arith.constant 1 : index
    %26 = vector.load %arg5[%c2_19, %c1_20] : memref<9x8xf32, #tpu.memory_space<vmem>>, vector<1x7xf32>
    %27 = vector.broadcast %26 : vector<1x7xf32> to vector<4x7xf32>
    %28 = arith.mulf %25, %27 : vector<4x7xf32>
    %c8 = arith.constant 8 : index
    %c1_21 = arith.constant 1 : index
    %29 = vector.load %arg11[%c8, %c1_21] : memref<36x8xf32, #tpu.memory_space<vmem>>, vector<4x7xf32>
    tpu.vector_store %arg11[%c8, %c1_21], %28 {strides = array<i32>} : memref<36x8xf32, #tpu.memory_space<vmem>>, vector<4x7xf32>,
    %30 = vector.extract_strided_slice %12 {offsets = [0, 0], sizes = [4, 7], strides = [1, 1]} : vector<4x8xf32> to vector<4x7xf32>
    %c3_22 = arith.constant 3 : index
    %c1_23 = arith.constant 1 : index
    %31 = vector.load %arg5[%c3_22, %c1_23] : memref<9x8xf32, #tpu.memory_space<vmem>>, vector<1x7xf32>
    %32 = vector.broadcast %31 : vector<1x7xf32> to vector<4x7xf32>
    %33 = arith.mulf %30, %32 : vector<4x7xf32>
    %c12 = arith.constant 12 : index
    %c1_24 = arith.constant 1 : index
    %34 = vector.load %arg11[%c12, %c1_24] : memref<36x8xf32, #tpu.memory_space<vmem>>, vector<4x7xf32>
    tpu.vector_store %arg11[%c12, %c1_24], %33 {strides = array<i32>} : memref<36x8xf32, #tpu.memory_space<vmem>>, vector<4x7xf32>,
    %c16 = arith.constant 16 : index
    %c0_25 = arith.constant 0 : index
    %35 = vector.load %arg11[%c16, %c0_25] : memref<36x8xf32, #tpu.memory_space<vmem>>, vector<4x8xf32>
    tpu.vector_store %arg11[%c16, %c0_25], %12 {strides = array<i32>} : memref<36x8xf32, #tpu.memory_space<vmem>>, vector<4x8xf32>,
    %36 = vector.extract_strided_slice %12 {offsets = [0, 1], sizes = [4, 7], strides = [1, 1]} : vector<4x8xf32> to vector<4x7xf32>
    %c5 = arith.constant 5 : index
    %c0_26 = arith.constant 0 : index
    %37 = vector.load %arg5[%c5, %c0_26] : memref<9x8xf32, #tpu.memory_space<vmem>>, vector<1x7xf32>
    %38 = vector.broadcast %37 : vector<1x7xf32> to vector<4x7xf32>
    %39 = arith.mulf %36, %38 : vector<4x7xf32>
    %c20 = arith.constant 20 : index
    %c0_27 = arith.constant 0 : index
    %40 = vector.load %arg11[%c20, %c0_27] : memref<36x8xf32, #tpu.memory_space<vmem>>, vector<4x7xf32>
    tpu.vector_store %arg11[%c20, %c0_27], %39 {strides = array<i32>} : memref<36x8xf32, #tpu.memory_space<vmem>>, vector<4x7xf32>,
    %41 = vector.extract_strided_slice %12 {offsets = [0, 1], sizes = [4, 7], strides = [1, 1]} : vector<4x8xf32> to vector<4x7xf32>
    %c6 = arith.constant 6 : index
    %c0_28 = arith.constant 0 : index
    %42 = vector.load %arg5[%c6, %c0_28] : memref<9x8xf32, #tpu.memory_space<vmem>>, vector<1x7xf32>
    %43 = vector.broadcast %42 : vector<1x7xf32> to vector<4x7xf32>
    %44 = arith.mulf %41, %43 : vector<4x7xf32>
    %c24 = arith.constant 24 : index
    %c0_29 = arith.constant 0 : index
    %45 = vector.load %arg11[%c24, %c0_29] : memref<36x8xf32, #tpu.memory_space<vmem>>, vector<4x7xf32>
    tpu.vector_store %arg11[%c24, %c0_29], %44 {strides = array<i32>} : memref<36x8xf32, #tpu.memory_space<vmem>>, vector<4x7xf32>,
    %46 = vector.extract_strided_slice %12 {offsets = [0, 2], sizes = [4, 6], strides = [1, 1]} : vector<4x8xf32> to vector<4x6xf32>
    %c7 = arith.constant 7 : index
    %c0_30 = arith.constant 0 : index
    %47 = vector.load %arg5[%c7, %c0_30] : memref<9x8xf32, #tpu.memory_space<vmem>>, vector<1x6xf32>
    %48 = vector.broadcast %47 : vector<1x6xf32> to vector<4x6xf32>
    %49 = arith.mulf %46, %48 : vector<4x6xf32>
    %c28 = arith.constant 28 : index
    %c0_31 = arith.constant 0 : index
    %50 = vector.load %arg11[%c28, %c0_31] : memref<36x8xf32, #tpu.memory_space<vmem>>, vector<4x6xf32>
    tpu.vector_store %arg11[%c28, %c0_31], %49 {strides = array<i32>} : memref<36x8xf32, #tpu.memory_space<vmem>>, vector<4x6xf32>,
    %51 = vector.extract_strided_slice %12 {offsets = [0, 3], sizes = [4, 5], strides = [1, 1]} : vector<4x8xf32> to vector<4x5xf32>
    %c8_32 = arith.constant 8 : index
    %c0_33 = arith.constant 0 : index
    %52 = vector.load %arg5[%c8_32, %c0_33] : memref<9x8xf32, #tpu.memory_space<vmem>>, vector<1x5xf32>
    %53 = vector.broadcast %52 : vector<1x5xf32> to vector<4x5xf32>
    %54 = arith.mulf %51, %53 : vector<4x5xf32>
    %c32 = arith.constant 32 : index
    %c0_34 = arith.constant 0 : index
    %55 = vector.load %arg11[%c32, %c0_34] : memref<36x8xf32, #tpu.memory_space<vmem>>, vector<4x5xf32>
    tpu.vector_store %arg11[%c32, %c0_34], %54 {strides = array<i32>} : memref<36x8xf32, #tpu.memory_space<vmem>>, vector<4x5xf32>,
    %c0_35 = arith.constant 0 : index
    %c0_36 = arith.constant 0 : index
    %56 = vector.load %arg6[%c0_35, %c0_36] : memref<4x36xbf16, #tpu.memory_space<vmem>>, vector<4x36xbf16>
    %c0_37 = arith.constant 0 : index
    %c0_38 = arith.constant 0 : index
    %57 = vector.load %arg11[%c0_37, %c0_38] : memref<36x8xf32, #tpu.memory_space<vmem>>, vector<36x8xf32>
    %58 = arith.truncf %57 : vector<36x8xf32> to vector<36x8xbf16>
    %cst_39 = arith.constant dense<0.000000e+00> : vector<4x8xf32>
    %59 = tpu.matmul %56, %58, %cst_39 {dimension_numbers = #tpu.dot_dimension_numbers<[1], [0], [0], [1], [0, 0, 1, 1], [], []>} : vector<4x36xbf16>, vector<36x8xbf16>, vector<4x8xf32> -> vector<4x8xf32>
    %c0_40 = arith.constant 0 : index
    %c0_41 = arith.constant 0 : index
    %60 = vector.load %arg7[%c0_40, %c0_41] : memref<4x1xf32, #tpu.memory_space<vmem>>, vector<4x1xf32>
    %61 = vector.broadcast %60 : vector<4x1xf32> to vector<4x8xf32>
    %62 = arith.addf %59, %61 : vector<4x8xf32>
    %cst_42 = arith.constant dense<0.000000e+00> : vector<4xf32>
    %63 = vector.multi_reduction <add>, %62, %cst_42 [1] : vector<4x8xf32> to vector<4xf32>
    %64 = vector.shape_cast %63 : vector<4xf32> to vector<4x1xf32>
    %cst_43 = arith.constant 1.250000e-01 : f32
    %65 = vector.broadcast %cst_43 : f32 to vector<4x1xf32>
    %66 = arith.mulf %64, %65 : vector<4x1xf32>
    %67 = arith.mulf %62, %62 : vector<4x8xf32>
    %cst_44 = arith.constant dense<0.000000e+00> : vector<4xf32>
    %68 = vector.multi_reduction <add>, %67, %cst_44 [1] : vector<4x8xf32> to vector<4xf32>
    %69 = vector.shape_cast %68 : vector<4xf32> to vector<4x1xf32>
    %cst_45 = arith.constant 1.250000e-01 : f32
    %70 = vector.broadcast %cst_45 : f32 to vector<4x1xf32>
    %71 = arith.mulf %69, %70 : vector<4x1xf32>
    %72 = arith.mulf %66, %66 : vector<4x1xf32>
    %73 = arith.subf %71, %72 : vector<4x1xf32>
    %cst_46 = arith.constant 0.000000e+00 : f32
    %74 = vector.broadcast %cst_46 : f32 to vector<4x1xf32>
    %75 = arith.maximumf %73, %74 : vector<4x1xf32>
    %76 = vector.broadcast %66 : vector<4x1xf32> to vector<4x8xf32>
    %77 = arith.subf %62, %76 : vector<4x8xf32>
    %cst_47 = arith.constant 9.99999974E-6 : f32
    %78 = vector.broadcast %cst_47 : f32 to vector<4x1xf32>
    %79 = arith.addf %75, %78 : vector<4x1xf32>
    %80 = math.rsqrt %79 : vector<4x1xf32>
    %81 = vector.broadcast %80 : vector<4x1xf32> to vector<4x8xf32>
    %82 = arith.mulf %77, %81 : vector<4x8xf32>
    %c0_48 = arith.constant 0 : index
    %c0_49 = arith.constant 0 : index
    %83 = vector.load %arg8[%c0_48, %c0_49] : memref<4x1xf32, #tpu.memory_space<vmem>>, vector<4x1xf32>
    %84 = vector.broadcast %83 : vector<4x1xf32> to vector<4x8xf32>
    %85 = arith.mulf %82, %84 : vector<4x8xf32>
    %c0_50 = arith.constant 0 : index
    %c0_51 = arith.constant 0 : index
    %86 = vector.load %arg9[%c0_50, %c0_51] : memref<4x1xf32, #tpu.memory_space<vmem>>, vector<4x1xf32>
    %87 = vector.broadcast %86 : vector<4x1xf32> to vector<4x8xf32>
    %88 = arith.addf %85, %87 : vector<4x8xf32>
    %cst_52 = arith.constant 0.000000e+00 : f32
    %89 = vector.broadcast %cst_52 : f32 to vector<4x8xf32>
    %90 = arith.maximumf %88, %89 : vector<4x8xf32>
    %c0_53 = arith.constant 0 : index
    %c0_54 = arith.constant 0 : index
    %91 = vector.load %arg10[%c0_53, %c0_54] : memref<4x8xf32, #tpu.memory_space<vmem>>, vector<4x8xf32>
    tpu.vector_store %arg10[%c0_53, %c0_54], %90 {strides = array<i32>} : memref<4x8xf32, #tpu.memory_space<vmem>>, vector<4x8xf32>,
    return
  }
}

module attributes {stable_mosaic.version = 11 : i64} {
  func.func @kernel(%arg0: memref<4x8xf32, #tpu.memory_space<vmem>>, %arg1: memref<8x2xbf16, #tpu.memory_space<vmem>>, %arg2: memref<8x2xbf16, #tpu.memory_space<vmem>>, %arg3: memref<8x2xbf16, #tpu.memory_space<vmem>>, %arg4: memref<8x2xbf16, #tpu.memory_space<vmem>>, %arg5: memref<9x2xf32, #tpu.memory_space<vmem>>, %arg6: memref<4x4xbf16, #tpu.memory_space<vmem>>, %arg7: memref<4x1xf32, #tpu.memory_space<vmem>>, %arg8: memref<4x1xf32, #tpu.memory_space<vmem>>, %arg9: memref<4x1xf32, #tpu.memory_space<vmem>>, %arg10: memref<4x2xf32, #tpu.memory_space<vmem>>, %arg11: memref<4x2xf32, #tpu.memory_space<vmem>>) attributes {dimension_semantics = [], scalar_prefetch = 0 : i64, scratch_operands = 1 : i64, tpu.core_type = #tpu.core_type<tc>} {
    %c0 = arith.constant 0 : index
    %c0_0 = arith.constant 0 : index
    %0 = vector.load %arg0[%c0, %c0_0] : memref<4x8xf32, #tpu.memory_space<vmem>>, vector<4x8xf32>
    %1 = arith.truncf %0 : vector<4x8xf32> to vector<4x8xbf16>
    %c0_1 = arith.constant 0 : index
    %c0_2 = arith.constant 0 : index
    %2 = vector.load %arg1[%c0_1, %c0_2] : memref<8x2xbf16, #tpu.memory_space<vmem>>, vector<8x2xbf16>
    %cst = arith.constant dense<0.000000e+00> : vector<4x2xf32>
    %3 = tpu.matmul %1, %2, %cst {dimension_numbers = #tpu.dot_dimension_numbers<[1], [0], [0], [1], [0, 0, 1, 1], [], []>} : vector<4x8xbf16>, vector<8x2xbf16>, vector<4x2xf32> -> vector<4x2xf32>
    %c0_3 = arith.constant 0 : index
    %c0_4 = arith.constant 0 : index
    %4 = vector.load %arg2[%c0_3, %c0_4] : memref<8x2xbf16, #tpu.memory_space<vmem>>, vector<8x2xbf16>
    %cst_5 = arith.constant dense<0.000000e+00> : vector<4x2xf32>
    %5 = tpu.matmul %1, %4, %cst_5 {dimension_numbers = #tpu.dot_dimension_numbers<[1], [0], [0], [1], [0, 0, 1, 1], [], []>} : vector<4x8xbf16>, vector<8x2xbf16>, vector<4x2xf32> -> vector<4x2xf32>
    %6 = arith.maximumf %3, %5 : vector<4x2xf32>
    %c0_6 = arith.constant 0 : index
    %c0_7 = arith.constant 0 : index
    %7 = vector.load %arg3[%c0_6, %c0_7] : memref<8x2xbf16, #tpu.memory_space<vmem>>, vector<8x2xbf16>
    %cst_8 = arith.constant dense<0.000000e+00> : vector<4x2xf32>
    %8 = tpu.matmul %1, %7, %cst_8 {dimension_numbers = #tpu.dot_dimension_numbers<[1], [0], [0], [1], [0, 0, 1, 1], [], []>} : vector<4x8xbf16>, vector<8x2xbf16>, vector<4x2xf32> -> vector<4x2xf32>
    %9 = arith.maximumf %6, %8 : vector<4x2xf32>
    %c0_9 = arith.constant 0 : index
    %c0_10 = arith.constant 0 : index
    %10 = vector.load %arg4[%c0_9, %c0_10] : memref<8x2xbf16, #tpu.memory_space<vmem>>, vector<8x2xbf16>
    %cst_11 = arith.constant dense<0.000000e+00> : vector<4x2xf32>
    %11 = tpu.matmul %1, %10, %cst_11 {dimension_numbers = #tpu.dot_dimension_numbers<[1], [0], [0], [1], [0, 0, 1, 1], [], []>} : vector<4x8xbf16>, vector<8x2xbf16>, vector<4x2xf32> -> vector<4x2xf32>
    %12 = arith.maximumf %9, %11 : vector<4x2xf32>
    %cst_12 = arith.constant 0.000000e+00 : f32
    %13 = vector.broadcast %cst_12 : f32 to vector<4x2xf32>
    %c0_13 = arith.constant 0 : index
    %c0_14 = arith.constant 0 : index
    %14 = vector.load %arg11[%c0_13, %c0_14] : memref<4x2xf32, #tpu.memory_space<vmem>>, vector<4x2xf32>
    tpu.vector_store %arg11[%c0_13, %c0_14], %13 {strides = array<i32>} : memref<4x2xf32, #tpu.memory_space<vmem>>, vector<4x2xf32>,
    %c0_15 = arith.constant 0 : index
    %c0_16 = arith.constant 0 : index
    %15 = vector.load %arg11[%c0_15, %c0_16] : memref<4x2xf32, #tpu.memory_space<vmem>>, vector<4x2xf32>
    tpu.vector_store %arg11[%c0_15, %c0_16], %12 {strides = array<i32>} : memref<4x2xf32, #tpu.memory_space<vmem>>, vector<4x2xf32>,
    %c0_17 = arith.constant 0 : index
    %c0_18 = arith.constant 0 : index
    %16 = vector.load %arg6[%c0_17, %c0_18] : memref<4x4xbf16, #tpu.memory_space<vmem>>, vector<4x4xbf16>
    %c0_19 = arith.constant 0 : index
    %c0_20 = arith.constant 0 : index
    %17 = vector.load %arg11[%c0_19, %c0_20] : memref<4x2xf32, #tpu.memory_space<vmem>>, vector<4x2xf32>
    %18 = arith.truncf %17 : vector<4x2xf32> to vector<4x2xbf16>
    %cst_21 = arith.constant dense<0.000000e+00> : vector<4x2xf32>
    %19 = tpu.matmul %16, %18, %cst_21 {dimension_numbers = #tpu.dot_dimension_numbers<[1], [0], [0], [1], [0, 0, 1, 1], [], []>} : vector<4x4xbf16>, vector<4x2xbf16>, vector<4x2xf32> -> vector<4x2xf32>
    %c0_22 = arith.constant 0 : index
    %c0_23 = arith.constant 0 : index
    %20 = vector.load %arg7[%c0_22, %c0_23] : memref<4x1xf32, #tpu.memory_space<vmem>>, vector<4x1xf32>
    %21 = vector.broadcast %20 : vector<4x1xf32> to vector<4x2xf32>
    %22 = arith.addf %19, %21 : vector<4x2xf32>
    %cst_24 = arith.constant dense<0.000000e+00> : vector<4xf32>
    %23 = vector.multi_reduction <add>, %22, %cst_24 [1] : vector<4x2xf32> to vector<4xf32>
    %24 = vector.shape_cast %23 : vector<4xf32> to vector<4x1xf32>
    %cst_25 = arith.constant 5.000000e-01 : f32
    %25 = vector.broadcast %cst_25 : f32 to vector<4x1xf32>
    %26 = arith.mulf %24, %25 : vector<4x1xf32>
    %27 = arith.mulf %22, %22 : vector<4x2xf32>
    %cst_26 = arith.constant dense<0.000000e+00> : vector<4xf32>
    %28 = vector.multi_reduction <add>, %27, %cst_26 [1] : vector<4x2xf32> to vector<4xf32>
    %29 = vector.shape_cast %28 : vector<4xf32> to vector<4x1xf32>
    %cst_27 = arith.constant 5.000000e-01 : f32
    %30 = vector.broadcast %cst_27 : f32 to vector<4x1xf32>
    %31 = arith.mulf %29, %30 : vector<4x1xf32>
    %32 = arith.mulf %26, %26 : vector<4x1xf32>
    %33 = arith.subf %31, %32 : vector<4x1xf32>
    %cst_28 = arith.constant 0.000000e+00 : f32
    %34 = vector.broadcast %cst_28 : f32 to vector<4x1xf32>
    %35 = arith.maximumf %33, %34 : vector<4x1xf32>
    %36 = vector.broadcast %26 : vector<4x1xf32> to vector<4x2xf32>
    %37 = arith.subf %22, %36 : vector<4x2xf32>
    %cst_29 = arith.constant 9.99999974E-6 : f32
    %38 = vector.broadcast %cst_29 : f32 to vector<4x1xf32>
    %39 = arith.addf %35, %38 : vector<4x1xf32>
    %40 = math.rsqrt %39 : vector<4x1xf32>
    %41 = vector.broadcast %40 : vector<4x1xf32> to vector<4x2xf32>
    %42 = arith.mulf %37, %41 : vector<4x2xf32>
    %c0_30 = arith.constant 0 : index
    %c0_31 = arith.constant 0 : index
    %43 = vector.load %arg8[%c0_30, %c0_31] : memref<4x1xf32, #tpu.memory_space<vmem>>, vector<4x1xf32>
    %44 = vector.broadcast %43 : vector<4x1xf32> to vector<4x2xf32>
    %45 = arith.mulf %42, %44 : vector<4x2xf32>
    %c0_32 = arith.constant 0 : index
    %c0_33 = arith.constant 0 : index
    %46 = vector.load %arg9[%c0_32, %c0_33] : memref<4x1xf32, #tpu.memory_space<vmem>>, vector<4x1xf32>
    %47 = vector.broadcast %46 : vector<4x1xf32> to vector<4x2xf32>
    %48 = arith.addf %45, %47 : vector<4x2xf32>
    %cst_34 = arith.constant 0.000000e+00 : f32
    %49 = vector.broadcast %cst_34 : f32 to vector<4x2xf32>
    %50 = arith.maximumf %48, %49 : vector<4x2xf32>
    %c0_35 = arith.constant 0 : index
    %c0_36 = arith.constant 0 : index
    %51 = vector.load %arg10[%c0_35, %c0_36] : memref<4x2xf32, #tpu.memory_space<vmem>>, vector<4x2xf32>
    tpu.vector_store %arg10[%c0_35, %c0_36], %50 {strides = array<i32>} : memref<4x2xf32, #tpu.memory_space<vmem>>, vector<4x2xf32>,
    return
  }
}

module attributes {stable_mosaic.version = 11 : i64} {
  func.func @kernel(%arg0: memref<4x2xf32, #tpu.memory_space<vmem>>, %arg1: memref<9x2xf32, #tpu.memory_space<vmem>>, %arg2: memref<4x4xbf16, #tpu.memory_space<vmem>>, %arg3: memref<4x1xf32, #tpu.memory_space<vmem>>, %arg4: memref<4x1xf32, #tpu.memory_space<vmem>>, %arg5: memref<4x1xf32, #tpu.memory_space<vmem>>, %arg6: memref<4x2xf32, #tpu.memory_space<vmem>>, %arg7: memref<4x2xf32, #tpu.memory_space<vmem>>) attributes {dimension_semantics = [], scalar_prefetch = 0 : i64, scratch_operands = 1 : i64, tpu.core_type = #tpu.core_type<tc>} {
    %cst = arith.constant 0.000000e+00 : f32
    %0 = vector.broadcast %cst : f32 to vector<4x2xf32>
    %c0 = arith.constant 0 : index
    %c0_0 = arith.constant 0 : index
    %1 = vector.load %arg7[%c0, %c0_0] : memref<4x2xf32, #tpu.memory_space<vmem>>, vector<4x2xf32>
    tpu.vector_store %arg7[%c0, %c0_0], %0 {strides = array<i32>} : memref<4x2xf32, #tpu.memory_space<vmem>>, vector<4x2xf32>,
    %c0_1 = arith.constant 0 : index
    %c0_2 = arith.constant 0 : index
    %2 = vector.load %arg0[%c0_1, %c0_2] : memref<4x2xf32, #tpu.memory_space<vmem>>, vector<4x2xf32>
    %c0_3 = arith.constant 0 : index
    %c0_4 = arith.constant 0 : index
    %3 = vector.load %arg7[%c0_3, %c0_4] : memref<4x2xf32, #tpu.memory_space<vmem>>, vector<4x2xf32>
    tpu.vector_store %arg7[%c0_3, %c0_4], %2 {strides = array<i32>} : memref<4x2xf32, #tpu.memory_space<vmem>>, vector<4x2xf32>,
    %c0_5 = arith.constant 0 : index
    %c0_6 = arith.constant 0 : index
    %4 = vector.load %arg2[%c0_5, %c0_6] : memref<4x4xbf16, #tpu.memory_space<vmem>>, vector<4x4xbf16>
    %c0_7 = arith.constant 0 : index
    %c0_8 = arith.constant 0 : index
    %5 = vector.load %arg7[%c0_7, %c0_8] : memref<4x2xf32, #tpu.memory_space<vmem>>, vector<4x2xf32>
    %6 = arith.truncf %5 : vector<4x2xf32> to vector<4x2xbf16>
    %cst_9 = arith.constant dense<0.000000e+00> : vector<4x2xf32>
    %7 = tpu.matmul %4, %6, %cst_9 {dimension_numbers = #tpu.dot_dimension_numbers<[1], [0], [0], [1], [0, 0, 1, 1], [], []>} : vector<4x4xbf16>, vector<4x2xbf16>, vector<4x2xf32> -> vector<4x2xf32>
    %c0_10 = arith.constant 0 : index
    %c0_11 = arith.constant 0 : index
    %8 = vector.load %arg3[%c0_10, %c0_11] : memref<4x1xf32, #tpu.memory_space<vmem>>, vector<4x1xf32>
    %9 = vector.broadcast %8 : vector<4x1xf32> to vector<4x2xf32>
    %10 = arith.addf %7, %9 : vector<4x2xf32>
    %cst_12 = arith.constant dense<0.000000e+00> : vector<4xf32>
    %11 = vector.multi_reduction <add>, %10, %cst_12 [1] : vector<4x2xf32> to vector<4xf32>
    %12 = vector.shape_cast %11 : vector<4xf32> to vector<4x1xf32>
    %cst_13 = arith.constant 5.000000e-01 : f32
    %13 = vector.broadcast %cst_13 : f32 to vector<4x1xf32>
    %14 = arith.mulf %12, %13 : vector<4x1xf32>
    %15 = arith.mulf %10, %10 : vector<4x2xf32>
    %cst_14 = arith.constant dense<0.000000e+00> : vector<4xf32>
    %16 = vector.multi_reduction <add>, %15, %cst_14 [1] : vector<4x2xf32> to vector<4xf32>
    %17 = vector.shape_cast %16 : vector<4xf32> to vector<4x1xf32>
    %cst_15 = arith.constant 5.000000e-01 : f32
    %18 = vector.broadcast %cst_15 : f32 to vector<4x1xf32>
    %19 = arith.mulf %17, %18 : vector<4x1xf32>
    %20 = arith.mulf %14, %14 : vector<4x1xf32>
    %21 = arith.subf %19, %20 : vector<4x1xf32>
    %cst_16 = arith.constant 0.000000e+00 : f32
    %22 = vector.broadcast %cst_16 : f32 to vector<4x1xf32>
    %23 = arith.maximumf %21, %22 : vector<4x1xf32>
    %24 = vector.broadcast %14 : vector<4x1xf32> to vector<4x2xf32>
    %25 = arith.subf %10, %24 : vector<4x2xf32>
    %cst_17 = arith.constant 9.99999974E-6 : f32
    %26 = vector.broadcast %cst_17 : f32 to vector<4x1xf32>
    %27 = arith.addf %23, %26 : vector<4x1xf32>
    %28 = math.rsqrt %27 : vector<4x1xf32>
    %29 = vector.broadcast %28 : vector<4x1xf32> to vector<4x2xf32>
    %30 = arith.mulf %25, %29 : vector<4x2xf32>
    %c0_18 = arith.constant 0 : index
    %c0_19 = arith.constant 0 : index
    %31 = vector.load %arg4[%c0_18, %c0_19] : memref<4x1xf32, #tpu.memory_space<vmem>>, vector<4x1xf32>
    %32 = vector.broadcast %31 : vector<4x1xf32> to vector<4x2xf32>
    %33 = arith.mulf %30, %32 : vector<4x2xf32>
    %c0_20 = arith.constant 0 : index
    %c0_21 = arith.constant 0 : index
    %34 = vector.load %arg5[%c0_20, %c0_21] : memref<4x1xf32, #tpu.memory_space<vmem>>, vector<4x1xf32>
    %35 = vector.broadcast %34 : vector<4x1xf32> to vector<4x2xf32>
    %36 = arith.addf %33, %35 : vector<4x2xf32>
    %cst_22 = arith.constant 0.000000e+00 : f32
    %37 = vector.broadcast %cst_22 : f32 to vector<4x2xf32>
    %38 = arith.maximumf %36, %37 : vector<4x2xf32>
    %c0_23 = arith.constant 0 : index
    %c0_24 = arith.constant 0 : index
    %39 = vector.load %arg6[%c0_23, %c0_24] : memref<4x2xf32, #tpu.memory_space<vmem>>, vector<4x2xf32>
    tpu.vector_store %arg6[%c0_23, %c0_24], %38 {strides = array<i32>} : memref<4x2xf32, #tpu.memory_space<vmem>>, vector<4x2xf32>,
    return
  }
}

module attributes {stable_mosaic.version = 11 : i64} {
  func.func @kernel(%arg0: memref<4x2xf32, #tpu.memory_space<vmem>>, %arg1: memref<4x8xf32, #tpu.memory_space<vmem>>, %arg2: memref<2x8xf32, #tpu.memory_space<vmem>>, %arg3: memref<9x8xf32, #tpu.memory_space<vmem>>, %arg4: memref<4x72xbf16, #tpu.memory_space<vmem>>, %arg5: memref<4x1xf32, #tpu.memory_space<vmem>>, %arg6: memref<4x1xf32, #tpu.memory_space<vmem>>, %arg7: memref<4x1xf32, #tpu.memory_space<vmem>>, %arg8: memref<4x8xf32, #tpu.memory_space<vmem>>, %arg9: memref<72x8xf32, #tpu.memory_space<vmem>>) attributes {dimension_semantics = [], scalar_prefetch = 0 : i64, scratch_operands = 1 : i64, tpu.core_type = #tpu.core_type<tc>} {
    %c0 = arith.constant 0 : index
    %c0_0 = arith.constant 0 : index
    %0 = vector.load %arg0[%c0, %c0_0] : memref<4x2xf32, #tpu.memory_space<vmem>>, vector<4x2xf32>
    %c0_1 = arith.constant 0 : index
    %c0_2 = arith.constant 0 : index
    %1 = vector.load %arg2[%c0_1, %c0_2] : memref<2x8xf32, #tpu.memory_space<vmem>>, vector<2x8xf32>
    %cst = arith.constant dense<0.000000e+00> : vector<4x8xf32>
    %2 = tpu.matmul %0, %1, %cst {dimension_numbers = #tpu.dot_dimension_numbers<[1], [0], [0], [1], [0, 0, 1, 1], [], []>} : vector<4x2xf32>, vector<2x8xf32>, vector<4x8xf32> -> vector<4x8xf32>
    %cst_3 = arith.constant 0.000000e+00 : f32
    %3 = vector.broadcast %cst_3 : f32 to vector<72x8xf32>
    %c0_4 = arith.constant 0 : index
    %c0_5 = arith.constant 0 : index
    %4 = vector.load %arg9[%c0_4, %c0_5] : memref<72x8xf32, #tpu.memory_space<vmem>>, vector<72x8xf32>
    tpu.vector_store %arg9[%c0_4, %c0_5], %3 {strides = array<i32>} : memref<72x8xf32, #tpu.memory_space<vmem>>, vector<72x8xf32>,
    %5 = vector.extract_strided_slice %2 {offsets = [0, 0], sizes = [4, 5], strides = [1, 1]} : vector<4x8xf32> to vector<4x5xf32>
    %c0_6 = arith.constant 0 : index
    %c3 = arith.constant 3 : index
    %6 = vector.load %arg3[%c0_6, %c3] : memref<9x8xf32, #tpu.memory_space<vmem>>, vector<1x5xf32>
    %7 = vector.broadcast %6 : vector<1x5xf32> to vector<4x5xf32>
    %8 = arith.mulf %5, %7 : vector<4x5xf32>
    %c0_7 = arith.constant 0 : index
    %c3_8 = arith.constant 3 : index
    %9 = vector.load %arg9[%c0_7, %c3_8] : memref<72x8xf32, #tpu.memory_space<vmem>>, vector<4x5xf32>
    tpu.vector_store %arg9[%c0_7, %c3_8], %8 {strides = array<i32>} : memref<72x8xf32, #tpu.memory_space<vmem>>, vector<4x5xf32>,
    %c0_9 = arith.constant 0 : index
    %c0_10 = arith.constant 0 : index
    %10 = vector.load %arg1[%c0_9, %c0_10] : memref<4x8xf32, #tpu.memory_space<vmem>>, vector<4x5xf32>
    %c0_11 = arith.constant 0 : index
    %c3_12 = arith.constant 3 : index
    %11 = vector.load %arg3[%c0_11, %c3_12] : memref<9x8xf32, #tpu.memory_space<vmem>>, vector<1x5xf32>
    %12 = vector.broadcast %11 : vector<1x5xf32> to vector<4x5xf32>
    %13 = arith.mulf %10, %12 : vector<4x5xf32>
    %c4 = arith.constant 4 : index
    %c3_13 = arith.constant 3 : index
    %14 = vector.load %arg9[%c4, %c3_13] : memref<72x8xf32, #tpu.memory_space<vmem>>, vector<4x5xf32>
    tpu.vector_store %arg9[%c4, %c3_13], %13 {strides = array<i32>} : memref<72x8xf32, #tpu.memory_space<vmem>>, vector<4x5xf32>,
    %15 = vector.extract_strided_slice %2 {offsets = [0, 0], sizes = [4, 6], strides = [1, 1]} : vector<4x8xf32> to vector<4x6xf32>
    %c1 = arith.constant 1 : index
    %c2 = arith.constant 2 : index
    %16 = vector.load %arg3[%c1, %c2] : memref<9x8xf32, #tpu.memory_space<vmem>>, vector<1x6xf32>
    %17 = vector.broadcast %16 : vector<1x6xf32> to vector<4x6xf32>
    %18 = arith.mulf %15, %17 : vector<4x6xf32>
    %c8 = arith.constant 8 : index
    %c2_14 = arith.constant 2 : index
    %19 = vector.load %arg9[%c8, %c2_14] : memref<72x8xf32, #tpu.memory_space<vmem>>, vector<4x6xf32>
    tpu.vector_store %arg9[%c8, %c2_14], %18 {strides = array<i32>} : memref<72x8xf32, #tpu.memory_space<vmem>>, vector<4x6xf32>,
    %c0_15 = arith.constant 0 : index
    %c0_16 = arith.constant 0 : index
    %20 = vector.load %arg1[%c0_15, %c0_16] : memref<4x8xf32, #tpu.memory_space<vmem>>, vector<4x6xf32>
    %c1_17 = arith.constant 1 : index
    %c2_18 = arith.constant 2 : index
    %21 = vector.load %arg3[%c1_17, %c2_18] : memref<9x8xf32, #tpu.memory_space<vmem>>, vector<1x6xf32>
    %22 = vector.broadcast %21 : vector<1x6xf32> to vector<4x6xf32>
    %23 = arith.mulf %20, %22 : vector<4x6xf32>
    %c12 = arith.constant 12 : index
    %c2_19 = arith.constant 2 : index
    %24 = vector.load %arg9[%c12, %c2_19] : memref<72x8xf32, #tpu.memory_space<vmem>>, vector<4x6xf32>
    tpu.vector_store %arg9[%c12, %c2_19], %23 {strides = array<i32>} : memref<72x8xf32, #tpu.memory_space<vmem>>, vector<4x6xf32>,
    %25 = vector.extract_strided_slice %2 {offsets = [0, 0], sizes = [4, 7], strides = [1, 1]} : vector<4x8xf32> to vector<4x7xf32>
    %c2_20 = arith.constant 2 : index
    %c1_21 = arith.constant 1 : index
    %26 = vector.load %arg3[%c2_20, %c1_21] : memref<9x8xf32, #tpu.memory_space<vmem>>, vector<1x7xf32>
    %27 = vector.broadcast %26 : vector<1x7xf32> to vector<4x7xf32>
    %28 = arith.mulf %25, %27 : vector<4x7xf32>
    %c16 = arith.constant 16 : index
    %c1_22 = arith.constant 1 : index
    %29 = vector.load %arg9[%c16, %c1_22] : memref<72x8xf32, #tpu.memory_space<vmem>>, vector<4x7xf32>
    tpu.vector_store %arg9[%c16, %c1_22], %28 {strides = array<i32>} : memref<72x8xf32, #tpu.memory_space<vmem>>, vector<4x7xf32>,
    %c0_23 = arith.constant 0 : index
    %c0_24 = arith.constant 0 : index
    %30 = vector.load %arg1[%c0_23, %c0_24] : memref<4x8xf32, #tpu.memory_space<vmem>>, vector<4x7xf32>
    %c2_25 = arith.constant 2 : index
    %c1_26 = arith.constant 1 : index
    %31 = vector.load %arg3[%c2_25, %c1_26] : memref<9x8xf32, #tpu.memory_space<vmem>>, vector<1x7xf32>
    %32 = vector.broadcast %31 : vector<1x7xf32> to vector<4x7xf32>
    %33 = arith.mulf %30, %32 : vector<4x7xf32>
    %c20 = arith.constant 20 : index
    %c1_27 = arith.constant 1 : index
    %34 = vector.load %arg9[%c20, %c1_27] : memref<72x8xf32, #tpu.memory_space<vmem>>, vector<4x7xf32>
    tpu.vector_store %arg9[%c20, %c1_27], %33 {strides = array<i32>} : memref<72x8xf32, #tpu.memory_space<vmem>>, vector<4x7xf32>,
    %35 = vector.extract_strided_slice %2 {offsets = [0, 0], sizes = [4, 7], strides = [1, 1]} : vector<4x8xf32> to vector<4x7xf32>
    %c3_28 = arith.constant 3 : index
    %c1_29 = arith.constant 1 : index
    %36 = vector.load %arg3[%c3_28, %c1_29] : memref<9x8xf32, #tpu.memory_space<vmem>>, vector<1x7xf32>
    %37 = vector.broadcast %36 : vector<1x7xf32> to vector<4x7xf32>
    %38 = arith.mulf %35, %37 : vector<4x7xf32>
    %c24 = arith.constant 24 : index
    %c1_30 = arith.constant 1 : index
    %39 = vector.load %arg9[%c24, %c1_30] : memref<72x8xf32, #tpu.memory_space<vmem>>, vector<4x7xf32>
    tpu.vector_store %arg9[%c24, %c1_30], %38 {strides = array<i32>} : memref<72x8xf32, #tpu.memory_space<vmem>>, vector<4x7xf32>,
    %c0_31 = arith.constant 0 : index
    %c0_32 = arith.constant 0 : index
    %40 = vector.load %arg1[%c0_31, %c0_32] : memref<4x8xf32, #tpu.memory_space<vmem>>, vector<4x7xf32>
    %c3_33 = arith.constant 3 : index
    %c1_34 = arith.constant 1 : index
    %41 = vector.load %arg3[%c3_33, %c1_34] : memref<9x8xf32, #tpu.memory_space<vmem>>, vector<1x7xf32>
    %42 = vector.broadcast %41 : vector<1x7xf32> to vector<4x7xf32>
    %43 = arith.mulf %40, %42 : vector<4x7xf32>
    %c28 = arith.constant 28 : index
    %c1_35 = arith.constant 1 : index
    %44 = vector.load %arg9[%c28, %c1_35] : memref<72x8xf32, #tpu.memory_space<vmem>>, vector<4x7xf32>
    tpu.vector_store %arg9[%c28, %c1_35], %43 {strides = array<i32>} : memref<72x8xf32, #tpu.memory_space<vmem>>, vector<4x7xf32>,
    %c32 = arith.constant 32 : index
    %c0_36 = arith.constant 0 : index
    %45 = vector.load %arg9[%c32, %c0_36] : memref<72x8xf32, #tpu.memory_space<vmem>>, vector<4x8xf32>
    tpu.vector_store %arg9[%c32, %c0_36], %2 {strides = array<i32>} : memref<72x8xf32, #tpu.memory_space<vmem>>, vector<4x8xf32>,
    %c0_37 = arith.constant 0 : index
    %c0_38 = arith.constant 0 : index
    %46 = vector.load %arg1[%c0_37, %c0_38] : memref<4x8xf32, #tpu.memory_space<vmem>>, vector<4x8xf32>
    %c36 = arith.constant 36 : index
    %c0_39 = arith.constant 0 : index
    %47 = vector.load %arg9[%c36, %c0_39] : memref<72x8xf32, #tpu.memory_space<vmem>>, vector<4x8xf32>
    tpu.vector_store %arg9[%c36, %c0_39], %46 {strides = array<i32>} : memref<72x8xf32, #tpu.memory_space<vmem>>, vector<4x8xf32>,
    %48 = vector.extract_strided_slice %2 {offsets = [0, 1], sizes = [4, 7], strides = [1, 1]} : vector<4x8xf32> to vector<4x7xf32>
    %c5 = arith.constant 5 : index
    %c0_40 = arith.constant 0 : index
    %49 = vector.load %arg3[%c5, %c0_40] : memref<9x8xf32, #tpu.memory_space<vmem>>, vector<1x7xf32>
    %50 = vector.broadcast %49 : vector<1x7xf32> to vector<4x7xf32>
    %51 = arith.mulf %48, %50 : vector<4x7xf32>
    %c40 = arith.constant 40 : index
    %c0_41 = arith.constant 0 : index
    %52 = vector.load %arg9[%c40, %c0_41] : memref<72x8xf32, #tpu.memory_space<vmem>>, vector<4x7xf32>
    tpu.vector_store %arg9[%c40, %c0_41], %51 {strides = array<i32>} : memref<72x8xf32, #tpu.memory_space<vmem>>, vector<4x7xf32>,
    %c0_42 = arith.constant 0 : index
    %c1_43 = arith.constant 1 : index
    %53 = vector.load %arg1[%c0_42, %c1_43] : memref<4x8xf32, #tpu.memory_space<vmem>>, vector<4x7xf32>
    %c5_44 = arith.constant 5 : index
    %c0_45 = arith.constant 0 : index
    %54 = vector.load %arg3[%c5_44, %c0_45] : memref<9x8xf32, #tpu.memory_space<vmem>>, vector<1x7xf32>
    %55 = vector.broadcast %54 : vector<1x7xf32> to vector<4x7xf32>
    %56 = arith.mulf %53, %55 : vector<4x7xf32>
    %c44 = arith.constant 44 : index
    %c0_46 = arith.constant 0 : index
    %57 = vector.load %arg9[%c44, %c0_46] : memref<72x8xf32, #tpu.memory_space<vmem>>, vector<4x7xf32>
    tpu.vector_store %arg9[%c44, %c0_46], %56 {strides = array<i32>} : memref<72x8xf32, #tpu.memory_space<vmem>>, vector<4x7xf32>,
    %58 = vector.extract_strided_slice %2 {offsets = [0, 1], sizes = [4, 7], strides = [1, 1]} : vector<4x8xf32> to vector<4x7xf32>
    %c6 = arith.constant 6 : index
    %c0_47 = arith.constant 0 : index
    %59 = vector.load %arg3[%c6, %c0_47] : memref<9x8xf32, #tpu.memory_space<vmem>>, vector<1x7xf32>
    %60 = vector.broadcast %59 : vector<1x7xf32> to vector<4x7xf32>
    %61 = arith.mulf %58, %60 : vector<4x7xf32>
    %c48 = arith.constant 48 : index
    %c0_48 = arith.constant 0 : index
    %62 = vector.load %arg9[%c48, %c0_48] : memref<72x8xf32, #tpu.memory_space<vmem>>, vector<4x7xf32>
    tpu.vector_store %arg9[%c48, %c0_48], %61 {strides = array<i32>} : memref<72x8xf32, #tpu.memory_space<vmem>>, vector<4x7xf32>,
    %c0_49 = arith.constant 0 : index
    %c1_50 = arith.constant 1 : index
    %63 = vector.load %arg1[%c0_49, %c1_50] : memref<4x8xf32, #tpu.memory_space<vmem>>, vector<4x7xf32>
    %c6_51 = arith.constant 6 : index
    %c0_52 = arith.constant 0 : index
    %64 = vector.load %arg3[%c6_51, %c0_52] : memref<9x8xf32, #tpu.memory_space<vmem>>, vector<1x7xf32>
    %65 = vector.broadcast %64 : vector<1x7xf32> to vector<4x7xf32>
    %66 = arith.mulf %63, %65 : vector<4x7xf32>
    %c52 = arith.constant 52 : index
    %c0_53 = arith.constant 0 : index
    %67 = vector.load %arg9[%c52, %c0_53] : memref<72x8xf32, #tpu.memory_space<vmem>>, vector<4x7xf32>
    tpu.vector_store %arg9[%c52, %c0_53], %66 {strides = array<i32>} : memref<72x8xf32, #tpu.memory_space<vmem>>, vector<4x7xf32>,
    %68 = vector.extract_strided_slice %2 {offsets = [0, 2], sizes = [4, 6], strides = [1, 1]} : vector<4x8xf32> to vector<4x6xf32>
    %c7 = arith.constant 7 : index
    %c0_54 = arith.constant 0 : index
    %69 = vector.load %arg3[%c7, %c0_54] : memref<9x8xf32, #tpu.memory_space<vmem>>, vector<1x6xf32>
    %70 = vector.broadcast %69 : vector<1x6xf32> to vector<4x6xf32>
    %71 = arith.mulf %68, %70 : vector<4x6xf32>
    %c56 = arith.constant 56 : index
    %c0_55 = arith.constant 0 : index
    %72 = vector.load %arg9[%c56, %c0_55] : memref<72x8xf32, #tpu.memory_space<vmem>>, vector<4x6xf32>
    tpu.vector_store %arg9[%c56, %c0_55], %71 {strides = array<i32>} : memref<72x8xf32, #tpu.memory_space<vmem>>, vector<4x6xf32>,
    %c0_56 = arith.constant 0 : index
    %c2_57 = arith.constant 2 : index
    %73 = vector.load %arg1[%c0_56, %c2_57] : memref<4x8xf32, #tpu.memory_space<vmem>>, vector<4x6xf32>
    %c7_58 = arith.constant 7 : index
    %c0_59 = arith.constant 0 : index
    %74 = vector.load %arg3[%c7_58, %c0_59] : memref<9x8xf32, #tpu.memory_space<vmem>>, vector<1x6xf32>
    %75 = vector.broadcast %74 : vector<1x6xf32> to vector<4x6xf32>
    %76 = arith.mulf %73, %75 : vector<4x6xf32>
    %c60 = arith.constant 60 : index
    %c0_60 = arith.constant 0 : index
    %77 = vector.load %arg9[%c60, %c0_60] : memref<72x8xf32, #tpu.memory_space<vmem>>, vector<4x6xf32>
    tpu.vector_store %arg9[%c60, %c0_60], %76 {strides = array<i32>} : memref<72x8xf32, #tpu.memory_space<vmem>>, vector<4x6xf32>,
    %78 = vector.extract_strided_slice %2 {offsets = [0, 3], sizes = [4, 5], strides = [1, 1]} : vector<4x8xf32> to vector<4x5xf32>
    %c8_61 = arith.constant 8 : index
    %c0_62 = arith.constant 0 : index
    %79 = vector.load %arg3[%c8_61, %c0_62] : memref<9x8xf32, #tpu.memory_space<vmem>>, vector<1x5xf32>
    %80 = vector.broadcast %79 : vector<1x5xf32> to vector<4x5xf32>
    %81 = arith.mulf %78, %80 : vector<4x5xf32>
    %c64 = arith.constant 64 : index
    %c0_63 = arith.constant 0 : index
    %82 = vector.load %arg9[%c64, %c0_63] : memref<72x8xf32, #tpu.memory_space<vmem>>, vector<4x5xf32>
    tpu.vector_store %arg9[%c64, %c0_63], %81 {strides = array<i32>} : memref<72x8xf32, #tpu.memory_space<vmem>>, vector<4x5xf32>,
    %c0_64 = arith.constant 0 : index
    %c3_65 = arith.constant 3 : index
    %83 = vector.load %arg1[%c0_64, %c3_65] : memref<4x8xf32, #tpu.memory_space<vmem>>, vector<4x5xf32>
    %c8_66 = arith.constant 8 : index
    %c0_67 = arith.constant 0 : index
    %84 = vector.load %arg3[%c8_66, %c0_67] : memref<9x8xf32, #tpu.memory_space<vmem>>, vector<1x5xf32>
    %85 = vector.broadcast %84 : vector<1x5xf32> to vector<4x5xf32>
    %86 = arith.mulf %83, %85 : vector<4x5xf32>
    %c68 = arith.constant 68 : index
    %c0_68 = arith.constant 0 : index
    %87 = vector.load %arg9[%c68, %c0_68] : memref<72x8xf32, #tpu.memory_space<vmem>>, vector<4x5xf32>
    tpu.vector_store %arg9[%c68, %c0_68], %86 {strides = array<i32>} : memref<72x8xf32, #tpu.memory_space<vmem>>, vector<4x5xf32>,
    %c0_69 = arith.constant 0 : index
    %c0_70 = arith.constant 0 : index
    %88 = vector.load %arg4[%c0_69, %c0_70] : memref<4x72xbf16, #tpu.memory_space<vmem>>, vector<4x72xbf16>
    %c0_71 = arith.constant 0 : index
    %c0_72 = arith.constant 0 : index
    %89 = vector.load %arg9[%c0_71, %c0_72] : memref<72x8xf32, #tpu.memory_space<vmem>>, vector<72x8xf32>
    %90 = arith.truncf %89 : vector<72x8xf32> to vector<72x8xbf16>
    %cst_73 = arith.constant dense<0.000000e+00> : vector<4x8xf32>
    %91 = tpu.matmul %88, %90, %cst_73 {dimension_numbers = #tpu.dot_dimension_numbers<[1], [0], [0], [1], [0, 0, 1, 1], [], []>} : vector<4x72xbf16>, vector<72x8xbf16>, vector<4x8xf32> -> vector<4x8xf32>
    %c0_74 = arith.constant 0 : index
    %c0_75 = arith.constant 0 : index
    %92 = vector.load %arg5[%c0_74, %c0_75] : memref<4x1xf32, #tpu.memory_space<vmem>>, vector<4x1xf32>
    %93 = vector.broadcast %92 : vector<4x1xf32> to vector<4x8xf32>
    %94 = arith.addf %91, %93 : vector<4x8xf32>
    %cst_76 = arith.constant dense<0.000000e+00> : vector<4xf32>
    %95 = vector.multi_reduction <add>, %94, %cst_76 [1] : vector<4x8xf32> to vector<4xf32>
    %96 = vector.shape_cast %95 : vector<4xf32> to vector<4x1xf32>
    %cst_77 = arith.constant 1.250000e-01 : f32
    %97 = vector.broadcast %cst_77 : f32 to vector<4x1xf32>
    %98 = arith.mulf %96, %97 : vector<4x1xf32>
    %99 = arith.mulf %94, %94 : vector<4x8xf32>
    %cst_78 = arith.constant dense<0.000000e+00> : vector<4xf32>
    %100 = vector.multi_reduction <add>, %99, %cst_78 [1] : vector<4x8xf32> to vector<4xf32>
    %101 = vector.shape_cast %100 : vector<4xf32> to vector<4x1xf32>
    %cst_79 = arith.constant 1.250000e-01 : f32
    %102 = vector.broadcast %cst_79 : f32 to vector<4x1xf32>
    %103 = arith.mulf %101, %102 : vector<4x1xf32>
    %104 = arith.mulf %98, %98 : vector<4x1xf32>
    %105 = arith.subf %103, %104 : vector<4x1xf32>
    %cst_80 = arith.constant 0.000000e+00 : f32
    %106 = vector.broadcast %cst_80 : f32 to vector<4x1xf32>
    %107 = arith.maximumf %105, %106 : vector<4x1xf32>
    %108 = vector.broadcast %98 : vector<4x1xf32> to vector<4x8xf32>
    %109 = arith.subf %94, %108 : vector<4x8xf32>
    %cst_81 = arith.constant 9.99999974E-6 : f32
    %110 = vector.broadcast %cst_81 : f32 to vector<4x1xf32>
    %111 = arith.addf %107, %110 : vector<4x1xf32>
    %112 = math.rsqrt %111 : vector<4x1xf32>
    %113 = vector.broadcast %112 : vector<4x1xf32> to vector<4x8xf32>
    %114 = arith.mulf %109, %113 : vector<4x8xf32>
    %c0_82 = arith.constant 0 : index
    %c0_83 = arith.constant 0 : index
    %115 = vector.load %arg6[%c0_82, %c0_83] : memref<4x1xf32, #tpu.memory_space<vmem>>, vector<4x1xf32>
    %116 = vector.broadcast %115 : vector<4x1xf32> to vector<4x8xf32>
    %117 = arith.mulf %114, %116 : vector<4x8xf32>
    %c0_84 = arith.constant 0 : index
    %c0_85 = arith.constant 0 : index
    %118 = vector.load %arg7[%c0_84, %c0_85] : memref<4x1xf32, #tpu.memory_space<vmem>>, vector<4x1xf32>
    %119 = vector.broadcast %118 : vector<4x1xf32> to vector<4x8xf32>
    %120 = arith.addf %117, %119 : vector<4x8xf32>
    %cst_86 = arith.constant 0.000000e+00 : f32
    %121 = vector.broadcast %cst_86 : f32 to vector<4x8xf32>
    %122 = arith.maximumf %120, %121 : vector<4x8xf32>
    %c0_87 = arith.constant 0 : index
    %c0_88 = arith.constant 0 : index
    %123 = vector.load %arg8[%c0_87, %c0_88] : memref<4x8xf32, #tpu.memory_space<vmem>>, vector<4x8xf32>
    tpu.vector_store %arg8[%c0_87, %c0_88], %122 {strides = array<i32>} : memref<4x8xf32, #tpu.memory_space<vmem>>, vector<4x8xf32>,
    return
  }
}

module attributes {stable_mosaic.version = 11 : i64} {
  func.func @kernel(%arg0: memref<4x32xf32, #tpu.memory_space<vmem>>, %arg1: memref<4x128xf32, #tpu.memory_space<vmem>>, %arg2: memref<32x128xf32, #tpu.memory_space<vmem>>, %arg3: memref<9x128xf32, #tpu.memory_space<vmem>>, %arg4: memref<4x72xbf16, #tpu.memory_space<vmem>>, %arg5: memref<4x1xf32, #tpu.memory_space<vmem>>, %arg6: memref<4x1xf32, #tpu.memory_space<vmem>>, %arg7: memref<4x1xf32, #tpu.memory_space<vmem>>, %arg8: memref<4x128xf32, #tpu.memory_space<vmem>>, %arg9: memref<72x128xf32, #tpu.memory_space<vmem>>) attributes {dimension_semantics = [], scalar_prefetch = 0 : i64, scratch_operands = 1 : i64, tpu.core_type = #tpu.core_type<tc>} {
    %c0 = arith.constant 0 : index
    %c0_0 = arith.constant 0 : index
    %0 = vector.load %arg0[%c0, %c0_0] : memref<4x32xf32, #tpu.memory_space<vmem>>, vector<4x32xf32>
    %c0_1 = arith.constant 0 : index
    %c0_2 = arith.constant 0 : index
    %1 = vector.load %arg2[%c0_1, %c0_2] : memref<32x128xf32, #tpu.memory_space<vmem>>, vector<32x128xf32>
    %cst = arith.constant dense<0.000000e+00> : vector<4x128xf32>
    %2 = tpu.matmul %0, %1, %cst {dimension_numbers = #tpu.dot_dimension_numbers<[1], [0], [0], [1], [0, 0, 1, 1], [], []>} : vector<4x32xf32>, vector<32x128xf32>, vector<4x128xf32> -> vector<4x128xf32>
    %cst_3 = arith.constant 0.000000e+00 : f32
    %3 = vector.broadcast %cst_3 : f32 to vector<72x128xf32>
    %c0_4 = arith.constant 0 : index
    %c0_5 = arith.constant 0 : index
    %4 = vector.load %arg9[%c0_4, %c0_5] : memref<72x128xf32, #tpu.memory_space<vmem>>, vector<72x128xf32>
    tpu.vector_store %arg9[%c0_4, %c0_5], %3 {strides = array<i32>} : memref<72x128xf32, #tpu.memory_space<vmem>>, vector<72x128xf32>,
    %5 = vector.extract_strided_slice %2 {offsets = [0, 0], sizes = [4, 119], strides = [1, 1]} : vector<4x128xf32> to vector<4x119xf32>
    %c0_6 = arith.constant 0 : index
    %c9 = arith.constant 9 : index
    %6 = vector.load %arg3[%c0_6, %c9] : memref<9x128xf32, #tpu.memory_space<vmem>>, vector<1x119xf32>
    %7 = vector.broadcast %6 : vector<1x119xf32> to vector<4x119xf32>
    %8 = arith.mulf %5, %7 : vector<4x119xf32>
    %c0_7 = arith.constant 0 : index
    %c9_8 = arith.constant 9 : index
    %9 = vector.load %arg9[%c0_7, %c9_8] : memref<72x128xf32, #tpu.memory_space<vmem>>, vector<4x119xf32>
    tpu.vector_store %arg9[%c0_7, %c9_8], %8 {strides = array<i32>} : memref<72x128xf32, #tpu.memory_space<vmem>>, vector<4x119xf32>,
    %c0_9 = arith.constant 0 : index
    %c0_10 = arith.constant 0 : index
    %10 = vector.load %arg1[%c0_9, %c0_10] : memref<4x128xf32, #tpu.memory_space<vmem>>, vector<4x119xf32>
    %c0_11 = arith.constant 0 : index
    %c9_12 = arith.constant 9 : index
    %11 = vector.load %arg3[%c0_11, %c9_12] : memref<9x128xf32, #tpu.memory_space<vmem>>, vector<1x119xf32>
    %12 = vector.broadcast %11 : vector<1x119xf32> to vector<4x119xf32>
    %13 = arith.mulf %10, %12 : vector<4x119xf32>
    %c4 = arith.constant 4 : index
    %c9_13 = arith.constant 9 : index
    %14 = vector.load %arg9[%c4, %c9_13] : memref<72x128xf32, #tpu.memory_space<vmem>>, vector<4x119xf32>
    tpu.vector_store %arg9[%c4, %c9_13], %13 {strides = array<i32>} : memref<72x128xf32, #tpu.memory_space<vmem>>, vector<4x119xf32>,
    %15 = vector.extract_strided_slice %2 {offsets = [0, 0], sizes = [4, 120], strides = [1, 1]} : vector<4x128xf32> to vector<4x120xf32>
    %c1 = arith.constant 1 : index
    %c8 = arith.constant 8 : index
    %16 = vector.load %arg3[%c1, %c8] : memref<9x128xf32, #tpu.memory_space<vmem>>, vector<1x120xf32>
    %17 = vector.broadcast %16 : vector<1x120xf32> to vector<4x120xf32>
    %18 = arith.mulf %15, %17 : vector<4x120xf32>
    %c8_14 = arith.constant 8 : index
    %c8_15 = arith.constant 8 : index
    %19 = vector.load %arg9[%c8_14, %c8_15] : memref<72x128xf32, #tpu.memory_space<vmem>>, vector<4x120xf32>
    tpu.vector_store %arg9[%c8_14, %c8_15], %18 {strides = array<i32>} : memref<72x128xf32, #tpu.memory_space<vmem>>, vector<4x120xf32>,
    %c0_16 = arith.constant 0 : index
    %c0_17 = arith.constant 0 : index
    %20 = vector.load %arg1[%c0_16, %c0_17] : memref<4x128xf32, #tpu.memory_space<vmem>>, vector<4x120xf32>
    %c1_18 = arith.constant 1 : index
    %c8_19 = arith.constant 8 : index
    %21 = vector.load %arg3[%c1_18, %c8_19] : memref<9x128xf32, #tpu.memory_space<vmem>>, vector<1x120xf32>
    %22 = vector.broadcast %21 : vector<1x120xf32> to vector<4x120xf32>
    %23 = arith.mulf %20, %22 : vector<4x120xf32>
    %c12 = arith.constant 12 : index
    %c8_20 = arith.constant 8 : index
    %24 = vector.load %arg9[%c12, %c8_20] : memref<72x128xf32, #tpu.memory_space<vmem>>, vector<4x120xf32>
    tpu.vector_store %arg9[%c12, %c8_20], %23 {strides = array<i32>} : memref<72x128xf32, #tpu.memory_space<vmem>>, vector<4x120xf32>,
    %25 = vector.extract_strided_slice %2 {offsets = [0, 0], sizes = [4, 121], strides = [1, 1]} : vector<4x128xf32> to vector<4x121xf32>
    %c2 = arith.constant 2 : index
    %c7 = arith.constant 7 : index
    %26 = vector.load %arg3[%c2, %c7] : memref<9x128xf32, #tpu.memory_space<vmem>>, vector<1x121xf32>
    %27 = vector.broadcast %26 : vector<1x121xf32> to vector<4x121xf32>
    %28 = arith.mulf %25, %27 : vector<4x121xf32>
    %c16 = arith.constant 16 : index
    %c7_21 = arith.constant 7 : index
    %29 = vector.load %arg9[%c16, %c7_21] : memref<72x128xf32, #tpu.memory_space<vmem>>, vector<4x121xf32>
    tpu.vector_store %arg9[%c16, %c7_21], %28 {strides = array<i32>} : memref<72x128xf32, #tpu.memory_space<vmem>>, vector<4x121xf32>,
    %c0_22 = arith.constant 0 : index
    %c0_23 = arith.constant 0 : index
    %30 = vector.load %arg1[%c0_22, %c0_23] : memref<4x128xf32, #tpu.memory_space<vmem>>, vector<4x121xf32>
    %c2_24 = arith.constant 2 : index
    %c7_25 = arith.constant 7 : index
    %31 = vector.load %arg3[%c2_24, %c7_25] : memref<9x128xf32, #tpu.memory_space<vmem>>, vector<1x121xf32>
    %32 = vector.broadcast %31 : vector<1x121xf32> to vector<4x121xf32>
    %33 = arith.mulf %30, %32 : vector<4x121xf32>
    %c20 = arith.constant 20 : index
    %c7_26 = arith.constant 7 : index
    %34 = vector.load %arg9[%c20, %c7_26] : memref<72x128xf32, #tpu.memory_space<vmem>>, vector<4x121xf32>
    tpu.vector_store %arg9[%c20, %c7_26], %33 {strides = array<i32>} : memref<72x128xf32, #tpu.memory_space<vmem>>, vector<4x121xf32>,
    %35 = vector.extract_strided_slice %2 {offsets = [0, 0], sizes = [4, 127], strides = [1, 1]} : vector<4x128xf32> to vector<4x127xf32>
    %c3 = arith.constant 3 : index
    %c1_27 = arith.constant 1 : index
    %36 = vector.load %arg3[%c3, %c1_27] : memref<9x128xf32, #tpu.memory_space<vmem>>, vector<1x127xf32>
    %37 = vector.broadcast %36 : vector<1x127xf32> to vector<4x127xf32>
    %38 = arith.mulf %35, %37 : vector<4x127xf32>
    %c24 = arith.constant 24 : index
    %c1_28 = arith.constant 1 : index
    %39 = vector.load %arg9[%c24, %c1_28] : memref<72x128xf32, #tpu.memory_space<vmem>>, vector<4x127xf32>
    tpu.vector_store %arg9[%c24, %c1_28], %38 {strides = array<i32>} : memref<72x128xf32, #tpu.memory_space<vmem>>, vector<4x127xf32>,
    %c0_29 = arith.constant 0 : index
    %c0_30 = arith.constant 0 : index
    %40 = vector.load %arg1[%c0_29, %c0_30] : memref<4x128xf32, #tpu.memory_space<vmem>>, vector<4x127xf32>
    %c3_31 = arith.constant 3 : index
    %c1_32 = arith.constant 1 : index
    %41 = vector.load %arg3[%c3_31, %c1_32] : memref<9x128xf32, #tpu.memory_space<vmem>>, vector<1x127xf32>
    %42 = vector.broadcast %41 : vector<1x127xf32> to vector<4x127xf32>
    %43 = arith.mulf %40, %42 : vector<4x127xf32>
    %c28 = arith.constant 28 : index
    %c1_33 = arith.constant 1 : index
    %44 = vector.load %arg9[%c28, %c1_33] : memref<72x128xf32, #tpu.memory_space<vmem>>, vector<4x127xf32>
    tpu.vector_store %arg9[%c28, %c1_33], %43 {strides = array<i32>} : memref<72x128xf32, #tpu.memory_space<vmem>>, vector<4x127xf32>,
    %c32 = arith.constant 32 : index
    %c0_34 = arith.constant 0 : index
    %45 = vector.load %arg9[%c32, %c0_34] : memref<72x128xf32, #tpu.memory_space<vmem>>, vector<4x128xf32>
    tpu.vector_store %arg9[%c32, %c0_34], %2 {strides = array<i32>} : memref<72x128xf32, #tpu.memory_space<vmem>>, vector<4x128xf32>,
    %c0_35 = arith.constant 0 : index
    %c0_36 = arith.constant 0 : index
    %46 = vector.load %arg1[%c0_35, %c0_36] : memref<4x128xf32, #tpu.memory_space<vmem>>, vector<4x128xf32>
    %c36 = arith.constant 36 : index
    %c0_37 = arith.constant 0 : index
    %47 = vector.load %arg9[%c36, %c0_37] : memref<72x128xf32, #tpu.memory_space<vmem>>, vector<4x128xf32>
    tpu.vector_store %arg9[%c36, %c0_37], %46 {strides = array<i32>} : memref<72x128xf32, #tpu.memory_space<vmem>>, vector<4x128xf32>,
    %48 = vector.extract_strided_slice %2 {offsets = [0, 1], sizes = [4, 127], strides = [1, 1]} : vector<4x128xf32> to vector<4x127xf32>
    %c5 = arith.constant 5 : index
    %c0_38 = arith.constant 0 : index
    %49 = vector.load %arg3[%c5, %c0_38] : memref<9x128xf32, #tpu.memory_space<vmem>>, vector<1x127xf32>
    %50 = vector.broadcast %49 : vector<1x127xf32> to vector<4x127xf32>
    %51 = arith.mulf %48, %50 : vector<4x127xf32>
    %c40 = arith.constant 40 : index
    %c0_39 = arith.constant 0 : index
    %52 = vector.load %arg9[%c40, %c0_39] : memref<72x128xf32, #tpu.memory_space<vmem>>, vector<4x127xf32>
    tpu.vector_store %arg9[%c40, %c0_39], %51 {strides = array<i32>} : memref<72x128xf32, #tpu.memory_space<vmem>>, vector<4x127xf32>,
    %c0_40 = arith.constant 0 : index
    %c1_41 = arith.constant 1 : index
    %53 = vector.load %arg1[%c0_40, %c1_41] : memref<4x128xf32, #tpu.memory_space<vmem>>, vector<4x127xf32>
    %c5_42 = arith.constant 5 : index
    %c0_43 = arith.constant 0 : index
    %54 = vector.load %arg3[%c5_42, %c0_43] : memref<9x128xf32, #tpu.memory_space<vmem>>, vector<1x127xf32>
    %55 = vector.broadcast %54 : vector<1x127xf32> to vector<4x127xf32>
    %56 = arith.mulf %53, %55 : vector<4x127xf32>
    %c44 = arith.constant 44 : index
    %c0_44 = arith.constant 0 : index
    %57 = vector.load %arg9[%c44, %c0_44] : memref<72x128xf32, #tpu.memory_space<vmem>>, vector<4x127xf32>
    tpu.vector_store %arg9[%c44, %c0_44], %56 {strides = array<i32>} : memref<72x128xf32, #tpu.memory_space<vmem>>, vector<4x127xf32>,
    %58 = vector.extract_strided_slice %2 {offsets = [0, 7], sizes = [4, 121], strides = [1, 1]} : vector<4x128xf32> to vector<4x121xf32>
    %c6 = arith.constant 6 : index
    %c0_45 = arith.constant 0 : index
    %59 = vector.load %arg3[%c6, %c0_45] : memref<9x128xf32, #tpu.memory_space<vmem>>, vector<1x121xf32>
    %60 = vector.broadcast %59 : vector<1x121xf32> to vector<4x121xf32>
    %61 = arith.mulf %58, %60 : vector<4x121xf32>
    %c48 = arith.constant 48 : index
    %c0_46 = arith.constant 0 : index
    %62 = vector.load %arg9[%c48, %c0_46] : memref<72x128xf32, #tpu.memory_space<vmem>>, vector<4x121xf32>
    tpu.vector_store %arg9[%c48, %c0_46], %61 {strides = array<i32>} : memref<72x128xf32, #tpu.memory_space<vmem>>, vector<4x121xf32>,
    %c0_47 = arith.constant 0 : index
    %c7_48 = arith.constant 7 : index
    %63 = vector.load %arg1[%c0_47, %c7_48] : memref<4x128xf32, #tpu.memory_space<vmem>>, vector<4x121xf32>
    %c6_49 = arith.constant 6 : index
    %c0_50 = arith.constant 0 : index
    %64 = vector.load %arg3[%c6_49, %c0_50] : memref<9x128xf32, #tpu.memory_space<vmem>>, vector<1x121xf32>
    %65 = vector.broadcast %64 : vector<1x121xf32> to vector<4x121xf32>
    %66 = arith.mulf %63, %65 : vector<4x121xf32>
    %c52 = arith.constant 52 : index
    %c0_51 = arith.constant 0 : index
    %67 = vector.load %arg9[%c52, %c0_51] : memref<72x128xf32, #tpu.memory_space<vmem>>, vector<4x121xf32>
    tpu.vector_store %arg9[%c52, %c0_51], %66 {strides = array<i32>} : memref<72x128xf32, #tpu.memory_space<vmem>>, vector<4x121xf32>,
    %68 = vector.extract_strided_slice %2 {offsets = [0, 8], sizes = [4, 120], strides = [1, 1]} : vector<4x128xf32> to vector<4x120xf32>
    %c7_52 = arith.constant 7 : index
    %c0_53 = arith.constant 0 : index
    %69 = vector.load %arg3[%c7_52, %c0_53] : memref<9x128xf32, #tpu.memory_space<vmem>>, vector<1x120xf32>
    %70 = vector.broadcast %69 : vector<1x120xf32> to vector<4x120xf32>
    %71 = arith.mulf %68, %70 : vector<4x120xf32>
    %c56 = arith.constant 56 : index
    %c0_54 = arith.constant 0 : index
    %72 = vector.load %arg9[%c56, %c0_54] : memref<72x128xf32, #tpu.memory_space<vmem>>, vector<4x120xf32>
    tpu.vector_store %arg9[%c56, %c0_54], %71 {strides = array<i32>} : memref<72x128xf32, #tpu.memory_space<vmem>>, vector<4x120xf32>,
    %c0_55 = arith.constant 0 : index
    %c8_56 = arith.constant 8 : index
    %73 = vector.load %arg1[%c0_55, %c8_56] : memref<4x128xf32, #tpu.memory_space<vmem>>, vector<4x120xf32>
    %c7_57 = arith.constant 7 : index
    %c0_58 = arith.constant 0 : index
    %74 = vector.load %arg3[%c7_57, %c0_58] : memref<9x128xf32, #tpu.memory_space<vmem>>, vector<1x120xf32>
    %75 = vector.broadcast %74 : vector<1x120xf32> to vector<4x120xf32>
    %76 = arith.mulf %73, %75 : vector<4x120xf32>
    %c60 = arith.constant 60 : index
    %c0_59 = arith.constant 0 : index
    %77 = vector.load %arg9[%c60, %c0_59] : memref<72x128xf32, #tpu.memory_space<vmem>>, vector<4x120xf32>
    tpu.vector_store %arg9[%c60, %c0_59], %76 {strides = array<i32>} : memref<72x128xf32, #tpu.memory_space<vmem>>, vector<4x120xf32>,
    %78 = vector.extract_strided_slice %2 {offsets = [0, 9], sizes = [4, 119], strides = [1, 1]} : vector<4x128xf32> to vector<4x119xf32>
    %c8_60 = arith.constant 8 : index
    %c0_61 = arith.constant 0 : index
    %79 = vector.load %arg3[%c8_60, %c0_61] : memref<9x128xf32, #tpu.memory_space<vmem>>, vector<1x119xf32>
    %80 = vector.broadcast %79 : vector<1x119xf32> to vector<4x119xf32>
    %81 = arith.mulf %78, %80 : vector<4x119xf32>
    %c64 = arith.constant 64 : index
    %c0_62 = arith.constant 0 : index
    %82 = vector.load %arg9[%c64, %c0_62] : memref<72x128xf32, #tpu.memory_space<vmem>>, vector<4x119xf32>
    tpu.vector_store %arg9[%c64, %c0_62], %81 {strides = array<i32>} : memref<72x128xf32, #tpu.memory_space<vmem>>, vector<4x119xf32>,
    %c0_63 = arith.constant 0 : index
    %c9_64 = arith.constant 9 : index
    %83 = vector.load %arg1[%c0_63, %c9_64] : memref<4x128xf32, #tpu.memory_space<vmem>>, vector<4x119xf32>
    %c8_65 = arith.constant 8 : index
    %c0_66 = arith.constant 0 : index
    %84 = vector.load %arg3[%c8_65, %c0_66] : memref<9x128xf32, #tpu.memory_space<vmem>>, vector<1x119xf32>
    %85 = vector.broadcast %84 : vector<1x119xf32> to vector<4x119xf32>
    %86 = arith.mulf %83, %85 : vector<4x119xf32>
    %c68 = arith.constant 68 : index
    %c0_67 = arith.constant 0 : index
    %87 = vector.load %arg9[%c68, %c0_67] : memref<72x128xf32, #tpu.memory_space<vmem>>, vector<4x119xf32>
    tpu.vector_store %arg9[%c68, %c0_67], %86 {strides = array<i32>} : memref<72x128xf32, #tpu.memory_space<vmem>>, vector<4x119xf32>,
    %c0_68 = arith.constant 0 : index
    %c0_69 = arith.constant 0 : index
    %88 = vector.load %arg4[%c0_68, %c0_69] : memref<4x72xbf16, #tpu.memory_space<vmem>>, vector<4x72xbf16>
    %c0_70 = arith.constant 0 : index
    %c0_71 = arith.constant 0 : index
    %89 = vector.load %arg9[%c0_70, %c0_71] : memref<72x128xf32, #tpu.memory_space<vmem>>, vector<72x128xf32>
    %90 = arith.truncf %89 : vector<72x128xf32> to vector<72x128xbf16>
    %cst_72 = arith.constant dense<0.000000e+00> : vector<4x128xf32>
    %91 = tpu.matmul %88, %90, %cst_72 {dimension_numbers = #tpu.dot_dimension_numbers<[1], [0], [0], [1], [0, 0, 1, 1], [], []>} : vector<4x72xbf16>, vector<72x128xbf16>, vector<4x128xf32> -> vector<4x128xf32>
    %c0_73 = arith.constant 0 : index
    %c0_74 = arith.constant 0 : index
    %92 = vector.load %arg5[%c0_73, %c0_74] : memref<4x1xf32, #tpu.memory_space<vmem>>, vector<4x1xf32>
    %93 = vector.broadcast %92 : vector<4x1xf32> to vector<4x128xf32>
    %94 = arith.addf %91, %93 : vector<4x128xf32>
    %cst_75 = arith.constant dense<0.000000e+00> : vector<4xf32>
    %95 = vector.multi_reduction <add>, %94, %cst_75 [1] : vector<4x128xf32> to vector<4xf32>
    %96 = vector.shape_cast %95 : vector<4xf32> to vector<4x1xf32>
    %cst_76 = arith.constant 7.812500e-03 : f32
    %97 = vector.broadcast %cst_76 : f32 to vector<4x1xf32>
    %98 = arith.mulf %96, %97 : vector<4x1xf32>
    %99 = arith.mulf %94, %94 : vector<4x128xf32>
    %cst_77 = arith.constant dense<0.000000e+00> : vector<4xf32>
    %100 = vector.multi_reduction <add>, %99, %cst_77 [1] : vector<4x128xf32> to vector<4xf32>
    %101 = vector.shape_cast %100 : vector<4xf32> to vector<4x1xf32>
    %cst_78 = arith.constant 7.812500e-03 : f32
    %102 = vector.broadcast %cst_78 : f32 to vector<4x1xf32>
    %103 = arith.mulf %101, %102 : vector<4x1xf32>
    %104 = arith.mulf %98, %98 : vector<4x1xf32>
    %105 = arith.subf %103, %104 : vector<4x1xf32>
    %cst_79 = arith.constant 0.000000e+00 : f32
    %106 = vector.broadcast %cst_79 : f32 to vector<4x1xf32>
    %107 = arith.maximumf %105, %106 : vector<4x1xf32>
    %108 = vector.broadcast %98 : vector<4x1xf32> to vector<4x128xf32>
    %109 = arith.subf %94, %108 : vector<4x128xf32>
    %cst_80 = arith.constant 9.99999974E-6 : f32
    %110 = vector.broadcast %cst_80 : f32 to vector<4x1xf32>
    %111 = arith.addf %107, %110 : vector<4x1xf32>
    %112 = math.rsqrt %111 : vector<4x1xf32>
    %113 = vector.broadcast %112 : vector<4x1xf32> to vector<4x128xf32>
    %114 = arith.mulf %109, %113 : vector<4x128xf32>
    %c0_81 = arith.constant 0 : index
    %c0_82 = arith.constant 0 : index
    %115 = vector.load %arg6[%c0_81, %c0_82] : memref<4x1xf32, #tpu.memory_space<vmem>>, vector<4x1xf32>
    %116 = vector.broadcast %115 : vector<4x1xf32> to vector<4x128xf32>
    %117 = arith.mulf %114, %116 : vector<4x128xf32>
    %c0_83 = arith.constant 0 : index
    %c0_84 = arith.constant 0 : index
    %118 = vector.load %arg7[%c0_83, %c0_84] : memref<4x1xf32, #tpu.memory_space<vmem>>, vector<4x1xf32>
    %119 = vector.broadcast %118 : vector<4x1xf32> to vector<4x128xf32>
    %120 = arith.addf %117, %119 : vector<4x128xf32>
    %cst_85 = arith.constant 0.000000e+00 : f32
    %121 = vector.broadcast %cst_85 : f32 to vector<4x128xf32>
    %122 = arith.maximumf %120, %121 : vector<4x128xf32>
    %c0_86 = arith.constant 0 : index
    %c0_87 = arith.constant 0 : index
    %123 = vector.load %arg8[%c0_86, %c0_87] : memref<4x128xf32, #tpu.memory_space<vmem>>, vector<4x128xf32>
    tpu.vector_store %arg8[%c0_86, %c0_87], %122 {strides = array<i32>} : memref<4x128xf32, #tpu.memory_space<vmem>>, vector<4x128xf32>,
    return
  }
}

module attributes {stable_mosaic.version = 11 : i64} {
  func.func @kernel(%arg0: memref<4x8xf32, #tpu.memory_space<vmem>>, %arg1: memref<4x32xf32, #tpu.memory_space<vmem>>, %arg2: memref<8x32xf32, #tpu.memory_space<vmem>>, %arg3: memref<9x32xf32, #tpu.memory_space<vmem>>, %arg4: memref<4x72xbf16, #tpu.memory_space<vmem>>, %arg5: memref<4x1xf32, #tpu.memory_space<vmem>>, %arg6: memref<4x1xf32, #tpu.memory_space<vmem>>, %arg7: memref<4x1xf32, #tpu.memory_space<vmem>>, %arg8: memref<4x32xf32, #tpu.memory_space<vmem>>, %arg9: memref<72x32xf32, #tpu.memory_space<vmem>>) attributes {dimension_semantics = [], scalar_prefetch = 0 : i64, scratch_operands = 1 : i64, tpu.core_type = #tpu.core_type<tc>} {
    %c0 = arith.constant 0 : index
    %c0_0 = arith.constant 0 : index
    %0 = vector.load %arg0[%c0, %c0_0] : memref<4x8xf32, #tpu.memory_space<vmem>>, vector<4x8xf32>
    %c0_1 = arith.constant 0 : index
    %c0_2 = arith.constant 0 : index
    %1 = vector.load %arg2[%c0_1, %c0_2] : memref<8x32xf32, #tpu.memory_space<vmem>>, vector<8x32xf32>
    %cst = arith.constant dense<0.000000e+00> : vector<4x32xf32>
    %2 = tpu.matmul %0, %1, %cst {dimension_numbers = #tpu.dot_dimension_numbers<[1], [0], [0], [1], [0, 0, 1, 1], [], []>} : vector<4x8xf32>, vector<8x32xf32>, vector<4x32xf32> -> vector<4x32xf32>
    %cst_3 = arith.constant 0.000000e+00 : f32
    %3 = vector.broadcast %cst_3 : f32 to vector<72x32xf32>
    %c0_4 = arith.constant 0 : index
    %c0_5 = arith.constant 0 : index
    %4 = vector.load %arg9[%c0_4, %c0_5] : memref<72x32xf32, #tpu.memory_space<vmem>>, vector<72x32xf32>
    tpu.vector_store %arg9[%c0_4, %c0_5], %3 {strides = array<i32>} : memref<72x32xf32, #tpu.memory_space<vmem>>, vector<72x32xf32>,
    %5 = vector.extract_strided_slice %2 {offsets = [0, 0], sizes = [4, 27], strides = [1, 1]} : vector<4x32xf32> to vector<4x27xf32>
    %c0_6 = arith.constant 0 : index
    %c5 = arith.constant 5 : index
    %6 = vector.load %arg3[%c0_6, %c5] : memref<9x32xf32, #tpu.memory_space<vmem>>, vector<1x27xf32>
    %7 = vector.broadcast %6 : vector<1x27xf32> to vector<4x27xf32>
    %8 = arith.mulf %5, %7 : vector<4x27xf32>
    %c0_7 = arith.constant 0 : index
    %c5_8 = arith.constant 5 : index
    %9 = vector.load %arg9[%c0_7, %c5_8] : memref<72x32xf32, #tpu.memory_space<vmem>>, vector<4x27xf32>
    tpu.vector_store %arg9[%c0_7, %c5_8], %8 {strides = array<i32>} : memref<72x32xf32, #tpu.memory_space<vmem>>, vector<4x27xf32>,
    %c0_9 = arith.constant 0 : index
    %c0_10 = arith.constant 0 : index
    %10 = vector.load %arg1[%c0_9, %c0_10] : memref<4x32xf32, #tpu.memory_space<vmem>>, vector<4x27xf32>
    %c0_11 = arith.constant 0 : index
    %c5_12 = arith.constant 5 : index
    %11 = vector.load %arg3[%c0_11, %c5_12] : memref<9x32xf32, #tpu.memory_space<vmem>>, vector<1x27xf32>
    %12 = vector.broadcast %11 : vector<1x27xf32> to vector<4x27xf32>
    %13 = arith.mulf %10, %12 : vector<4x27xf32>
    %c4 = arith.constant 4 : index
    %c5_13 = arith.constant 5 : index
    %14 = vector.load %arg9[%c4, %c5_13] : memref<72x32xf32, #tpu.memory_space<vmem>>, vector<4x27xf32>
    tpu.vector_store %arg9[%c4, %c5_13], %13 {strides = array<i32>} : memref<72x32xf32, #tpu.memory_space<vmem>>, vector<4x27xf32>,
    %15 = vector.extract_strided_slice %2 {offsets = [0, 0], sizes = [4, 28], strides = [1, 1]} : vector<4x32xf32> to vector<4x28xf32>
    %c1 = arith.constant 1 : index
    %c4_14 = arith.constant 4 : index
    %16 = vector.load %arg3[%c1, %c4_14] : memref<9x32xf32, #tpu.memory_space<vmem>>, vector<1x28xf32>
    %17 = vector.broadcast %16 : vector<1x28xf32> to vector<4x28xf32>
    %18 = arith.mulf %15, %17 : vector<4x28xf32>
    %c8 = arith.constant 8 : index
    %c4_15 = arith.constant 4 : index
    %19 = vector.load %arg9[%c8, %c4_15] : memref<72x32xf32, #tpu.memory_space<vmem>>, vector<4x28xf32>
    tpu.vector_store %arg9[%c8, %c4_15], %18 {strides = array<i32>} : memref<72x32xf32, #tpu.memory_space<vmem>>, vector<4x28xf32>,
    %c0_16 = arith.constant 0 : index
    %c0_17 = arith.constant 0 : index
    %20 = vector.load %arg1[%c0_16, %c0_17] : memref<4x32xf32, #tpu.memory_space<vmem>>, vector<4x28xf32>
    %c1_18 = arith.constant 1 : index
    %c4_19 = arith.constant 4 : index
    %21 = vector.load %arg3[%c1_18, %c4_19] : memref<9x32xf32, #tpu.memory_space<vmem>>, vector<1x28xf32>
    %22 = vector.broadcast %21 : vector<1x28xf32> to vector<4x28xf32>
    %23 = arith.mulf %20, %22 : vector<4x28xf32>
    %c12 = arith.constant 12 : index
    %c4_20 = arith.constant 4 : index
    %24 = vector.load %arg9[%c12, %c4_20] : memref<72x32xf32, #tpu.memory_space<vmem>>, vector<4x28xf32>
    tpu.vector_store %arg9[%c12, %c4_20], %23 {strides = array<i32>} : memref<72x32xf32, #tpu.memory_space<vmem>>, vector<4x28xf32>,
    %25 = vector.extract_strided_slice %2 {offsets = [0, 0], sizes = [4, 29], strides = [1, 1]} : vector<4x32xf32> to vector<4x29xf32>
    %c2 = arith.constant 2 : index
    %c3 = arith.constant 3 : index
    %26 = vector.load %arg3[%c2, %c3] : memref<9x32xf32, #tpu.memory_space<vmem>>, vector<1x29xf32>
    %27 = vector.broadcast %26 : vector<1x29xf32> to vector<4x29xf32>
    %28 = arith.mulf %25, %27 : vector<4x29xf32>
    %c16 = arith.constant 16 : index
    %c3_21 = arith.constant 3 : index
    %29 = vector.load %arg9[%c16, %c3_21] : memref<72x32xf32, #tpu.memory_space<vmem>>, vector<4x29xf32>
    tpu.vector_store %arg9[%c16, %c3_21], %28 {strides = array<i32>} : memref<72x32xf32, #tpu.memory_space<vmem>>, vector<4x29xf32>,
    %c0_22 = arith.constant 0 : index
    %c0_23 = arith.constant 0 : index
    %30 = vector.load %arg1[%c0_22, %c0_23] : memref<4x32xf32, #tpu.memory_space<vmem>>, vector<4x29xf32>
    %c2_24 = arith.constant 2 : index
    %c3_25 = arith.constant 3 : index
    %31 = vector.load %arg3[%c2_24, %c3_25] : memref<9x32xf32, #tpu.memory_space<vmem>>, vector<1x29xf32>
    %32 = vector.broadcast %31 : vector<1x29xf32> to vector<4x29xf32>
    %33 = arith.mulf %30, %32 : vector<4x29xf32>
    %c20 = arith.constant 20 : index
    %c3_26 = arith.constant 3 : index
    %34 = vector.load %arg9[%c20, %c3_26] : memref<72x32xf32, #tpu.memory_space<vmem>>, vector<4x29xf32>
    tpu.vector_store %arg9[%c20, %c3_26], %33 {strides = array<i32>} : memref<72x32xf32, #tpu.memory_space<vmem>>, vector<4x29xf32>,
    %35 = vector.extract_strided_slice %2 {offsets = [0, 0], sizes = [4, 31], strides = [1, 1]} : vector<4x32xf32> to vector<4x31xf32>
    %c3_27 = arith.constant 3 : index
    %c1_28 = arith.constant 1 : index
    %36 = vector.load %arg3[%c3_27, %c1_28] : memref<9x32xf32, #tpu.memory_space<vmem>>, vector<1x31xf32>
    %37 = vector.broadcast %36 : vector<1x31xf32> to vector<4x31xf32>
    %38 = arith.mulf %35, %37 : vector<4x31xf32>
    %c24 = arith.constant 24 : index
    %c1_29 = arith.constant 1 : index
    %39 = vector.load %arg9[%c24, %c1_29] : memref<72x32xf32, #tpu.memory_space<vmem>>, vector<4x31xf32>
    tpu.vector_store %arg9[%c24, %c1_29], %38 {strides = array<i32>} : memref<72x32xf32, #tpu.memory_space<vmem>>, vector<4x31xf32>,
    %c0_30 = arith.constant 0 : index
    %c0_31 = arith.constant 0 : index
    %40 = vector.load %arg1[%c0_30, %c0_31] : memref<4x32xf32, #tpu.memory_space<vmem>>, vector<4x31xf32>
    %c3_32 = arith.constant 3 : index
    %c1_33 = arith.constant 1 : index
    %41 = vector.load %arg3[%c3_32, %c1_33] : memref<9x32xf32, #tpu.memory_space<vmem>>, vector<1x31xf32>
    %42 = vector.broadcast %41 : vector<1x31xf32> to vector<4x31xf32>
    %43 = arith.mulf %40, %42 : vector<4x31xf32>
    %c28 = arith.constant 28 : index
    %c1_34 = arith.constant 1 : index
    %44 = vector.load %arg9[%c28, %c1_34] : memref<72x32xf32, #tpu.memory_space<vmem>>, vector<4x31xf32>
    tpu.vector_store %arg9[%c28, %c1_34], %43 {strides = array<i32>} : memref<72x32xf32, #tpu.memory_space<vmem>>, vector<4x31xf32>,
    %c32 = arith.constant 32 : index
    %c0_35 = arith.constant 0 : index
    %45 = vector.load %arg9[%c32, %c0_35] : memref<72x32xf32, #tpu.memory_space<vmem>>, vector<4x32xf32>
    tpu.vector_store %arg9[%c32, %c0_35], %2 {strides = array<i32>} : memref<72x32xf32, #tpu.memory_space<vmem>>, vector<4x32xf32>,
    %c0_36 = arith.constant 0 : index
    %c0_37 = arith.constant 0 : index
    %46 = vector.load %arg1[%c0_36, %c0_37] : memref<4x32xf32, #tpu.memory_space<vmem>>, vector<4x32xf32>
    %c36 = arith.constant 36 : index
    %c0_38 = arith.constant 0 : index
    %47 = vector.load %arg9[%c36, %c0_38] : memref<72x32xf32, #tpu.memory_space<vmem>>, vector<4x32xf32>
    tpu.vector_store %arg9[%c36, %c0_38], %46 {strides = array<i32>} : memref<72x32xf32, #tpu.memory_space<vmem>>, vector<4x32xf32>,
    %48 = vector.extract_strided_slice %2 {offsets = [0, 1], sizes = [4, 31], strides = [1, 1]} : vector<4x32xf32> to vector<4x31xf32>
    %c5_39 = arith.constant 5 : index
    %c0_40 = arith.constant 0 : index
    %49 = vector.load %arg3[%c5_39, %c0_40] : memref<9x32xf32, #tpu.memory_space<vmem>>, vector<1x31xf32>
    %50 = vector.broadcast %49 : vector<1x31xf32> to vector<4x31xf32>
    %51 = arith.mulf %48, %50 : vector<4x31xf32>
    %c40 = arith.constant 40 : index
    %c0_41 = arith.constant 0 : index
    %52 = vector.load %arg9[%c40, %c0_41] : memref<72x32xf32, #tpu.memory_space<vmem>>, vector<4x31xf32>
    tpu.vector_store %arg9[%c40, %c0_41], %51 {strides = array<i32>} : memref<72x32xf32, #tpu.memory_space<vmem>>, vector<4x31xf32>,
    %c0_42 = arith.constant 0 : index
    %c1_43 = arith.constant 1 : index
    %53 = vector.load %arg1[%c0_42, %c1_43] : memref<4x32xf32, #tpu.memory_space<vmem>>, vector<4x31xf32>
    %c5_44 = arith.constant 5 : index
    %c0_45 = arith.constant 0 : index
    %54 = vector.load %arg3[%c5_44, %c0_45] : memref<9x32xf32, #tpu.memory_space<vmem>>, vector<1x31xf32>
    %55 = vector.broadcast %54 : vector<1x31xf32> to vector<4x31xf32>
    %56 = arith.mulf %53, %55 : vector<4x31xf32>
    %c44 = arith.constant 44 : index
    %c0_46 = arith.constant 0 : index
    %57 = vector.load %arg9[%c44, %c0_46] : memref<72x32xf32, #tpu.memory_space<vmem>>, vector<4x31xf32>
    tpu.vector_store %arg9[%c44, %c0_46], %56 {strides = array<i32>} : memref<72x32xf32, #tpu.memory_space<vmem>>, vector<4x31xf32>,
    %58 = vector.extract_strided_slice %2 {offsets = [0, 3], sizes = [4, 29], strides = [1, 1]} : vector<4x32xf32> to vector<4x29xf32>
    %c6 = arith.constant 6 : index
    %c0_47 = arith.constant 0 : index
    %59 = vector.load %arg3[%c6, %c0_47] : memref<9x32xf32, #tpu.memory_space<vmem>>, vector<1x29xf32>
    %60 = vector.broadcast %59 : vector<1x29xf32> to vector<4x29xf32>
    %61 = arith.mulf %58, %60 : vector<4x29xf32>
    %c48 = arith.constant 48 : index
    %c0_48 = arith.constant 0 : index
    %62 = vector.load %arg9[%c48, %c0_48] : memref<72x32xf32, #tpu.memory_space<vmem>>, vector<4x29xf32>
    tpu.vector_store %arg9[%c48, %c0_48], %61 {strides = array<i32>} : memref<72x32xf32, #tpu.memory_space<vmem>>, vector<4x29xf32>,
    %c0_49 = arith.constant 0 : index
    %c3_50 = arith.constant 3 : index
    %63 = vector.load %arg1[%c0_49, %c3_50] : memref<4x32xf32, #tpu.memory_space<vmem>>, vector<4x29xf32>
    %c6_51 = arith.constant 6 : index
    %c0_52 = arith.constant 0 : index
    %64 = vector.load %arg3[%c6_51, %c0_52] : memref<9x32xf32, #tpu.memory_space<vmem>>, vector<1x29xf32>
    %65 = vector.broadcast %64 : vector<1x29xf32> to vector<4x29xf32>
    %66 = arith.mulf %63, %65 : vector<4x29xf32>
    %c52 = arith.constant 52 : index
    %c0_53 = arith.constant 0 : index
    %67 = vector.load %arg9[%c52, %c0_53] : memref<72x32xf32, #tpu.memory_space<vmem>>, vector<4x29xf32>
    tpu.vector_store %arg9[%c52, %c0_53], %66 {strides = array<i32>} : memref<72x32xf32, #tpu.memory_space<vmem>>, vector<4x29xf32>,
    %68 = vector.extract_strided_slice %2 {offsets = [0, 4], sizes = [4, 28], strides = [1, 1]} : vector<4x32xf32> to vector<4x28xf32>
    %c7 = arith.constant 7 : index
    %c0_54 = arith.constant 0 : index
    %69 = vector.load %arg3[%c7, %c0_54] : memref<9x32xf32, #tpu.memory_space<vmem>>, vector<1x28xf32>
    %70 = vector.broadcast %69 : vector<1x28xf32> to vector<4x28xf32>
    %71 = arith.mulf %68, %70 : vector<4x28xf32>
    %c56 = arith.constant 56 : index
    %c0_55 = arith.constant 0 : index
    %72 = vector.load %arg9[%c56, %c0_55] : memref<72x32xf32, #tpu.memory_space<vmem>>, vector<4x28xf32>
    tpu.vector_store %arg9[%c56, %c0_55], %71 {strides = array<i32>} : memref<72x32xf32, #tpu.memory_space<vmem>>, vector<4x28xf32>,
    %c0_56 = arith.constant 0 : index
    %c4_57 = arith.constant 4 : index
    %73 = vector.load %arg1[%c0_56, %c4_57] : memref<4x32xf32, #tpu.memory_space<vmem>>, vector<4x28xf32>
    %c7_58 = arith.constant 7 : index
    %c0_59 = arith.constant 0 : index
    %74 = vector.load %arg3[%c7_58, %c0_59] : memref<9x32xf32, #tpu.memory_space<vmem>>, vector<1x28xf32>
    %75 = vector.broadcast %74 : vector<1x28xf32> to vector<4x28xf32>
    %76 = arith.mulf %73, %75 : vector<4x28xf32>
    %c60 = arith.constant 60 : index
    %c0_60 = arith.constant 0 : index
    %77 = vector.load %arg9[%c60, %c0_60] : memref<72x32xf32, #tpu.memory_space<vmem>>, vector<4x28xf32>
    tpu.vector_store %arg9[%c60, %c0_60], %76 {strides = array<i32>} : memref<72x32xf32, #tpu.memory_space<vmem>>, vector<4x28xf32>,
    %78 = vector.extract_strided_slice %2 {offsets = [0, 5], sizes = [4, 27], strides = [1, 1]} : vector<4x32xf32> to vector<4x27xf32>
    %c8_61 = arith.constant 8 : index
    %c0_62 = arith.constant 0 : index
    %79 = vector.load %arg3[%c8_61, %c0_62] : memref<9x32xf32, #tpu.memory_space<vmem>>, vector<1x27xf32>
    %80 = vector.broadcast %79 : vector<1x27xf32> to vector<4x27xf32>
    %81 = arith.mulf %78, %80 : vector<4x27xf32>
    %c64 = arith.constant 64 : index
    %c0_63 = arith.constant 0 : index
    %82 = vector.load %arg9[%c64, %c0_63] : memref<72x32xf32, #tpu.memory_space<vmem>>, vector<4x27xf32>
    tpu.vector_store %arg9[%c64, %c0_63], %81 {strides = array<i32>} : memref<72x32xf32, #tpu.memory_space<vmem>>, vector<4x27xf32>,
    %c0_64 = arith.constant 0 : index
    %c5_65 = arith.constant 5 : index
    %83 = vector.load %arg1[%c0_64, %c5_65] : memref<4x32xf32, #tpu.memory_space<vmem>>, vector<4x27xf32>
    %c8_66 = arith.constant 8 : index
    %c0_67 = arith.constant 0 : index
    %84 = vector.load %arg3[%c8_66, %c0_67] : memref<9x32xf32, #tpu.memory_space<vmem>>, vector<1x27xf32>
    %85 = vector.broadcast %84 : vector<1x27xf32> to vector<4x27xf32>
    %86 = arith.mulf %83, %85 : vector<4x27xf32>
    %c68 = arith.constant 68 : index
    %c0_68 = arith.constant 0 : index
    %87 = vector.load %arg9[%c68, %c0_68] : memref<72x32xf32, #tpu.memory_space<vmem>>, vector<4x27xf32>
    tpu.vector_store %arg9[%c68, %c0_68], %86 {strides = array<i32>} : memref<72x32xf32, #tpu.memory_space<vmem>>, vector<4x27xf32>,
    %c0_69 = arith.constant 0 : index
    %c0_70 = arith.constant 0 : index
    %88 = vector.load %arg4[%c0_69, %c0_70] : memref<4x72xbf16, #tpu.memory_space<vmem>>, vector<4x72xbf16>
    %c0_71 = arith.constant 0 : index
    %c0_72 = arith.constant 0 : index
    %89 = vector.load %arg9[%c0_71, %c0_72] : memref<72x32xf32, #tpu.memory_space<vmem>>, vector<72x32xf32>
    %90 = arith.truncf %89 : vector<72x32xf32> to vector<72x32xbf16>
    %cst_73 = arith.constant dense<0.000000e+00> : vector<4x32xf32>
    %91 = tpu.matmul %88, %90, %cst_73 {dimension_numbers = #tpu.dot_dimension_numbers<[1], [0], [0], [1], [0, 0, 1, 1], [], []>} : vector<4x72xbf16>, vector<72x32xbf16>, vector<4x32xf32> -> vector<4x32xf32>
    %c0_74 = arith.constant 0 : index
    %c0_75 = arith.constant 0 : index
    %92 = vector.load %arg5[%c0_74, %c0_75] : memref<4x1xf32, #tpu.memory_space<vmem>>, vector<4x1xf32>
    %93 = vector.broadcast %92 : vector<4x1xf32> to vector<4x32xf32>
    %94 = arith.addf %91, %93 : vector<4x32xf32>
    %cst_76 = arith.constant dense<0.000000e+00> : vector<4xf32>
    %95 = vector.multi_reduction <add>, %94, %cst_76 [1] : vector<4x32xf32> to vector<4xf32>
    %96 = vector.shape_cast %95 : vector<4xf32> to vector<4x1xf32>
    %cst_77 = arith.constant 3.125000e-02 : f32
    %97 = vector.broadcast %cst_77 : f32 to vector<4x1xf32>
    %98 = arith.mulf %96, %97 : vector<4x1xf32>
    %99 = arith.mulf %94, %94 : vector<4x32xf32>
    %cst_78 = arith.constant dense<0.000000e+00> : vector<4xf32>
    %100 = vector.multi_reduction <add>, %99, %cst_78 [1] : vector<4x32xf32> to vector<4xf32>
    %101 = vector.shape_cast %100 : vector<4xf32> to vector<4x1xf32>
    %cst_79 = arith.constant 3.125000e-02 : f32
    %102 = vector.broadcast %cst_79 : f32 to vector<4x1xf32>
    %103 = arith.mulf %101, %102 : vector<4x1xf32>
    %104 = arith.mulf %98, %98 : vector<4x1xf32>
    %105 = arith.subf %103, %104 : vector<4x1xf32>
    %cst_80 = arith.constant 0.000000e+00 : f32
    %106 = vector.broadcast %cst_80 : f32 to vector<4x1xf32>
    %107 = arith.maximumf %105, %106 : vector<4x1xf32>
    %108 = vector.broadcast %98 : vector<4x1xf32> to vector<4x32xf32>
    %109 = arith.subf %94, %108 : vector<4x32xf32>
    %cst_81 = arith.constant 9.99999974E-6 : f32
    %110 = vector.broadcast %cst_81 : f32 to vector<4x1xf32>
    %111 = arith.addf %107, %110 : vector<4x1xf32>
    %112 = math.rsqrt %111 : vector<4x1xf32>
    %113 = vector.broadcast %112 : vector<4x1xf32> to vector<4x32xf32>
    %114 = arith.mulf %109, %113 : vector<4x32xf32>
    %c0_82 = arith.constant 0 : index
    %c0_83 = arith.constant 0 : index
    %115 = vector.load %arg6[%c0_82, %c0_83] : memref<4x1xf32, #tpu.memory_space<vmem>>, vector<4x1xf32>
    %116 = vector.broadcast %115 : vector<4x1xf32> to vector<4x32xf32>
    %117 = arith.mulf %114, %116 : vector<4x32xf32>
    %c0_84 = arith.constant 0 : index
    %c0_85 = arith.constant 0 : index
    %118 = vector.load %arg7[%c0_84, %c0_85] : memref<4x1xf32, #tpu.memory_space<vmem>>, vector<4x1xf32>
    %119 = vector.broadcast %118 : vector<4x1xf32> to vector<4x32xf32>
    %120 = arith.addf %117, %119 : vector<4x32xf32>
    %cst_86 = arith.constant 0.000000e+00 : f32
    %121 = vector.broadcast %cst_86 : f32 to vector<4x32xf32>
    %122 = arith.maximumf %120, %121 : vector<4x32xf32>
    %c0_87 = arith.constant 0 : index
    %c0_88 = arith.constant 0 : index
    %123 = vector.load %arg8[%c0_87, %c0_88] : memref<4x32xf32, #tpu.memory_space<vmem>>, vector<4x32xf32>
    tpu.vector_store %arg8[%c0_87, %c0_88], %122 {strides = array<i32>} : memref<4x32xf32, #tpu.memory_space<vmem>>, vector<4x32xf32>,
    return
  }
}

module attributes {stable_mosaic.version = 11 : i64} {
  func.func @kernel(%arg0: memref<4x2xf32, #tpu.memory_space<vmem>>, %arg1: memref<4x2xf32, #tpu.memory_space<vmem>>, %arg2: memref<9x2xf32, #tpu.memory_space<vmem>>, %arg3: memref<4x8xbf16, #tpu.memory_space<vmem>>, %arg4: memref<4x1xf32, #tpu.memory_space<vmem>>, %arg5: memref<4x1xf32, #tpu.memory_space<vmem>>, %arg6: memref<4x1xf32, #tpu.memory_space<vmem>>, %arg7: memref<4x2xf32, #tpu.memory_space<vmem>>, %arg8: memref<8x2xf32, #tpu.memory_space<vmem>>) attributes {dimension_semantics = [], scalar_prefetch = 0 : i64, scratch_operands = 1 : i64, tpu.core_type = #tpu.core_type<tc>} {
    %cst = arith.constant 0.000000e+00 : f32
    %0 = vector.broadcast %cst : f32 to vector<8x2xf32>
    %c0 = arith.constant 0 : index
    %c0_0 = arith.constant 0 : index
    %1 = vector.load %arg8[%c0, %c0_0] : memref<8x2xf32, #tpu.memory_space<vmem>>, vector<8x2xf32>
    tpu.vector_store %arg8[%c0, %c0_0], %0 {strides = array<i32>} : memref<8x2xf32, #tpu.memory_space<vmem>>, vector<8x2xf32>,
    %c0_1 = arith.constant 0 : index
    %c0_2 = arith.constant 0 : index
    %2 = vector.load %arg0[%c0_1, %c0_2] : memref<4x2xf32, #tpu.memory_space<vmem>>, vector<4x2xf32>
    %c0_3 = arith.constant 0 : index
    %c0_4 = arith.constant 0 : index
    %3 = vector.load %arg8[%c0_3, %c0_4] : memref<8x2xf32, #tpu.memory_space<vmem>>, vector<4x2xf32>
    tpu.vector_store %arg8[%c0_3, %c0_4], %2 {strides = array<i32>} : memref<8x2xf32, #tpu.memory_space<vmem>>, vector<4x2xf32>,
    %c0_5 = arith.constant 0 : index
    %c0_6 = arith.constant 0 : index
    %4 = vector.load %arg1[%c0_5, %c0_6] : memref<4x2xf32, #tpu.memory_space<vmem>>, vector<4x2xf32>
    %c4 = arith.constant 4 : index
    %c0_7 = arith.constant 0 : index
    %5 = vector.load %arg8[%c4, %c0_7] : memref<8x2xf32, #tpu.memory_space<vmem>>, vector<4x2xf32>
    tpu.vector_store %arg8[%c4, %c0_7], %4 {strides = array<i32>} : memref<8x2xf32, #tpu.memory_space<vmem>>, vector<4x2xf32>,
    %c0_8 = arith.constant 0 : index
    %c0_9 = arith.constant 0 : index
    %6 = vector.load %arg3[%c0_8, %c0_9] : memref<4x8xbf16, #tpu.memory_space<vmem>>, vector<4x8xbf16>
    %c0_10 = arith.constant 0 : index
    %c0_11 = arith.constant 0 : index
    %7 = vector.load %arg8[%c0_10, %c0_11] : memref<8x2xf32, #tpu.memory_space<vmem>>, vector<8x2xf32>
    %8 = arith.truncf %7 : vector<8x2xf32> to vector<8x2xbf16>
    %cst_12 = arith.constant dense<0.000000e+00> : vector<4x2xf32>
    %9 = tpu.matmul %6, %8, %cst_12 {dimension_numbers = #tpu.dot_dimension_numbers<[1], [0], [0], [1], [0, 0, 1, 1], [], []>} : vector<4x8xbf16>, vector<8x2xbf16>, vector<4x2xf32> -> vector<4x2xf32>
    %c0_13 = arith.constant 0 : index
    %c0_14 = arith.constant 0 : index
    %10 = vector.load %arg4[%c0_13, %c0_14] : memref<4x1xf32, #tpu.memory_space<vmem>>, vector<4x1xf32>
    %11 = vector.broadcast %10 : vector<4x1xf32> to vector<4x2xf32>
    %12 = arith.addf %9, %11 : vector<4x2xf32>
    %cst_15 = arith.constant dense<0.000000e+00> : vector<4xf32>
    %13 = vector.multi_reduction <add>, %12, %cst_15 [1] : vector<4x2xf32> to vector<4xf32>
    %14 = vector.shape_cast %13 : vector<4xf32> to vector<4x1xf32>
    %cst_16 = arith.constant 5.000000e-01 : f32
    %15 = vector.broadcast %cst_16 : f32 to vector<4x1xf32>
    %16 = arith.mulf %14, %15 : vector<4x1xf32>
    %17 = arith.mulf %12, %12 : vector<4x2xf32>
    %cst_17 = arith.constant dense<0.000000e+00> : vector<4xf32>
    %18 = vector.multi_reduction <add>, %17, %cst_17 [1] : vector<4x2xf32> to vector<4xf32>
    %19 = vector.shape_cast %18 : vector<4xf32> to vector<4x1xf32>
    %cst_18 = arith.constant 5.000000e-01 : f32
    %20 = vector.broadcast %cst_18 : f32 to vector<4x1xf32>
    %21 = arith.mulf %19, %20 : vector<4x1xf32>
    %22 = arith.mulf %16, %16 : vector<4x1xf32>
    %23 = arith.subf %21, %22 : vector<4x1xf32>
    %cst_19 = arith.constant 0.000000e+00 : f32
    %24 = vector.broadcast %cst_19 : f32 to vector<4x1xf32>
    %25 = arith.maximumf %23, %24 : vector<4x1xf32>
    %26 = vector.broadcast %16 : vector<4x1xf32> to vector<4x2xf32>
    %27 = arith.subf %12, %26 : vector<4x2xf32>
    %cst_20 = arith.constant 9.99999974E-6 : f32
    %28 = vector.broadcast %cst_20 : f32 to vector<4x1xf32>
    %29 = arith.addf %25, %28 : vector<4x1xf32>
    %30 = math.rsqrt %29 : vector<4x1xf32>
    %31 = vector.broadcast %30 : vector<4x1xf32> to vector<4x2xf32>
    %32 = arith.mulf %27, %31 : vector<4x2xf32>
    %c0_21 = arith.constant 0 : index
    %c0_22 = arith.constant 0 : index
    %33 = vector.load %arg5[%c0_21, %c0_22] : memref<4x1xf32, #tpu.memory_space<vmem>>, vector<4x1xf32>
    %34 = vector.broadcast %33 : vector<4x1xf32> to vector<4x2xf32>
    %35 = arith.mulf %32, %34 : vector<4x2xf32>
    %c0_23 = arith.constant 0 : index
    %c0_24 = arith.constant 0 : index
    %36 = vector.load %arg6[%c0_23, %c0_24] : memref<4x1xf32, #tpu.memory_space<vmem>>, vector<4x1xf32>
    %37 = vector.broadcast %36 : vector<4x1xf32> to vector<4x2xf32>
    %38 = arith.addf %35, %37 : vector<4x2xf32>
    %cst_25 = arith.constant 0.000000e+00 : f32
    %39 = vector.broadcast %cst_25 : f32 to vector<4x2xf32>
    %40 = arith.maximumf %38, %39 : vector<4x2xf32>
    %c0_26 = arith.constant 0 : index
    %c0_27 = arith.constant 0 : index
    %41 = vector.load %arg7[%c0_26, %c0_27] : memref<4x2xf32, #tpu.memory_space<vmem>>, vector<4x2xf32>
    tpu.vector_store %arg7[%c0_26, %c0_27], %40 {strides = array<i32>} : memref<4x2xf32, #tpu.memory_space<vmem>>, vector<4x2xf32>,
    return
  }
}

module attributes {stable_mosaic.version = 11 : i64} {
  func.func @kernel(%arg0: memref<4x128xf32, #tpu.memory_space<vmem>>, %arg1: memref<4x512xf32, #tpu.memory_space<vmem>>, %arg2: memref<128x512xf32, #tpu.memory_space<vmem>>, %arg3: memref<9x512xf32, #tpu.memory_space<vmem>>, %arg4: memref<3x72xbf16, #tpu.memory_space<vmem>>, %arg5: memref<3x1xf32, #tpu.memory_space<vmem>>, %arg6: memref<3x1xf32, #tpu.memory_space<vmem>>, %arg7: memref<3x1xf32, #tpu.memory_space<vmem>>, %arg8: memref<3x512xf32, #tpu.memory_space<vmem>>, %arg9: memref<3x512xf32, #tpu.memory_space<vmem>>, %arg10: memref<72x512xf32, #tpu.memory_space<vmem>>) attributes {dimension_semantics = [], scalar_prefetch = 0 : i64, scratch_operands = 1 : i64, tpu.core_type = #tpu.core_type<tc>} {
    %c0 = arith.constant 0 : index
    %c0_0 = arith.constant 0 : index
    %0 = vector.load %arg0[%c0, %c0_0] : memref<4x128xf32, #tpu.memory_space<vmem>>, vector<4x128xf32>
    %c0_1 = arith.constant 0 : index
    %c0_2 = arith.constant 0 : index
    %1 = vector.load %arg2[%c0_1, %c0_2] : memref<128x512xf32, #tpu.memory_space<vmem>>, vector<128x512xf32>
    %cst = arith.constant dense<0.000000e+00> : vector<4x512xf32>
    %2 = tpu.matmul %0, %1, %cst {dimension_numbers = #tpu.dot_dimension_numbers<[1], [0], [0], [1], [0, 0, 1, 1], [], []>} : vector<4x128xf32>, vector<128x512xf32>, vector<4x512xf32> -> vector<4x512xf32>
    %cst_3 = arith.constant 0.000000e+00 : f32
    %3 = vector.broadcast %cst_3 : f32 to vector<72x512xf32>
    %c0_4 = arith.constant 0 : index
    %c0_5 = arith.constant 0 : index
    %4 = vector.load %arg10[%c0_4, %c0_5] : memref<72x512xf32, #tpu.memory_space<vmem>>, vector<72x512xf32>
    tpu.vector_store %arg10[%c0_4, %c0_5], %3 {strides = array<i32>} : memref<72x512xf32, #tpu.memory_space<vmem>>, vector<72x512xf32>,
    %5 = vector.extract_strided_slice %2 {offsets = [0, 0], sizes = [4, 495], strides = [1, 1]} : vector<4x512xf32> to vector<4x495xf32>
    %c0_6 = arith.constant 0 : index
    %c17 = arith.constant 17 : index
    %6 = vector.load %arg3[%c0_6, %c17] : memref<9x512xf32, #tpu.memory_space<vmem>>, vector<1x495xf32>
    %7 = vector.broadcast %6 : vector<1x495xf32> to vector<4x495xf32>
    %8 = arith.mulf %5, %7 : vector<4x495xf32>
    %c0_7 = arith.constant 0 : index
    %c17_8 = arith.constant 17 : index
    %9 = vector.load %arg10[%c0_7, %c17_8] : memref<72x512xf32, #tpu.memory_space<vmem>>, vector<4x495xf32>
    tpu.vector_store %arg10[%c0_7, %c17_8], %8 {strides = array<i32>} : memref<72x512xf32, #tpu.memory_space<vmem>>, vector<4x495xf32>,
    %c0_9 = arith.constant 0 : index
    %c0_10 = arith.constant 0 : index
    %10 = vector.load %arg1[%c0_9, %c0_10] : memref<4x512xf32, #tpu.memory_space<vmem>>, vector<4x495xf32>
    %c0_11 = arith.constant 0 : index
    %c17_12 = arith.constant 17 : index
    %11 = vector.load %arg3[%c0_11, %c17_12] : memref<9x512xf32, #tpu.memory_space<vmem>>, vector<1x495xf32>
    %12 = vector.broadcast %11 : vector<1x495xf32> to vector<4x495xf32>
    %13 = arith.mulf %10, %12 : vector<4x495xf32>
    %c4 = arith.constant 4 : index
    %c17_13 = arith.constant 17 : index
    %14 = vector.load %arg10[%c4, %c17_13] : memref<72x512xf32, #tpu.memory_space<vmem>>, vector<4x495xf32>
    tpu.vector_store %arg10[%c4, %c17_13], %13 {strides = array<i32>} : memref<72x512xf32, #tpu.memory_space<vmem>>, vector<4x495xf32>,
    %15 = vector.extract_strided_slice %2 {offsets = [0, 0], sizes = [4, 496], strides = [1, 1]} : vector<4x512xf32> to vector<4x496xf32>
    %c1 = arith.constant 1 : index
    %c16 = arith.constant 16 : index
    %16 = vector.load %arg3[%c1, %c16] : memref<9x512xf32, #tpu.memory_space<vmem>>, vector<1x496xf32>
    %17 = vector.broadcast %16 : vector<1x496xf32> to vector<4x496xf32>
    %18 = arith.mulf %15, %17 : vector<4x496xf32>
    %c8 = arith.constant 8 : index
    %c16_14 = arith.constant 16 : index
    %19 = vector.load %arg10[%c8, %c16_14] : memref<72x512xf32, #tpu.memory_space<vmem>>, vector<4x496xf32>
    tpu.vector_store %arg10[%c8, %c16_14], %18 {strides = array<i32>} : memref<72x512xf32, #tpu.memory_space<vmem>>, vector<4x496xf32>,
    %c0_15 = arith.constant 0 : index
    %c0_16 = arith.constant 0 : index
    %20 = vector.load %arg1[%c0_15, %c0_16] : memref<4x512xf32, #tpu.memory_space<vmem>>, vector<4x496xf32>
    %c1_17 = arith.constant 1 : index
    %c16_18 = arith.constant 16 : index
    %21 = vector.load %arg3[%c1_17, %c16_18] : memref<9x512xf32, #tpu.memory_space<vmem>>, vector<1x496xf32>
    %22 = vector.broadcast %21 : vector<1x496xf32> to vector<4x496xf32>
    %23 = arith.mulf %20, %22 : vector<4x496xf32>
    %c12 = arith.constant 12 : index
    %c16_19 = arith.constant 16 : index
    %24 = vector.load %arg10[%c12, %c16_19] : memref<72x512xf32, #tpu.memory_space<vmem>>, vector<4x496xf32>
    tpu.vector_store %arg10[%c12, %c16_19], %23 {strides = array<i32>} : memref<72x512xf32, #tpu.memory_space<vmem>>, vector<4x496xf32>,
    %25 = vector.extract_strided_slice %2 {offsets = [0, 0], sizes = [4, 497], strides = [1, 1]} : vector<4x512xf32> to vector<4x497xf32>
    %c2 = arith.constant 2 : index
    %c15 = arith.constant 15 : index
    %26 = vector.load %arg3[%c2, %c15] : memref<9x512xf32, #tpu.memory_space<vmem>>, vector<1x497xf32>
    %27 = vector.broadcast %26 : vector<1x497xf32> to vector<4x497xf32>
    %28 = arith.mulf %25, %27 : vector<4x497xf32>
    %c16_20 = arith.constant 16 : index
    %c15_21 = arith.constant 15 : index
    %29 = vector.load %arg10[%c16_20, %c15_21] : memref<72x512xf32, #tpu.memory_space<vmem>>, vector<4x497xf32>
    tpu.vector_store %arg10[%c16_20, %c15_21], %28 {strides = array<i32>} : memref<72x512xf32, #tpu.memory_space<vmem>>, vector<4x497xf32>,
    %c0_22 = arith.constant 0 : index
    %c0_23 = arith.constant 0 : index
    %30 = vector.load %arg1[%c0_22, %c0_23] : memref<4x512xf32, #tpu.memory_space<vmem>>, vector<4x497xf32>
    %c2_24 = arith.constant 2 : index
    %c15_25 = arith.constant 15 : index
    %31 = vector.load %arg3[%c2_24, %c15_25] : memref<9x512xf32, #tpu.memory_space<vmem>>, vector<1x497xf32>
    %32 = vector.broadcast %31 : vector<1x497xf32> to vector<4x497xf32>
    %33 = arith.mulf %30, %32 : vector<4x497xf32>
    %c20 = arith.constant 20 : index
    %c15_26 = arith.constant 15 : index
    %34 = vector.load %arg10[%c20, %c15_26] : memref<72x512xf32, #tpu.memory_space<vmem>>, vector<4x497xf32>
    tpu.vector_store %arg10[%c20, %c15_26], %33 {strides = array<i32>} : memref<72x512xf32, #tpu.memory_space<vmem>>, vector<4x497xf32>,
    %35 = vector.extract_strided_slice %2 {offsets = [0, 0], sizes = [4, 511], strides = [1, 1]} : vector<4x512xf32> to vector<4x511xf32>
    %c3 = arith.constant 3 : index
    %c1_27 = arith.constant 1 : index
    %36 = vector.load %arg3[%c3, %c1_27] : memref<9x512xf32, #tpu.memory_space<vmem>>, vector<1x511xf32>
    %37 = vector.broadcast %36 : vector<1x511xf32> to vector<4x511xf32>
    %38 = arith.mulf %35, %37 : vector<4x511xf32>
    %c24 = arith.constant 24 : index
    %c1_28 = arith.constant 1 : index
    %39 = vector.load %arg10[%c24, %c1_28] : memref<72x512xf32, #tpu.memory_space<vmem>>, vector<4x511xf32>
    tpu.vector_store %arg10[%c24, %c1_28], %38 {strides = array<i32>} : memref<72x512xf32, #tpu.memory_space<vmem>>, vector<4x511xf32>,
    %c0_29 = arith.constant 0 : index
    %c0_30 = arith.constant 0 : index
    %40 = vector.load %arg1[%c0_29, %c0_30] : memref<4x512xf32, #tpu.memory_space<vmem>>, vector<4x511xf32>
    %c3_31 = arith.constant 3 : index
    %c1_32 = arith.constant 1 : index
    %41 = vector.load %arg3[%c3_31, %c1_32] : memref<9x512xf32, #tpu.memory_space<vmem>>, vector<1x511xf32>
    %42 = vector.broadcast %41 : vector<1x511xf32> to vector<4x511xf32>
    %43 = arith.mulf %40, %42 : vector<4x511xf32>
    %c28 = arith.constant 28 : index
    %c1_33 = arith.constant 1 : index
    %44 = vector.load %arg10[%c28, %c1_33] : memref<72x512xf32, #tpu.memory_space<vmem>>, vector<4x511xf32>
    tpu.vector_store %arg10[%c28, %c1_33], %43 {strides = array<i32>} : memref<72x512xf32, #tpu.memory_space<vmem>>, vector<4x511xf32>,
    %c32 = arith.constant 32 : index
    %c0_34 = arith.constant 0 : index
    %45 = vector.load %arg10[%c32, %c0_34] : memref<72x512xf32, #tpu.memory_space<vmem>>, vector<4x512xf32>
    tpu.vector_store %arg10[%c32, %c0_34], %2 {strides = array<i32>} : memref<72x512xf32, #tpu.memory_space<vmem>>, vector<4x512xf32>,
    %c0_35 = arith.constant 0 : index
    %c0_36 = arith.constant 0 : index
    %46 = vector.load %arg1[%c0_35, %c0_36] : memref<4x512xf32, #tpu.memory_space<vmem>>, vector<4x512xf32>
    %c36 = arith.constant 36 : index
    %c0_37 = arith.constant 0 : index
    %47 = vector.load %arg10[%c36, %c0_37] : memref<72x512xf32, #tpu.memory_space<vmem>>, vector<4x512xf32>
    tpu.vector_store %arg10[%c36, %c0_37], %46 {strides = array<i32>} : memref<72x512xf32, #tpu.memory_space<vmem>>, vector<4x512xf32>,
    %48 = vector.extract_strided_slice %2 {offsets = [0, 1], sizes = [4, 511], strides = [1, 1]} : vector<4x512xf32> to vector<4x511xf32>
    %c5 = arith.constant 5 : index
    %c0_38 = arith.constant 0 : index
    %49 = vector.load %arg3[%c5, %c0_38] : memref<9x512xf32, #tpu.memory_space<vmem>>, vector<1x511xf32>
    %50 = vector.broadcast %49 : vector<1x511xf32> to vector<4x511xf32>
    %51 = arith.mulf %48, %50 : vector<4x511xf32>
    %c40 = arith.constant 40 : index
    %c0_39 = arith.constant 0 : index
    %52 = vector.load %arg10[%c40, %c0_39] : memref<72x512xf32, #tpu.memory_space<vmem>>, vector<4x511xf32>
    tpu.vector_store %arg10[%c40, %c0_39], %51 {strides = array<i32>} : memref<72x512xf32, #tpu.memory_space<vmem>>, vector<4x511xf32>,
    %c0_40 = arith.constant 0 : index
    %c1_41 = arith.constant 1 : index
    %53 = vector.load %arg1[%c0_40, %c1_41] : memref<4x512xf32, #tpu.memory_space<vmem>>, vector<4x511xf32>
    %c5_42 = arith.constant 5 : index
    %c0_43 = arith.constant 0 : index
    %54 = vector.load %arg3[%c5_42, %c0_43] : memref<9x512xf32, #tpu.memory_space<vmem>>, vector<1x511xf32>
    %55 = vector.broadcast %54 : vector<1x511xf32> to vector<4x511xf32>
    %56 = arith.mulf %53, %55 : vector<4x511xf32>
    %c44 = arith.constant 44 : index
    %c0_44 = arith.constant 0 : index
    %57 = vector.load %arg10[%c44, %c0_44] : memref<72x512xf32, #tpu.memory_space<vmem>>, vector<4x511xf32>
    tpu.vector_store %arg10[%c44, %c0_44], %56 {strides = array<i32>} : memref<72x512xf32, #tpu.memory_space<vmem>>, vector<4x511xf32>,
    %58 = vector.extract_strided_slice %2 {offsets = [0, 15], sizes = [4, 497], strides = [1, 1]} : vector<4x512xf32> to vector<4x497xf32>
    %c6 = arith.constant 6 : index
    %c0_45 = arith.constant 0 : index
    %59 = vector.load %arg3[%c6, %c0_45] : memref<9x512xf32, #tpu.memory_space<vmem>>, vector<1x497xf32>
    %60 = vector.broadcast %59 : vector<1x497xf32> to vector<4x497xf32>
    %61 = arith.mulf %58, %60 : vector<4x497xf32>
    %c48 = arith.constant 48 : index
    %c0_46 = arith.constant 0 : index
    %62 = vector.load %arg10[%c48, %c0_46] : memref<72x512xf32, #tpu.memory_space<vmem>>, vector<4x497xf32>
    tpu.vector_store %arg10[%c48, %c0_46], %61 {strides = array<i32>} : memref<72x512xf32, #tpu.memory_space<vmem>>, vector<4x497xf32>,
    %c0_47 = arith.constant 0 : index
    %c15_48 = arith.constant 15 : index
    %63 = vector.load %arg1[%c0_47, %c15_48] : memref<4x512xf32, #tpu.memory_space<vmem>>, vector<4x497xf32>
    %c6_49 = arith.constant 6 : index
    %c0_50 = arith.constant 0 : index
    %64 = vector.load %arg3[%c6_49, %c0_50] : memref<9x512xf32, #tpu.memory_space<vmem>>, vector<1x497xf32>
    %65 = vector.broadcast %64 : vector<1x497xf32> to vector<4x497xf32>
    %66 = arith.mulf %63, %65 : vector<4x497xf32>
    %c52 = arith.constant 52 : index
    %c0_51 = arith.constant 0 : index
    %67 = vector.load %arg10[%c52, %c0_51] : memref<72x512xf32, #tpu.memory_space<vmem>>, vector<4x497xf32>
    tpu.vector_store %arg10[%c52, %c0_51], %66 {strides = array<i32>} : memref<72x512xf32, #tpu.memory_space<vmem>>, vector<4x497xf32>,
    %68 = vector.extract_strided_slice %2 {offsets = [0, 16], sizes = [4, 496], strides = [1, 1]} : vector<4x512xf32> to vector<4x496xf32>
    %c7 = arith.constant 7 : index
    %c0_52 = arith.constant 0 : index
    %69 = vector.load %arg3[%c7, %c0_52] : memref<9x512xf32, #tpu.memory_space<vmem>>, vector<1x496xf32>
    %70 = vector.broadcast %69 : vector<1x496xf32> to vector<4x496xf32>
    %71 = arith.mulf %68, %70 : vector<4x496xf32>
    %c56 = arith.constant 56 : index
    %c0_53 = arith.constant 0 : index
    %72 = vector.load %arg10[%c56, %c0_53] : memref<72x512xf32, #tpu.memory_space<vmem>>, vector<4x496xf32>
    tpu.vector_store %arg10[%c56, %c0_53], %71 {strides = array<i32>} : memref<72x512xf32, #tpu.memory_space<vmem>>, vector<4x496xf32>,
    %c0_54 = arith.constant 0 : index
    %c16_55 = arith.constant 16 : index
    %73 = vector.load %arg1[%c0_54, %c16_55] : memref<4x512xf32, #tpu.memory_space<vmem>>, vector<4x496xf32>
    %c7_56 = arith.constant 7 : index
    %c0_57 = arith.constant 0 : index
    %74 = vector.load %arg3[%c7_56, %c0_57] : memref<9x512xf32, #tpu.memory_space<vmem>>, vector<1x496xf32>
    %75 = vector.broadcast %74 : vector<1x496xf32> to vector<4x496xf32>
    %76 = arith.mulf %73, %75 : vector<4x496xf32>
    %c60 = arith.constant 60 : index
    %c0_58 = arith.constant 0 : index
    %77 = vector.load %arg10[%c60, %c0_58] : memref<72x512xf32, #tpu.memory_space<vmem>>, vector<4x496xf32>
    tpu.vector_store %arg10[%c60, %c0_58], %76 {strides = array<i32>} : memref<72x512xf32, #tpu.memory_space<vmem>>, vector<4x496xf32>,
    %78 = vector.extract_strided_slice %2 {offsets = [0, 17], sizes = [4, 495], strides = [1, 1]} : vector<4x512xf32> to vector<4x495xf32>
    %c8_59 = arith.constant 8 : index
    %c0_60 = arith.constant 0 : index
    %79 = vector.load %arg3[%c8_59, %c0_60] : memref<9x512xf32, #tpu.memory_space<vmem>>, vector<1x495xf32>
    %80 = vector.broadcast %79 : vector<1x495xf32> to vector<4x495xf32>
    %81 = arith.mulf %78, %80 : vector<4x495xf32>
    %c64 = arith.constant 64 : index
    %c0_61 = arith.constant 0 : index
    %82 = vector.load %arg10[%c64, %c0_61] : memref<72x512xf32, #tpu.memory_space<vmem>>, vector<4x495xf32>
    tpu.vector_store %arg10[%c64, %c0_61], %81 {strides = array<i32>} : memref<72x512xf32, #tpu.memory_space<vmem>>, vector<4x495xf32>,
    %c0_62 = arith.constant 0 : index
    %c17_63 = arith.constant 17 : index
    %83 = vector.load %arg1[%c0_62, %c17_63] : memref<4x512xf32, #tpu.memory_space<vmem>>, vector<4x495xf32>
    %c8_64 = arith.constant 8 : index
    %c0_65 = arith.constant 0 : index
    %84 = vector.load %arg3[%c8_64, %c0_65] : memref<9x512xf32, #tpu.memory_space<vmem>>, vector<1x495xf32>
    %85 = vector.broadcast %84 : vector<1x495xf32> to vector<4x495xf32>
    %86 = arith.mulf %83, %85 : vector<4x495xf32>
    %c68 = arith.constant 68 : index
    %c0_66 = arith.constant 0 : index
    %87 = vector.load %arg10[%c68, %c0_66] : memref<72x512xf32, #tpu.memory_space<vmem>>, vector<4x495xf32>
    tpu.vector_store %arg10[%c68, %c0_66], %86 {strides = array<i32>} : memref<72x512xf32, #tpu.memory_space<vmem>>, vector<4x495xf32>,
    %c0_67 = arith.constant 0 : index
    %c0_68 = arith.constant 0 : index
    %88 = vector.load %arg4[%c0_67, %c0_68] : memref<3x72xbf16, #tpu.memory_space<vmem>>, vector<3x72xbf16>
    %c0_69 = arith.constant 0 : index
    %c0_70 = arith.constant 0 : index
    %89 = vector.load %arg10[%c0_69, %c0_70] : memref<72x512xf32, #tpu.memory_space<vmem>>, vector<72x512xf32>
    %90 = arith.truncf %89 : vector<72x512xf32> to vector<72x512xbf16>
    %cst_71 = arith.constant dense<0.000000e+00> : vector<3x512xf32>
    %91 = tpu.matmul %88, %90, %cst_71 {dimension_numbers = #tpu.dot_dimension_numbers<[1], [0], [0], [1], [0, 0, 1, 1], [], []>} : vector<3x72xbf16>, vector<72x512xbf16>, vector<3x512xf32> -> vector<3x512xf32>
    %c0_72 = arith.constant 0 : index
    %c0_73 = arith.constant 0 : index
    %92 = vector.load %arg5[%c0_72, %c0_73] : memref<3x1xf32, #tpu.memory_space<vmem>>, vector<3x1xf32>
    %93 = vector.broadcast %92 : vector<3x1xf32> to vector<3x512xf32>
    %94 = arith.addf %91, %93 : vector<3x512xf32>
    %cst_74 = arith.constant dense<0.000000e+00> : vector<3xf32>
    %95 = vector.multi_reduction <add>, %94, %cst_74 [1] : vector<3x512xf32> to vector<3xf32>
    %96 = vector.shape_cast %95 : vector<3xf32> to vector<3x1xf32>
    %cst_75 = arith.constant 0.001953125 : f32
    %97 = vector.broadcast %cst_75 : f32 to vector<3x1xf32>
    %98 = arith.mulf %96, %97 : vector<3x1xf32>
    %99 = arith.mulf %94, %94 : vector<3x512xf32>
    %cst_76 = arith.constant dense<0.000000e+00> : vector<3xf32>
    %100 = vector.multi_reduction <add>, %99, %cst_76 [1] : vector<3x512xf32> to vector<3xf32>
    %101 = vector.shape_cast %100 : vector<3xf32> to vector<3x1xf32>
    %cst_77 = arith.constant 0.001953125 : f32
    %102 = vector.broadcast %cst_77 : f32 to vector<3x1xf32>
    %103 = arith.mulf %101, %102 : vector<3x1xf32>
    %104 = arith.mulf %98, %98 : vector<3x1xf32>
    %105 = arith.subf %103, %104 : vector<3x1xf32>
    %cst_78 = arith.constant 0.000000e+00 : f32
    %106 = vector.broadcast %cst_78 : f32 to vector<3x1xf32>
    %107 = arith.maximumf %105, %106 : vector<3x1xf32>
    %108 = vector.broadcast %98 : vector<3x1xf32> to vector<3x512xf32>
    %109 = arith.subf %94, %108 : vector<3x512xf32>
    %cst_79 = arith.constant 9.99999974E-6 : f32
    %110 = vector.broadcast %cst_79 : f32 to vector<3x1xf32>
    %111 = arith.addf %107, %110 : vector<3x1xf32>
    %112 = math.rsqrt %111 : vector<3x1xf32>
    %113 = vector.broadcast %112 : vector<3x1xf32> to vector<3x512xf32>
    %114 = arith.mulf %109, %113 : vector<3x512xf32>
    %c0_80 = arith.constant 0 : index
    %c0_81 = arith.constant 0 : index
    %115 = vector.load %arg6[%c0_80, %c0_81] : memref<3x1xf32, #tpu.memory_space<vmem>>, vector<3x1xf32>
    %116 = vector.broadcast %115 : vector<3x1xf32> to vector<3x512xf32>
    %117 = arith.mulf %114, %116 : vector<3x512xf32>
    %c0_82 = arith.constant 0 : index
    %c0_83 = arith.constant 0 : index
    %118 = vector.load %arg7[%c0_82, %c0_83] : memref<3x1xf32, #tpu.memory_space<vmem>>, vector<3x1xf32>
    %119 = vector.broadcast %118 : vector<3x1xf32> to vector<3x512xf32>
    %120 = arith.addf %117, %119 : vector<3x512xf32>
    %cst_84 = arith.constant 0.000000e+00 : f32
    %121 = vector.broadcast %cst_84 : f32 to vector<3x512xf32>
    %122 = arith.maximumf %120, %121 : vector<3x512xf32>
    %c0_85 = arith.constant 0 : index
    %c0_86 = arith.constant 0 : index
    %123 = vector.load %arg8[%c0_85, %c0_86] : memref<3x512xf32, #tpu.memory_space<vmem>>, vector<3x512xf32>
    %124 = arith.addf %122, %123 : vector<3x512xf32>
    %c0_87 = arith.constant 0 : index
    %c0_88 = arith.constant 0 : index
    %125 = vector.load %arg9[%c0_87, %c0_88] : memref<3x512xf32, #tpu.memory_space<vmem>>, vector<3x512xf32>
    tpu.vector_store %arg9[%c0_87, %c0_88], %124 {strides = array<i32>} : memref<3x512xf32, #tpu.memory_space<vmem>>, vector<3x512xf32>,
    return
  }
}

</mosaic_0001>

<bundles_post_ra>
// kernel: rsu6_forward.13
= control target key start
LH: loop header
LB: loop body
LE: loop exit
PB: predicated region body
PF: predicated region fallthrough
CT: control target
= control target key end

     0   :  { %vm50_vm0 = vcmask 1043456   ;;  %s756_s27 = smov 112   ;;  %s757_s28 = smov 111   ;;  %vm60_vm1 = vcmask 908288   ;;  %vm117_vm2 = vcmask 916480   ;;  %vm178_vm3 = vcmask 924672   ;;  %s1068_s1 = inlined_call_operand.vmem [shape: f32[9,512], index: 1, kind: input, shape index: {}]   ;;  %s1069_s0 = inlined_call_operand.vmem [shape: f32[3,512], index: 0, kind: input, shape index: {}]   ;;  %s1070_s3 = inlined_call_operand.vmem [shape: f32[4,1], index: 3, kind: input, shape index: {}]   ;;  %s1071_s4 = inlined_call_operand.vmem [shape: f32[4,1], index: 4, kind: input, shape index: {}]   ;;  %s1072_s5 = inlined_call_operand.vmem [shape: f32[4,1], index: 5, kind: input, shape index: {}]   ;;  %s1073_s2 = inlined_call_operand.vmem [shape: bf16[4,27], index: 2, kind: input, shape index: {}]   ;;  %s1074_s6 = inlined_call_operand.vmem [shape: f32[4,512], index: 6, kind: output, shape index: {}]  }
   0x1   :  { %v731_v0 = vld [vmem:[%s1068_s1 + $0x1] ss:$8 sm:$0xf]  ;;  %v42_v1 = vld [vmem:[%s1068_s1] ss:$8 sm:$0xf] }
   0x2   :  { %v104_v2 = vperm.slane %v731_v0, 2  ;;  %v105_v3 = vperm.slane %v731_v0, 3  ;;  %v46_v4 = vperm.slane %v42_v1, 2  ;;  %v47_v5 = vperm.slane %v42_v1, 3  ;;  %s758_s7 = smov 113   ;;  %s759_s12 = smov 127  }
   0x3   :  { %v103_v8 = vperm.slane %v731_v0, 1  ;;  %v45_v9 = vperm.slane %v42_v1, 1  ;;  %v732_v12 = vld [vmem:[%s1068_s1 + $0x2] ss:$8 sm:$0xf]  ;;  %v102_v13 = vperm.slane %v731_v0, 0 }
   0x4   :  { %v107_v6 = vrot.slane %v105_v3, 4  ;;  %v49_v7 = vrot.slane %v47_v5, 4  ;;  %v44_v14 = vperm.slane %v42_v1, 0  ;;  %v733_v15 = vld [vmem:[%s1068_s1 + $0x3] ss:$8 sm:$0xf] }
   0x5   :  { %v106_v16 = vrot.slane %v103_v8, 4  ;;  %v48_v17 = vrot.slane %v45_v9, 4  ;;  %v165_v18 = vperm.slane %v732_v12, 2  ;;  %v166_v19 = vperm.slane %v732_v12, 3  ;;  %s760_s15 = smov 1   ;;  %s761_s16 = smov 15  }
   0x6   :  { %v109_v10 = vsel %vm50_vm0, %v104_v2, %v107_v6  ;;  %v52_v11 = vsel %vm50_vm0, %v46_v4, %v49_v7  ;;  %v164_v21 = vperm.slane %v732_v12, 1  ;;  %v232_v22 = vperm.slane %v733_v15, 3  ;;  %v734_v33 = vld [vmem:[%s1068_s1 + $0x5] ss:$8 sm:$0xf]  ;;  %s762_s19 = smov 16  }
   0x7   :  { %112 = vrot.lane.b32.xlu1 %v109_v10, %s756_s27  ;;  %55 = vrot.lane.b32.xlu0 %v52_v11, %s757_s28  ;;  %v168_v20 = vrot.slane %v166_v19, 4  ;;  %v108_v23 = vsel %vm50_vm0, %v102_v13, %v106_v16  ;;  %v51_v24 = vsel %vm50_vm0, %v44_v14, %v48_v17  ;;  %v230_v25 = vperm.slane %v733_v15, 1  ;;  %v735_v34 = vld [vmem:[%s1068_s1 + $0x6] ss:$8 sm:$0xf] }
   0x8   :  { %v163_v27 = vperm.slane %v732_v12, 0  ;;  %v167_v28 = vrot.slane %v164_v21, 4  ;;  %v231_v29 = vperm.slane %v733_v15, 2  ;;  %v234_v30 = vrot.slane %v232_v22, 4  ;;  %v41_v10 = vld [vmem:[%s1069_s0 + $0x8] sm:$0x77] }
   0x9   :  { %v170_v26 = vsel %vm50_vm0, %v165_v18, %v168_v20  ;;  %v229_v31 = vperm.slane %v733_v15, 0  ;;  %v233_v32 = vrot.slane %v230_v25, 4  ;;  %v311_v36 = vperm.slane %v734_v33, 1  ;;  %v736_v47 = vld [vmem:[%s1068_s1 + $0x7] ss:$8 sm:$0xf] }
   0xa   :  { %173 = vrot.lane.b32.xlu2 %v170_v26, %s758_s7  ;;  %v169_v35 = vsel %vm50_vm0, %v163_v27, %v167_v28  ;;  %v236_v37 = vsel %vm50_vm0, %v231_v29, %v234_v30  ;;  %v313_v39 = vperm.slane %v734_v33, 3  ;;  %v375_v40 = vperm.slane %v735_v34, 1  ;;  %v737_v60 = vld [vmem:[%s1068_s1 + $0x20] ss:$8 sm:$0xf]  ;;  %s763_s1 = smov 17  }
   0xb   :  { %v235_v38 = vsel %vm50_vm0, %v229_v31, %v233_v32  ;;  %v310_v41 = vperm.slane %v734_v33, 0  ;;  %v314_v42 = vrot.slane %v311_v36, 4  ;;  %v312_v43 = vperm.slane %v734_v33, 2  ;;  %v98_v18 = vld [vmem:[%s1069_s0 + $0x8] sm:$0x77] }
   0xc   :  { %v315_v44 = vrot.slane %v313_v39, 4  ;;  %v374_v45 = vperm.slane %v735_v34, 0  ;;  %v378_v46 = vrot.slane %v375_v40, 4  ;;  %v377_v49 = vperm.slane %v735_v34, 3  ;;  %v40_v21 = vld [vmem:[%s1069_s0] sm:$0x77] }
   0xd   :  { %v316_v48 = vsel %vm50_vm0, %v310_v41, %v314_v42  ;;  %v436_v52 = vperm.slane %v736_v47, 3  ;;  %v434_v53 = vperm.slane %v736_v47, 1  ;;  %v376_v54 = vperm.slane %v735_v34, 2  ;;  %v97_v34 = vld [vmem:[%s1069_s0] sm:$0x77] }
   0xe   :  { %v317_v50 = vsel %vm50_vm0, %v312_v43, %v315_v44  ;;  %v380_v51 = vsel %vm50_vm0, %v374_v45, %v378_v46  ;;  %v379_v55 = vrot.slane %v377_v49, 4  ;;  %v435_v56 = vperm.slane %v736_v47, 2  ;;  %v159_v36 = vld [vmem:[%s1069_s0 + $0x8] sm:$0x77] }
   0xf   :  { %110 = vrot.lane.b32.xlu1 %v108_v23, %s756_s27  ;;  %53 = vrot.lane.b32.xlu0 %v51_v24, %s757_s28  ;;  %v438_v57 = vrot.slane %v436_v52, 4  ;;  %v433_v58 = vperm.slane %v736_v47, 0  ;;  %v437_v59 = vrot.slane %v434_v53, 4  ;;  %v493_v62 = vperm.slane %v737_v60, 1 }
  0x10   :  { %v381_v61 = vsel %vm50_vm0, %v376_v54, %v379_v55  ;;  %v495_v1 = vperm.slane %v737_v60, 3  ;;  %v492_v2 = vperm.slane %v737_v60, 0  ;;  %v494_v4 = vperm.slane %v737_v60, 2 }
  0x11   :  { %v440_v63 = vsel %vm50_vm0, %v435_v56, %v438_v57  ;;  %v439_v0 = vsel %vm50_vm0, %v433_v58, %v437_v59  ;;  %v496_v3 = vrot.slane %v493_v62, 4  ;;  %v764_v32 = vmov 0.0  }
  0x12   :  { %171 = vrot.lane.b32.xlu2 %v169_v35, %s758_s7  ;;  %v497_v5 = vrot.slane %v495_v1, 4  ;;  %26 = vst [vmem:[#allocation2 + $0x10] sm:$0xff] %v764_v32  ;;  %vm244_vm4 = vcmask 1039360   ;;  %vm272_vm5 = vcmask 7168   ;;  %vm206_vm6 = vcmask 121856  }
  0x13   :  { %v498_v6 = vsel %vm50_vm0, %v492_v2, %v496_v3  ;;  %27 = vst [vmem:[#allocation2 + $0x18] sm:$0xff] %v764_v32  ;;  %vm145_vm7 = vcmask 130048   ;;  %vm84_vm8 = vcmask 138240   ;;  %vm362_vm9 = vcmask 1039367  }
  0x14   :  { %v499_v7 = vsel %vm50_vm0, %v494_v4, %v497_v5  ;;  %24 = vst [vmem:[#allocation2] sm:$0xff] %v764_v32  ;;  %vm367_vm10 = vcmask 1033216   ;;  %vm540_vm11 = vcmask 903168   ;;  %vm426_vm12 = vcmask 921602  }
  0x15   :  { %25 = vst [vmem:[#allocation2 + $0x8] sm:$0xff] %v764_v32  ;;  %vm92_vm13 = vcmask 1042568   ;;  %vm485_vm14 = vcmask 916485   ;;  %vm280_vm15 = vcmask 1043465  }
  0x16   :  { %28 = vst [vmem:[#allocation2 + $0x20] sm:$0xff] %v764_v32 }
  0x17   :  { %239 = vrot.lane.b32.xlu0 %v236_v37, %s759_s12  ;;  %237 = vrot.lane.b32.xlu1 %v235_v38, %s759_s12  ;;  %29 = vst [vmem:[#allocation2 + $0x28] sm:$0xff] %v764_v32 }
  0x18   :  { %30 = vst [vmem:[#allocation2 + $0x30] sm:$0xff] %v764_v32 }
  0x19   :  { %31 = vst [vmem:[#allocation2 + $0x38] sm:$0xff] %v764_v32 }
  0x1a   :  { %318 = vrot.lane.b32.xlu2 %v316_v48, %s760_s15  ;;  %v158_v48 = vld [vmem:[%s1069_s0] sm:$0x77]  ;;  %32 = vst [vmem:[#allocation2 + $0x40] sm:$0xff] %v764_v32 }
  0x1b   :  { %33 = vst [vmem:[#allocation2 + $0x48] sm:$0xff] %v764_v32 }
  0x1c   :  { %34 = vst [vmem:[#allocation2 + $0x50] sm:$0xff] %v764_v32 }
  0x1d   :  { %35 = vst [vmem:[#allocation2 + $0x58] sm:$0xff] %v764_v32 }
  0x1e   :  { %36 = vst [vmem:[#allocation2 + $0x60] sm:$0x7] %v764_v32 }
  0x1f   :  { %320 = vrot.lane.b32.xlu0 %v317_v50, %s760_s15  ;;  %382 = vrot.lane.b32.xlu1 %v380_v51, %s761_s16  ;;  %v225_v50 = vld [vmem:[%s1069_s0 + $0x8] sm:$0x77]  ;;  %37 = vst [vmem:[#allocation2 + $0x68] sm:$0x7] %v764_v32 }
  0x20   :  { %38 = vst [vmem:[#allocation2 + $0x70] sm:$0x7] %v764_v32 }
  0x21   :  { %39 = vst [vmem:[#allocation2 + $0x78] sm:$0x7] %v764_v32 }
  0x22   :  { %384 = vrot.lane.b32.xlu2 %v381_v61, %s761_s16 }
  0x27   :  { %443 = vrot.lane.b32.xlu1 %v440_v63, %s762_s19  ;;  %441 = vrot.lane.b32.xlu0 %v439_v0, %s762_s19  ;;  %v224_v0 = vld [vmem:[%s1069_s0] sm:$0x77] }
  0x2a   :  { %500 = vrot.lane.b32.xlu2 %v498_v6, %s763_s1 }
  0x2f   :  { %502 = vrot.lane.b32.xlu0 %v499_v7, %s763_s1  ;;  %v286_v7 = vld [vmem:[%s1069_s0 + $0x8] sm:$0x77] }
  0x64   :  { %v174_v15 = vpop.permute.xlu2 %173 }
  0x65   :  { %v176_v29 = vrot.slane %v174_v15, 4 }
  0x67   :  { %v180_v37 = vsel %vm178_vm3, %v174_v15, %v176_v29 }
  0x68   :  { %v184_v43 = vmul.f32 %v180_v37, %v159_v36 }
  0x6c   :  { %v172_v31 = vpop.permute.xlu2 %171 }
  0x6d   :  { %v175_v38 = vrot.slane %v172_v31, 4 }
  0x6f   :  { %v177_v46 = vsel %vm50_vm0, %v175_v38, %v176_v29 }
  0x70   :  { %v179_v49 = vsel %vm178_vm3, %v172_v31, %v177_v46 }
  0x71   :  { %v183_v53 = vmul.f32 %v179_v49, %v158_v48 }
  0x74   :  { %v319_v61 = vpop.permute.xlu2 %318 }
  0x75   :  { %v322_v3 = vrot.slane %v319_v61, 4 }
  0x79   :  { %v113_v8 = vpop.permute.xlu1 %112  ;;  %v56_v9 = vpop.permute.xlu0 %55 }
  0x7a   :  { %v58_v11 = vrot.slane %v56_v9, 4  ;;  %v115_v14 = vrot.slane %v113_v8, 4 }
  0x7c   :  { %v62_v12 = vsel %vm60_vm1, %v56_v9, %v58_v11  ;;  %v119_v19 = vsel %vm117_vm2, %v113_v8, %v115_v14 }
  0x7d   :  { %v66_v13 = vmul.f32 %v62_v12, %v41_v10  ;;  %v123_v24 = vmul.f32 %v119_v19, %v98_v18  ;;  %v385_v12 = vpop.permute.xlu2 %384  ;;  %v306_v19 = vld [vmem:[%s1069_s0 + $0x8] sm:$0x77] }
  0x7f   :  { %71 = vst [vmem:[#allocation1 + $0x10] ss:$2 sm:$0xff] %v66_v13 }
  0x81   :  { %v111_v16 = vpop.permute.xlu1 %110  ;;  %v54_v17 = vpop.permute.xlu0 %53 }
  0x82   :  { %v57_v20 = vrot.slane %v54_v17, 4  ;;  %v114_v22 = vrot.slane %v111_v16, 4 }
  0x84   :  { %v59_v23 = vsel %vm50_vm0, %v57_v20, %v58_v11  ;;  %v116_v30 = vsel %vm50_vm0, %v114_v22, %v115_v14 }
  0x85   :  { %v61_v25 = vsel %vm60_vm1, %v54_v17, %v59_v23  ;;  %v118_v35 = vsel %vm117_vm2, %v111_v16, %v116_v30  ;;  %v387_v17 = vrot.slane %v385_v12, 4 }
  0x86   :  { %v74_v26 = vld.sshfl [vmem:[#allocation1 + $0x10] sm:$0xff pattern:$0x75316420]  ;;  %v75_v27 = vld.sshfl [vmem:[#allocation1 + $0x18] sm:$0xff pattern:$0x75316420]  ;;  %v65_v28 = vmul.f32 %v61_v25, %v40_v21  ;;  %v122_v41 = vmul.f32 %v118_v35, %v97_v34  ;;  %v324_v34 = vsel %vm272_vm5, %v322_v3, %v319_v61 }
  0x87   :  { %128 = vst [vmem:[#allocation1 + $0x10] ss:$2 sm:$0xff] %v123_v24  ;;  %82 = vrot.lane.b32.xlu1 %v75_v27, %s763_s1  ;;  %80 = vrot.lane.b32.xlu0 %v74_v26, %s763_s1  ;;  %v285_v21 = vld [vmem:[%s1069_s0] sm:$0x77]  ;;  %v370_v35 = vld [vmem:[%s1069_s0 + $0x8] sm:$0x77] }
  0x88   :  { %69 = vst [vmem:[#allocation1] ss:$2 sm:$0xff] %v65_v28 }
  0x89   :  { %v240_v33 = vpop.permute.xlu0 %239  ;;  %v238_v47 = vpop.permute.xlu1 %237 }
  0x8a   :  { %v242_v39 = vrot.slane %v240_v33, 4  ;;  %v241_v52 = vrot.slane %v238_v47, 4 }
  0x8c   :  { %v246_v51 = vsel %vm244_vm4, %v240_v33, %v242_v39  ;;  %v243_v58 = vsel %vm50_vm0, %v241_v52, %v242_v39  ;;  %v305_v33 = vld [vmem:[%s1069_s0] sm:$0x77] }
  0x8d   :  { %v250_v54 = vmul.f32 %v246_v51, %v225_v50  ;;  %v245_v1 = vsel %vm244_vm4, %v238_v47, %v243_v58  ;;  %v329_v39 = vmul.f32 %v324_v34, %v305_v33  ;;  %v501_v47 = vpop.permute.xlu2 %500  ;;  %v369_v51 = vld [vmem:[%s1069_s0] sm:$0x77] }
  0x8e   :  { %v132_v40 = vld.sshfl [vmem:[#allocation1 + $0x18] sm:$0xff pattern:$0x75316420]  ;;  %v131_v42 = vld.sshfl [vmem:[#allocation1 + $0x10] sm:$0xff pattern:$0x75316420]  ;;  %v249_v4 = vmul.f32 %v245_v1, %v224_v0 }
  0x8f   :  { %v887_v44 = vld.sshfl [vmem:[#allocation1] sm:$0xff pattern:$0x75316420]  ;;  %v73_v45 = vld.sshfl [vmem:[#allocation1 + $0x8] sm:$0xff pattern:$0x75316420] }
  0x90   :  { %126 = vst [vmem:[#allocation1] ss:$2 sm:$0xff] %v122_v41  ;;  %78 = vrot.lane.b32.xlu2 %v73_v45, %s763_s1  ;;  %v135_v55 = vrot.slane %v131_v42, 5  ;;  %v136_v6 = vrot.slane %v132_v40, 5 }
  0x91   :  { %189 = vst [vmem:[#allocation1 + $0x10] ss:$2 sm:$0xff] %v184_v43  ;;  %v321_v2 = vpop.permute.xlu0 %320  ;;  %v383_v13 = vpop.permute.xlu1 %382 }
  0x92   :  { %v323_v5 = vrot.slane %v321_v2, 4  ;;  %v386_v18 = vrot.slane %v383_v13, 4 }
  0x94   :  { %v325_v16 = vsel %vm50_vm0, %v322_v3, %v323_v5  ;;  %v389_v24 = vsel %vm50_vm0, %v386_v18, %v387_v17  ;;  %v388_v52 = vsel %vm206_vm6, %v386_v18, %v383_v13  ;;  %v428_v3 = vld [vmem:[%s1069_s0] sm:$0x77]  ;;  %v488_v5 = vld [vmem:[%s1069_s0 + $0x8] sm:$0x77] }
  0x95   :  { %v326_v20 = vsel %vm272_vm5, %v325_v16, %v321_v2  ;;  %v390_v36 = vsel %vm206_vm6, %v389_v24, %v385_v12  ;;  %v393_v58 = vmul.f32 %v388_v52, %v369_v51  ;;  %v487_v12 = vld [vmem:[%s1069_s0] sm:$0x77] }
  0x96   :  { %v330_v26 = vmul.f32 %v326_v20, %v306_v19  ;;  %v394_v40 = vmul.f32 %v390_v36, %v370_v35 }
  0x97   :  { %v904_v56 = vld.sshfl [vmem:[#allocation1] sm:$0xff pattern:$0x75316420]  ;;  %v130_v57 = vld.sshfl [vmem:[#allocation1 + $0x8] sm:$0xff pattern:$0x75316420] }
  0x98   :  { %141 = vrot.lane.b32.xlu2 %v135_v55, %s762_s19  ;;  %v193_v59 = vld.sshfl [vmem:[#allocation1 + $0x18] sm:$0xff pattern:$0x75316420]  ;;  %v134_v60 = vrot.slane %v130_v57, 5  ;;  %187 = vst [vmem:[#allocation1] ss:$2 sm:$0xff] %v183_v53 }
  0x99   :  { %v197_v62 = vrot.slane %v193_v59, 2  ;;  %v192_v63 = vld.sshfl [vmem:[#allocation1 + $0x10] sm:$0xff pattern:$0x75316420]  ;;  %v442_v25 = vpop.permute.xlu0 %441  ;;  %v444_v32 = vpop.permute.xlu1 %443  ;;  %v429_v53 = vld [vmem:[%s1069_s0 + $0x8] sm:$0x77] }
  0x9a   :  { %139 = vrot.lane.b32.xlu1 %v134_v60, %s762_s19  ;;  %255 = vst [vmem:[#allocation1 + $0x10] ss:$2 sm:$0xff] %v250_v54  ;;  %v196_v10 = vrot.slane %v192_v63, 2  ;;  %v446_v37 = vrot.slane %v444_v32, 4  ;;  %v445_v38 = vrot.slane %v442_v25, 4  ;;  %v504_v55 = vrot.slane %v501_v47, 4 }
  0x9b   :  { %204 = vrot.lane.b32.xlu0 %v197_v62, %s761_s16 }
  0x9c   :  { %v448_v43 = vsel %vm50_vm0, %v445_v38, %v446_v37 }
  0x9d   :  { %v449_v54 = vsel %vm145_vm7, %v448_v43, %v444_v32  ;;  %v133_v32 = vrot.slane %v904_v56, 5 }
  0x9e   :  { %v453_v59 = vmul.f32 %v449_v54, %v429_v53 }
  0x9f   :  { %v191_v8 = vld.sshfl [vmem:[#allocation1 + $0x8] sm:$0xff pattern:$0x75316420]  ;;  %v921_v9 = vld.sshfl [vmem:[#allocation1] sm:$0xff pattern:$0x75316420] }
  0xa0   :  { %143 = vrot.lane.b32.xlu2 %v136_v6, %s762_s19  ;;  %v195_v11 = vrot.slane %v191_v8, 2  ;;  %253 = vst [vmem:[#allocation1] ss:$2 sm:$0xff] %v249_v4  ;;  %v447_v4 = vsel %vm145_vm7, %v445_v38, %v442_v25  ;;  %v194_v33 = vrot.slane %v921_v9, 2 }
  0xa1   :  { %v259_v14 = vld.sshfl [vmem:[#allocation1 + $0x18] sm:$0xff pattern:$0x75316420]  ;;  %v258_v15 = vld.sshfl [vmem:[#allocation1 + $0x10] sm:$0xff pattern:$0x75316420]  ;;  %v503_v48 = vpop.permute.xlu0 %502 }
  0xa2   :  { %202 = vrot.lane.b32.xlu1 %v196_v10, %s761_s16  ;;  %292 = vst [vmem:[#allocation1 + $0x11] ss:$2 sm:$0xff] %v286_v7  ;;  %v263_v27 = vrot.slane %v259_v14, 7  ;;  %v262_v28 = vrot.slane %v258_v15, 7  ;;  %v505_v57 = vrot.slane %v503_v48, 4  ;;  %v452_v7 = vmul.f32 %v447_v4, %v428_v3 }
  0xa3   :  { %200 = vrot.lane.b32.xlu0 %v195_v11, %s761_s16  ;;  %v506_v15 = vsel %vm84_vm8, %v504_v55, %v501_v47 }
  0xa4   :  { %v507_v0 = vsel %vm50_vm0, %v504_v55, %v505_v57  ;;  %v511_v19 = vmul.f32 %v506_v15, %v487_v12  ;;  %v765_v12 = vmov 0  }
  0xa5   :  { %v508_v6 = vsel %vm84_vm8, %v507_v0, %v503_v48  ;;  %753 = vset.pattern.permute.xlu0 %v765_v12 }
  0xa6   :  { %v512_v8 = vmul.f32 %v508_v6, %v488_v5 }
  0xa7   :  { %v257_v22 = vld.sshfl [vmem:[#allocation1 + $0x8] sm:$0xff pattern:$0x75316420]  ;;  %v936_v23 = vld.sshfl [vmem:[#allocation1] sm:$0xff pattern:$0x75316420] }
  0xa8   :  { %v261_v29 = vrot.slane %v257_v22, 7  ;;  %290 = vst [vmem:[#allocation1 + $0x1] ss:$2 sm:$0xff] %v285_v21  ;;  %v260_v34 = vrot.slane %v936_v23, 7 }
  0xa9   :  { %v295_v30 = vld.sshfl [vmem:[#allocation1 + $0x10] sm:$0xff pattern:$0x75316420]  ;;  %v296_v31 = vld.sshfl [vmem:[#allocation1 + $0x18] sm:$0xff pattern:$0x75316420] }
  0xaa   :  { %270 = vrot.lane.b32.xlu1 %v263_v27, %s760_s15  ;;  %335 = vst [vmem:[#allocation1 + $0x10] ss:$2 sm:$0xff] %v330_v26  ;;  %266 = vrot.lane.b32.xlu2 %v261_v29, %s760_s15 }
  0xab   :  { %268 = vrot.lane.b32.xlu0 %v262_v28, %s760_s15  ;;  %303 = vst [vmem:[#allocation2 + $0x30] sm:$0x70] %v295_v30 }
  0xac   :  { %304 = vst [vmem:[#allocation2 + $0x38] sm:$0x70] %v296_v31 }
  0xaf   :  { %v293_v41 = vld.sshfl [vmem:[#allocation1] sm:$0xff pattern:$0x75316420]  ;;  %v294_v42 = vld.sshfl [vmem:[#allocation1 + $0x8] sm:$0xff pattern:$0x75316420] }
  0xb0   :  { %333 = vst [vmem:[#allocation1] ss:$2 sm:$0xff] %v329_v39 }
  0xb1   :  { %v338_v45 = vld.sshfl [vmem:[#allocation1 + $0x10] sm:$0xff pattern:$0x75316420]  ;;  %v339_v46 = vld.sshfl [vmem:[#allocation1 + $0x18] sm:$0xff pattern:$0x75316420] }
  0xb2   :  { %v342_v49 = vrot.slane %v338_v45, 1  ;;  %v343_v50 = vrot.slane %v339_v46, 1  ;;  %399 = vst [vmem:[#allocation1 + $0x10] ss:$2 sm:$0xff] %v394_v40 }
  0xb3   :  { %301 = vst [vmem:[#allocation2 + $0x20] sm:$0x70] %v293_v41 }
  0xb4   :  { %348 = vrot.lane.b32.xlu1 %v342_v49, %s759_s12  ;;  %350 = vrot.lane.b32.xlu2 %v343_v50, %s759_s12  ;;  %302 = vst [vmem:[#allocation2 + $0x28] sm:$0x70] %v294_v42 }
  0xb7   :  { %v337_v60 = vld.sshfl [vmem:[#allocation1 + $0x8] sm:$0xff pattern:$0x75316420]  ;;  %v336_v61 = vld.sshfl [vmem:[#allocation1] sm:$0xff pattern:$0x75316420] }
  0xb8   :  { %v341_v62 = vrot.slane %v337_v60, 1  ;;  %v340_v63 = vrot.slane %v336_v61, 1  ;;  %397 = vst [vmem:[#allocation1] ss:$2 sm:$0xff] %v393_v58 }
  0xb9   :  { %v403_v1 = vld.sshfl [vmem:[#allocation1 + $0x18] sm:$0xff pattern:$0x75316420]  ;;  %v402_v2 = vld.sshfl [vmem:[#allocation1 + $0x10] sm:$0xff pattern:$0x75316420] }
  0xba   :  { %344 = vrot.lane.b32.xlu0 %v340_v63, %s759_s12  ;;  %458 = vst [vmem:[#allocation1 + $0x10] ss:$2 sm:$0xff] %v453_v59  ;;  %v406_v14 = vrot.slane %v402_v2, 6  ;;  %v407_v18 = vrot.slane %v403_v1, 6 }
  0xbc   :  { %346 = vrot.lane.b32.xlu1 %v341_v62, %s759_s12 }
  0xbf   :  { %v400_v10 = vld.sshfl [vmem:[#allocation1] sm:$0xff pattern:$0x75316420]  ;;  %v401_v11 = vld.sshfl [vmem:[#allocation1 + $0x8] sm:$0xff pattern:$0x75316420] }
  0xc0   :  { %v404_v13 = vrot.slane %v400_v10, 6  ;;  %456 = vst [vmem:[#allocation1] ss:$2 sm:$0xff] %v452_v7  ;;  %v405_v25 = vrot.slane %v401_v11, 6 }
  0xc1   :  { %v462_v16 = vld.sshfl [vmem:[#allocation1 + $0x18] sm:$0xff pattern:$0x75316420]  ;;  %v461_v17 = vld.sshfl [vmem:[#allocation1 + $0x10] sm:$0xff pattern:$0x75316420] }
  0xc2   :  { %408 = vrot.lane.b32.xlu2 %v404_v13, %s758_s7  ;;  %412 = vrot.lane.b32.xlu0 %v406_v14, %s758_s7  ;;  %517 = vst [vmem:[#allocation1 + $0x10] ss:$2 sm:$0xff] %v512_v8  ;;  %v465_v20 = vrot.slane %v461_v17, 3  ;;  %v466_v27 = vrot.slane %v462_v16, 3  ;;  %v567_v8 = vld [vmem:[%s1070_s3] sm:$0xf] }
  0xc4   :  { %414 = vrot.lane.b32.xlu1 %v407_v18, %s758_s7 }
  0xc7   :  { %v459_v21 = vld.sshfl [vmem:[#allocation1] sm:$0xff pattern:$0x75316420]  ;;  %v460_v22 = vld.sshfl [vmem:[#allocation1 + $0x8] sm:$0xff pattern:$0x75316420] }
  0xc8   :  { %v463_v24 = vrot.slane %v459_v21, 3  ;;  %515 = vst [vmem:[#allocation1] ss:$2 sm:$0xff] %v511_v19  ;;  %v464_v26 = vrot.slane %v460_v22, 3  ;;  %v766_v21 = vmov 65535  }
  0xc9   :  { %v520_v28 = vld.sshfl [vmem:[#allocation1 + $0x10] sm:$0xff pattern:$0x75316420]  ;;  %v521_v29 = vld.sshfl [vmem:[#allocation1 + $0x18] sm:$0xff pattern:$0x75316420] }
  0xca   :  { %471 = vrot.lane.b32.xlu2 %v465_v20, %s756_s27  ;;  %410 = vrot.lane.b32.xlu0 %v405_v25, %s758_s7  ;;  %v691_v20 = vld [vmem:[%s1071_s4] sm:$0xf] }
  0xcc   :  { %467 = vrot.lane.b32.xlu1 %v463_v24, %s756_s27 }
  0xcf   :  { %v518_v30 = vld.sshfl [vmem:[#allocation1] sm:$0xff pattern:$0x75316420]  ;;  %v519_v31 = vld.sshfl [vmem:[#allocation1 + $0x8] sm:$0xff pattern:$0x75316420] }
  0xd2   :  { %469 = vrot.lane.b32.xlu2 %v464_v26, %s756_s27  ;;  %473 = vrot.lane.b32.xlu0 %v466_v27, %s756_s27 }
  0xd4   :  { %526 = vrot.lane.b32.xlu1 %v520_v28, %s757_s28 }
  0xda   :  { %528 = vrot.lane.b32.xlu2 %v521_v29, %s757_s28  ;;  %522 = vrot.lane.b32.xlu0 %v518_v30, %s757_s28  ;;  %v701_v30 = vld [vmem:[%s1072_s5] sm:$0xf] }
  0xdc   :  { %524 = vrot.lane.b32.xlu1 %v519_v31, %s757_s28 }
  0xe2   :  { %76 = vrot.lane.b32.xlu2 %v887_v44, %s763_s1  ;;  %137 = vrot.lane.b32.xlu0 %v133_v32, %s762_s19 }
  0xe4   :  { %198 = vrot.lane.b32.xlu1 %v194_v33, %s761_s16 }
  0xea   :  { %v995_v35 = vpop.permute.xlu2 %78  ;;  %264 = vrot.lane.b32.xlu2 %v260_v34, %s760_s15  ;;  %570 = vperm.xlu0 %753, %v567_v8  }
  0xf2   :  { %v142_v36 = vpop.permute.xlu2 %141  ;;  %694 = vperm.xlu0 %753, %v691_v20  }
  0xf9   :  { %v83_v37 = vpop.permute.xlu1 %82  ;;  %v81_v38 = vpop.permute.xlu0 %80 }
  0xfa   :  { %v86_v56 = vsel %vm84_vm8, %v995_v35, %v81_v38  ;;  %v87_v44 = vsel %vm84_vm8, %v81_v38, %v83_v37  ;;  %v144_v39 = vpop.permute.xlu2 %143  ;;  %704 = vperm.xlu0 %753, %v701_v30  }
  0xfb   :  { %95 = vst [vmem:[#allocation2 + $0x10] sm:$0x7] %v86_v56  ;;  %v148_v9 = vsel %vm145_vm7, %v142_v36, %v144_v39 }
  0xfc   :  { %96 = vst [vmem:[#allocation2 + $0x18] sm:$0x7] %v87_v44 }
  0xfd   :  { %157 = vst [vmem:[#allocation2 + $0x18] sm:$0x38] %v148_v9 }
 0x104   :  { %v1002_v40 = vpop.permute.xlu2 %266 }
 0x10c   :  { %v1004_v23 = vpop.permute.xlu1 %139 }
 0x10d   :  { %v205_v41 = vpop.permute.xlu0 %204  ;;  %v147_v42 = vsel %vm145_vm7, %v1004_v23, %v142_v36 }
 0x10e   :  { %156 = vst [vmem:[#allocation2 + $0x10] sm:$0x38] %v147_v42  ;;  %v351_v43 = vpop.permute.xlu2 %350  ;;  %v542_v42 = vld [vmem:[%s1073_s2] sm:$0x3] }
 0x10f   :  { %363 = vst.msk [vmem:[#allocation2 + $0x38] sm:$0x80] %vm362_vm9, %v351_v43 }
 0x110   :  { %368 = vst.msk [vmem:[#allocation2 + $0x58] sm:$0x3] %vm367_vm10, %v351_v43 }
 0x114   :  { %v203_v45 = vpop.permute.xlu1 %202 }
 0x115   :  { %v209_v46 = vsel %vm206_vm6, %v203_v45, %v205_v41  ;;  %v1009_v47 = vpop.permute.xlu0 %200 }
 0x116   :  { %218 = vst [vmem:[#allocation2 + $0x18] sm:$0xc0] %v209_v46  ;;  %v208_v48 = vsel %vm206_vm6, %v1009_v47, %v203_v45 }
 0x117   :  { %223 = vst [vmem:[#allocation2 + $0x38] sm:$0x1] %v209_v46 }
 0x118   :  { %217 = vst [vmem:[#allocation2 + $0x10] sm:$0xc0] %v208_v48 }
 0x119   :  { %222 = vst [vmem:[#allocation2 + $0x30] sm:$0x1] %v208_v48 }
 0x11c   :  { %v271_v49 = vpop.permute.xlu1 %270  ;;  %v409_v50 = vpop.permute.xlu2 %408 }
 0x11d   :  { %v269_v51 = vpop.permute.xlu0 %268  ;;  %v546_v56 = vld [vmem:[#allocation2 + $0x18] sm:$0xff] }
 0x11e   :  { %v274_v52 = vsel %vm272_vm5, %v1002_v40, %v269_v51  ;;  %v275_v53 = vsel %vm272_vm5, %v269_v51, %v271_v49 }
 0x11f   :  { %283 = vst [vmem:[#allocation2 + $0x30] sm:$0xe] %v274_v52  ;;  %v545_v41 = vld [vmem:[#allocation2 + $0x10] sm:$0xff] }
 0x120   :  { %284 = vst [vmem:[#allocation2 + $0x38] sm:$0xe] %v275_v53 }
 0x124   :  { %v472_v54 = vpop.permute.xlu2 %471 }
 0x126   :  { %v349_v55 = vpop.permute.xlu1 %348 }
 0x127   :  { %v354_v57 = vsel %vm244_vm4, %v349_v55, %v351_v43  ;;  %v550_v37 = vld [vmem:[#allocation2 + $0x38] sm:$0xff] }
 0x128   :  { %361 = vst [vmem:[#allocation2 + $0x30] sm:$0x80] %v354_v57  ;;  %v562_v44 = vpack.c.bf16 %v550_v37, %v546_v56 }
 0x129   :  { %366 = vst [vmem:[#allocation2 + $0x50] sm:$0x3] %v354_v57 }
 0x12c   :  { %v470_v58 = vpop.permute.xlu2 %469  ;;  %v345_v59 = vpop.permute.xlu0 %344 }
 0x12d   :  { %v476_v60 = vsel %vm117_vm2, %v470_v58, %v472_v54 }
 0x12e   :  { %v347_v61 = vpop.permute.xlu1 %346  ;;  %483 = vst [vmem:[#allocation2 + $0x48] sm:$0xe0] %v476_v60 }
 0x12f   :  { %v353_v62 = vsel %vm244_vm4, %v347_v61, %v349_v55  ;;  %v352_v63 = vsel %vm244_vm4, %v345_v59, %v347_v61  ;;  %vm578_vm4 = vcmask 1045504   ;;  %v549_v39 = vld [vmem:[#allocation2 + $0x30] sm:$0xff] }
 0x130   :  { %360 = vst [vmem:[#allocation2 + $0x28] sm:$0x80] %v353_v62  ;;  %v561_v45 = vpack.c.bf16 %v549_v39, %v545_v41 }
 0x131   :  { %365 = vst [vmem:[#allocation2 + $0x48] sm:$0x3] %v353_v62 }
 0x132   :  { %359 = vst [vmem:[#allocation2 + $0x20] sm:$0x80] %v352_v63 }
 0x133   :  { %364 = vst [vmem:[#allocation2 + $0x40] sm:$0x3] %v352_v63 }
 0x134   :  { %v529_v0 = vpop.permute.xlu2 %528  ;;  %v413_v1 = vpop.permute.xlu0 %412 }
 0x135   :  { %541 = vst.msk [vmem:[#allocation2 + $0x78] sm:$0x7] %vm540_vm11, %v529_v0 }
 0x136   :  { %v415_v2 = vpop.permute.xlu1 %414 }
 0x137   :  { %427 = vst.msk [vmem:[#allocation2 + $0x58] sm:$0x1c] %vm426_vm12, %v415_v2  ;;  %v418_v3 = vsel %vm178_vm3, %v413_v1, %v415_v2 }
 0x138   :  { %425 = vst [vmem:[#allocation2 + $0x50] sm:$0x1c] %v418_v3 }
 0x13c   :  { %v77_v4 = vpop.permute.xlu2 %76  ;;  %v411_v5 = vpop.permute.xlu0 %410  ;;  %v558_v26 = vld [vmem:[#allocation2 + $0x78] sm:$0x7] }
 0x13d   :  { %v85_v6 = vsel %vm84_vm8, %v77_v4, %v995_v35  ;;  %93 = vst.msk [vmem:[#allocation2] sm:$0x7] %vm92_vm13, %v77_v4  ;;  %v416_v7 = vsel %vm178_vm3, %v409_v50, %v411_v5  ;;  %v417_v11 = vsel %vm178_vm3, %v411_v5, %v413_v1  ;;  %vm577_vm3 = vcmask 1044480  }
 0x13e   :  { %v468_v10 = vpop.permute.xlu1 %467  ;;  %94 = vst [vmem:[#allocation2 + $0x8] sm:$0x7] %v85_v6  ;;  %v579_v22 = vsel %vm577_vm3, 4294967295, %v766_v21  ;;  %vm219_vm8 = vcmask 1040504  }
 0x13f   :  { %v475_v13 = vsel %vm117_vm2, %v468_v10, %v470_v58  ;;  %423 = vst [vmem:[#allocation2 + $0x40] sm:$0x1c] %v416_v7  ;;  %v580_v27 = vsel %vm578_vm4, %v579_v22, 0 }
 0x140   :  { %482 = vst [vmem:[#allocation2 + $0x40] sm:$0xe0] %v475_v13 }
 0x141   :  { %424 = vst [vmem:[#allocation2 + $0x48] sm:$0x1c] %v417_v11 }
 0x144   :  { %v474_v14 = vpop.permute.xlu0 %473  ;;  %v265_v15 = vpop.permute.xlu2 %264 }
 0x145   :  { %v477_v16 = vsel %vm117_vm2, %v472_v54, %v474_v14  ;;  %486 = vst.msk [vmem:[#allocation2 + $0x58] sm:$0xe0] %vm485_vm14, %v474_v14  ;;  %v273_v18 = vsel %vm272_vm5, %v265_v15, %v1002_v40  ;;  %vm153_vm2 = vcmask 1045635   ;;  %vm214_vm5 = vcmask 1047678  }
 0x146   :  { %v527_v17 = vpop.permute.xlu1 %526  ;;  %484 = vst [vmem:[#allocation2 + $0x50] sm:$0xe0] %v477_v16 }
 0x147   :  { %v532_v19 = vsel %vm60_vm1, %v527_v17, %v529_v0  ;;  %281 = vst.msk [vmem:[#allocation2 + $0x20] sm:$0xe] %vm280_vm15, %v265_v15 }
 0x148   :  { %539 = vst [vmem:[#allocation2 + $0x70] sm:$0x7] %v532_v19  ;;  %v552_v48 = vld [vmem:[#allocation2 + $0x48] sm:$0xff] }
 0x149   :  { %282 = vst [vmem:[#allocation2 + $0x28] sm:$0xe] %v273_v18 }
 0x14c   :  { %v523_v24 = vpop.permute.xlu0 %522  ;;  %v554_v25 = vld [vmem:[#allocation2 + $0x58] sm:$0xff] }
 0x14d   :  { %v566_v28 = vpack.c.bf16 %v558_v26, %v554_v25  ;;  %v553_v29 = vld [vmem:[#allocation2 + $0x50] sm:$0xff] }
 0x14e   :  { %v525_v31 = vpop.permute.xlu1 %524 }
 0x14f   :  { %v531_v32 = vsel %vm60_vm1, %v525_v31, %v527_v17  ;;  %v530_v33 = vsel %vm60_vm1, %v523_v24, %v525_v31  ;;  %v591_v34 = vand.u32 %v580_v27, %v566_v28  ;;  %v557_v35 = vld [vmem:[#allocation2 + $0x70] sm:$0x7]  ;;  %vm573_vm1 = vcmask 220160  }
 0x150   :  { %538 = vst [vmem:[#allocation2 + $0x68] sm:$0x7] %v531_v32  ;;  %v565_v36 = vpack.c.bf16 %v557_v35, %v553_v29 }
 0x151   :  { %537 = vst [vmem:[#allocation2 + $0x60] sm:$0x7] %v530_v33  ;;  %638 = vmatpush.bf16.msra.mxu3 %v591_v34 }
 0x152   :  { %v588_v38 = vand.u32 %v580_v27, %v565_v36 }
 0x154   :  { %625 = vmatpush.bf16.msra.mxu2 %v588_v38  ;;  %v138_v9 = vpop.permute.xlu0 %137 }
 0x155   :  { %v146_v40 = vsel %vm145_vm7, %v138_v9, %v1004_v23  ;;  %154 = vst.msk [vmem:[#allocation2] sm:$0x38] %vm153_vm2, %v138_v9  ;;  %639 = vmatpush.bf16.msra.mxu3 %v562_v44  ;;  %v551_v23 = vld [vmem:[#allocation2 + $0x40] sm:$0xff] }
 0x156   :  { %v199_v43 = vpop.permute.xlu1 %198  ;;  %155 = vst [vmem:[#allocation2 + $0x8] sm:$0x38] %v146_v40 }
 0x157   :  { %v207_v46 = vsel %vm206_vm6, %v199_v43, %v1009_v47  ;;  %215 = vst.msk [vmem:[#allocation2] sm:$0xc0] %vm214_vm5, %v199_v43  ;;  %v556_v49 = vld [vmem:[#allocation2 + $0x68] sm:$0x7] }
 0x158   :  { %216 = vst [vmem:[#allocation2 + $0x8] sm:$0xc0] %v207_v46  ;;  %626 = vmatpush.bf16.msra.mxu2 %v561_v45  ;;  %741 = vmatmul.msk.bf16.vlgmr.msra.gmra.mxu3 %vm573_vm1, %v542_v42  ;;  %v555_v50 = vld [vmem:[#allocation2 + $0x60] sm:$0x7]  ;;  %v564_v51 = vpack.c.bf16 %v556_v49, %v552_v48 }
 0x159   :  { %220 = vst.msk [vmem:[#allocation2 + $0x20] sm:$0x1] %vm219_vm8, %v199_v43  ;;  %v563_v52 = vpack.c.bf16 %v555_v50, %v551_v23 }
 0x15a   :  { %221 = vst [vmem:[#allocation2 + $0x28] sm:$0x1] %v207_v46  ;;  %v585_v53 = vand.u32 %v580_v27, %v564_v51 }
 0x15b   :  { %740 = vmatmul.msk.bf16.vlgmr.msra.gmra.mxu2 %vm573_vm1, %v542_v42  ;;  %v582_v54 = vand.u32 %v580_v27, %v563_v52 }
 0x15c   :  { %612 = vmatpush.bf16.msra.mxu1 %v585_v53  ;;  %v571_v63 = vpop.permute.xlu0 %570 }
 0x15d   :  { %599 = vmatpush.bf16.msra.mxu0 %v582_v54 }
 0x15e   :  { %v543_v47 = vld [vmem:[#allocation2] sm:$0xff] }
 0x15f   :  { %v544_v55 = vld [vmem:[#allocation2 + $0x8] sm:$0xff] }
 0x160   :  { %v547_v57 = vld [vmem:[#allocation2 + $0x20] sm:$0xff] }
 0x161   :  { %v559_v58 = vpack.c.bf16 %v547_v57, %v543_v47  ;;  %v548_v59 = vld [vmem:[#allocation2 + $0x28] sm:$0xff] }
 0x162   :  { %v560_v60 = vpack.c.bf16 %v548_v59, %v544_v55 }
 0x163   :  { %600 = vmatpush.bf16.msra.mxu0 %v559_v58 }
 0x164   :  { %613 = vmatpush.bf16.msra.mxu1 %v560_v60  ;;  %v695_v39 = vpop.permute.xlu0 %694 }
 0x166   :  { %738 = vmatmul.msk.bf16.vlgmr.msra.gmra.mxu0 %vm573_vm1, %v542_v42 }
 0x167   :  { %739 = vmatmul.msk.bf16.vlgmr.msra.gmra.mxu1 %vm573_vm1, %v542_v42 }
 0x16c   :  { %v705_v55 = vpop.permute.xlu0 %704 }
 0x1db   :  { %v641_v61 = vpop.f32.mrf.mxu3 }
 0x1dc   :  { %v642_v5 = vadd.f32 %v641_v61, %v571_v63 }
 0x1de   :  { %v628_v62 = vpop.f32.mrf.mxu2  ;;  %v658_v17 = vmul.f32 %v642_v5, %v642_v5  ;;  %v650_v22 = vsel %vm50_vm0, %v642_v5, 0.0 }
 0x1df   :  { %v629_v0 = vadd.f32 %v628_v62, %v571_v63 }
 0x1e0   :  { %v664_v28 = vsel %vm50_vm0, %v658_v17, 0.0 }
 0x1e1   :  { %v657_v11 = vmul.f32 %v629_v0, %v629_v0  ;;  %v648_v16 = vsel %vm50_vm0, %v629_v0, 0.0 }
 0x1e3   :  { %v602_v1 = vpop.f32.mrf.mxu0  ;;  %v643_v2 = vpop.f32.mrf.mxu3  ;;  %v662_v24 = vsel %vm50_vm0, %v657_v11, 0.0 }
 0x1e4   :  { %v603_v3 = vadd.f32 %v602_v1, %v571_v63  ;;  %v615_v4 = vpop.f32.mrf.mxu1 }
 0x1e5   :  { %v616_v6 = vadd.f32 %v615_v4, %v571_v63 }
 0x1e6   :  { %v645_v7 = vsel %vm50_vm0, %v603_v3, 0.0  ;;  %v655_v8 = vmul.f32 %v603_v3, %v603_v3  ;;  %v630_v10 = vpop.f32.mrf.mxu2 }
 0x1e7   :  { %v646_v12 = vsel %vm50_vm0, %v616_v6, 0.0  ;;  %v656_v13 = vmul.f32 %v616_v6, %v616_v6 }
 0x1e8   :  { %v647_v14 = vadd.f32 %v646_v12, %v645_v7  ;;  %v659_v15 = vsel %vm50_vm0, %v655_v8, 0.0 }
 0x1e9   :  { %v660_v18 = vsel %vm50_vm0, %v656_v13, 0.0 }
 0x1ea   :  { %v649_v19 = vadd.f32 %v648_v16, %v647_v14  ;;  %v661_v20 = vadd.f32 %v660_v18, %v659_v15 }
 0x1eb   :  { %v604_v21 = vpop.f32.mrf.mxu0 }
 0x1ec   :  { %v617_v25 = vpop.f32.mrf.mxu1  ;;  %v651_v26 = vadd.f32 %v650_v22, %v649_v19  ;;  %v663_v27 = vadd.f32 %v662_v24, %v661_v20 }
 0x1ee   :  { %652 = vadd.xlane.f32.xlu1 %v651_v26  ;;  %v665_v29 = vadd.f32 %v664_v28, %v663_v27 }
 0x1f0   :  { %666 = vadd.xlane.f32.xlu2 %v665_v29 }
 0x261   :  { %v653_v30 = vpop.xlane.xlu1 %652 }
 0x262   :  { %v654_v31 = vmul.f32 0.001953125, %v653_v30 }
 0x263   :  { %v667_v32 = vpop.xlane.xlu2 %666 }
 0x264   :  { %v668_v33 = vmul.f32 0.001953125, %v667_v32  ;;  %v669_v34 = vmul.f32 %v654_v31, %v654_v31  ;;  %v672_v42 = vsub.f32 %v603_v3, %v654_v31  ;;  %v673_v43 = vsub.f32 %v616_v6, %v654_v31 }
 0x265   :  { %v674_v45 = vsub.f32 %v629_v0, %v654_v31  ;;  %v675_v46 = vsub.f32 %v642_v5, %v654_v31 }
 0x266   :  { %v670_v35 = vsub.f32 %v668_v33, %v669_v34 }
 0x268   :  { %v671_v36 = vmax.f32 %v670_v35, 0.0 }
 0x26a   :  { %v676_v37 = vadd.f32 1e-05, %v671_v36 }
 0x26c   :  { %754 = vrsqrt.f32 %v676_v37  ;;  %vm683_vm7 = vweird.f32 %v676_v37 }
 0x272   :  { %v755_v38 = vpop.eup %754 }
 0x273   :  { %v678_v56 = vmul.f32 %v755_v38, %v676_v37  ;;  %vm684_vm6 = vweird.f32 %v755_v38 }
 0x274   :  { %vm685_vm9 = vmor %vm683_vm7, %vm684_vm6 }
 0x275   :  { %v679_v44 = vmul.f32 %v755_v38, %v678_v56 }
 0x277   :  { %v680_v9 = vmul.f32 0.5, %v679_v44 }
 0x279   :  { %v681_v40 = vsub.f32 1.5, %v680_v9 }
 0x27b   :  { %v682_v41 = vmul.f32 %v755_v38, %v681_v40 }
 0x27d   :  { %v686_v48 = vsel %vm685_vm9, %v755_v38, %v682_v41 }
 0x27e   :  { %v687_v49 = vmul.f32 %v686_v48, %v672_v42  ;;  %v688_v23 = vmul.f32 %v686_v48, %v673_v43  ;;  %v689_v50 = vmul.f32 %v686_v48, %v674_v45  ;;  %v690_v51 = vmul.f32 %v686_v48, %v675_v46 }
 0x280   :  { %v697_v52 = vmul.f32 %v695_v39, %v687_v49  ;;  %v698_v53 = vmul.f32 %v695_v39, %v688_v23  ;;  %v699_v54 = vmul.f32 %v695_v39, %v689_v50  ;;  %v700_v47 = vmul.f32 %v695_v39, %v690_v51 }
 0x282   :  { %v707_v57 = vadd.f32 %v705_v55, %v697_v52  ;;  %v708_v58 = vadd.f32 %v705_v55, %v698_v53  ;;  %v709_v59 = vadd.f32 %v705_v55, %v699_v54  ;;  %v710_v60 = vadd.f32 %v705_v55, %v700_v47 }
 0x284   :  { %v712_v61 = vmax.f32 %v708_v58, 0.0  ;;  %v714_v62 = vmax.f32 %v710_v60, 0.0  ;;  %v711_v63 = vmax.f32 %v707_v57, 0.0  ;;  %v713_v0 = vmax.f32 %v709_v59, 0.0 }
 0x286   :  { %v719_v1 = vrot.slane %v712_v61, 4  ;;  %v720_v2 = vrot.slane %v714_v62, 4 }
 0x288   :  { %v721_v3 = vsel %vm50_vm0, %v711_v63, %v719_v1  ;;  %v722_v4 = vsel %vm50_vm0, %v713_v0, %v720_v2 }
 0x289   :  { %725 = vst [vmem:[%s1074_s6] sm:$0xff] %v721_v3 }
 0x28a   :  { %726 = vst [vmem:[%s1074_s6 + $0x8] sm:$0xff] %v722_v4 }

// kernel: rsu6_forward.12
= control target key start
LH: loop header
LB: loop body
LE: loop exit
PB: predicated region body
PF: predicated region fallthrough
CT: control target
= control target key end

     0   :  { %vm50_vm0 = vcmask 1043456   ;;  %s757_s27 = smov 112   ;;  %s758_s28 = smov 111   ;;  %vm60_vm1 = vcmask 908288   ;;  %vm117_vm2 = vcmask 916480   ;;  %vm178_vm3 = vcmask 924672   ;;  %s1069_s1 = inlined_call_operand.vmem [shape: f32[9,512], index: 1, kind: input, shape index: {}]   ;;  %s1070_s0 = inlined_call_operand.vmem [shape: f32[3,512], index: 0, kind: input, shape index: {}]   ;;  %s1071_s3 = inlined_call_operand.vmem [shape: f32[3,1], index: 3, kind: input, shape index: {}]   ;;  %s1072_s4 = inlined_call_operand.vmem [shape: f32[3,1], index: 4, kind: input, shape index: {}]   ;;  %s1073_s5 = inlined_call_operand.vmem [shape: f32[3,1], index: 5, kind: input, shape index: {}]   ;;  %s1074_s2 = inlined_call_operand.vmem [shape: bf16[3,27], index: 2, kind: input, shape index: {}]   ;;  %s1075_s6 = inlined_call_operand.vmem [shape: f32[3,512], index: 6, kind: output, shape index: {}]  }
   0x1   :  { %v732_v0 = vld [vmem:[%s1069_s1 + $0x1] ss:$8 sm:$0xf]  ;;  %v42_v1 = vld [vmem:[%s1069_s1] ss:$8 sm:$0xf] }
   0x2   :  { %v104_v2 = vperm.slane %v732_v0, 2  ;;  %v105_v3 = vperm.slane %v732_v0, 3  ;;  %v46_v4 = vperm.slane %v42_v1, 2  ;;  %v47_v5 = vperm.slane %v42_v1, 3  ;;  %s759_s7 = smov 113   ;;  %s760_s12 = smov 127  }
   0x3   :  { %v103_v8 = vperm.slane %v732_v0, 1  ;;  %v45_v9 = vperm.slane %v42_v1, 1  ;;  %v733_v12 = vld [vmem:[%s1069_s1 + $0x2] ss:$8 sm:$0xf]  ;;  %v102_v13 = vperm.slane %v732_v0, 0 }
   0x4   :  { %v107_v6 = vrot.slane %v105_v3, 4  ;;  %v49_v7 = vrot.slane %v47_v5, 4  ;;  %v44_v14 = vperm.slane %v42_v1, 0  ;;  %v734_v15 = vld [vmem:[%s1069_s1 + $0x3] ss:$8 sm:$0xf] }
   0x5   :  { %v106_v16 = vrot.slane %v103_v8, 4  ;;  %v48_v17 = vrot.slane %v45_v9, 4  ;;  %v165_v18 = vperm.slane %v733_v12, 2  ;;  %v166_v19 = vperm.slane %v733_v12, 3  ;;  %s761_s15 = smov 1   ;;  %s762_s16 = smov 15  }
   0x6   :  { %v109_v10 = vsel %vm50_vm0, %v104_v2, %v107_v6  ;;  %v52_v11 = vsel %vm50_vm0, %v46_v4, %v49_v7  ;;  %v164_v21 = vperm.slane %v733_v12, 1  ;;  %v232_v22 = vperm.slane %v734_v15, 3  ;;  %v735_v33 = vld [vmem:[%s1069_s1 + $0x5] ss:$8 sm:$0xf]  ;;  %s763_s19 = smov 16  }
   0x7   :  { %112 = vrot.lane.b32.xlu1 %v109_v10, %s757_s27  ;;  %55 = vrot.lane.b32.xlu0 %v52_v11, %s758_s28  ;;  %v168_v20 = vrot.slane %v166_v19, 4  ;;  %v108_v23 = vsel %vm50_vm0, %v102_v13, %v106_v16  ;;  %v51_v24 = vsel %vm50_vm0, %v44_v14, %v48_v17  ;;  %v230_v25 = vperm.slane %v734_v15, 1  ;;  %v736_v34 = vld [vmem:[%s1069_s1 + $0x6] ss:$8 sm:$0xf] }
   0x8   :  { %v163_v27 = vperm.slane %v733_v12, 0  ;;  %v167_v28 = vrot.slane %v164_v21, 4  ;;  %v231_v29 = vperm.slane %v734_v15, 2  ;;  %v234_v30 = vrot.slane %v232_v22, 4  ;;  %v41_v10 = vld [vmem:[%s1070_s0 + $0x8] sm:$0x77] }
   0x9   :  { %v170_v26 = vsel %vm50_vm0, %v165_v18, %v168_v20  ;;  %v229_v31 = vperm.slane %v734_v15, 0  ;;  %v233_v32 = vrot.slane %v230_v25, 4  ;;  %v311_v36 = vperm.slane %v735_v33, 1  ;;  %v737_v47 = vld [vmem:[%s1069_s1 + $0x7] ss:$8 sm:$0xf] }
   0xa   :  { %173 = vrot.lane.b32.xlu2 %v170_v26, %s759_s7  ;;  %v169_v35 = vsel %vm50_vm0, %v163_v27, %v167_v28  ;;  %v236_v37 = vsel %vm50_vm0, %v231_v29, %v234_v30  ;;  %v313_v39 = vperm.slane %v735_v33, 3  ;;  %v375_v40 = vperm.slane %v736_v34, 1  ;;  %v738_v60 = vld [vmem:[%s1069_s1 + $0x20] ss:$8 sm:$0xf]  ;;  %s764_s1 = smov 17  }
   0xb   :  { %v235_v38 = vsel %vm50_vm0, %v229_v31, %v233_v32  ;;  %v310_v41 = vperm.slane %v735_v33, 0  ;;  %v314_v42 = vrot.slane %v311_v36, 4  ;;  %v312_v43 = vperm.slane %v735_v33, 2  ;;  %v98_v18 = vld [vmem:[%s1070_s0 + $0x8] sm:$0x77] }
   0xc   :  { %v315_v44 = vrot.slane %v313_v39, 4  ;;  %v374_v45 = vperm.slane %v736_v34, 0  ;;  %v378_v46 = vrot.slane %v375_v40, 4  ;;  %v377_v49 = vperm.slane %v736_v34, 3  ;;  %v40_v21 = vld [vmem:[%s1070_s0] sm:$0x77] }
   0xd   :  { %v316_v48 = vsel %vm50_vm0, %v310_v41, %v314_v42  ;;  %v436_v52 = vperm.slane %v737_v47, 3  ;;  %v434_v53 = vperm.slane %v737_v47, 1  ;;  %v376_v54 = vperm.slane %v736_v34, 2  ;;  %v97_v34 = vld [vmem:[%s1070_s0] sm:$0x77] }
   0xe   :  { %v317_v50 = vsel %vm50_vm0, %v312_v43, %v315_v44  ;;  %v380_v51 = vsel %vm50_vm0, %v374_v45, %v378_v46  ;;  %v379_v55 = vrot.slane %v377_v49, 4  ;;  %v435_v56 = vperm.slane %v737_v47, 2  ;;  %v159_v36 = vld [vmem:[%s1070_s0 + $0x8] sm:$0x77] }
   0xf   :  { %110 = vrot.lane.b32.xlu1 %v108_v23, %s757_s27  ;;  %53 = vrot.lane.b32.xlu0 %v51_v24, %s758_s28  ;;  %v438_v57 = vrot.slane %v436_v52, 4  ;;  %v433_v58 = vperm.slane %v737_v47, 0  ;;  %v437_v59 = vrot.slane %v434_v53, 4  ;;  %v493_v62 = vperm.slane %v738_v60, 1 }
  0x10   :  { %v381_v61 = vsel %vm50_vm0, %v376_v54, %v379_v55  ;;  %v495_v1 = vperm.slane %v738_v60, 3  ;;  %v492_v2 = vperm.slane %v738_v60, 0  ;;  %v494_v4 = vperm.slane %v738_v60, 2 }
  0x11   :  { %v440_v63 = vsel %vm50_vm0, %v435_v56, %v438_v57  ;;  %v439_v0 = vsel %vm50_vm0, %v433_v58, %v437_v59  ;;  %v496_v3 = vrot.slane %v493_v62, 4  ;;  %v765_v32 = vmov 0.0  }
  0x12   :  { %171 = vrot.lane.b32.xlu2 %v169_v35, %s759_s7  ;;  %v497_v5 = vrot.slane %v495_v1, 4  ;;  %26 = vst [vmem:[#allocation2 + $0x10] sm:$0xff] %v765_v32  ;;  %vm244_vm4 = vcmask 1039360   ;;  %vm272_vm5 = vcmask 7168   ;;  %vm206_vm6 = vcmask 121856  }
  0x13   :  { %v498_v6 = vsel %vm50_vm0, %v492_v2, %v496_v3  ;;  %27 = vst [vmem:[#allocation2 + $0x18] sm:$0xff] %v765_v32  ;;  %vm145_vm7 = vcmask 130048   ;;  %vm84_vm8 = vcmask 138240   ;;  %vm362_vm9 = vcmask 1039367  }
  0x14   :  { %v499_v7 = vsel %vm50_vm0, %v494_v4, %v497_v5  ;;  %24 = vst [vmem:[#allocation2] sm:$0xff] %v765_v32  ;;  %vm367_vm10 = vcmask 1033216   ;;  %vm540_vm11 = vcmask 903168   ;;  %vm426_vm12 = vcmask 921602  }
  0x15   :  { %25 = vst [vmem:[#allocation2 + $0x8] sm:$0xff] %v765_v32  ;;  %vm92_vm13 = vcmask 1042568   ;;  %vm485_vm14 = vcmask 916485   ;;  %vm280_vm15 = vcmask 1043465  }
  0x16   :  { %28 = vst [vmem:[#allocation2 + $0x20] sm:$0xff] %v765_v32 }
  0x17   :  { %239 = vrot.lane.b32.xlu0 %v236_v37, %s760_s12  ;;  %237 = vrot.lane.b32.xlu1 %v235_v38, %s760_s12  ;;  %29 = vst [vmem:[#allocation2 + $0x28] sm:$0xff] %v765_v32 }
  0x18   :  { %30 = vst [vmem:[#allocation2 + $0x30] sm:$0xff] %v765_v32 }
  0x19   :  { %31 = vst [vmem:[#allocation2 + $0x38] sm:$0xff] %v765_v32 }
  0x1a   :  { %318 = vrot.lane.b32.xlu2 %v316_v48, %s761_s15  ;;  %v158_v48 = vld [vmem:[%s1070_s0] sm:$0x77]  ;;  %32 = vst [vmem:[#allocation2 + $0x40] sm:$0xff] %v765_v32 }
  0x1b   :  { %33 = vst [vmem:[#allocation2 + $0x48] sm:$0xff] %v765_v32 }
  0x1c   :  { %34 = vst [vmem:[#allocation2 + $0x50] sm:$0xff] %v765_v32 }
  0x1d   :  { %35 = vst [vmem:[#allocation2 + $0x58] sm:$0xff] %v765_v32 }
  0x1e   :  { %36 = vst [vmem:[#allocation2 + $0x60] sm:$0x7] %v765_v32 }
  0x1f   :  { %320 = vrot.lane.b32.xlu0 %v317_v50, %s761_s15  ;;  %382 = vrot.lane.b32.xlu1 %v380_v51, %s762_s16  ;;  %v225_v50 = vld [vmem:[%s1070_s0 + $0x8] sm:$0x77]  ;;  %37 = vst [vmem:[#allocation2 + $0x68] sm:$0x7] %v765_v32 }
  0x20   :  { %38 = vst [vmem:[#allocation2 + $0x70] sm:$0x7] %v765_v32 }
  0x21   :  { %39 = vst [vmem:[#allocation2 + $0x78] sm:$0x7] %v765_v32 }
  0x22   :  { %384 = vrot.lane.b32.xlu2 %v381_v61, %s762_s16 }
  0x27   :  { %443 = vrot.lane.b32.xlu1 %v440_v63, %s763_s19  ;;  %441 = vrot.lane.b32.xlu0 %v439_v0, %s763_s19  ;;  %v224_v0 = vld [vmem:[%s1070_s0] sm:$0x77] }
  0x2a   :  { %500 = vrot.lane.b32.xlu2 %v498_v6, %s764_s1 }
  0x2f   :  { %502 = vrot.lane.b32.xlu0 %v499_v7, %s764_s1  ;;  %v286_v7 = vld [vmem:[%s1070_s0 + $0x8] sm:$0x77] }
  0x64   :  { %v174_v15 = vpop.permute.xlu2 %173 }
  0x65   :  { %v176_v29 = vrot.slane %v174_v15, 4 }
  0x67   :  { %v180_v37 = vsel %vm178_vm3, %v174_v15, %v176_v29 }
  0x68   :  { %v184_v43 = vmul.f32 %v180_v37, %v159_v36 }
  0x6c   :  { %v172_v31 = vpop.permute.xlu2 %171 }
  0x6d   :  { %v175_v38 = vrot.slane %v172_v31, 4 }
  0x6f   :  { %v177_v46 = vsel %vm50_vm0, %v175_v38, %v176_v29 }
  0x70   :  { %v179_v49 = vsel %vm178_vm3, %v172_v31, %v177_v46 }
  0x71   :  { %v183_v53 = vmul.f32 %v179_v49, %v158_v48 }
  0x74   :  { %v319_v61 = vpop.permute.xlu2 %318 }
  0x75   :  { %v322_v3 = vrot.slane %v319_v61, 4 }
  0x79   :  { %v113_v8 = vpop.permute.xlu1 %112  ;;  %v56_v9 = vpop.permute.xlu0 %55 }
  0x7a   :  { %v58_v11 = vrot.slane %v56_v9, 4  ;;  %v115_v14 = vrot.slane %v113_v8, 4 }
  0x7c   :  { %v62_v12 = vsel %vm60_vm1, %v56_v9, %v58_v11  ;;  %v119_v19 = vsel %vm117_vm2, %v113_v8, %v115_v14 }
  0x7d   :  { %v66_v13 = vmul.f32 %v62_v12, %v41_v10  ;;  %v123_v24 = vmul.f32 %v119_v19, %v98_v18  ;;  %v385_v12 = vpop.permute.xlu2 %384  ;;  %v306_v19 = vld [vmem:[%s1070_s0 + $0x8] sm:$0x77] }
  0x7f   :  { %71 = vst [vmem:[#allocation1 + $0x10] ss:$2 sm:$0xff] %v66_v13 }
  0x81   :  { %v111_v16 = vpop.permute.xlu1 %110  ;;  %v54_v17 = vpop.permute.xlu0 %53 }
  0x82   :  { %v57_v20 = vrot.slane %v54_v17, 4  ;;  %v114_v22 = vrot.slane %v111_v16, 4 }
  0x84   :  { %v59_v23 = vsel %vm50_vm0, %v57_v20, %v58_v11  ;;  %v116_v30 = vsel %vm50_vm0, %v114_v22, %v115_v14 }
  0x85   :  { %v61_v25 = vsel %vm60_vm1, %v54_v17, %v59_v23  ;;  %v118_v35 = vsel %vm117_vm2, %v111_v16, %v116_v30  ;;  %v387_v17 = vrot.slane %v385_v12, 4 }
  0x86   :  { %v74_v26 = vld.sshfl [vmem:[#allocation1 + $0x10] sm:$0xff pattern:$0x75316420]  ;;  %v75_v27 = vld.sshfl [vmem:[#allocation1 + $0x18] sm:$0xff pattern:$0x75316420]  ;;  %v65_v28 = vmul.f32 %v61_v25, %v40_v21  ;;  %v122_v41 = vmul.f32 %v118_v35, %v97_v34  ;;  %v324_v34 = vsel %vm272_vm5, %v322_v3, %v319_v61 }
  0x87   :  { %128 = vst [vmem:[#allocation1 + $0x10] ss:$2 sm:$0xff] %v123_v24  ;;  %82 = vrot.lane.b32.xlu1 %v75_v27, %s764_s1  ;;  %80 = vrot.lane.b32.xlu0 %v74_v26, %s764_s1  ;;  %v285_v21 = vld [vmem:[%s1070_s0] sm:$0x77]  ;;  %v370_v35 = vld [vmem:[%s1070_s0 + $0x8] sm:$0x77] }
  0x88   :  { %69 = vst [vmem:[#allocation1] ss:$2 sm:$0xff] %v65_v28 }
  0x89   :  { %v240_v33 = vpop.permute.xlu0 %239  ;;  %v238_v47 = vpop.permute.xlu1 %237 }
  0x8a   :  { %v242_v39 = vrot.slane %v240_v33, 4  ;;  %v241_v52 = vrot.slane %v238_v47, 4 }
  0x8c   :  { %v246_v51 = vsel %vm244_vm4, %v240_v33, %v242_v39  ;;  %v243_v58 = vsel %vm50_vm0, %v241_v52, %v242_v39  ;;  %v305_v33 = vld [vmem:[%s1070_s0] sm:$0x77] }
  0x8d   :  { %v250_v54 = vmul.f32 %v246_v51, %v225_v50  ;;  %v245_v1 = vsel %vm244_vm4, %v238_v47, %v243_v58  ;;  %v329_v39 = vmul.f32 %v324_v34, %v305_v33  ;;  %v501_v47 = vpop.permute.xlu2 %500  ;;  %v369_v51 = vld [vmem:[%s1070_s0] sm:$0x77] }
  0x8e   :  { %v132_v40 = vld.sshfl [vmem:[#allocation1 + $0x18] sm:$0xff pattern:$0x75316420]  ;;  %v131_v42 = vld.sshfl [vmem:[#allocation1 + $0x10] sm:$0xff pattern:$0x75316420]  ;;  %v249_v4 = vmul.f32 %v245_v1, %v224_v0 }
  0x8f   :  { %v888_v44 = vld.sshfl [vmem:[#allocation1] sm:$0xff pattern:$0x75316420]  ;;  %v73_v45 = vld.sshfl [vmem:[#allocation1 + $0x8] sm:$0xff pattern:$0x75316420] }
  0x90   :  { %126 = vst [vmem:[#allocation1] ss:$2 sm:$0xff] %v122_v41  ;;  %78 = vrot.lane.b32.xlu2 %v73_v45, %s764_s1  ;;  %v135_v55 = vrot.slane %v131_v42, 5  ;;  %v136_v6 = vrot.slane %v132_v40, 5 }
  0x91   :  { %189 = vst [vmem:[#allocation1 + $0x10] ss:$2 sm:$0xff] %v184_v43  ;;  %v321_v2 = vpop.permute.xlu0 %320  ;;  %v383_v13 = vpop.permute.xlu1 %382 }
  0x92   :  { %v323_v5 = vrot.slane %v321_v2, 4  ;;  %v386_v18 = vrot.slane %v383_v13, 4 }
  0x94   :  { %v325_v16 = vsel %vm50_vm0, %v322_v3, %v323_v5  ;;  %v389_v24 = vsel %vm50_vm0, %v386_v18, %v387_v17  ;;  %v388_v52 = vsel %vm206_vm6, %v386_v18, %v383_v13  ;;  %v428_v3 = vld [vmem:[%s1070_s0] sm:$0x77]  ;;  %v488_v5 = vld [vmem:[%s1070_s0 + $0x8] sm:$0x77] }
  0x95   :  { %v326_v20 = vsel %vm272_vm5, %v325_v16, %v321_v2  ;;  %v390_v36 = vsel %vm206_vm6, %v389_v24, %v385_v12  ;;  %v393_v58 = vmul.f32 %v388_v52, %v369_v51  ;;  %v487_v12 = vld [vmem:[%s1070_s0] sm:$0x77] }
  0x96   :  { %v330_v26 = vmul.f32 %v326_v20, %v306_v19  ;;  %v394_v40 = vmul.f32 %v390_v36, %v370_v35 }
  0x97   :  { %v905_v56 = vld.sshfl [vmem:[#allocation1] sm:$0xff pattern:$0x75316420]  ;;  %v130_v57 = vld.sshfl [vmem:[#allocation1 + $0x8] sm:$0xff pattern:$0x75316420] }
  0x98   :  { %141 = vrot.lane.b32.xlu2 %v135_v55, %s763_s19  ;;  %v193_v59 = vld.sshfl [vmem:[#allocation1 + $0x18] sm:$0xff pattern:$0x75316420]  ;;  %v134_v60 = vrot.slane %v130_v57, 5  ;;  %187 = vst [vmem:[#allocation1] ss:$2 sm:$0xff] %v183_v53 }
  0x99   :  { %v197_v62 = vrot.slane %v193_v59, 2  ;;  %v192_v63 = vld.sshfl [vmem:[#allocation1 + $0x10] sm:$0xff pattern:$0x75316420]  ;;  %v442_v25 = vpop.permute.xlu0 %441  ;;  %v444_v32 = vpop.permute.xlu1 %443  ;;  %v429_v53 = vld [vmem:[%s1070_s0 + $0x8] sm:$0x77] }
  0x9a   :  { %139 = vrot.lane.b32.xlu1 %v134_v60, %s763_s19  ;;  %255 = vst [vmem:[#allocation1 + $0x10] ss:$2 sm:$0xff] %v250_v54  ;;  %v196_v10 = vrot.slane %v192_v63, 2  ;;  %v446_v37 = vrot.slane %v444_v32, 4  ;;  %v445_v38 = vrot.slane %v442_v25, 4  ;;  %v504_v55 = vrot.slane %v501_v47, 4 }
  0x9b   :  { %204 = vrot.lane.b32.xlu0 %v197_v62, %s762_s16 }
  0x9c   :  { %v448_v43 = vsel %vm50_vm0, %v445_v38, %v446_v37 }
  0x9d   :  { %v449_v54 = vsel %vm145_vm7, %v448_v43, %v444_v32  ;;  %v133_v32 = vrot.slane %v905_v56, 5 }
  0x9e   :  { %v453_v59 = vmul.f32 %v449_v54, %v429_v53 }
  0x9f   :  { %v191_v8 = vld.sshfl [vmem:[#allocation1 + $0x8] sm:$0xff pattern:$0x75316420]  ;;  %v922_v9 = vld.sshfl [vmem:[#allocation1] sm:$0xff pattern:$0x75316420] }
  0xa0   :  { %143 = vrot.lane.b32.xlu2 %v136_v6, %s763_s19  ;;  %v195_v11 = vrot.slane %v191_v8, 2  ;;  %253 = vst [vmem:[#allocation1] ss:$2 sm:$0xff] %v249_v4  ;;  %v447_v4 = vsel %vm145_vm7, %v445_v38, %v442_v25  ;;  %v194_v33 = vrot.slane %v922_v9, 2 }
  0xa1   :  { %v259_v14 = vld.sshfl [vmem:[#allocation1 + $0x18] sm:$0xff pattern:$0x75316420]  ;;  %v258_v15 = vld.sshfl [vmem:[#allocation1 + $0x10] sm:$0xff pattern:$0x75316420]  ;;  %v503_v48 = vpop.permute.xlu0 %502 }
  0xa2   :  { %202 = vrot.lane.b32.xlu1 %v196_v10, %s762_s16  ;;  %292 = vst [vmem:[#allocation1 + $0x11] ss:$2 sm:$0xff] %v286_v7  ;;  %v263_v27 = vrot.slane %v259_v14, 7  ;;  %v262_v28 = vrot.slane %v258_v15, 7  ;;  %v505_v57 = vrot.slane %v503_v48, 4  ;;  %v452_v7 = vmul.f32 %v447_v4, %v428_v3 }
  0xa3   :  { %200 = vrot.lane.b32.xlu0 %v195_v11, %s762_s16  ;;  %v506_v15 = vsel %vm84_vm8, %v504_v55, %v501_v47 }
  0xa4   :  { %v507_v0 = vsel %vm50_vm0, %v504_v55, %v505_v57  ;;  %v511_v19 = vmul.f32 %v506_v15, %v487_v12  ;;  %v766_v12 = vmov 0  }
  0xa5   :  { %v508_v6 = vsel %vm84_vm8, %v507_v0, %v503_v48  ;;  %754 = vset.pattern.permute.xlu0 %v766_v12 }
  0xa6   :  { %v512_v8 = vmul.f32 %v508_v6, %v488_v5 }
  0xa7   :  { %v257_v22 = vld.sshfl [vmem:[#allocation1 + $0x8] sm:$0xff pattern:$0x75316420]  ;;  %v937_v23 = vld.sshfl [vmem:[#allocation1] sm:$0xff pattern:$0x75316420] }
  0xa8   :  { %v261_v29 = vrot.slane %v257_v22, 7  ;;  %290 = vst [vmem:[#allocation1 + $0x1] ss:$2 sm:$0xff] %v285_v21  ;;  %v260_v34 = vrot.slane %v937_v23, 7 }
  0xa9   :  { %v295_v30 = vld.sshfl [vmem:[#allocation1 + $0x10] sm:$0xff pattern:$0x75316420]  ;;  %v296_v31 = vld.sshfl [vmem:[#allocation1 + $0x18] sm:$0xff pattern:$0x75316420] }
  0xaa   :  { %270 = vrot.lane.b32.xlu1 %v263_v27, %s761_s15  ;;  %335 = vst [vmem:[#allocation1 + $0x10] ss:$2 sm:$0xff] %v330_v26  ;;  %266 = vrot.lane.b32.xlu2 %v261_v29, %s761_s15 }
  0xab   :  { %268 = vrot.lane.b32.xlu0 %v262_v28, %s761_s15  ;;  %303 = vst [vmem:[#allocation2 + $0x30] sm:$0x70] %v295_v30 }
  0xac   :  { %304 = vst [vmem:[#allocation2 + $0x38] sm:$0x70] %v296_v31 }
  0xaf   :  { %v293_v41 = vld.sshfl [vmem:[#allocation1] sm:$0xff pattern:$0x75316420]  ;;  %v294_v42 = vld.sshfl [vmem:[#allocation1 + $0x8] sm:$0xff pattern:$0x75316420] }
  0xb0   :  { %333 = vst [vmem:[#allocation1] ss:$2 sm:$0xff] %v329_v39 }
  0xb1   :  { %v338_v45 = vld.sshfl [vmem:[#allocation1 + $0x10] sm:$0xff pattern:$0x75316420]  ;;  %v339_v46 = vld.sshfl [vmem:[#allocation1 + $0x18] sm:$0xff pattern:$0x75316420] }
  0xb2   :  { %v342_v49 = vrot.slane %v338_v45, 1  ;;  %v343_v50 = vrot.slane %v339_v46, 1  ;;  %399 = vst [vmem:[#allocation1 + $0x10] ss:$2 sm:$0xff] %v394_v40 }
  0xb3   :  { %301 = vst [vmem:[#allocation2 + $0x20] sm:$0x70] %v293_v41 }
  0xb4   :  { %348 = vrot.lane.b32.xlu1 %v342_v49, %s760_s12  ;;  %350 = vrot.lane.b32.xlu2 %v343_v50, %s760_s12  ;;  %302 = vst [vmem:[#allocation2 + $0x28] sm:$0x70] %v294_v42 }
  0xb7   :  { %v337_v60 = vld.sshfl [vmem:[#allocation1 + $0x8] sm:$0xff pattern:$0x75316420]  ;;  %v336_v61 = vld.sshfl [vmem:[#allocation1] sm:$0xff pattern:$0x75316420] }
  0xb8   :  { %v341_v62 = vrot.slane %v337_v60, 1  ;;  %v340_v63 = vrot.slane %v336_v61, 1  ;;  %397 = vst [vmem:[#allocation1] ss:$2 sm:$0xff] %v393_v58 }
  0xb9   :  { %v403_v1 = vld.sshfl [vmem:[#allocation1 + $0x18] sm:$0xff pattern:$0x75316420]  ;;  %v402_v2 = vld.sshfl [vmem:[#allocation1 + $0x10] sm:$0xff pattern:$0x75316420] }
  0xba   :  { %344 = vrot.lane.b32.xlu0 %v340_v63, %s760_s12  ;;  %458 = vst [vmem:[#allocation1 + $0x10] ss:$2 sm:$0xff] %v453_v59  ;;  %v406_v14 = vrot.slane %v402_v2, 6  ;;  %v407_v18 = vrot.slane %v403_v1, 6 }
  0xbc   :  { %346 = vrot.lane.b32.xlu1 %v341_v62, %s760_s12 }
  0xbf   :  { %v400_v10 = vld.sshfl [vmem:[#allocation1] sm:$0xff pattern:$0x75316420]  ;;  %v401_v11 = vld.sshfl [vmem:[#allocation1 + $0x8] sm:$0xff pattern:$0x75316420] }
  0xc0   :  { %v404_v13 = vrot.slane %v400_v10, 6  ;;  %456 = vst [vmem:[#allocation1] ss:$2 sm:$0xff] %v452_v7  ;;  %v405_v25 = vrot.slane %v401_v11, 6 }
  0xc1   :  { %v462_v16 = vld.sshfl [vmem:[#allocation1 + $0x18] sm:$0xff pattern:$0x75316420]  ;;  %v461_v17 = vld.sshfl [vmem:[#allocation1 + $0x10] sm:$0xff pattern:$0x75316420] }
  0xc2   :  { %408 = vrot.lane.b32.xlu2 %v404_v13, %s759_s7  ;;  %412 = vrot.lane.b32.xlu0 %v406_v14, %s759_s7  ;;  %517 = vst [vmem:[#allocation1 + $0x10] ss:$2 sm:$0xff] %v512_v8  ;;  %v465_v20 = vrot.slane %v461_v17, 3  ;;  %v466_v27 = vrot.slane %v462_v16, 3  ;;  %v567_v8 = vld [vmem:[%s1071_s3] sm:$0x7] }
  0xc4   :  { %414 = vrot.lane.b32.xlu1 %v407_v18, %s759_s7 }
  0xc7   :  { %v459_v21 = vld.sshfl [vmem:[#allocation1] sm:$0xff pattern:$0x75316420]  ;;  %v460_v22 = vld.sshfl [vmem:[#allocation1 + $0x8] sm:$0xff pattern:$0x75316420] }
  0xc8   :  { %v463_v24 = vrot.slane %v459_v21, 3  ;;  %515 = vst [vmem:[#allocation1] ss:$2 sm:$0xff] %v511_v19  ;;  %v464_v26 = vrot.slane %v460_v22, 3  ;;  %v767_v21 = vmov 65535  }
  0xc9   :  { %v520_v28 = vld.sshfl [vmem:[#allocation1 + $0x10] sm:$0xff pattern:$0x75316420]  ;;  %v521_v29 = vld.sshfl [vmem:[#allocation1 + $0x18] sm:$0xff pattern:$0x75316420] }
  0xca   :  { %471 = vrot.lane.b32.xlu2 %v465_v20, %s757_s27  ;;  %410 = vrot.lane.b32.xlu0 %v405_v25, %s759_s7  ;;  %v692_v20 = vld [vmem:[%s1072_s4] sm:$0x7] }
  0xcc   :  { %467 = vrot.lane.b32.xlu1 %v463_v24, %s757_s27 }
  0xcf   :  { %v518_v30 = vld.sshfl [vmem:[#allocation1] sm:$0xff pattern:$0x75316420]  ;;  %v519_v31 = vld.sshfl [vmem:[#allocation1 + $0x8] sm:$0xff pattern:$0x75316420] }
  0xd2   :  { %469 = vrot.lane.b32.xlu2 %v464_v26, %s757_s27  ;;  %473 = vrot.lane.b32.xlu0 %v466_v27, %s757_s27 }
  0xd4   :  { %526 = vrot.lane.b32.xlu1 %v520_v28, %s758_s28 }
  0xda   :  { %528 = vrot.lane.b32.xlu2 %v521_v29, %s758_s28  ;;  %522 = vrot.lane.b32.xlu0 %v518_v30, %s758_s28  ;;  %v702_v30 = vld [vmem:[%s1073_s5] sm:$0x7] }
  0xdc   :  { %524 = vrot.lane.b32.xlu1 %v519_v31, %s758_s28 }
  0xe2   :  { %76 = vrot.lane.b32.xlu2 %v888_v44, %s764_s1  ;;  %137 = vrot.lane.b32.xlu0 %v133_v32, %s763_s19 }
  0xe4   :  { %198 = vrot.lane.b32.xlu1 %v194_v33, %s762_s16 }
  0xea   :  { %v996_v35 = vpop.permute.xlu2 %78  ;;  %264 = vrot.lane.b32.xlu2 %v260_v34, %s761_s15  ;;  %570 = vperm.xlu0 %754, %v567_v8  }
  0xf2   :  { %v142_v36 = vpop.permute.xlu2 %141  ;;  %695 = vperm.xlu0 %754, %v692_v20  }
  0xf9   :  { %v83_v37 = vpop.permute.xlu1 %82  ;;  %v81_v38 = vpop.permute.xlu0 %80 }
  0xfa   :  { %v86_v56 = vsel %vm84_vm8, %v996_v35, %v81_v38  ;;  %v87_v44 = vsel %vm84_vm8, %v81_v38, %v83_v37  ;;  %v144_v39 = vpop.permute.xlu2 %143  ;;  %705 = vperm.xlu0 %754, %v702_v30  }
  0xfb   :  { %95 = vst [vmem:[#allocation2 + $0x10] sm:$0x7] %v86_v56  ;;  %v148_v9 = vsel %vm145_vm7, %v142_v36, %v144_v39 }
  0xfc   :  { %96 = vst [vmem:[#allocation2 + $0x18] sm:$0x7] %v87_v44 }
  0xfd   :  { %157 = vst [vmem:[#allocation2 + $0x18] sm:$0x38] %v148_v9 }
 0x104   :  { %v1003_v40 = vpop.permute.xlu2 %266 }
 0x10c   :  { %v1005_v23 = vpop.permute.xlu1 %139 }
 0x10d   :  { %v205_v41 = vpop.permute.xlu0 %204  ;;  %v147_v42 = vsel %vm145_vm7, %v1005_v23, %v142_v36 }
 0x10e   :  { %156 = vst [vmem:[#allocation2 + $0x10] sm:$0x38] %v147_v42  ;;  %v351_v43 = vpop.permute.xlu2 %350  ;;  %v542_v42 = vld [vmem:[%s1074_s2] sm:$0x3] }
 0x10f   :  { %363 = vst.msk [vmem:[#allocation2 + $0x38] sm:$0x80] %vm362_vm9, %v351_v43 }
 0x110   :  { %368 = vst.msk [vmem:[#allocation2 + $0x58] sm:$0x3] %vm367_vm10, %v351_v43 }
 0x114   :  { %v203_v45 = vpop.permute.xlu1 %202 }
 0x115   :  { %v209_v46 = vsel %vm206_vm6, %v203_v45, %v205_v41  ;;  %v1010_v47 = vpop.permute.xlu0 %200 }
 0x116   :  { %218 = vst [vmem:[#allocation2 + $0x18] sm:$0xc0] %v209_v46  ;;  %v208_v48 = vsel %vm206_vm6, %v1010_v47, %v203_v45 }
 0x117   :  { %223 = vst [vmem:[#allocation2 + $0x38] sm:$0x1] %v209_v46 }
 0x118   :  { %217 = vst [vmem:[#allocation2 + $0x10] sm:$0xc0] %v208_v48 }
 0x119   :  { %222 = vst [vmem:[#allocation2 + $0x30] sm:$0x1] %v208_v48 }
 0x11c   :  { %v271_v49 = vpop.permute.xlu1 %270  ;;  %v409_v50 = vpop.permute.xlu2 %408 }
 0x11d   :  { %v269_v51 = vpop.permute.xlu0 %268  ;;  %v546_v56 = vld [vmem:[#allocation2 + $0x18] sm:$0xff] }
 0x11e   :  { %v274_v52 = vsel %vm272_vm5, %v1003_v40, %v269_v51  ;;  %v275_v53 = vsel %vm272_vm5, %v269_v51, %v271_v49 }
 0x11f   :  { %283 = vst [vmem:[#allocation2 + $0x30] sm:$0xe] %v274_v52  ;;  %v545_v41 = vld [vmem:[#allocation2 + $0x10] sm:$0xff] }
 0x120   :  { %284 = vst [vmem:[#allocation2 + $0x38] sm:$0xe] %v275_v53 }
 0x124   :  { %v472_v54 = vpop.permute.xlu2 %471 }
 0x126   :  { %v349_v55 = vpop.permute.xlu1 %348 }
 0x127   :  { %v354_v57 = vsel %vm244_vm4, %v349_v55, %v351_v43  ;;  %v550_v37 = vld [vmem:[#allocation2 + $0x38] sm:$0xff] }
 0x128   :  { %361 = vst [vmem:[#allocation2 + $0x30] sm:$0x80] %v354_v57  ;;  %v562_v44 = vpack.c.bf16 %v550_v37, %v546_v56 }
 0x129   :  { %366 = vst [vmem:[#allocation2 + $0x50] sm:$0x3] %v354_v57 }
 0x12c   :  { %v470_v58 = vpop.permute.xlu2 %469  ;;  %v345_v59 = vpop.permute.xlu0 %344 }
 0x12d   :  { %v476_v60 = vsel %vm117_vm2, %v470_v58, %v472_v54 }
 0x12e   :  { %v347_v61 = vpop.permute.xlu1 %346  ;;  %483 = vst [vmem:[#allocation2 + $0x48] sm:$0xe0] %v476_v60 }
 0x12f   :  { %v353_v62 = vsel %vm244_vm4, %v347_v61, %v349_v55  ;;  %v352_v63 = vsel %vm244_vm4, %v345_v59, %v347_v61  ;;  %vm578_vm4 = vcmask 1045504   ;;  %v549_v39 = vld [vmem:[#allocation2 + $0x30] sm:$0xff] }
 0x130   :  { %360 = vst [vmem:[#allocation2 + $0x28] sm:$0x80] %v353_v62  ;;  %v561_v45 = vpack.c.bf16 %v549_v39, %v545_v41 }
 0x131   :  { %365 = vst [vmem:[#allocation2 + $0x48] sm:$0x3] %v353_v62 }
 0x132   :  { %359 = vst [vmem:[#allocation2 + $0x20] sm:$0x80] %v352_v63 }
 0x133   :  { %364 = vst [vmem:[#allocation2 + $0x40] sm:$0x3] %v352_v63 }
 0x134   :  { %v529_v0 = vpop.permute.xlu2 %528  ;;  %v413_v1 = vpop.permute.xlu0 %412 }
 0x135   :  { %541 = vst.msk [vmem:[#allocation2 + $0x78] sm:$0x7] %vm540_vm11, %v529_v0 }
 0x136   :  { %v415_v2 = vpop.permute.xlu1 %414 }
 0x137   :  { %427 = vst.msk [vmem:[#allocation2 + $0x58] sm:$0x1c] %vm426_vm12, %v415_v2  ;;  %v418_v3 = vsel %vm178_vm3, %v413_v1, %v415_v2 }
 0x138   :  { %425 = vst [vmem:[#allocation2 + $0x50] sm:$0x1c] %v418_v3 }
 0x13c   :  { %v77_v4 = vpop.permute.xlu2 %76  ;;  %v411_v5 = vpop.permute.xlu0 %410  ;;  %v558_v26 = vld [vmem:[#allocation2 + $0x78] sm:$0x7] }
 0x13d   :  { %v85_v6 = vsel %vm84_vm8, %v77_v4, %v996_v35  ;;  %93 = vst.msk [vmem:[#allocation2] sm:$0x7] %vm92_vm13, %v77_v4  ;;  %v416_v7 = vsel %vm178_vm3, %v409_v50, %v411_v5  ;;  %v417_v11 = vsel %vm178_vm3, %v411_v5, %v413_v1  ;;  %vm577_vm3 = vcmask 1044480  }
 0x13e   :  { %v468_v10 = vpop.permute.xlu1 %467  ;;  %94 = vst [vmem:[#allocation2 + $0x8] sm:$0x7] %v85_v6  ;;  %v579_v22 = vsel %vm577_vm3, 4294967295, %v767_v21  ;;  %vm219_vm8 = vcmask 1040504  }
 0x13f   :  { %v475_v13 = vsel %vm117_vm2, %v468_v10, %v470_v58  ;;  %423 = vst [vmem:[#allocation2 + $0x40] sm:$0x1c] %v416_v7  ;;  %v580_v27 = vsel %vm578_vm4, %v579_v22, 0 }
 0x140   :  { %482 = vst [vmem:[#allocation2 + $0x40] sm:$0xe0] %v475_v13 }
 0x141   :  { %424 = vst [vmem:[#allocation2 + $0x48] sm:$0x1c] %v417_v11 }
 0x144   :  { %v474_v14 = vpop.permute.xlu0 %473  ;;  %v265_v15 = vpop.permute.xlu2 %264 }
 0x145   :  { %v477_v16 = vsel %vm117_vm2, %v472_v54, %v474_v14  ;;  %486 = vst.msk [vmem:[#allocation2 + $0x58] sm:$0xe0] %vm485_vm14, %v474_v14  ;;  %v273_v18 = vsel %vm272_vm5, %v265_v15, %v1003_v40  ;;  %vm153_vm2 = vcmask 1045635   ;;  %vm214_vm5 = vcmask 1047678  }
 0x146   :  { %v527_v17 = vpop.permute.xlu1 %526  ;;  %484 = vst [vmem:[#allocation2 + $0x50] sm:$0xe0] %v477_v16 }
 0x147   :  { %v532_v19 = vsel %vm60_vm1, %v527_v17, %v529_v0  ;;  %281 = vst.msk [vmem:[#allocation2 + $0x20] sm:$0xe] %vm280_vm15, %v265_v15 }
 0x148   :  { %539 = vst [vmem:[#allocation2 + $0x70] sm:$0x7] %v532_v19  ;;  %v552_v48 = vld [vmem:[#allocation2 + $0x48] sm:$0xff] }
 0x149   :  { %282 = vst [vmem:[#allocation2 + $0x28] sm:$0xe] %v273_v18 }
 0x14c   :  { %v523_v24 = vpop.permute.xlu0 %522  ;;  %v554_v25 = vld [vmem:[#allocation2 + $0x58] sm:$0xff] }
 0x14d   :  { %v566_v28 = vpack.c.bf16 %v558_v26, %v554_v25  ;;  %v553_v29 = vld [vmem:[#allocation2 + $0x50] sm:$0xff] }
 0x14e   :  { %v525_v31 = vpop.permute.xlu1 %524 }
 0x14f   :  { %v531_v32 = vsel %vm60_vm1, %v525_v31, %v527_v17  ;;  %v530_v33 = vsel %vm60_vm1, %v523_v24, %v525_v31  ;;  %v591_v34 = vand.u32 %v580_v27, %v566_v28  ;;  %v557_v35 = vld [vmem:[#allocation2 + $0x70] sm:$0x7]  ;;  %vm573_vm1 = vcmask 220160  }
 0x150   :  { %538 = vst [vmem:[#allocation2 + $0x68] sm:$0x7] %v531_v32  ;;  %v565_v36 = vpack.c.bf16 %v557_v35, %v553_v29 }
 0x151   :  { %537 = vst [vmem:[#allocation2 + $0x60] sm:$0x7] %v530_v33  ;;  %638 = vmatpush.bf16.msra.mxu3 %v591_v34 }
 0x152   :  { %v588_v38 = vand.u32 %v580_v27, %v565_v36 }
 0x154   :  { %625 = vmatpush.bf16.msra.mxu2 %v588_v38  ;;  %v138_v9 = vpop.permute.xlu0 %137 }
 0x155   :  { %v146_v40 = vsel %vm145_vm7, %v138_v9, %v1005_v23  ;;  %154 = vst.msk [vmem:[#allocation2] sm:$0x38] %vm153_vm2, %v138_v9  ;;  %639 = vmatpush.bf16.msra.mxu3 %v562_v44  ;;  %v551_v23 = vld [vmem:[#allocation2 + $0x40] sm:$0xff] }
 0x156   :  { %v199_v43 = vpop.permute.xlu1 %198  ;;  %155 = vst [vmem:[#allocation2 + $0x8] sm:$0x38] %v146_v40 }
 0x157   :  { %v207_v46 = vsel %vm206_vm6, %v199_v43, %v1010_v47  ;;  %215 = vst.msk [vmem:[#allocation2] sm:$0xc0] %vm214_vm5, %v199_v43  ;;  %v556_v49 = vld [vmem:[#allocation2 + $0x68] sm:$0x7]  ;;  %vm645_vm6 = vcmask 1042432  }
 0x158   :  { %216 = vst [vmem:[#allocation2 + $0x8] sm:$0xc0] %v207_v46  ;;  %626 = vmatpush.bf16.msra.mxu2 %v561_v45  ;;  %742 = vmatmul.msk.bf16.vlgmr.msra.gmra.mxu3 %vm573_vm1, %v542_v42  ;;  %v555_v50 = vld [vmem:[#allocation2 + $0x60] sm:$0x7]  ;;  %v564_v51 = vpack.c.bf16 %v556_v49, %v552_v48 }
 0x159   :  { %220 = vst.msk [vmem:[#allocation2 + $0x20] sm:$0x1] %vm219_vm8, %v199_v43  ;;  %v563_v52 = vpack.c.bf16 %v555_v50, %v551_v23 }
 0x15a   :  { %221 = vst [vmem:[#allocation2 + $0x28] sm:$0x1] %v207_v46  ;;  %v585_v53 = vand.u32 %v580_v27, %v564_v51 }
 0x15b   :  { %741 = vmatmul.msk.bf16.vlgmr.msra.gmra.mxu2 %vm573_vm1, %v542_v42  ;;  %v582_v54 = vand.u32 %v580_v27, %v563_v52 }
 0x15c   :  { %612 = vmatpush.bf16.msra.mxu1 %v585_v53  ;;  %v571_v63 = vpop.permute.xlu0 %570 }
 0x15d   :  { %599 = vmatpush.bf16.msra.mxu0 %v582_v54 }
 0x15e   :  { %v543_v47 = vld [vmem:[#allocation2] sm:$0xff] }
 0x15f   :  { %v544_v55 = vld [vmem:[#allocation2 + $0x8] sm:$0xff] }
 0x160   :  { %v547_v57 = vld [vmem:[#allocation2 + $0x20] sm:$0xff] }
 0x161   :  { %v559_v58 = vpack.c.bf16 %v547_v57, %v543_v47  ;;  %v548_v59 = vld [vmem:[#allocation2 + $0x28] sm:$0xff] }
 0x162   :  { %v560_v60 = vpack.c.bf16 %v548_v59, %v544_v55 }
 0x163   :  { %600 = vmatpush.bf16.msra.mxu0 %v559_v58 }
 0x164   :  { %613 = vmatpush.bf16.msra.mxu1 %v560_v60  ;;  %v696_v39 = vpop.permute.xlu0 %695 }
 0x166   :  { %739 = vmatmul.msk.bf16.vlgmr.msra.gmra.mxu0 %vm573_vm1, %v542_v42 }
 0x167   :  { %740 = vmatmul.msk.bf16.vlgmr.msra.gmra.mxu1 %vm573_vm1, %v542_v42 }
 0x16c   :  { %v706_v55 = vpop.permute.xlu0 %705 }
 0x1db   :  { %v641_v61 = vpop.f32.mrf.mxu3 }
 0x1dc   :  { %v642_v5 = vadd.f32 %v641_v61, %v571_v63 }
 0x1de   :  { %v628_v62 = vpop.f32.mrf.mxu2  ;;  %v659_v17 = vmul.f32 %v642_v5, %v642_v5  ;;  %v651_v22 = vsel %vm645_vm6, %v642_v5, 0.0 }
 0x1df   :  { %v629_v0 = vadd.f32 %v628_v62, %v571_v63 }
 0x1e0   :  { %v665_v28 = vsel %vm645_vm6, %v659_v17, 0.0 }
 0x1e1   :  { %v658_v11 = vmul.f32 %v629_v0, %v629_v0  ;;  %v649_v16 = vsel %vm645_vm6, %v629_v0, 0.0 }
 0x1e3   :  { %v602_v1 = vpop.f32.mrf.mxu0  ;;  %v643_v2 = vpop.f32.mrf.mxu3  ;;  %v663_v24 = vsel %vm645_vm6, %v658_v11, 0.0 }
 0x1e4   :  { %v603_v3 = vadd.f32 %v602_v1, %v571_v63  ;;  %v615_v4 = vpop.f32.mrf.mxu1 }
 0x1e5   :  { %v616_v6 = vadd.f32 %v615_v4, %v571_v63 }
 0x1e6   :  { %v646_v7 = vsel %vm645_vm6, %v603_v3, 0.0  ;;  %v656_v8 = vmul.f32 %v603_v3, %v603_v3  ;;  %v630_v10 = vpop.f32.mrf.mxu2 }
 0x1e7   :  { %v647_v12 = vsel %vm645_vm6, %v616_v6, 0.0  ;;  %v657_v13 = vmul.f32 %v616_v6, %v616_v6 }
 0x1e8   :  { %v648_v14 = vadd.f32 %v647_v12, %v646_v7  ;;  %v660_v15 = vsel %vm645_vm6, %v656_v8, 0.0 }
 0x1e9   :  { %v661_v18 = vsel %vm645_vm6, %v657_v13, 0.0 }
 0x1ea   :  { %v650_v19 = vadd.f32 %v649_v16, %v648_v14  ;;  %v662_v20 = vadd.f32 %v661_v18, %v660_v15 }
 0x1eb   :  { %v604_v21 = vpop.f32.mrf.mxu0 }
 0x1ec   :  { %v617_v25 = vpop.f32.mrf.mxu1  ;;  %v652_v26 = vadd.f32 %v651_v22, %v650_v19  ;;  %v664_v27 = vadd.f32 %v663_v24, %v662_v20 }
 0x1ee   :  { %653 = vadd.xlane.f32.xlu1 %v652_v26  ;;  %v666_v29 = vadd.f32 %v665_v28, %v664_v27 }
 0x1f0   :  { %667 = vadd.xlane.f32.xlu2 %v666_v29 }
 0x261   :  { %v654_v30 = vpop.xlane.xlu1 %653 }
 0x262   :  { %v655_v31 = vmul.f32 0.001953125, %v654_v30 }
 0x263   :  { %v668_v32 = vpop.xlane.xlu2 %667 }
 0x264   :  { %v669_v33 = vmul.f32 0.001953125, %v668_v32  ;;  %v670_v34 = vmul.f32 %v655_v31, %v655_v31  ;;  %v673_v42 = vsub.f32 %v603_v3, %v655_v31  ;;  %v674_v43 = vsub.f32 %v616_v6, %v655_v31 }
 0x265   :  { %v675_v45 = vsub.f32 %v629_v0, %v655_v31  ;;  %v676_v46 = vsub.f32 %v642_v5, %v655_v31 }
 0x266   :  { %v671_v35 = vsub.f32 %v669_v33, %v670_v34 }
 0x268   :  { %v672_v36 = vmax.f32 %v671_v35, 0.0 }
 0x26a   :  { %v677_v37 = vadd.f32 1e-05, %v672_v36 }
 0x26c   :  { %755 = vrsqrt.f32 %v677_v37  ;;  %vm684_vm9 = vweird.f32 %v677_v37 }
 0x272   :  { %v756_v38 = vpop.eup %755 }
 0x273   :  { %v679_v56 = vmul.f32 %v756_v38, %v677_v37  ;;  %vm685_vm7 = vweird.f32 %v756_v38 }
 0x274   :  { %vm686_vm10 = vmor %vm684_vm9, %vm685_vm7 }
 0x275   :  { %v680_v44 = vmul.f32 %v756_v38, %v679_v56 }
 0x277   :  { %v681_v9 = vmul.f32 0.5, %v680_v44 }
 0x279   :  { %v682_v40 = vsub.f32 1.5, %v681_v9 }
 0x27b   :  { %v683_v41 = vmul.f32 %v756_v38, %v682_v40 }
 0x27d   :  { %v687_v48 = vsel %vm686_vm10, %v756_v38, %v683_v41 }
 0x27e   :  { %v688_v49 = vmul.f32 %v687_v48, %v673_v42  ;;  %v689_v23 = vmul.f32 %v687_v48, %v674_v43  ;;  %v690_v50 = vmul.f32 %v687_v48, %v675_v45  ;;  %v691_v51 = vmul.f32 %v687_v48, %v676_v46 }
 0x280   :  { %v698_v52 = vmul.f32 %v696_v39, %v688_v49  ;;  %v699_v53 = vmul.f32 %v696_v39, %v689_v23  ;;  %v700_v54 = vmul.f32 %v696_v39, %v690_v50  ;;  %v701_v47 = vmul.f32 %v696_v39, %v691_v51 }
 0x282   :  { %v708_v57 = vadd.f32 %v706_v55, %v698_v52  ;;  %v709_v58 = vadd.f32 %v706_v55, %v699_v53  ;;  %v710_v59 = vadd.f32 %v706_v55, %v700_v54  ;;  %v711_v60 = vadd.f32 %v706_v55, %v701_v47 }
 0x284   :  { %v713_v61 = vmax.f32 %v709_v58, 0.0  ;;  %v715_v62 = vmax.f32 %v711_v60, 0.0  ;;  %v712_v63 = vmax.f32 %v708_v57, 0.0  ;;  %v714_v0 = vmax.f32 %v710_v59, 0.0 }
 0x286   :  { %v720_v1 = vrot.slane %v713_v61, 4  ;;  %v721_v2 = vrot.slane %v715_v62, 4 }
 0x288   :  { %v722_v3 = vsel %vm50_vm0, %v712_v63, %v720_v1  ;;  %v723_v4 = vsel %vm50_vm0, %v714_v0, %v721_v2 }
 0x289   :  { %726 = vst [vmem:[%s1075_s6] sm:$0x77] %v722_v3 }
 0x28a   :  { %727 = vst [vmem:[%s1075_s6 + $0x8] sm:$0x77] %v723_v4 }

// kernel: rsu6_forward.15
= control target key start
LH: loop header
LB: loop body
LE: loop exit
PB: predicated region body
PF: predicated region fallthrough
CT: control target
= control target key end

     0   :  { %s725_s13 = smov 5   ;;  %s726_s20 = smov 3   ;;  %vm349_vm0 = vcmask 261120   ;;  %vm354_vm1 = vcmask 257024   ;;  %v733_v42 = vmov 0.0   ;;  %vm459_vm2 = vcmask 216064   ;;  %s949_s1 = inlined_call_operand.vmem [shape: bf16[128,32], index: 1, kind: input, shape index: {}]   ;;  %s950_s2 = inlined_call_operand.vmem [shape: bf16[128,32], index: 2, kind: input, shape index: {}]   ;;  %s951_s3 = inlined_call_operand.vmem [shape: bf16[128,32], index: 3, kind: input, shape index: {}]   ;;  %s952_s4 = inlined_call_operand.vmem [shape: bf16[128,32], index: 4, kind: input, shape index: {}]   ;;  %s953_s5 = inlined_call_operand.vmem [shape: f32[9,32], index: 5, kind: input, shape index: {}]   ;;  %s954_s0 = inlined_call_operand.vmem [shape: f32[4,128], index: 0, kind: input, shape index: {}]   ;;  %s955_s7 = inlined_call_operand.vmem [shape: f32[4,1], index: 7, kind: input, shape index: {}]   ;;  %s956_s8 = inlined_call_operand.vmem [shape: f32[4,1], index: 8, kind: input, shape index: {}]   ;;  %s957_s9 = inlined_call_operand.vmem [shape: f32[4,1], index: 9, kind: input, shape index: {}]   ;;  %s958_s6 = inlined_call_operand.vmem [shape: bf16[4,36], index: 6, kind: input, shape index: {}]   ;;  %s959_s10 = inlined_call_operand.vmem [shape: f32[4,32], index: 10, kind: output, shape index: {}]  }
   0x1   :  { %v678_v0 = vld [vmem:[%s949_s1 + $0x38] sm:$0xff]  ;;  %v677_v4 = vld [vmem:[%s949_s1 + $0x30] sm:$0xff]  ;;  %v676_v8 = vld [vmem:[%s949_s1 + $0x28] sm:$0xff]  ;;  %s727_s23 = smov 123   ;;  %s728_s15 = smov 1   ;;  %353 = vst.msk [vmem:[#allocation2 + $0x18] sm:$0xff] %vm349_vm0, %v733_v42 }
   0x2   :  { %v686_v1 = vld [vmem:[%s950_s2 + $0x38] sm:$0xff]  ;;  %102 = vmatpush.bf16.msra.mxu0 %v678_v0  ;;  %v685_v5 = vld [vmem:[%s950_s2 + $0x30] sm:$0xff]  ;;  %v684_v9 = vld [vmem:[%s950_s2 + $0x28] sm:$0xff]  ;;  %s729_s28 = smov 4   ;;  %s730_s11 = smov 124   ;;  %350 = vst.msk [vmem:[#allocation2] sm:$0xff] %vm349_vm0, %v733_v42 }
   0x3   :  { %v694_v2 = vld [vmem:[%s951_s3 + $0x38] sm:$0xff]  ;;  %179 = vmatpush.bf16.msra.mxu1 %v686_v1  ;;  %v693_v6 = vld [vmem:[%s951_s3 + $0x30] sm:$0xff]  ;;  %v692_v10 = vld [vmem:[%s951_s3 + $0x28] sm:$0xff]  ;;  %355 = vst.msk [vmem:[#allocation2 + $0x20] sm:$0xf] %vm354_vm1, %v733_v42  ;;  %vm446_vm3 = vcmask 224256  }
   0x4   :  { %v702_v3 = vld [vmem:[%s952_s4 + $0x38] sm:$0xff]  ;;  %257 = vmatpush.bf16.msra.mxu2 %v694_v2  ;;  %v701_v7 = vld [vmem:[%s952_s4 + $0x30] sm:$0xff]  ;;  %v700_v11 = vld [vmem:[%s952_s4 + $0x28] sm:$0xff]  ;;  %351 = vst.msk [vmem:[#allocation2 + $0x8] sm:$0xff] %vm349_vm0, %v733_v42  ;;  %vm480_vm4 = vcmask 1041408   ;;  %vm393_vm5 = vcmask 257048  }
   0x5   :  { %335 = vmatpush.bf16.msra.mxu3 %v702_v3  ;;  %v675_v12 = vld [vmem:[%s949_s1 + $0x20] sm:$0xff]  ;;  %v715_v16 = vld [vmem:[%s953_s5 + $0x8] ss:$0 sm:$0xff]  ;;  %v674_v17 = vld [vmem:[%s949_s1 + $0x18] sm:$0xff]  ;;  %352 = vst.msk [vmem:[#allocation2 + $0x10] sm:$0xff] %vm349_vm0, %v733_v42  ;;  %vm433_vm6 = vcmask 232448  }
   0x6   :  { %103 = vmatpush.bf16.msra.mxu0 %v677_v4  ;;  %v683_v13 = vld [vmem:[%s950_s2 + $0x20] sm:$0xff]  ;;  %v682_v19 = vld [vmem:[%s950_s2 + $0x18] sm:$0xff]  ;;  %451 = vrot.lane.b32.xlu0 %v715_v16, %s725_s13  ;;  %v673_v24 = vld [vmem:[%s949_s1 + $0x10] sm:$0xff]  ;;  %vm420_vm7 = vcmask 248832   ;;  %vm380_vm8 = vcmask 257056   ;;  %vm367_vm9 = vcmask 257064  }
   0x7   :  { %180 = vmatpush.bf16.msra.mxu1 %v685_v5  ;;  %v691_v14 = vld [vmem:[%s951_s3 + $0x20] sm:$0xff]  ;;  %v690_v20 = vld [vmem:[%s951_s3 + $0x18] sm:$0xff]  ;;  %v681_v25 = vld [vmem:[%s950_s2 + $0x10] sm:$0xff]  ;;  %vm406_vm10 = vcmask 257032   ;;  %vm476_vm11 = vcmask 293888  }
   0x8   :  { %258 = vmatpush.bf16.msra.mxu2 %v693_v6  ;;  %v699_v15 = vld [vmem:[%s952_s4 + $0x20] sm:$0xff]  ;;  %v698_v21 = vld [vmem:[%s952_s4 + $0x18] sm:$0xff]  ;;  %v689_v26 = vld [vmem:[%s951_s3 + $0x10] sm:$0xff] }
   0x9   :  { %336 = vmatpush.bf16.msra.mxu3 %v701_v7  ;;  %v716_v18 = vld [vmem:[%s953_s5 + $0x6] ss:$0 sm:$0xff]  ;;  %v721_v22 = vld [vmem:[%s953_s5] ss:$0 sm:$0xff]  ;;  %v718_v23 = vld [vmem:[%s953_s5 + $0x5] ss:$0 sm:$0xff] }
   0xa   :  { %104 = vmatpush.bf16.msra.mxu0 %v676_v8  ;;  %425 = vrot.lane.b32.xlu1 %v716_v18, %s726_s20  ;;  %v697_v27 = vld [vmem:[%s952_s4 + $0x10] sm:$0xff]  ;;  %v717_v28 = vld [vmem:[%s953_s5 + $0x7] ss:$0 sm:$0xff]  ;;  %v722_v29 = vld [vmem:[%s953_s5 + $0x1] ss:$0 sm:$0xff] }
   0xb   :  { %181 = vmatpush.bf16.msra.mxu1 %v684_v9  ;;  %359 = vrot.lane.b32.xlu2 %v721_v22, %s727_s23  ;;  %v672_v30 = vld [vmem:[%s949_s1 + $0x8] sm:$0xff]  ;;  %v720_v34 = vld [vmem:[%s953_s5 + $0x2] ss:$0 sm:$0xff]  ;;  %v719_v40 = vld [vmem:[%s953_s5 + $0x3] ss:$0 sm:$0xff] }
   0xc   :  { %259 = vmatpush.bf16.msra.mxu2 %v692_v10  ;;  %v680_v31 = vld [vmem:[%s950_s2 + $0x8] sm:$0xff]  ;;  %v671_v35 = vld [vmem:[%s949_s1] sm:$0xff] }
   0xd   :  { %337 = vmatpush.bf16.msra.mxu3 %v700_v11  ;;  %v688_v32 = vld [vmem:[%s951_s3 + $0x8] sm:$0xff]  ;;  %v679_v36 = vld [vmem:[%s950_s2] sm:$0xff]  ;;  %s731_s2 = smov 125  }
   0xe   :  { %105 = vmatpush.bf16.msra.mxu0 %v675_v12  ;;  %412 = vrot.lane.b32.xlu0 %v718_v23, %s728_s15  ;;  %v696_v33 = vld [vmem:[%s952_s4 + $0x8] sm:$0xff]  ;;  %v36_v37 = vld [vmem:[%s954_s0] sm:$0xf]  ;;  %s732_s0 = smov 127   ;;  %v734_v12 = vmov 0  }
   0xf   :  { %182 = vmatpush.bf16.msra.mxu1 %v683_v13  ;;  %v687_v38 = vld [vmem:[%s951_s3] sm:$0xff]  ;;  %v37_v41 = vpack.c.bf16 %v36_v37, %v36_v37  ;;  %713 = vset.pattern.permute.xlu1 %v734_v12 }
  0x10   :  { %260 = vmatpush.bf16.msra.mxu2 %v691_v14  ;;  %v695_v39 = vld [vmem:[%s952_s4] sm:$0xff]  ;;  %714 = vset.pattern.permute.xlu0 %v734_v12 }
  0x11   :  { %338 = vmatpush.bf16.msra.mxu3 %v699_v15  ;;  %v470_v10 = vld [vmem:[%s955_s7] sm:$0xf] }
  0x12   :  { %106 = vmatpush.bf16.msra.mxu0 %v674_v17  ;;  %438 = vrot.lane.b32.xlu1 %v717_v28, %s729_s28  ;;  %v522_v14 = vld [vmem:[%s956_s8] sm:$0xf] }
  0x13   :  { %183 = vmatpush.bf16.msra.mxu1 %v682_v19  ;;  %372 = vrot.lane.b32.xlu2 %v722_v29, %s730_s11  ;;  %v529_v17 = vld [vmem:[%s957_s9] sm:$0xf] }
  0x14   :  { %261 = vmatpush.bf16.msra.mxu2 %v690_v20 }
  0x15   :  { %339 = vmatpush.bf16.msra.mxu3 %v698_v21 }
  0x16   :  { %107 = vmatpush.bf16.msra.mxu0 %v673_v24  ;;  %385 = vrot.lane.b32.xlu0 %v720_v34, %s731_s2 }
  0x17   :  { %184 = vmatpush.bf16.msra.mxu1 %v681_v25 }
  0x18   :  { %262 = vmatpush.bf16.msra.mxu2 %v689_v26 }
  0x19   :  { %340 = vmatpush.bf16.msra.mxu3 %v697_v27  ;;  %v461_v27 = vld [vmem:[%s958_s6] sm:$0x3] }
  0x1a   :  { %108 = vmatpush.bf16.msra.mxu0 %v672_v30  ;;  %398 = vrot.lane.b32.xlu1 %v719_v40, %s732_s0 }
  0x1b   :  { %185 = vmatpush.bf16.msra.mxu1 %v680_v31 }
  0x1c   :  { %263 = vmatpush.bf16.msra.mxu2 %v688_v32 }
  0x1d   :  { %341 = vmatpush.bf16.msra.mxu3 %v696_v33 }
  0x1e   :  { %109 = vmatpush.bf16.msra.mxu0 %v671_v35 }
  0x1f   :  { %186 = vmatpush.bf16.msra.mxu1 %v679_v36 }
  0x20   :  { %264 = vmatpush.bf16.msra.mxu2 %v687_v38 }
  0x21   :  { %342 = vmatpush.bf16.msra.mxu3 %v695_v39  ;;  %110 = vmatmul.bf16.vlgmr.msra.gmra.mxu0 %v37_v41 }
  0x22   :  { %187 = vmatmul.bf16.vlgmr.msra.gmra.mxu1 %v37_v41 }
  0x23   :  { %265 = vmatmul.bf16.vlgmr.msra.gmra.mxu2 %v37_v41 }
  0x24   :  { %343 = vmatmul.bf16.vlgmr.msra.gmra.mxu3 %v37_v41 }
  0x65   :  { %v360_v48 = vpop.permute.xlu2 %359 }
  0x6d   :  { %v373_v62 = vpop.permute.xlu2 %372 }
  0x78   :  { %v452_v45 = vpop.permute.xlu0 %451 }
  0x7c   :  { %v426_v47 = vpop.permute.xlu1 %425 }
  0x80   :  { %v413_v55 = vpop.permute.xlu0 %412 }
  0x84   :  { %v439_v61 = vpop.permute.xlu1 %438 }
  0x88   :  { %v386_v2 = vpop.permute.xlu0 %385 }
  0x8c   :  { %v399_v3 = vpop.permute.xlu1 %398 }
  0x9e   :  { %v111_v43 = vpop.f32.mrf.mxu0 }
  0x9f   :  { %v188_v44 = vpop.f32.mrf.mxu1 }
  0xa0   :  { %v192_v46 = vmax.f32 %v111_v43, %v188_v44 }
  0xa6   :  { %v266_v49 = vpop.f32.mrf.mxu2  ;;  %v113_v52 = vpop.f32.mrf.mxu0 }
  0xa7   :  { %v344_v50 = vpop.f32.mrf.mxu3  ;;  %v270_v51 = vmax.f32 %v192_v46, %v266_v49  ;;  %v190_v53 = vpop.f32.mrf.mxu1 }
  0xa9   :  { %v348_v54 = vmax.f32 %v270_v51, %v344_v50 }
  0xab   :  { %v454_v56 = vmul.f32 %v452_v45, %v348_v54  ;;  %408 = vst.msk [vmem:[#allocation2 + $0x10] sm:$0xf] %vm354_vm1, %v348_v54  ;;  %v428_v57 = vmul.f32 %v426_v47, %v348_v54  ;;  %v415_v58 = vmul.f32 %v413_v55, %v348_v54  ;;  %v441_v63 = vmul.f32 %v439_v61, %v348_v54 }
  0xac   :  { %v375_v0 = vmul.f32 %v373_v62, %v348_v54  ;;  %v362_v1 = vmul.f32 %v360_v48, %v348_v54  ;;  %v388_v4 = vmul.f32 %v386_v2, %v348_v54  ;;  %v401_v5 = vmul.f32 %v399_v3, %v348_v54 }
  0xad   :  { %456 = vrot.lane.b32.xlu2 %v454_v56, %s727_s23  ;;  %430 = vrot.lane.b32.xlu1 %v428_v57, %s731_s2 }
  0xae   :  { %417 = vrot.lane.b32.xlu0 %v415_v58, %s732_s0  ;;  %v268_v59 = vpop.f32.mrf.mxu2 }
  0xaf   :  { %v346_v60 = vpop.f32.mrf.mxu3 }
  0xb5   :  { %443 = vrot.lane.b32.xlu2 %v441_v63, %s730_s11  ;;  %377 = vrot.lane.b32.xlu1 %v375_v0, %s729_s28 }
  0xb6   :  { %364 = vrot.lane.b32.xlu0 %v362_v1, %s725_s13 }
  0xbd   :  { %390 = vrot.lane.b32.xlu2 %v388_v4, %s726_s20  ;;  %473 = vperm.xlu1 %713, %v470_v10  }
  0xbe   :  { %403 = vrot.lane.b32.xlu0 %v401_v5, %s728_s15 }
  0xc5   :  { %525 = vperm.xlu1 %713, %v522_v14  }
  0xcd   :  { %532 = vperm.xlu1 %713, %v529_v17  }
 0x107   :  { %v457_v6 = vpop.permute.xlu2 %456 }
 0x108   :  { %460 = vst.msk [vmem:[#allocation2 + $0x20] sm:$0xf] %vm459_vm2, %v457_v6 }
 0x10f   :  { %v444_v7 = vpop.permute.xlu2 %443  ;;  %v466_v8 = vld [vmem:[#allocation2 + $0x20] sm:$0xf] }
 0x110   :  { %447 = vst.msk [vmem:[#allocation2 + $0x1c] sm:$0xf] %vm446_vm3, %v444_v7  ;;  %v469_v9 = vpack.c.bf16 %v466_v8, %v466_v8 }
 0x112   :  { %v482_v11 = vsel %vm480_vm4, %v469_v9, 0 }
 0x113   :  { %489 = vmatpush.bf16.msrb.mxu0 %v482_v11 }
 0x117   :  { %v391_v13 = vpop.permute.xlu2 %390 }
 0x118   :  { %394 = vst.msk [vmem:[#allocation2 + $0x8] sm:$0xf] %vm393_vm5, %v391_v13 }
 0x11f   :  { %v431_v15 = vpop.permute.xlu1 %430 }
 0x120   :  { %v418_v16 = vpop.permute.xlu0 %417  ;;  %434 = vst.msk [vmem:[#allocation2 + $0x18] sm:$0xf] %vm433_vm6, %v431_v15 }
 0x121   :  { %421 = vst.msk [vmem:[#allocation2 + $0x14] sm:$0xf] %vm420_vm7, %v418_v16 }
 0x127   :  { %v378_v18 = vpop.permute.xlu1 %377  ;;  %v465_v20 = vld [vmem:[#allocation2 + $0x18] sm:$0xff] }
 0x128   :  { %v365_v19 = vpop.permute.xlu0 %364  ;;  %381 = vst.msk [vmem:[#allocation2 + $0x4] sm:$0xf] %vm380_vm8, %v378_v18  ;;  %v464_v21 = vld [vmem:[#allocation2 + $0x10] sm:$0xff] }
 0x129   :  { %368 = vst.msk [vmem:[#allocation2] sm:$0xf] %vm367_vm9, %v365_v19  ;;  %v468_v22 = vpack.c.bf16 %v465_v20, %v464_v21 }
 0x12b   :  { %490 = vmatpush.bf16.msrb.mxu0 %v468_v22 }
 0x12f   :  { %v474_v28 = vpop.permute.xlu1 %473 }
 0x130   :  { %v404_v23 = vpop.permute.xlu0 %403  ;;  %v462_v24 = vld [vmem:[#allocation2] sm:$0xff] }
 0x131   :  { %407 = vst.msk [vmem:[#allocation2 + $0xc] sm:$0xf] %vm406_vm10, %v404_v23 }
 0x137   :  { %v526_v46 = vpop.permute.xlu1 %525 }
 0x138   :  { %v463_v25 = vld [vmem:[#allocation2 + $0x8] sm:$0xff] }
 0x139   :  { %v467_v26 = vpack.c.bf16 %v463_v25, %v462_v24 }
 0x13b   :  { %491 = vmatpush.bf16.msrb.mxu0 %v467_v26 }
 0x13e   :  { %670 = vmatmul.msk.bf16.vlgmr.msrb.gmra.mxu0 %vm476_vm11, %v461_v27 }
 0x13f   :  { %v533_v54 = vpop.permute.xlu1 %532 }
 0x1bb   :  { %v493_v29 = vpop.f32.mrf.mxu0 }
 0x1bc   :  { %v494_v30 = vadd.f32 %v493_v29, %v474_v28 }
 0x1be   :  { %v497_v31 = vsel %vm354_vm1, %v494_v30, 0.0  ;;  %v501_v32 = vmul.f32 %v494_v30, %v494_v30 }
 0x1bf   :  { %498 = vadd.xlane.f32.xlu2 %v497_v31 }
 0x1c0   :  { %v502_v33 = vsel %vm354_vm1, %v501_v32, 0.0 }
 0x1c1   :  { %503 = vadd.xlane.f32.xlu0 %v502_v33 }
 0x1c3   :  { %v495_v34 = vpop.f32.mrf.mxu0 }
 0x232   :  { %v499_v35 = vpop.xlane.xlu2 %498 }
 0x233   :  { %v500_v36 = vmul.f32 0.03125, %v499_v35 }
 0x234   :  { %v504_v37 = vpop.xlane.xlu0 %503 }
 0x235   :  { %v506_v38 = vmul.f32 %v500_v36, %v500_v36  ;;  %v505_v39 = vmul.f32 0.03125, %v504_v37  ;;  %v509_v50 = vsub.f32 %v494_v30, %v500_v36 }
 0x237   :  { %v507_v40 = vsub.f32 %v505_v39, %v506_v38 }
 0x239   :  { %v508_v41 = vmax.f32 %v507_v40, 0.0 }
 0x23b   :  { %v510_v42 = vadd.f32 1e-05, %v508_v41 }
 0x23d   :  { %723 = vrsqrt.f32 %v510_v42  ;;  %vm517_vm13 = vweird.f32 %v510_v42 }
 0x243   :  { %v724_v43 = vpop.eup %723 }
 0x244   :  { %v512_v44 = vmul.f32 %v724_v43, %v510_v42  ;;  %vm518_vm12 = vweird.f32 %v724_v43 }
 0x245   :  { %vm519_vm14 = vmor %vm517_vm13, %vm518_vm12 }
 0x246   :  { %v513_v45 = vmul.f32 %v724_v43, %v512_v44 }
 0x248   :  { %v514_v47 = vmul.f32 0.5, %v513_v45 }
 0x24a   :  { %v515_v48 = vsub.f32 1.5, %v514_v47 }
 0x24c   :  { %v516_v49 = vmul.f32 %v724_v43, %v515_v48 }
 0x24e   :  { %v520_v51 = vsel %vm519_vm14, %v724_v43, %v516_v49 }
 0x24f   :  { %v521_v52 = vmul.f32 %v520_v51, %v509_v50 }
 0x251   :  { %v528_v53 = vmul.f32 %v526_v46, %v521_v52 }
 0x253   :  { %v535_v55 = vadd.f32 %v533_v54, %v528_v53 }
 0x255   :  { %v536_v56 = vmax.f32 %v535_v55, 0.0 }
 0x257   :  { %537 = vst.msk [vmem:[%s959_s10] sm:$0xf] %vm354_vm1, %v536_v56 }

// kernel: rsu6_forward.17
= control target key start
LH: loop header
LB: loop body
LE: loop exit
PB: predicated region body
PF: predicated region fallthrough
CT: control target
= control target key end

     0   :  { %vm43_vm0 = vcmask 1043456   ;;  %vm39_vm1 = vcmask 64512   ;;  %vm114_vm2 = vcmask 11264   ;;  %v204_v10 = vmov 0.0   ;;  %s296_s1 = inlined_call_operand.vmem [shape: bf16[8,2], index: 1, kind: input, shape index: {}]   ;;  %s297_s5 = inlined_call_operand.vmem [shape: f32[9,2], index: 5, kind: input, shape index: {}]   ;;  %s298_s2 = inlined_call_operand.vmem [shape: bf16[8,2], index: 2, kind: input, shape index: {}]   ;;  %s299_s3 = inlined_call_operand.vmem [shape: bf16[8,2], index: 3, kind: input, shape index: {}]   ;;  %s300_s4 = inlined_call_operand.vmem [shape: bf16[8,2], index: 4, kind: input, shape index: {}]   ;;  %s301_s0 = inlined_call_operand.vmem [shape: f32[4,8], index: 0, kind: input, shape index: {}]   ;;  %s302_s7 = inlined_call_operand.vmem [shape: f32[4,1], index: 7, kind: input, shape index: {}]   ;;  %s303_s6 = inlined_call_operand.vmem [shape: bf16[4,4], index: 6, kind: input, shape index: {}]   ;;  %s304_s9 = inlined_call_operand.vmem [shape: f32[4,1], index: 9, kind: input, shape index: {}]   ;;  %s305_s8 = inlined_call_operand.vmem [shape: f32[4,1], index: 8, kind: input, shape index: {}]   ;;  %s306_s10 = inlined_call_operand.vmem [shape: f32[4,2], index: 10, kind: output, shape index: {}]  }
   0x1   :  { %v38_v0 = vld [vmem:[%s296_s1] sm:$0xf]  ;;  %115 = vst.msk [vmem:[#allocation2] sm:$0xf] %vm114_vm2, %v204_v10  ;;  %v205_v12 = vmov 0   ;;  %vm130_vm3 = vcmask 1041408  }
   0x2   :  { %v60_v1 = vld [vmem:[%s298_s2] sm:$0xf]  ;;  %v45_v3 = vsel %vm43_vm0, %v38_v0, 0  ;;  %199 = vset.pattern.permute.xlu0 %v205_v12  ;;  %200 = vset.pattern.permute.xlu1 %v205_v12  ;;  %vm126_vm4 = vcmask 31744  }
   0x3   :  { %v78_v2 = vld [vmem:[%s299_s3] sm:$0xf]  ;;  %v62_v4 = vsel %vm43_vm0, %v60_v1, 0  ;;  %54 = vmatpush.bf16.msra.mxu0 %v45_v3  ;;  %201 = vset.pattern.permute.xlu2 %v205_v12 }
   0x4   :  { %v80_v5 = vsel %vm43_vm0, %v78_v2, 0  ;;  %v96_v6 = vld [vmem:[%s300_s4] sm:$0xf]  ;;  %71 = vmatpush.bf16.msra.mxu1 %v62_v4 }
   0x5   :  { %v98_v7 = vsel %vm43_vm0, %v96_v6, 0  ;;  %v36_v8 = vld [vmem:[%s301_s0] sm:$0xf]  ;;  %89 = vmatpush.bf16.msra.mxu2 %v80_v5 }
   0x6   :  { %107 = vmatpush.bf16.msra.mxu3 %v98_v7  ;;  %v37_v9 = vpack.c.bf16 %v36_v8, %v36_v8  ;;  %v120_v11 = vld [vmem:[%s302_s7] sm:$0xf] }
   0x7   :  { %123 = vperm.xlu0 %199, %v120_v11   ;;  %v117_v27 = vld [vmem:[%s303_s6] sm:$0x3] }
   0x8   :  { %192 = vmatmul.msk.bf16.vlgmr.msra.gmra.mxu0 %vm39_vm1, %v37_v9  ;;  %193 = vmatmul.msk.bf16.vlgmr.msra.gmra.mxu1 %vm39_vm1, %v37_v9  ;;  %v179_v29 = vld [vmem:[%s304_s9] sm:$0xf] }
   0x9   :  { %194 = vmatmul.msk.bf16.vlgmr.msra.gmra.mxu2 %vm39_vm1, %v37_v9  ;;  %195 = vmatmul.msk.bf16.vlgmr.msra.gmra.mxu3 %vm39_vm1, %v37_v9  ;;  %v172_v36 = vld [vmem:[%s305_s8] sm:$0xf] }
   0xa   :  { %182 = vperm.xlu2 %201, %v179_v29  }
  0x64   :  { %v183_v55 = vpop.permute.xlu2 %182 }
  0x79   :  { %v124_v28 = vpop.permute.xlu0 %123 }
  0x85   :  { %v56_v13 = vpop.f32.mrf.mxu0  ;;  %v73_v14 = vpop.f32.mrf.mxu1 }
  0x86   :  { %v77_v15 = vmax.f32 %v56_v13, %v73_v14 }
  0x8c   :  { %v91_v16 = vpop.f32.mrf.mxu2  ;;  %v109_v17 = vpop.f32.mrf.mxu3 }
  0x8d   :  { %v95_v18 = vmax.f32 %v77_v15, %v91_v16  ;;  %v58_v19 = vpop.f32.mrf.mxu0  ;;  %v75_v20 = vpop.f32.mrf.mxu1 }
  0x8f   :  { %v113_v21 = vmax.f32 %v95_v18, %v109_v17 }
  0x91   :  { %116 = vst.msk [vmem:[#allocation2] sm:$0xf] %vm114_vm2, %v113_v21 }
  0x94   :  { %v93_v22 = vpop.f32.mrf.mxu2  ;;  %v111_v23 = vpop.f32.mrf.mxu3 }
  0x98   :  { %v118_v24 = vld [vmem:[#allocation2] sm:$0xf] }
  0x99   :  { %v119_v25 = vpack.c.bf16 %v118_v24, %v118_v24 }
  0x9b   :  { %v132_v26 = vsel %vm130_vm3, %v119_v25, 0 }
  0x9c   :  { %141 = vmatpush.bf16.msrb.mxu0 %v132_v26 }
  0x9f   :  { %196 = vmatmul.msk.bf16.vlgmr.msrb.gmra.mxu0 %vm126_vm4, %v117_v27 }
 0x11c   :  { %v143_v30 = vpop.f32.mrf.mxu0 }
 0x11d   :  { %v144_v31 = vadd.f32 %v143_v30, %v124_v28 }
 0x11f   :  { %v147_v32 = vsel %vm114_vm2, %v144_v31, 0.0  ;;  %v151_v33 = vmul.f32 %v144_v31, %v144_v31 }
 0x120   :  { %148 = vadd.xlane.f32.xlu0 %v147_v32 }
 0x121   :  { %v152_v34 = vsel %vm114_vm2, %v151_v33, 0.0 }
 0x122   :  { %153 = vadd.xlane.f32.xlu1 %v152_v34 }
 0x124   :  { %v145_v35 = vpop.f32.mrf.mxu0 }
 0x13b   :  { %175 = vperm.xlu1 %200, %v172_v36  }
 0x193   :  { %v149_v37 = vpop.xlane.xlu0 %148 }
 0x194   :  { %v150_v38 = vmul.f32 0.5, %v149_v37 }
 0x195   :  { %v154_v39 = vpop.xlane.xlu1 %153 }
 0x196   :  { %v156_v40 = vmul.f32 %v150_v38, %v150_v38  ;;  %v155_v41 = vmul.f32 0.5, %v154_v39  ;;  %v159_v51 = vsub.f32 %v144_v31, %v150_v38 }
 0x198   :  { %v157_v42 = vsub.f32 %v155_v41, %v156_v40 }
 0x19a   :  { %v158_v43 = vmax.f32 %v157_v42, 0.0 }
 0x19c   :  { %v160_v44 = vadd.f32 1e-05, %v158_v43 }
 0x19e   :  { %202 = vrsqrt.f32 %v160_v44  ;;  %vm167_vm6 = vweird.f32 %v160_v44 }
 0x1a4   :  { %v203_v45 = vpop.eup %202 }
 0x1a5   :  { %v162_v46 = vmul.f32 %v203_v45, %v160_v44  ;;  %vm168_vm5 = vweird.f32 %v203_v45 }
 0x1a6   :  { %vm169_vm7 = vmor %vm167_vm6, %vm168_vm5 }
 0x1a7   :  { %v163_v47 = vmul.f32 %v203_v45, %v162_v46 }
 0x1a9   :  { %v164_v48 = vmul.f32 0.5, %v163_v47 }
 0x1ab   :  { %v165_v49 = vsub.f32 1.5, %v164_v48 }
 0x1ad   :  { %v166_v50 = vmul.f32 %v203_v45, %v165_v49  ;;  %v176_v52 = vpop.permute.xlu1 %175 }
 0x1af   :  { %v170_v53 = vsel %vm169_vm7, %v203_v45, %v166_v50 }
 0x1b0   :  { %v171_v54 = vmul.f32 %v170_v53, %v159_v51 }
 0x1b2   :  { %v178_v56 = vmul.f32 %v176_v52, %v171_v54 }
 0x1b4   :  { %v185_v57 = vadd.f32 %v183_v55, %v178_v56 }
 0x1b6   :  { %v186_v58 = vmax.f32 %v185_v57, 0.0 }
 0x1b8   :  { %187 = vst.msk [vmem:[%s306_s10] sm:$0xf] %vm114_vm2, %v186_v58 }

// kernel: rsu6_forward.16
= control target key start
LH: loop header
LB: loop body
LE: loop exit
PB: predicated region body
PF: predicated region fallthrough
CT: control target
= control target key end

     0   :  { %vm54_vm0 = vcmask 261120   ;;  %s418_s13 = smov 1   ;;  %s419_s16 = smov 125   ;;  %vm161_vm1 = vcmask 64512   ;;  %vm166_vm2 = vcmask 60416   ;;  %v423_v18 = vmov 0.0   ;;  %s565_s1 = inlined_call_operand.vmem [shape: bf16[32,8], index: 1, kind: input, shape index: {}]   ;;  %s566_s2 = inlined_call_operand.vmem [shape: bf16[32,8], index: 2, kind: input, shape index: {}]   ;;  %s567_s3 = inlined_call_operand.vmem [shape: bf16[32,8], index: 3, kind: input, shape index: {}]   ;;  %s568_s4 = inlined_call_operand.vmem [shape: bf16[32,8], index: 4, kind: input, shape index: {}]   ;;  %s569_s0 = inlined_call_operand.vmem [shape: f32[4,32], index: 0, kind: input, shape index: {}]   ;;  %s570_s5 = inlined_call_operand.vmem [shape: f32[9,8], index: 5, kind: input, shape index: {}]   ;;  %s571_s7 = inlined_call_operand.vmem [shape: f32[4,1], index: 7, kind: input, shape index: {}]   ;;  %s572_s8 = inlined_call_operand.vmem [shape: f32[4,1], index: 8, kind: input, shape index: {}]   ;;  %s573_s9 = inlined_call_operand.vmem [shape: f32[4,1], index: 9, kind: input, shape index: {}]   ;;  %s574_s6 = inlined_call_operand.vmem [shape: bf16[4,36], index: 6, kind: input, shape index: {}]   ;;  %s575_s10 = inlined_call_operand.vmem [shape: f32[4,8], index: 10, kind: output, shape index: {}]  }
   0x1   :  { %v390_v0 = vld [vmem:[%s565_s1 + $0x8] sm:$0xff]  ;;  %v389_v4 = vld [vmem:[%s565_s1] sm:$0xff]  ;;  %s420_s21 = smov 2   ;;  %s421_s24 = smov 126   ;;  %165 = vst.msk [vmem:[#allocation2 + $0x18] sm:$0xff] %vm161_vm1, %v423_v18  ;;  %vm269_vm3 = vcmask 35840  }
   0x2   :  { %v392_v1 = vld [vmem:[%s566_s2 + $0x8] sm:$0xff]  ;;  %v391_v5 = vld [vmem:[%s566_s2] sm:$0xff]  ;;  %64 = vmatpush.bf16.msra.mxu0 %v390_v0  ;;  %s422_s27 = smov 127   ;;  %167 = vst.msk [vmem:[#allocation2 + $0x20] sm:$0xf] %vm166_vm2, %v423_v18  ;;  %vm256_vm4 = vcmask 44032  }
   0x3   :  { %v394_v2 = vld [vmem:[%s567_s3 + $0x8] sm:$0xff]  ;;  %93 = vmatpush.bf16.msra.mxu1 %v392_v1  ;;  %v393_v6 = vld [vmem:[%s567_s3] sm:$0xff]  ;;  %s417_s3 = smov 3   ;;  %162 = vst.msk [vmem:[#allocation2] sm:$0xff] %vm161_vm1, %v423_v18  ;;  %vm290_vm5 = vcmask 1041408   ;;  %v424_v52 = vmov 0  }
   0x4   :  { %v396_v3 = vld [vmem:[%s568_s4 + $0x8] sm:$0xff]  ;;  %v395_v7 = vld [vmem:[%s568_s4] sm:$0xff]  ;;  %123 = vmatpush.bf16.msra.mxu2 %v394_v2  ;;  %163 = vst.msk [vmem:[#allocation2 + $0x8] sm:$0xff] %vm161_vm1, %v423_v18  ;;  %405 = vset.pattern.permute.xlu1 %v424_v52  ;;  %vm205_vm6 = vcmask 60424   ;;  %vm231_vm7 = vcmask 52224   ;;  %vm192_vm8 = vcmask 60432  }
   0x5   :  { %v36_v8 = vld [vmem:[%s569_s0] sm:$0xf]  ;;  %153 = vmatpush.bf16.msra.mxu3 %v396_v3  ;;  %v407_v9 = vld [vmem:[%s570_s5 + $0x8] ss:$0 sm:$0xff]  ;;  %v408_v10 = vld [vmem:[%s570_s5 + $0x6] ss:$0 sm:$0xff]  ;;  %406 = vset.pattern.permute.xlu0 %v424_v52 }
   0x6   :  { %v37_v11 = vpack.c.bf16 %v36_v8, %v36_v8  ;;  %261 = vrot.lane.b32.xlu0 %v407_v9, %s417_s3  ;;  %65 = vmatpush.bf16.msra.mxu0 %v389_v4  ;;  %v413_v12 = vld [vmem:[%s570_s5] ss:$0 sm:$0xff]  ;;  %v410_v13 = vld [vmem:[%s570_s5 + $0x5] ss:$0 sm:$0xff]  ;;  %v409_v14 = vld [vmem:[%s570_s5 + $0x7] ss:$0 sm:$0xff] }
   0x7   :  { %94 = vmatpush.bf16.msra.mxu1 %v391_v5  ;;  %236 = vrot.lane.b32.xlu1 %v408_v10, %s418_s13  ;;  %v414_v15 = vld [vmem:[%s570_s5 + $0x1] ss:$0 sm:$0xff]  ;;  %v412_v16 = vld [vmem:[%s570_s5 + $0x2] ss:$0 sm:$0xff]  ;;  %v411_v17 = vld [vmem:[%s570_s5 + $0x3] ss:$0 sm:$0xff] }
   0x8   :  { %124 = vmatpush.bf16.msra.mxu2 %v393_v6  ;;  %171 = vrot.lane.b32.xlu2 %v413_v12, %s419_s16  ;;  %164 = vst.msk [vmem:[#allocation2 + $0x10] sm:$0xff] %vm161_vm1, %v423_v18  ;;  %v280_v50 = vld [vmem:[%s571_s7] sm:$0xf]  ;;  %vm179_vm9 = vcmask 60440   ;;  %vm286_vm10 = vcmask 293888  }
   0x9   :  { %154 = vmatpush.bf16.msra.mxu3 %v395_v7  ;;  %360 = vmatmul.msk.bf16.vlgmr.msra.gmra.mxu0 %vm54_vm0, %v37_v11  ;;  %v332_v54 = vld [vmem:[%s572_s8] sm:$0xf] }
   0xa   :  { %369 = vmatmul.msk.bf16.vlgmr.msra.gmra.mxu1 %vm54_vm0, %v37_v11  ;;  %v339_v57 = vld [vmem:[%s573_s9] sm:$0xf] }
   0xb   :  { %378 = vmatmul.msk.bf16.vlgmr.msra.gmra.mxu2 %vm54_vm0, %v37_v11  ;;  %v271_v3 = vld [vmem:[%s574_s6] sm:$0x3] }
   0xc   :  { %387 = vmatmul.msk.bf16.vlgmr.msra.gmra.mxu3 %vm54_vm0, %v37_v11 }
   0xe   :  { %223 = vrot.lane.b32.xlu0 %v410_v13, %s418_s13 }
   0xf   :  { %248 = vrot.lane.b32.xlu1 %v409_v14, %s420_s21 }
  0x10   :  { %184 = vrot.lane.b32.xlu2 %v414_v15, %s421_s24 }
  0x16   :  { %197 = vrot.lane.b32.xlu0 %v412_v16, %s422_s27 }
  0x17   :  { %210 = vrot.lane.b32.xlu1 %v411_v17, %s422_s27 }
  0x62   :  { %v172_v24 = vpop.permute.xlu2 %171 }
  0x6a   :  { %v185_v38 = vpop.permute.xlu2 %184 }
  0x78   :  { %v262_v21 = vpop.permute.xlu0 %261 }
  0x79   :  { %v237_v23 = vpop.permute.xlu1 %236 }
  0x80   :  { %v224_v31 = vpop.permute.xlu0 %223 }
  0x81   :  { %v249_v37 = vpop.permute.xlu1 %248 }
  0x86   :  { %v67_v19 = vpop.f32.mrf.mxu0 }
  0x87   :  { %v96_v20 = vpop.f32.mrf.mxu1 }
  0x88   :  { %v100_v22 = vmax.f32 %v67_v19, %v96_v20  ;;  %v198_v42 = vpop.permute.xlu0 %197 }
  0x89   :  { %v211_v43 = vpop.permute.xlu1 %210 }
  0x8e   :  { %v126_v25 = vpop.f32.mrf.mxu2  ;;  %v69_v28 = vpop.f32.mrf.mxu0 }
  0x8f   :  { %v156_v26 = vpop.f32.mrf.mxu3  ;;  %v130_v27 = vmax.f32 %v100_v22, %v126_v25  ;;  %v98_v29 = vpop.f32.mrf.mxu1 }
  0x91   :  { %v160_v30 = vmax.f32 %v130_v27, %v156_v26 }
  0x93   :  { %v264_v32 = vmul.f32 %v262_v21, %v160_v30  ;;  %219 = vst.msk [vmem:[#allocation2 + $0x10] sm:$0xf] %vm166_vm2, %v160_v30  ;;  %v239_v33 = vmul.f32 %v237_v23, %v160_v30  ;;  %v226_v34 = vmul.f32 %v224_v31, %v160_v30  ;;  %v251_v39 = vmul.f32 %v249_v37, %v160_v30 }
  0x94   :  { %v187_v40 = vmul.f32 %v185_v38, %v160_v30  ;;  %v174_v41 = vmul.f32 %v172_v24, %v160_v30  ;;  %v200_v44 = vmul.f32 %v198_v42, %v160_v30  ;;  %v213_v45 = vmul.f32 %v211_v43, %v160_v30 }
  0x95   :  { %266 = vrot.lane.b32.xlu2 %v264_v32, %s419_s16  ;;  %241 = vrot.lane.b32.xlu1 %v239_v33, %s422_s27 }
  0x96   :  { %228 = vrot.lane.b32.xlu0 %v226_v34, %s422_s27  ;;  %v128_v35 = vpop.f32.mrf.mxu2 }
  0x97   :  { %v158_v36 = vpop.f32.mrf.mxu3 }
  0x9d   :  { %253 = vrot.lane.b32.xlu2 %v251_v39, %s421_s24  ;;  %189 = vrot.lane.b32.xlu1 %v187_v40, %s420_s21 }
  0x9e   :  { %176 = vrot.lane.b32.xlu0 %v174_v41, %s417_s3 }
  0xa5   :  { %202 = vrot.lane.b32.xlu2 %v200_v44, %s418_s13  ;;  %283 = vperm.xlu1 %405, %v280_v50  }
  0xa6   :  { %215 = vrot.lane.b32.xlu0 %v213_v45, %s418_s13 }
  0xad   :  { %335 = vperm.xlu1 %405, %v332_v54  }
  0xb5   :  { %342 = vperm.xlu1 %405, %v339_v57  }
  0xef   :  { %v267_v46 = vpop.permute.xlu2 %266 }
  0xf0   :  { %270 = vst.msk [vmem:[#allocation2 + $0x20] sm:$0xf] %vm269_vm3, %v267_v46 }
  0xf7   :  { %v254_v47 = vpop.permute.xlu2 %253  ;;  %v276_v48 = vld [vmem:[#allocation2 + $0x20] sm:$0xf] }
  0xf8   :  { %257 = vst.msk [vmem:[#allocation2 + $0x1c] sm:$0xf] %vm256_vm4, %v254_v47  ;;  %v279_v49 = vpack.c.bf16 %v276_v48, %v276_v48 }
  0xfa   :  { %v292_v51 = vsel %vm290_vm5, %v279_v49, 0 }
  0xfb   :  { %299 = vmatpush.bf16.msrb.mxu0 %v292_v51 }
  0xff   :  { %v203_v53 = vpop.permute.xlu2 %202 }
 0x100   :  { %206 = vst.msk [vmem:[#allocation2 + $0x8] sm:$0xf] %vm205_vm6, %v203_v53 }
 0x107   :  { %v242_v55 = vpop.permute.xlu1 %241 }
 0x108   :  { %v229_v56 = vpop.permute.xlu0 %228  ;;  %244 = vst.msk [vmem:[#allocation2 + $0x18] sm:$0xf] %vm231_vm7, %v242_v55 }
 0x109   :  { %232 = vst.msk [vmem:[#allocation2 + $0x14] sm:$0xf] %vm231_vm7, %v229_v56 }
 0x10f   :  { %v190_v58 = vpop.permute.xlu1 %189  ;;  %v275_v60 = vld [vmem:[#allocation2 + $0x18] sm:$0xff] }
 0x110   :  { %v177_v59 = vpop.permute.xlu0 %176  ;;  %193 = vst.msk [vmem:[#allocation2 + $0x4] sm:$0xf] %vm192_vm8, %v190_v58  ;;  %v274_v61 = vld [vmem:[#allocation2 + $0x10] sm:$0xff] }
 0x111   :  { %180 = vst.msk [vmem:[#allocation2] sm:$0xf] %vm179_vm9, %v177_v59  ;;  %v278_v62 = vpack.c.bf16 %v275_v60, %v274_v61 }
 0x113   :  { %300 = vmatpush.bf16.msrb.mxu0 %v278_v62 }
 0x117   :  { %v284_v4 = vpop.permute.xlu1 %283 }
 0x118   :  { %v216_v63 = vpop.permute.xlu0 %215  ;;  %v272_v0 = vld [vmem:[#allocation2] sm:$0xff] }
 0x119   :  { %218 = vst.msk [vmem:[#allocation2 + $0xc] sm:$0xf] %vm205_vm6, %v216_v63 }
 0x11f   :  { %v336_v22 = vpop.permute.xlu1 %335 }
 0x120   :  { %v273_v1 = vld [vmem:[#allocation2 + $0x8] sm:$0xff] }
 0x121   :  { %v277_v2 = vpack.c.bf16 %v273_v1, %v272_v0 }
 0x123   :  { %301 = vmatpush.bf16.msrb.mxu0 %v277_v2 }
 0x126   :  { %388 = vmatmul.msk.bf16.vlgmr.msrb.gmra.mxu0 %vm286_vm10, %v271_v3 }
 0x127   :  { %v343_v30 = vpop.permute.xlu1 %342 }
 0x1a3   :  { %v303_v5 = vpop.f32.mrf.mxu0 }
 0x1a4   :  { %v304_v6 = vadd.f32 %v303_v5, %v284_v4 }
 0x1a6   :  { %v307_v7 = vsel %vm166_vm2, %v304_v6, 0.0  ;;  %v311_v8 = vmul.f32 %v304_v6, %v304_v6 }
 0x1a7   :  { %308 = vadd.xlane.f32.xlu2 %v307_v7 }
 0x1a8   :  { %v312_v9 = vsel %vm166_vm2, %v311_v8, 0.0 }
 0x1a9   :  { %313 = vadd.xlane.f32.xlu0 %v312_v9 }
 0x1ab   :  { %v305_v10 = vpop.f32.mrf.mxu0 }
 0x21a   :  { %v309_v11 = vpop.xlane.xlu2 %308 }
 0x21b   :  { %v310_v12 = vmul.f32 0.125, %v309_v11 }
 0x21c   :  { %v314_v13 = vpop.xlane.xlu0 %313 }
 0x21d   :  { %v316_v14 = vmul.f32 %v310_v12, %v310_v12  ;;  %v315_v15 = vmul.f32 0.125, %v314_v13  ;;  %v319_v26 = vsub.f32 %v304_v6, %v310_v12 }
 0x21f   :  { %v317_v16 = vsub.f32 %v315_v15, %v316_v14 }
 0x221   :  { %v318_v17 = vmax.f32 %v317_v16, 0.0 }
 0x223   :  { %v320_v18 = vadd.f32 1e-05, %v318_v17 }
 0x225   :  { %415 = vrsqrt.f32 %v320_v18  ;;  %vm327_vm12 = vweird.f32 %v320_v18 }
 0x22b   :  { %v416_v19 = vpop.eup %415 }
 0x22c   :  { %v322_v20 = vmul.f32 %v416_v19, %v320_v18  ;;  %vm328_vm11 = vweird.f32 %v416_v19 }
 0x22d   :  { %vm329_vm13 = vmor %vm327_vm12, %vm328_vm11 }
 0x22e   :  { %v323_v21 = vmul.f32 %v416_v19, %v322_v20 }
 0x230   :  { %v324_v23 = vmul.f32 0.5, %v323_v21 }
 0x232   :  { %v325_v24 = vsub.f32 1.5, %v324_v23 }
 0x234   :  { %v326_v25 = vmul.f32 %v416_v19, %v325_v24 }
 0x236   :  { %v330_v27 = vsel %vm329_vm13, %v416_v19, %v326_v25 }
 0x237   :  { %v331_v28 = vmul.f32 %v330_v27, %v319_v26 }
 0x239   :  { %v338_v29 = vmul.f32 %v336_v22, %v331_v28 }
 0x23b   :  { %v345_v31 = vadd.f32 %v343_v30, %v338_v29 }
 0x23d   :  { %v346_v32 = vmax.f32 %v345_v31, 0.0 }
 0x23f   :  { %347 = vst.msk [vmem:[%s575_s10] sm:$0xf] %vm166_vm2, %v346_v32 }

// kernel: rsu6_forward.18
= control target key start
LH: loop header
LB: loop body
LE: loop exit
PB: predicated region body
PF: predicated region fallthrough
CT: control target
= control target key end

     0   :  { %vm24_vm0 = vcmask 11264   ;;  %v111_v0 = vmov 0.0   ;;  %v112_v3 = vmov 0   ;;  %vm41_vm1 = vcmask 1041408   ;;  %s171_s0 = inlined_call_operand.vmem [shape: f32[4,2], index: 0, kind: input, shape index: {}]   ;;  %s172_s1 = inlined_call_operand.vmem [shape: f32[9,2], index: 1, kind: input, shape index: {}]   ;;  %s173_s3 = inlined_call_operand.vmem [shape: f32[4,1], index: 3, kind: input, shape index: {}]   ;;  %s174_s2 = inlined_call_operand.vmem [shape: bf16[4,4], index: 2, kind: input, shape index: {}]   ;;  %s175_s5 = inlined_call_operand.vmem [shape: f32[4,1], index: 5, kind: input, shape index: {}]   ;;  %s176_s4 = inlined_call_operand.vmem [shape: f32[4,1], index: 4, kind: input, shape index: {}]   ;;  %s177_s6 = inlined_call_operand.vmem [shape: f32[4,2], index: 6, kind: output, shape index: {}]  }
   0x1   :  { %25 = vst.msk [vmem:[#allocation2] sm:$0xf] %vm24_vm0, %v111_v0  ;;  %v26_v1 = vld [vmem:[%s171_s0] sm:$0xf]  ;;  %106 = vset.pattern.permute.xlu0 %v112_v3  ;;  %107 = vset.pattern.permute.xlu1 %v112_v3  ;;  %vm37_vm2 = vcmask 31744  }
   0x2   :  { %27 = vst.msk [vmem:[#allocation2] sm:$0xf] %vm24_vm0, %v26_v1  ;;  %v31_v2 = vld [vmem:[%s173_s3] sm:$0xf]  ;;  %108 = vset.pattern.permute.xlu2 %v112_v3 }
   0x3   :  { %34 = vperm.xlu0 %106, %v31_v2   ;;  %v28_v7 = vld [vmem:[%s174_s2] sm:$0x3] }
   0x4   :  { %v90_v9 = vld [vmem:[%s175_s5] sm:$0xf] }
   0x5   :  { %93 = vperm.xlu2 %108, %v90_v9   ;;  %v83_v16 = vld [vmem:[%s176_s4] sm:$0xf] }
   0x9   :  { %v29_v4 = vld [vmem:[#allocation2] sm:$0xf] }
   0xa   :  { %v30_v5 = vpack.c.bf16 %v29_v4, %v29_v4 }
   0xc   :  { %v43_v6 = vsel %vm41_vm1, %v30_v5, 0 }
   0xd   :  { %52 = vmatpush.bf16.msra.mxu0 %v43_v6 }
  0x10   :  { %103 = vmatmul.msk.bf16.vlgmr.msra.gmra.mxu0 %vm37_vm2, %v28_v7 }
  0x5f   :  { %v94_v35 = vpop.permute.xlu2 %93 }
  0x75   :  { %v35_v8 = vpop.permute.xlu0 %34 }
  0x8d   :  { %v54_v10 = vpop.f32.mrf.mxu0 }
  0x8e   :  { %v55_v11 = vadd.f32 %v54_v10, %v35_v8 }
  0x90   :  { %v58_v12 = vsel %vm24_vm0, %v55_v11, 0.0  ;;  %v62_v13 = vmul.f32 %v55_v11, %v55_v11 }
  0x91   :  { %59 = vadd.xlane.f32.xlu0 %v58_v12 }
  0x92   :  { %v63_v14 = vsel %vm24_vm0, %v62_v13, 0.0 }
  0x93   :  { %64 = vadd.xlane.f32.xlu1 %v63_v14 }
  0x95   :  { %v56_v15 = vpop.f32.mrf.mxu0 }
  0xac   :  { %86 = vperm.xlu1 %107, %v83_v16  }
 0x104   :  { %v60_v17 = vpop.xlane.xlu0 %59 }
 0x105   :  { %v61_v18 = vmul.f32 0.5, %v60_v17 }
 0x106   :  { %v65_v19 = vpop.xlane.xlu1 %64 }
 0x107   :  { %v67_v20 = vmul.f32 %v61_v18, %v61_v18  ;;  %v66_v21 = vmul.f32 0.5, %v65_v19  ;;  %v70_v31 = vsub.f32 %v55_v11, %v61_v18 }
 0x109   :  { %v68_v22 = vsub.f32 %v66_v21, %v67_v20 }
 0x10b   :  { %v69_v23 = vmax.f32 %v68_v22, 0.0 }
 0x10d   :  { %v71_v24 = vadd.f32 1e-05, %v69_v23 }
 0x10f   :  { %109 = vrsqrt.f32 %v71_v24  ;;  %vm78_vm4 = vweird.f32 %v71_v24 }
 0x115   :  { %v110_v25 = vpop.eup %109 }
 0x116   :  { %v73_v26 = vmul.f32 %v110_v25, %v71_v24  ;;  %vm79_vm3 = vweird.f32 %v110_v25 }
 0x117   :  { %vm80_vm5 = vmor %vm78_vm4, %vm79_vm3 }
 0x118   :  { %v74_v27 = vmul.f32 %v110_v25, %v73_v26 }
 0x11a   :  { %v75_v28 = vmul.f32 0.5, %v74_v27 }
 0x11c   :  { %v76_v29 = vsub.f32 1.5, %v75_v28 }
 0x11e   :  { %v77_v30 = vmul.f32 %v110_v25, %v76_v29  ;;  %v87_v32 = vpop.permute.xlu1 %86 }
 0x120   :  { %v81_v33 = vsel %vm80_vm5, %v110_v25, %v77_v30 }
 0x121   :  { %v82_v34 = vmul.f32 %v81_v33, %v70_v31 }
 0x123   :  { %v89_v36 = vmul.f32 %v87_v32, %v82_v34 }
 0x125   :  { %v96_v37 = vadd.f32 %v94_v35, %v89_v36 }
 0x127   :  { %v97_v38 = vmax.f32 %v96_v37, 0.0 }
 0x129   :  { %98 = vst.msk [vmem:[%s177_s6] sm:$0xf] %vm24_vm0, %v97_v38 }

// kernel: rsu6_forward.14
= control target key start
LH: loop header
LB: loop body
LE: loop exit
PB: predicated region body
PF: predicated region fallthrough
CT: control target
= control target key end

     0   :  { %15 = vsyncpa [#allocation4], 0  ;;  %s2535_s0 = inlined_call_operand.vmem [shape: f32[4,512], index: 0, kind: input, shape index: {}]   ;;  %s2536_s1 = inlined_call_operand.vmem [shape: bf16[512,128], index: 1, kind: input, shape index: {}]   ;;  %s2537_s2 = inlined_call_operand.hbm [shape: bf16[512,128], index: 2, kind: input, shape index: {}]   ;;  %s2538_s3 = inlined_call_operand.hbm [shape: bf16[512,128], index: 3, kind: input, shape index: {}]   ;;  %s2539_s4 = inlined_call_operand.hbm [shape: bf16[512,128], index: 4, kind: input, shape index: {}]   ;;  %s2540_s5 = inlined_call_operand.vmem [shape: f32[9,128], index: 5, kind: input, shape index: {}]   ;;  %s2541_s6 = inlined_call_operand.vmem [shape: bf16[4,36], index: 6, kind: input, shape index: {}]   ;;  %s2542_s7 = inlined_call_operand.vmem [shape: f32[4,1], index: 7, kind: input, shape index: {}]   ;;  %s2543_s8 = inlined_call_operand.vmem [shape: f32[4,1], index: 8, kind: input, shape index: {}]   ;;  %s2544_s9 = inlined_call_operand.vmem [shape: f32[4,1], index: 9, kind: input, shape index: {}]   ;;  %s2545_s10 = inlined_call_operand.vmem [shape: f32[4,128], index: 10, kind: output, shape index: {}]  }
   0x1   :  { %16 = vsyncpa [#allocation6], 0  ;;  %s38_s15 = sshll.u32 %s2538_s3, 4  ;;  %s2275_s16 = smov [#allocation5]   ;;  %s39_s15 = int_to_ptr.hbm [resolvable:$true] %s38_s15 }
   0x2   :  { %s40_s17 = sshll.u32 %s2275_s16, 4  ;;  %s25_s20 = sshll.u32 %s2537_s2, 4  ;;  %s41_s17 = int_to_ptr.vmem [resolvable:$true] %s40_s17  ;;  %s26_s20 = int_to_ptr.hbm [resolvable:$true] %s25_s20 }
   0x3   :  { %s2276_s21 = smov 64   ;;  %s2277_s22 = smov 4  }
   0x4   :  { %46 = dma.hbm_to_vmem [thread:$0]  %s39_s15, 4096, %s41_s17, [#allocation6], %s2276_s21, %s2276_s21, %s2277_s22  }
   0x5   :  { %s2278_s23 = smov [#allocation3]   ;;  %s51_s27 = sshll.u32 %s2539_s4, 4  ;;  %s52_s27 = int_to_ptr.hbm [resolvable:$true] %s51_s27 }
   0x6   :  { %s27_s24 = sshll.u32 %s2278_s23, 4  ;;  %s2279_s3 = smov [#allocation7]   ;;  %s28_s24 = int_to_ptr.vmem [resolvable:$true] %s27_s24 }
   0x7   :  { %33 = dma.hbm_to_vmem [thread:$0]  %s26_s20, 4096, %s28_s24, [#allocation4], %s2276_s21, %s2276_s21, %s2277_s22  }
   0x8   :  { %s53_s28 = sshll.u32 %s2279_s3, 4  ;;  %s54_s28 = int_to_ptr.vmem [resolvable:$true] %s53_s28 }
   0x9   :  { %59 = dma.hbm_to_vmem [thread:$0]  %s52_s27, 4096, %s54_s28, [#allocation6], %s2276_s21, %s2276_s21, %s2277_s22  }
   0xa   :  { %2271 = dma.done.wait [#allocation4], 4096  }
   0xb   :  { %2272 = vsyncadd [#allocation4], 4294963200 }
   0xc   :  { %2273 = dma.done.wait [#allocation6], 8192  }
   0xd   :  { %2274 = vsyncadd [#allocation6], 4294959104  ;;  %v2051_v0 = vld [vmem:[%s2536_s1 + $0x38] sm:$0xff]  ;;  %v2050_v4 = vld [vmem:[%s2536_s1 + $0x30] sm:$0xff]  ;;  %s2280_s11 = smov 9   ;;  %s2281_s4 = smov 7  }
   0xe   :  { %v2059_v1 = vld [vmem:[%s2536_s1 + $0x78] sm:$0xff]  ;;  %358 = vmatpush.bf16.msra.mxu0 %v2051_v0  ;;  %v2058_v5 = vld [vmem:[%s2536_s1 + $0x70] sm:$0xff]  ;;  %v2049_v8 = vld [vmem:[%s2536_s1 + $0x28] sm:$0xff]  ;;  %s2282_s12 = smov 119   ;;  %s2283_s18 = smov 8   ;;  %vm1445_vm0 = vcmask 969728  }
   0xf   :  { %v2067_v2 = vld [vmem:[%s2536_s1 + $0xb8] sm:$0xff]  ;;  %371 = vmatpush.bf16.msra.mxu1 %v2059_v1  ;;  %v2066_v6 = vld [vmem:[%s2536_s1 + $0xb0] sm:$0xff]  ;;  %v2057_v9 = vld [vmem:[%s2536_s1 + $0x68] sm:$0xff]  ;;  %s2284_s19 = smov 1   ;;  %s2285_s20 = smov 120   ;;  %vm1432_vm1 = vcmask 977920  }
  0x10   :  { %v2075_v3 = vld [vmem:[%s2536_s1 + $0xf8] sm:$0xff]  ;;  %384 = vmatpush.bf16.msra.mxu2 %v2067_v2  ;;  %v2074_v7 = vld [vmem:[%s2536_s1 + $0xf0] sm:$0xff]  ;;  %v2065_v10 = vld [vmem:[%s2536_s1 + $0xa8] sm:$0xff]  ;;  %s2286_s25 = smov 127   ;;  %s2287_s26 = smov 121   ;;  %vm1466_vm2 = vcmask 1041408  }
  0x11   :  { %397 = vmatpush.bf16.msra.mxu3 %v2075_v3  ;;  %v2073_v11 = vld [vmem:[%s2536_s1 + $0xe8] sm:$0xff]  ;;  %v2048_v12 = vld [vmem:[%s2536_s1 + $0x20] sm:$0xff]  ;;  %v2047_v16 = vld [vmem:[%s2536_s1 + $0x18] sm:$0xff]  ;;  %vm1379_vm3 = vcmask 1043512   ;;  %vm1419_vm4 = vcmask 986112   ;;  %vm1406_vm5 = vcmask 1035264  }
  0x12   :  { %359 = vmatpush.bf16.msra.mxu0 %v2050_v4  ;;  %v2056_v13 = vld [vmem:[%s2536_s1 + $0x60] sm:$0xff]  ;;  %v2055_v17 = vld [vmem:[%s2536_s1 + $0x58] sm:$0xff]  ;;  %v84_v20 = vld [vmem:[%s2535_s0 + $0x8] sm:$0xff]  ;;  %vm1366_vm6 = vcmask 1043520   ;;  %vm1353_vm7 = vcmask 1043528   ;;  %vm1392_vm8 = vcmask 1043464  }
  0x13   :  { %372 = vmatpush.bf16.msra.mxu1 %v2058_v5  ;;  %v2064_v14 = vld [vmem:[%s2536_s1 + $0xa0] sm:$0xff]  ;;  %v2063_v18 = vld [vmem:[%s2536_s1 + $0x98] sm:$0xff]  ;;  %89 = vst [vmem:[#allocation1 + $0x10] ss:$2 sm:$0xff] %v84_v20  ;;  %v2046_v22 = vld [vmem:[%s2536_s1 + $0x10] sm:$0xff]  ;;  %vm1462_vm9 = vcmask 293888  }
  0x14   :  { %385 = vmatpush.bf16.msra.mxu2 %v2066_v6  ;;  %v2072_v15 = vld [vmem:[%s2536_s1 + $0xe0] sm:$0xff]  ;;  %v2071_v19 = vld [vmem:[%s2536_s1 + $0xd8] sm:$0xff]  ;;  %v2054_v23 = vld [vmem:[%s2536_s1 + $0x50] sm:$0xff]  ;;  %vm1483_vm10 = vcmask 1043456  }
  0x15   :  { %398 = vmatpush.bf16.msra.mxu3 %v2074_v7  ;;  %v83_v21 = vld [vmem:[%s2535_s0] sm:$0xff]  ;;  %v2062_v24 = vld [vmem:[%s2536_s1 + $0x90] sm:$0xff]  ;;  %v2045_v26 = vld [vmem:[%s2536_s1 + $0x8] sm:$0xff] }
  0x16   :  { %360 = vmatpush.bf16.msra.mxu0 %v2049_v8  ;;  %87 = vst [vmem:[#allocation1] ss:$2 sm:$0xff] %v83_v21  ;;  %v2070_v25 = vld [vmem:[%s2536_s1 + $0xd0] sm:$0xff]  ;;  %v2053_v27 = vld [vmem:[%s2536_s1 + $0x48] sm:$0xff]  ;;  %v2044_v30 = vld [vmem:[%s2536_s1] sm:$0xff] }
  0x17   :  { %373 = vmatpush.bf16.msra.mxu1 %v2057_v9  ;;  %v2061_v28 = vld [vmem:[%s2536_s1 + $0x88] sm:$0xff]  ;;  %v2052_v31 = vld [vmem:[%s2536_s1 + $0x40] sm:$0xff]  ;;  %v2081_v50 = vld [vmem:[#allocation3 + $0x28] sm:$0xff] }
  0x18   :  { %386 = vmatpush.bf16.msra.mxu2 %v2065_v10  ;;  %v2069_v29 = vld [vmem:[%s2536_s1 + $0xc8] sm:$0xff]  ;;  %v2060_v32 = vld [vmem:[%s2536_s1 + $0x80] sm:$0xff]  ;;  %v2089_v51 = vld [vmem:[#allocation3 + $0x68] sm:$0xff] }
  0x19   :  { %399 = vmatpush.bf16.msra.mxu3 %v2073_v11  ;;  %v2068_v33 = vld [vmem:[%s2536_s1 + $0xc0] sm:$0xff]  ;;  %v2083_v34 = vld [vmem:[#allocation3 + $0x38] sm:$0xff]  ;;  %v2097_v52 = vld [vmem:[#allocation3 + $0xa8] sm:$0xff] }
  0x1a   :  { %361 = vmatpush.bf16.msra.mxu0 %v2048_v12  ;;  %v2091_v35 = vld [vmem:[#allocation3 + $0x78] sm:$0xff]  ;;  %v92_v36 = vld.sshfl [vmem:[#allocation1 + $0x10] sm:$0xff pattern:$0x75316420]  ;;  %v2082_v46 = vld [vmem:[#allocation3 + $0x30] sm:$0xff] }
  0x1b   :  { %374 = vmatpush.bf16.msra.mxu1 %v2056_v13  ;;  %v93_v37 = vld.sshfl [vmem:[#allocation1 + $0x18] sm:$0xff pattern:$0x75316420]  ;;  %v2099_v40 = vld [vmem:[#allocation3 + $0xb8] sm:$0xff]  ;;  %v2456_v42 = vpack.c.bf16 %v92_v36, %v92_v36  ;;  %v2090_v47 = vld [vmem:[#allocation3 + $0x70] sm:$0xff] }
  0x1c   :  { %387 = vmatpush.bf16.msra.mxu2 %v2064_v14  ;;  %v2107_v41 = vld [vmem:[#allocation3 + $0xf8] sm:$0xff]  ;;  %v2458_v43 = vpack.c.bf16 %v93_v37, %v93_v37  ;;  %v2098_v48 = vld [vmem:[#allocation3 + $0xb0] sm:$0xff]  ;;  %v2105_v53 = vld [vmem:[#allocation3 + $0xe8] sm:$0xff] }
  0x1d   :  { %400 = vmatpush.bf16.msra.mxu3 %v2072_v15  ;;  %v90_v38 = vld.sshfl [vmem:[#allocation1] sm:$0xff pattern:$0x75316420]  ;;  %v91_v39 = vld.sshfl [vmem:[#allocation1 + $0x8] sm:$0xff pattern:$0x75316420] }
  0x1e   :  { %362 = vmatpush.bf16.msra.mxu0 %v2047_v16  ;;  %v2460_v44 = vpack.c.bf16 %v90_v38, %v90_v38  ;;  %v2462_v45 = vpack.c.bf16 %v91_v39, %v91_v39  ;;  %v2106_v49 = vld [vmem:[#allocation3 + $0xf0] sm:$0xff]  ;;  %v2080_v54 = vld [vmem:[#allocation3 + $0x20] sm:$0xff]  ;;  %v2079_v58 = vld [vmem:[#allocation3 + $0x18] sm:$0xff] }
  0x1f   :  { %375 = vmatpush.bf16.msra.mxu1 %v2055_v17  ;;  %v2088_v55 = vld [vmem:[#allocation3 + $0x60] sm:$0xff]  ;;  %v2087_v59 = vld [vmem:[#allocation3 + $0x58] sm:$0xff]  ;;  %v2078_v62 = vld [vmem:[#allocation3 + $0x10] sm:$0xff] }
  0x20   :  { %388 = vmatpush.bf16.msra.mxu2 %v2063_v18  ;;  %v2096_v56 = vld [vmem:[#allocation3 + $0xa0] sm:$0xff]  ;;  %v2095_v60 = vld [vmem:[#allocation3 + $0x98] sm:$0xff]  ;;  %v2086_v63 = vld [vmem:[#allocation3 + $0x50] sm:$0xff] }
  0x21   :  { %401 = vmatpush.bf16.msra.mxu3 %v2071_v19  ;;  %v2104_v57 = vld [vmem:[#allocation3 + $0xe0] sm:$0xff]  ;;  %v2103_v61 = vld [vmem:[#allocation3 + $0xd8] sm:$0xff]  ;;  %v2094_v0 = vld [vmem:[#allocation3 + $0x90] sm:$0xff] }
  0x22   :  { %363 = vmatpush.bf16.msra.mxu0 %v2046_v22  ;;  %v2102_v1 = vld [vmem:[#allocation3 + $0xd0] sm:$0xff]  ;;  %v2077_v2 = vld [vmem:[#allocation3 + $0x8] sm:$0xff]  ;;  %v2076_v6 = vld [vmem:[#allocation3] sm:$0xff] }
  0x23   :  { %376 = vmatpush.bf16.msra.mxu1 %v2054_v23  ;;  %v2085_v3 = vld [vmem:[#allocation3 + $0x48] sm:$0xff]  ;;  %v2084_v7 = vld [vmem:[#allocation3 + $0x40] sm:$0xff]  ;;  %v2115_v10 = vld [vmem:[#allocation5 + $0x38] sm:$0xff] }
  0x24   :  { %389 = vmatpush.bf16.msra.mxu2 %v2062_v24  ;;  %v2093_v4 = vld [vmem:[#allocation3 + $0x88] sm:$0xff]  ;;  %v2092_v8 = vld [vmem:[#allocation3 + $0x80] sm:$0xff]  ;;  %v2123_v11 = vld [vmem:[#allocation5 + $0x78] sm:$0xff] }
  0x25   :  { %402 = vmatpush.bf16.msra.mxu3 %v2070_v25  ;;  %v2101_v5 = vld [vmem:[#allocation3 + $0xc8] sm:$0xff]  ;;  %v2100_v9 = vld [vmem:[#allocation3 + $0xc0] sm:$0xff]  ;;  %v2131_v12 = vld [vmem:[#allocation5 + $0xb8] sm:$0xff] }
  0x26   :  { %364 = vmatpush.bf16.msra.mxu0 %v2045_v26  ;;  %v2139_v13 = vld [vmem:[#allocation5 + $0xf8] sm:$0xff]  ;;  %v2114_v14 = vld [vmem:[#allocation5 + $0x30] sm:$0xff]  ;;  %v2113_v18 = vld [vmem:[#allocation5 + $0x28] sm:$0xff] }
  0x27   :  { %377 = vmatpush.bf16.msra.mxu1 %v2053_v27  ;;  %v2122_v15 = vld [vmem:[#allocation5 + $0x70] sm:$0xff]  ;;  %v2121_v19 = vld [vmem:[#allocation5 + $0x68] sm:$0xff]  ;;  %v2112_v22 = vld [vmem:[#allocation5 + $0x20] sm:$0xff] }
  0x28   :  { %390 = vmatpush.bf16.msra.mxu2 %v2061_v28  ;;  %v2130_v16 = vld [vmem:[#allocation5 + $0xb0] sm:$0xff]  ;;  %v2129_v20 = vld [vmem:[#allocation5 + $0xa8] sm:$0xff]  ;;  %v2120_v23 = vld [vmem:[#allocation5 + $0x60] sm:$0xff] }
  0x29   :  { %403 = vmatpush.bf16.msra.mxu3 %v2069_v29  ;;  %v2138_v17 = vld [vmem:[#allocation5 + $0xf0] sm:$0xff]  ;;  %v2137_v21 = vld [vmem:[#allocation5 + $0xe8] sm:$0xff]  ;;  %v2128_v24 = vld [vmem:[#allocation5 + $0xa0] sm:$0xff] }
  0x2a   :  { %365 = vmatpush.bf16.msra.mxu0 %v2044_v30  ;;  %v2136_v25 = vld [vmem:[#allocation5 + $0xe0] sm:$0xff]  ;;  %v2111_v26 = vld [vmem:[#allocation5 + $0x18] sm:$0xff]  ;;  %v2110_v30 = vld [vmem:[#allocation5 + $0x10] sm:$0xff] }
  0x2b   :  { %378 = vmatpush.bf16.msra.mxu1 %v2052_v31  ;;  %v2119_v27 = vld [vmem:[#allocation5 + $0x58] sm:$0xff]  ;;  %v2118_v31 = vld [vmem:[#allocation5 + $0x50] sm:$0xff]  ;;  %v2125_v36 = vld [vmem:[#allocation5 + $0x88] sm:$0xff] }
  0x2c   :  { %391 = vmatpush.bf16.msra.mxu2 %v2060_v32  ;;  %v2127_v28 = vld [vmem:[#allocation5 + $0x98] sm:$0xff]  ;;  %v2126_v32 = vld [vmem:[#allocation5 + $0x90] sm:$0xff]  ;;  %v2133_v37 = vld [vmem:[#allocation5 + $0xc8] sm:$0xff] }
  0x2d   :  { %404 = vmatpush.bf16.msra.mxu3 %v2068_v33  ;;  %366 = vmatmul.bf16.vlgmr.msra.gmra.mxu0 %v2460_v44  ;;  %v2135_v29 = vld [vmem:[#allocation5 + $0xd8] sm:$0xff]  ;;  %v2134_v33 = vld [vmem:[#allocation5 + $0xd0] sm:$0xff]  ;;  %v2108_v38 = vld [vmem:[#allocation5] sm:$0xff] }
  0x2e   :  { %666 = vmatpush.bf16.msrb.mxu0 %v2083_v34  ;;  %379 = vmatmul.bf16.vlgmr.msra.gmra.mxu1 %v2462_v45  ;;  %v2109_v34 = vld [vmem:[#allocation5 + $0x8] sm:$0xff]  ;;  %v2116_v39 = vld [vmem:[#allocation5 + $0x40] sm:$0xff] }
  0x2f   :  { %679 = vmatpush.bf16.msrb.mxu1 %v2091_v35  ;;  %392 = vmatmul.bf16.vlgmr.msra.gmra.mxu2 %v2456_v42  ;;  %v2117_v35 = vld [vmem:[#allocation5 + $0x48] sm:$0xff] }
  0x30   :  { %692 = vmatpush.bf16.msrb.mxu2 %v2099_v40  ;;  %405 = vmatmul.bf16.vlgmr.msra.gmra.mxu3 %v2458_v43  ;;  %v2124_v40 = vld [vmem:[#allocation5 + $0x80] sm:$0xff] }
  0x31   :  { %705 = vmatpush.bf16.msrb.mxu3 %v2107_v41  ;;  %v2132_v41 = vld [vmem:[#allocation5 + $0xc0] sm:$0xff] }
  0x32   :  { %667 = vmatpush.bf16.msrb.mxu0 %v2082_v46  ;;  %v2147_v46 = vld [vmem:[#allocation7 + $0x38] sm:$0xff] }
  0x33   :  { %680 = vmatpush.bf16.msrb.mxu1 %v2090_v47  ;;  %v2155_v47 = vld [vmem:[#allocation7 + $0x78] sm:$0xff] }
  0x34   :  { %693 = vmatpush.bf16.msrb.mxu2 %v2098_v48  ;;  %v2163_v48 = vld [vmem:[#allocation7 + $0xb8] sm:$0xff] }
  0x35   :  { %706 = vmatpush.bf16.msrb.mxu3 %v2106_v49  ;;  %v2171_v49 = vld [vmem:[#allocation7 + $0xf8] sm:$0xff] }
  0x36   :  { %668 = vmatpush.bf16.msrb.mxu0 %v2081_v50  ;;  %v2146_v50 = vld [vmem:[#allocation7 + $0x30] sm:$0xff] }
  0x37   :  { %681 = vmatpush.bf16.msrb.mxu1 %v2089_v51  ;;  %v2154_v51 = vld [vmem:[#allocation7 + $0x70] sm:$0xff] }
  0x38   :  { %694 = vmatpush.bf16.msrb.mxu2 %v2097_v52  ;;  %v2162_v52 = vld [vmem:[#allocation7 + $0xb0] sm:$0xff] }
  0x39   :  { %707 = vmatpush.bf16.msrb.mxu3 %v2105_v53  ;;  %v2170_v53 = vld [vmem:[#allocation7 + $0xf0] sm:$0xff] }
  0x3a   :  { %669 = vmatpush.bf16.msrb.mxu0 %v2080_v54  ;;  %v2189_v54 = vld [vmem:[%s2540_s5 + $0x8] ss:$0 sm:$0xff] }
  0x3b   :  { %682 = vmatpush.bf16.msrb.mxu1 %v2088_v55  ;;  %v2190_v55 = vld [vmem:[%s2540_s5 + $0x6] ss:$0 sm:$0xff]  ;;  %1437 = vrot.lane.b32.xlu0 %v2189_v54, %s2280_s11 }
  0x3c   :  { %695 = vmatpush.bf16.msrb.mxu2 %v2096_v56  ;;  %v2195_v56 = vld [vmem:[%s2540_s5] ss:$0 sm:$0xff]  ;;  %1411 = vrot.lane.b32.xlu1 %v2190_v55, %s2281_s4 }
  0x3d   :  { %708 = vmatpush.bf16.msrb.mxu3 %v2104_v57  ;;  %v2145_v57 = vld [vmem:[#allocation7 + $0x28] sm:$0xff]  ;;  %1345 = vrot.lane.b32.xlu2 %v2195_v56, %s2282_s12 }
  0x3e   :  { %670 = vmatpush.bf16.msrb.mxu0 %v2079_v58  ;;  %v2153_v58 = vld [vmem:[#allocation7 + $0x68] sm:$0xff] }
  0x3f   :  { %683 = vmatpush.bf16.msrb.mxu1 %v2087_v59  ;;  %v2161_v59 = vld [vmem:[#allocation7 + $0xa8] sm:$0xff] }
  0x40   :  { %696 = vmatpush.bf16.msrb.mxu2 %v2095_v60  ;;  %v2169_v60 = vld [vmem:[#allocation7 + $0xe8] sm:$0xff] }
  0x41   :  { %709 = vmatpush.bf16.msrb.mxu3 %v2103_v61  ;;  %v2144_v61 = vld [vmem:[#allocation7 + $0x20] sm:$0xff] }
  0x42   :  { %671 = vmatpush.bf16.msrb.mxu0 %v2078_v62  ;;  %v2152_v62 = vld [vmem:[#allocation7 + $0x60] sm:$0xff] }
  0x43   :  { %684 = vmatpush.bf16.msrb.mxu1 %v2086_v63  ;;  %v2160_v63 = vld [vmem:[#allocation7 + $0xa0] sm:$0xff] }
  0x44   :  { %697 = vmatpush.bf16.msrb.mxu2 %v2094_v0  ;;  %v2168_v0 = vld [vmem:[#allocation7 + $0xe0] sm:$0xff] }
  0x45   :  { %710 = vmatpush.bf16.msrb.mxu3 %v2102_v1  ;;  %v2191_v1 = vld [vmem:[%s2540_s5 + $0x7] ss:$0 sm:$0xff] }
  0x46   :  { %672 = vmatpush.bf16.msrb.mxu0 %v2077_v2  ;;  %v2192_v2 = vld [vmem:[%s2540_s5 + $0x5] ss:$0 sm:$0xff]  ;;  %1424 = vrot.lane.b32.xlu1 %v2191_v1, %s2283_s18 }
  0x47   :  { %685 = vmatpush.bf16.msrb.mxu1 %v2085_v3  ;;  %v2196_v3 = vld [vmem:[%s2540_s5 + $0x1] ss:$0 sm:$0xff]  ;;  %1398 = vrot.lane.b32.xlu0 %v2192_v2, %s2284_s19 }
  0x48   :  { %698 = vmatpush.bf16.msrb.mxu2 %v2093_v4  ;;  %v2143_v4 = vld [vmem:[#allocation7 + $0x18] sm:$0xff]  ;;  %1358 = vrot.lane.b32.xlu2 %v2196_v3, %s2285_s20 }
  0x49   :  { %711 = vmatpush.bf16.msrb.mxu3 %v2101_v5  ;;  %v2151_v5 = vld [vmem:[#allocation7 + $0x58] sm:$0xff] }
  0x4a   :  { %673 = vmatpush.bf16.msrb.mxu0 %v2076_v6  ;;  %v2159_v6 = vld [vmem:[#allocation7 + $0x98] sm:$0xff] }
  0x4b   :  { %686 = vmatpush.bf16.msrb.mxu1 %v2084_v7  ;;  %v2167_v7 = vld [vmem:[#allocation7 + $0xd8] sm:$0xff] }
  0x4c   :  { %699 = vmatpush.bf16.msrb.mxu2 %v2092_v8  ;;  %v2142_v8 = vld [vmem:[#allocation7 + $0x10] sm:$0xff] }
  0x4d   :  { %712 = vmatpush.bf16.msrb.mxu3 %v2100_v9  ;;  %674 = vmatmul.bf16.vlgmr.msrb.gmra.mxu0 %v2460_v44  ;;  %v2150_v9 = vld [vmem:[#allocation7 + $0x50] sm:$0xff] }
  0x4e   :  { %975 = vmatpush.bf16.msra.mxu0 %v2115_v10  ;;  %687 = vmatmul.bf16.vlgmr.msrb.gmra.mxu1 %v2462_v45  ;;  %v2158_v10 = vld [vmem:[#allocation7 + $0x90] sm:$0xff] }
  0x4f   :  { %988 = vmatpush.bf16.msra.mxu1 %v2123_v11  ;;  %700 = vmatmul.bf16.vlgmr.msrb.gmra.mxu2 %v2456_v42  ;;  %v2166_v11 = vld [vmem:[#allocation7 + $0xd0] sm:$0xff] }
  0x50   :  { %1001 = vmatpush.bf16.msra.mxu2 %v2131_v12  ;;  %713 = vmatmul.bf16.vlgmr.msrb.gmra.mxu3 %v2458_v43  ;;  %v2193_v12 = vld [vmem:[%s2540_s5 + $0x3] ss:$0 sm:$0xff] }
  0x51   :  { %1014 = vmatpush.bf16.msra.mxu3 %v2139_v13  ;;  %v2194_v13 = vld [vmem:[%s2540_s5 + $0x2] ss:$0 sm:$0xff]  ;;  %1384 = vrot.lane.b32.xlu1 %v2193_v12, %s2286_s25 }
  0x52   :  { %976 = vmatpush.bf16.msra.mxu0 %v2114_v14  ;;  %v2141_v14 = vld [vmem:[#allocation7 + $0x8] sm:$0xff]  ;;  %1371 = vrot.lane.b32.xlu0 %v2194_v13, %s2287_s26 }
  0x53   :  { %989 = vmatpush.bf16.msra.mxu1 %v2122_v15  ;;  %v2149_v15 = vld [vmem:[#allocation7 + $0x48] sm:$0xff] }
  0x54   :  { %1002 = vmatpush.bf16.msra.mxu2 %v2130_v16  ;;  %v2157_v16 = vld [vmem:[#allocation7 + $0x88] sm:$0xff] }
  0x55   :  { %1015 = vmatpush.bf16.msra.mxu3 %v2138_v17  ;;  %v2165_v17 = vld [vmem:[#allocation7 + $0xc8] sm:$0xff] }
  0x56   :  { %977 = vmatpush.bf16.msra.mxu0 %v2113_v18  ;;  %v2140_v18 = vld [vmem:[#allocation7] sm:$0xff] }
  0x57   :  { %990 = vmatpush.bf16.msra.mxu1 %v2121_v19  ;;  %v2148_v19 = vld [vmem:[#allocation7 + $0x40] sm:$0xff] }
  0x58   :  { %1003 = vmatpush.bf16.msra.mxu2 %v2129_v20  ;;  %v2156_v20 = vld [vmem:[#allocation7 + $0x80] sm:$0xff] }
  0x59   :  { %1016 = vmatpush.bf16.msra.mxu3 %v2137_v21  ;;  %v2164_v21 = vld [vmem:[#allocation7 + $0xc0] sm:$0xff] }
  0x5a   :  { %978 = vmatpush.bf16.msra.mxu0 %v2112_v22 }
  0x5b   :  { %991 = vmatpush.bf16.msra.mxu1 %v2120_v23 }
  0x5c   :  { %1004 = vmatpush.bf16.msra.mxu2 %v2128_v24 }
  0x5d   :  { %1017 = vmatpush.bf16.msra.mxu3 %v2136_v25 }
  0x5e   :  { %979 = vmatpush.bf16.msra.mxu0 %v2111_v26 }
  0x5f   :  { %992 = vmatpush.bf16.msra.mxu1 %v2119_v27 }
  0x60   :  { %1005 = vmatpush.bf16.msra.mxu2 %v2127_v28 }
  0x61   :  { %1018 = vmatpush.bf16.msra.mxu3 %v2135_v29 }
  0x62   :  { %980 = vmatpush.bf16.msra.mxu0 %v2110_v30 }
  0x63   :  { %993 = vmatpush.bf16.msra.mxu1 %v2118_v31 }
  0x64   :  { %1006 = vmatpush.bf16.msra.mxu2 %v2126_v32 }
  0x65   :  { %1019 = vmatpush.bf16.msra.mxu3 %v2134_v33 }
  0x66   :  { %981 = vmatpush.bf16.msra.mxu0 %v2109_v34 }
  0x67   :  { %994 = vmatpush.bf16.msra.mxu1 %v2117_v35 }
  0x68   :  { %1007 = vmatpush.bf16.msra.mxu2 %v2125_v36 }
  0x69   :  { %1020 = vmatpush.bf16.msra.mxu3 %v2133_v37 }
  0x6a   :  { %982 = vmatpush.bf16.msra.mxu0 %v2108_v38 }
  0x6b   :  { %995 = vmatpush.bf16.msra.mxu1 %v2116_v39 }
  0x6c   :  { %1008 = vmatpush.bf16.msra.mxu2 %v2124_v40 }
  0x6d   :  { %1021 = vmatpush.bf16.msra.mxu3 %v2132_v41  ;;  %983 = vmatmul.bf16.vlgmr.msra.gmra.mxu0 %v2460_v44 }
  0x6e   :  { %1284 = vmatpush.bf16.msrb.mxu0 %v2147_v46  ;;  %996 = vmatmul.bf16.vlgmr.msra.gmra.mxu1 %v2462_v45 }
  0x6f   :  { %1297 = vmatpush.bf16.msrb.mxu1 %v2155_v47  ;;  %1009 = vmatmul.bf16.vlgmr.msra.gmra.mxu2 %v2456_v42  ;;  %v2288_v47 = vmov 0.0  }
  0x70   :  { %1310 = vmatpush.bf16.msrb.mxu2 %v2163_v48  ;;  %1022 = vmatmul.bf16.vlgmr.msra.gmra.mxu3 %v2458_v43  ;;  %1341 = vst [vmem:[#allocation2 + $0x20] sm:$0xf] %v2288_v47 }
  0x71   :  { %1323 = vmatpush.bf16.msrb.mxu3 %v2171_v49  ;;  %1337 = vst [vmem:[#allocation2] sm:$0xff] %v2288_v47 }
  0x72   :  { %1285 = vmatpush.bf16.msrb.mxu0 %v2146_v50  ;;  %1338 = vst [vmem:[#allocation2 + $0x8] sm:$0xff] %v2288_v47 }
  0x73   :  { %1298 = vmatpush.bf16.msrb.mxu1 %v2154_v51  ;;  %1339 = vst [vmem:[#allocation2 + $0x10] sm:$0xff] %v2288_v47 }
  0x74   :  { %1311 = vmatpush.bf16.msrb.mxu2 %v2162_v52  ;;  %1340 = vst [vmem:[#allocation2 + $0x18] sm:$0xff] %v2288_v47 }
  0x75   :  { %1324 = vmatpush.bf16.msrb.mxu3 %v2170_v53 }
  0x76   :  { %1286 = vmatpush.bf16.msrb.mxu0 %v2145_v57 }
  0x77   :  { %1299 = vmatpush.bf16.msrb.mxu1 %v2153_v58 }
  0x78   :  { %1312 = vmatpush.bf16.msrb.mxu2 %v2161_v59 }
  0x79   :  { %1325 = vmatpush.bf16.msrb.mxu3 %v2169_v60 }
  0x7a   :  { %1287 = vmatpush.bf16.msrb.mxu0 %v2144_v61 }
  0x7b   :  { %1300 = vmatpush.bf16.msrb.mxu1 %v2152_v62 }
  0x7c   :  { %1313 = vmatpush.bf16.msrb.mxu2 %v2160_v63 }
  0x7d   :  { %1326 = vmatpush.bf16.msrb.mxu3 %v2168_v0 }
  0x7e   :  { %1288 = vmatpush.bf16.msrb.mxu0 %v2143_v4 }
  0x7f   :  { %1301 = vmatpush.bf16.msrb.mxu1 %v2151_v5 }
  0x80   :  { %1314 = vmatpush.bf16.msrb.mxu2 %v2159_v6 }
  0x81   :  { %1327 = vmatpush.bf16.msrb.mxu3 %v2167_v7 }
  0x82   :  { %1289 = vmatpush.bf16.msrb.mxu0 %v2142_v8 }
  0x83   :  { %1302 = vmatpush.bf16.msrb.mxu1 %v2150_v9 }
  0x84   :  { %1315 = vmatpush.bf16.msrb.mxu2 %v2158_v10 }
  0x85   :  { %1328 = vmatpush.bf16.msrb.mxu3 %v2166_v11 }
  0x86   :  { %1290 = vmatpush.bf16.msrb.mxu0 %v2141_v14 }
  0x87   :  { %1303 = vmatpush.bf16.msrb.mxu1 %v2149_v15 }
  0x88   :  { %1316 = vmatpush.bf16.msrb.mxu2 %v2157_v16 }
  0x89   :  { %1329 = vmatpush.bf16.msrb.mxu3 %v2165_v17 }
  0x8a   :  { %1291 = vmatpush.bf16.msrb.mxu0 %v2140_v18 }
  0x8b   :  { %1304 = vmatpush.bf16.msrb.mxu1 %v2148_v19 }
  0x8c   :  { %1317 = vmatpush.bf16.msrb.mxu2 %v2156_v20 }
  0x8d   :  { %1330 = vmatpush.bf16.msrb.mxu3 %v2164_v21  ;;  %1292 = vmatmul.bf16.vlgmr.msrb.gmra.mxu0 %v2460_v44 }
  0x8e   :  { %1305 = vmatmul.bf16.vlgmr.msrb.gmra.mxu1 %v2462_v45 }
  0x8f   :  { %1318 = vmatmul.bf16.vlgmr.msrb.gmra.mxu2 %v2456_v42 }
  0x90   :  { %1331 = vmatmul.bf16.vlgmr.msrb.gmra.mxu3 %v2458_v43 }
  0x97   :  { %v1346_v4 = vpop.permute.xlu2 %1345 }
  0xa2   :  { %v1359_v14 = vpop.permute.xlu2 %1358 }
  0xaa   :  { %v367_v22 = vpop.f32.mrf.mxu0 }
  0xab   :  { %v380_v23 = vpop.f32.mrf.mxu1 }
  0xac   :  { %v381_v24 = vadd.f32 %v380_v23, %v367_v22 }
  0xad   :  { %v1438_v57 = vpop.permute.xlu0 %1437 }
  0xae   :  { %v1412_v60 = vpop.permute.xlu1 %1411 }
  0xb2   :  { %v393_v25 = vpop.f32.mrf.mxu2  ;;  %v369_v29 = vpop.f32.mrf.mxu0 }
  0xb3   :  { %v406_v26 = vpop.f32.mrf.mxu3  ;;  %v394_v27 = vadd.f32 %v393_v25, %v381_v24  ;;  %v382_v30 = vpop.f32.mrf.mxu1 }
  0xb4   :  { %v1509_v30 = vld [vmem:[%s2543_s8] sm:$0xf] }
  0xb5   :  { %v407_v28 = vadd.f32 %v406_v26, %v394_v27  ;;  %v1456_v26 = vld [vmem:[%s2542_s7] sm:$0xf] }
  0xb8   :  { %v1425_v13 = vpop.permute.xlu1 %1424 }
  0xb9   :  { %v1399_v7 = vpop.permute.xlu0 %1398 }
  0xba   :  { %v395_v31 = vpop.f32.mrf.mxu2 }
  0xbb   :  { %v408_v32 = vpop.f32.mrf.mxu3 }
  0xc3   :  { %v1385_v19 = vpop.permute.xlu1 %1384 }
  0xc4   :  { %v1372_v18 = vpop.permute.xlu0 %1371 }
  0xca   :  { %v675_v33 = vpop.f32.mrf.mxu0 }
  0xcb   :  { %v688_v34 = vpop.f32.mrf.mxu1 }
  0xcc   :  { %v689_v50 = vadd.f32 %v688_v34, %v675_v33  ;;  %v1516_v33 = vld [vmem:[%s2544_s9] sm:$0xf] }
  0xd2   :  { %v701_v44 = vpop.f32.mrf.mxu2  ;;  %v677_v45 = vpop.f32.mrf.mxu0 }
  0xd3   :  { %v714_v35 = vpop.f32.mrf.mxu3  ;;  %v690_v36 = vpop.f32.mrf.mxu1  ;;  %v702_v52 = vadd.f32 %v701_v44, %v689_v50 }
  0xd5   :  { %v715_v56 = vadd.f32 %v714_v35, %v702_v52 }
  0xd7   :  { %v718_v63 = vmax.f32 %v407_v28, %v715_v56  ;;  %v2289_v28 = vmov 0  }
  0xd8   :  { %2187 = vset.pattern.permute.xlu1 %v2289_v28  ;;  %2188 = vset.pattern.permute.xlu0 %v2289_v28 }
  0xda   :  { %v703_v42 = vpop.f32.mrf.mxu2 }
  0xdb   :  { %v716_v37 = vpop.f32.mrf.mxu3 }
  0xea   :  { %v984_v43 = vpop.f32.mrf.mxu0 }
  0xeb   :  { %v997_v38 = vpop.f32.mrf.mxu1 }
  0xec   :  { %v998_v51 = vadd.f32 %v997_v38, %v984_v43 }
  0xf2   :  { %v1010_v39 = vpop.f32.mrf.mxu2  ;;  %v986_v41 = vpop.f32.mrf.mxu0 }
  0xf3   :  { %v1023_v40 = vpop.f32.mrf.mxu3  ;;  %v999_v46 = vpop.f32.mrf.mxu1  ;;  %v1011_v55 = vadd.f32 %v1010_v39, %v998_v51  ;;  %v1447_v39 = vld [vmem:[%s2541_s6] sm:$0x3] }
  0xf5   :  { %v1024_v59 = vadd.f32 %v1023_v40, %v1011_v55 }
  0xf7   :  { %v1027_v3 = vmax.f32 %v718_v63, %v1024_v59 }
  0xfa   :  { %v1012_v48 = vpop.f32.mrf.mxu2 }
  0xfb   :  { %v1025_v49 = vpop.f32.mrf.mxu3 }
 0x10a   :  { %v1293_v53 = vpop.f32.mrf.mxu0 }
 0x10b   :  { %v1306_v54 = vpop.f32.mrf.mxu1 }
 0x10c   :  { %v1307_v58 = vadd.f32 %v1306_v54, %v1293_v53 }
 0x112   :  { %v1319_v61 = vpop.f32.mrf.mxu2  ;;  %v1295_v1 = vpop.f32.mrf.mxu0 }
 0x113   :  { %v1332_v62 = vpop.f32.mrf.mxu3  ;;  %v1320_v0 = vadd.f32 %v1319_v61, %v1307_v58  ;;  %v1308_v2 = vpop.f32.mrf.mxu1 }
 0x115   :  { %v1333_v5 = vadd.f32 %v1332_v62, %v1320_v0 }
 0x117   :  { %v1336_v6 = vmax.f32 %v1027_v3, %v1333_v5 }
 0x119   :  { %v1440_v8 = vmul.f32 %v1438_v57, %v1336_v6  ;;  %1394 = vst [vmem:[#allocation2 + $0x10] sm:$0xf] %v1336_v6  ;;  %v1414_v11 = vmul.f32 %v1412_v60, %v1336_v6  ;;  %v1401_v12 = vmul.f32 %v1399_v7, %v1336_v6  ;;  %v1427_v15 = vmul.f32 %v1425_v13, %v1336_v6 }
 0x11a   :  { %v1321_v9 = vpop.f32.mrf.mxu2  ;;  %v1361_v16 = vmul.f32 %v1359_v14, %v1336_v6  ;;  %v1348_v17 = vmul.f32 %v1346_v4, %v1336_v6  ;;  %v1374_v20 = vmul.f32 %v1372_v18, %v1336_v6  ;;  %v1387_v21 = vmul.f32 %v1385_v19, %v1336_v6 }
 0x11b   :  { %v1334_v10 = vpop.f32.mrf.mxu3  ;;  %1442 = vrot.lane.b32.xlu2 %v1440_v8, %s2282_s12  ;;  %1416 = vrot.lane.b32.xlu1 %v1414_v11, %s2287_s26 }
 0x11c   :  { %1403 = vrot.lane.b32.xlu0 %v1401_v12, %s2286_s25 }
 0x123   :  { %1429 = vrot.lane.b32.xlu2 %v1427_v15, %s2285_s20  ;;  %1363 = vrot.lane.b32.xlu1 %v1361_v16, %s2283_s18 }
 0x124   :  { %1350 = vrot.lane.b32.xlu0 %v1348_v17, %s2280_s11 }
 0x12b   :  { %1376 = vrot.lane.b32.xlu2 %v1374_v20, %s2281_s4  ;;  %1459 = vperm.xlu1 %2187, %v1456_v26  }
 0x12c   :  { %1389 = vrot.lane.b32.xlu0 %v1387_v21, %s2284_s19 }
 0x133   :  { %1512 = vperm.xlu1 %2187, %v1509_v30  }
 0x13b   :  { %1519 = vperm.xlu1 %2187, %v1516_v33  }
 0x175   :  { %v1443_v22 = vpop.permute.xlu2 %1442 }
 0x176   :  { %1446 = vst.msk [vmem:[#allocation2 + $0x20] sm:$0xf] %vm1445_vm0, %v1443_v22 }
 0x17d   :  { %v1430_v23 = vpop.permute.xlu2 %1429  ;;  %v1452_v24 = vld [vmem:[#allocation2 + $0x20] sm:$0xf] }
 0x17e   :  { %1433 = vst.msk [vmem:[#allocation2 + $0x1c] sm:$0xf] %vm1432_vm1, %v1430_v23  ;;  %v1455_v25 = vpack.c.bf16 %v1452_v24, %v1452_v24 }
 0x180   :  { %v1468_v27 = vsel %vm1466_vm2, %v1455_v25, 0 }
 0x181   :  { %1475 = vmatpush.bf16.msra.mxu0 %v1468_v27 }
 0x185   :  { %v1377_v29 = vpop.permute.xlu2 %1376 }
 0x186   :  { %1380 = vst.msk [vmem:[#allocation2 + $0x8] sm:$0xf] %vm1379_vm3, %v1377_v29 }
 0x18d   :  { %v1417_v31 = vpop.permute.xlu1 %1416 }
 0x18e   :  { %v1404_v32 = vpop.permute.xlu0 %1403  ;;  %1420 = vst.msk [vmem:[#allocation2 + $0x18] sm:$0xf] %vm1419_vm4, %v1417_v31 }
 0x18f   :  { %1407 = vst.msk [vmem:[#allocation2 + $0x14] sm:$0xf] %vm1406_vm5, %v1404_v32 }
 0x195   :  { %v1364_v34 = vpop.permute.xlu1 %1363  ;;  %v1451_v35 = vld [vmem:[#allocation2 + $0x18] sm:$0xff] }
 0x196   :  { %v1351_v44 = vpop.permute.xlu0 %1350  ;;  %1367 = vst.msk [vmem:[#allocation2 + $0x4] sm:$0xf] %vm1366_vm6, %v1364_v34  ;;  %v1450_v45 = vld [vmem:[#allocation2 + $0x10] sm:$0xff] }
 0x197   :  { %1354 = vst.msk [vmem:[#allocation2] sm:$0xf] %vm1353_vm7, %v1351_v44  ;;  %v1454_v36 = vpack.c.bf16 %v1451_v35, %v1450_v45 }
 0x199   :  { %1476 = vmatpush.bf16.msra.mxu0 %v1454_v36 }
 0x19d   :  { %v1460_v40 = vpop.permute.xlu1 %1459 }
 0x19e   :  { %v1390_v42 = vpop.permute.xlu0 %1389  ;;  %v1448_v37 = vld [vmem:[#allocation2] sm:$0xff] }
 0x19f   :  { %1393 = vst.msk [vmem:[#allocation2 + $0xc] sm:$0xf] %vm1392_vm8, %v1390_v42 }
 0x1a5   :  { %v1513_v62 = vpop.permute.xlu1 %1512 }
 0x1a6   :  { %v1449_v43 = vld [vmem:[#allocation2 + $0x8] sm:$0xff] }
 0x1a7   :  { %v1453_v38 = vpack.c.bf16 %v1449_v43, %v1448_v37 }
 0x1a9   :  { %1477 = vmatpush.bf16.msra.mxu0 %v1453_v38 }
 0x1ac   :  { %2043 = vmatmul.msk.bf16.vlgmr.msra.gmra.mxu0 %vm1462_vm9, %v1447_v39 }
 0x1ad   :  { %v1520_v6 = vpop.permute.xlu1 %1519 }
 0x229   :  { %v1479_v41 = vpop.f32.mrf.mxu0 }
 0x22a   :  { %v1480_v46 = vadd.f32 %v1479_v41, %v1460_v40 }
 0x22c   :  { %v1484_v47 = vsel %vm1483_vm10, %v1480_v46, 0.0  ;;  %v1488_v48 = vmul.f32 %v1480_v46, %v1480_v46 }
 0x22d   :  { %1485 = vadd.xlane.f32.xlu2 %v1484_v47 }
 0x22e   :  { %v1489_v49 = vsel %vm1483_vm10, %v1488_v48, 0.0 }
 0x22f   :  { %1490 = vadd.xlane.f32.xlu0 %v1489_v49 }
 0x231   :  { %v1481_v50 = vpop.f32.mrf.mxu0 }
 0x2a0   :  { %v1486_v51 = vpop.xlane.xlu2 %1485 }
 0x2a1   :  { %v1487_v52 = vmul.f32 0.0078125, %v1486_v51 }
 0x2a2   :  { %v1491_v53 = vpop.xlane.xlu0 %1490 }
 0x2a3   :  { %v1493_v54 = vmul.f32 %v1487_v52, %v1487_v52  ;;  %v1492_v55 = vmul.f32 0.0078125, %v1491_v53  ;;  %v1496_v2 = vsub.f32 %v1480_v46, %v1487_v52 }
 0x2a5   :  { %v1494_v56 = vsub.f32 %v1492_v55, %v1493_v54 }
 0x2a7   :  { %v1495_v57 = vmax.f32 %v1494_v56, 0.0 }
 0x2a9   :  { %v1497_v58 = vadd.f32 1e-05, %v1495_v57 }
 0x2ab   :  { %2197 = vrsqrt.f32 %v1497_v58  ;;  %vm1504_vm12 = vweird.f32 %v1497_v58 }
 0x2b1   :  { %v2198_v59 = vpop.eup %2197 }
 0x2b2   :  { %v1499_v60 = vmul.f32 %v2198_v59, %v1497_v58  ;;  %vm1505_vm11 = vweird.f32 %v2198_v59 }
 0x2b3   :  { %vm1506_vm13 = vmor %vm1504_vm12, %vm1505_vm11 }
 0x2b4   :  { %v1500_v61 = vmul.f32 %v2198_v59, %v1499_v60 }
 0x2b6   :  { %v1501_v63 = vmul.f32 0.5, %v1500_v61 }
 0x2b8   :  { %v1502_v0 = vsub.f32 1.5, %v1501_v63 }
 0x2ba   :  { %v1503_v1 = vmul.f32 %v2198_v59, %v1502_v0 }
 0x2bc   :  { %v1507_v3 = vsel %vm1506_vm13, %v2198_v59, %v1503_v1 }
 0x2bd   :  { %v1508_v4 = vmul.f32 %v1507_v3, %v1496_v2 }
 0x2bf   :  { %v1515_v5 = vmul.f32 %v1513_v62, %v1508_v4 }
 0x2c1   :  { %v1522_v7 = vadd.f32 %v1520_v6, %v1515_v5 }
 0x2c3   :  { %v1523_v8 = vmax.f32 %v1522_v7, 0.0 }
 0x2c5   :  { %1524 = vst [vmem:[%s2545_s10] sm:$0xf] %v1523_v8 }
 0x2c6   :  { %1529 = vsyncpa [#allocation4], 1 }
 0x2c7   :  { %1530 = vsyncpa [#allocation6], 1 }

// kernel: rsu6_forward.19
= control target key start
LH: loop header
LB: loop body
LE: loop exit
PB: predicated region body
PF: predicated region fallthrough
CT: control target
= control target key end

     0   :  { %vm27_vm0 = vcmask 15360   ;;  %vm30_vm1 = vcmask 11264   ;;  %v117_v0 = vmov 0.0   ;;  %v118_v3 = vmov 0   ;;  %s185_s0 = inlined_call_operand.vmem [shape: f32[4,2], index: 0, kind: input, shape index: {}]   ;;  %s186_s1 = inlined_call_operand.vmem [shape: f32[4,2], index: 1, kind: input, shape index: {}]   ;;  %s187_s2 = inlined_call_operand.vmem [shape: f32[9,2], index: 2, kind: input, shape index: {}]   ;;  %s188_s4 = inlined_call_operand.vmem [shape: f32[4,1], index: 4, kind: input, shape index: {}]   ;;  %s189_s3 = inlined_call_operand.vmem [shape: bf16[4,8], index: 3, kind: input, shape index: {}]   ;;  %s190_s6 = inlined_call_operand.vmem [shape: f32[4,1], index: 6, kind: input, shape index: {}]   ;;  %s191_s5 = inlined_call_operand.vmem [shape: f32[4,1], index: 5, kind: input, shape index: {}]   ;;  %s192_s7 = inlined_call_operand.vmem [shape: f32[4,2], index: 7, kind: output, shape index: {}]  }
   0x1   :  { %28 = vst.msk [vmem:[#allocation2] sm:$0xff] %vm27_vm0, %v117_v0  ;;  %v29_v1 = vld [vmem:[%s185_s0] sm:$0xf]  ;;  %112 = vset.pattern.permute.xlu0 %v118_v3  ;;  %113 = vset.pattern.permute.xlu1 %v118_v3  ;;  %vm47_vm2 = vcmask 1043456   ;;  %vm43_vm3 = vcmask 64512  }
   0x2   :  { %v32_v2 = vld [vmem:[%s186_s1] sm:$0xf]  ;;  %31 = vst.msk [vmem:[#allocation2] sm:$0xf] %vm30_vm1, %v29_v1  ;;  %114 = vset.pattern.permute.xlu2 %v118_v3 }
   0x3   :  { %33 = vst.msk [vmem:[#allocation2 + $0x4] sm:$0xf] %vm30_vm1, %v32_v2  ;;  %v37_v4 = vld [vmem:[%s188_s4] sm:$0xf] }
   0x4   :  { %40 = vperm.xlu0 %112, %v37_v4   ;;  %v34_v8 = vld [vmem:[%s189_s3] sm:$0x3] }
   0x5   :  { %v96_v10 = vld [vmem:[%s190_s6] sm:$0xf] }
   0x6   :  { %99 = vperm.xlu2 %114, %v96_v10   ;;  %v89_v17 = vld [vmem:[%s191_s5] sm:$0xf] }
   0xa   :  { %v35_v5 = vld [vmem:[#allocation2] sm:$0xff] }
   0xb   :  { %v36_v6 = vpack.c.bf16 %v35_v5, %v35_v5 }
   0xd   :  { %v49_v7 = vsel %vm47_vm2, %v36_v6, 0 }
   0xe   :  { %58 = vmatpush.bf16.msra.mxu0 %v49_v7 }
  0x11   :  { %109 = vmatmul.msk.bf16.vlgmr.msra.gmra.mxu0 %vm43_vm3, %v34_v8 }
  0x60   :  { %v100_v36 = vpop.permute.xlu2 %99 }
  0x76   :  { %v41_v9 = vpop.permute.xlu0 %40 }
  0x8e   :  { %v60_v11 = vpop.f32.mrf.mxu0 }
  0x8f   :  { %v61_v12 = vadd.f32 %v60_v11, %v41_v9 }
  0x91   :  { %v64_v13 = vsel %vm30_vm1, %v61_v12, 0.0  ;;  %v68_v14 = vmul.f32 %v61_v12, %v61_v12 }
  0x92   :  { %65 = vadd.xlane.f32.xlu0 %v64_v13 }
  0x93   :  { %v69_v15 = vsel %vm30_vm1, %v68_v14, 0.0 }
  0x94   :  { %70 = vadd.xlane.f32.xlu1 %v69_v15 }
  0x96   :  { %v62_v16 = vpop.f32.mrf.mxu0 }
  0xad   :  { %92 = vperm.xlu1 %113, %v89_v17  }
 0x105   :  { %v66_v18 = vpop.xlane.xlu0 %65 }
 0x106   :  { %v67_v19 = vmul.f32 0.5, %v66_v18 }
 0x107   :  { %v71_v20 = vpop.xlane.xlu1 %70 }
 0x108   :  { %v73_v21 = vmul.f32 %v67_v19, %v67_v19  ;;  %v72_v22 = vmul.f32 0.5, %v71_v20  ;;  %v76_v32 = vsub.f32 %v61_v12, %v67_v19 }
 0x10a   :  { %v74_v23 = vsub.f32 %v72_v22, %v73_v21 }
 0x10c   :  { %v75_v24 = vmax.f32 %v74_v23, 0.0 }
 0x10e   :  { %v77_v25 = vadd.f32 1e-05, %v75_v24 }
 0x110   :  { %115 = vrsqrt.f32 %v77_v25  ;;  %vm84_vm5 = vweird.f32 %v77_v25 }
 0x116   :  { %v116_v26 = vpop.eup %115 }
 0x117   :  { %v79_v27 = vmul.f32 %v116_v26, %v77_v25  ;;  %vm85_vm4 = vweird.f32 %v116_v26 }
 0x118   :  { %vm86_vm6 = vmor %vm84_vm5, %vm85_vm4 }
 0x119   :  { %v80_v28 = vmul.f32 %v116_v26, %v79_v27 }
 0x11b   :  { %v81_v29 = vmul.f32 0.5, %v80_v28 }
 0x11d   :  { %v82_v30 = vsub.f32 1.5, %v81_v29 }
 0x11f   :  { %v83_v31 = vmul.f32 %v116_v26, %v82_v30  ;;  %v93_v33 = vpop.permute.xlu1 %92 }
 0x121   :  { %v87_v34 = vsel %vm86_vm6, %v116_v26, %v83_v31 }
 0x122   :  { %v88_v35 = vmul.f32 %v87_v34, %v76_v32 }
 0x124   :  { %v95_v37 = vmul.f32 %v93_v33, %v88_v35 }
 0x126   :  { %v102_v38 = vadd.f32 %v100_v36, %v95_v37 }
 0x128   :  { %v103_v39 = vmax.f32 %v102_v38, 0.0 }
 0x12a   :  { %104 = vst.msk [vmem:[%s192_s7] sm:$0xf] %vm30_vm1, %v103_v39 }

// kernel: rsu6_forward.22
= control target key start
LH: loop header
LB: loop body
LE: loop exit
PB: predicated region body
PF: predicated region fallthrough
CT: control target
= control target key end

     0   :  { %s398_s13 = smov 9   ;;  %s399_s16 = smov 7   ;;  %vm35_vm0 = vcmask 261120   ;;  %v406_v24 = vmov 0.0   ;;  %vm264_vm1 = vcmask 969728   ;;  %vm238_vm2 = vcmask 977920   ;;  %s601_s2 = inlined_call_operand.vmem [shape: f32[32,128], index: 2, kind: input, shape index: {}]   ;;  %s602_s3 = inlined_call_operand.vmem [shape: f32[9,128], index: 3, kind: input, shape index: {}]   ;;  %s603_s0 = inlined_call_operand.vmem [shape: f32[4,32], index: 0, kind: input, shape index: {}]   ;;  %s604_s1 = inlined_call_operand.vmem [shape: f32[4,128], index: 1, kind: input, shape index: {}]   ;;  %s605_s5 = inlined_call_operand.vmem [shape: f32[4,1], index: 5, kind: input, shape index: {}]   ;;  %s606_s6 = inlined_call_operand.vmem [shape: f32[4,1], index: 6, kind: input, shape index: {}]   ;;  %s607_s7 = inlined_call_operand.vmem [shape: f32[4,1], index: 7, kind: input, shape index: {}]   ;;  %s608_s4 = inlined_call_operand.vmem [shape: bf16[4,72], index: 4, kind: input, shape index: {}]   ;;  %s609_s8 = inlined_call_operand.vmem [shape: f32[4,128], index: 8, kind: output, shape index: {}]  }
   0x1   :  { %v34_v0 = vld [vmem:[%s601_s2 + $0x18] sm:$0xff]  ;;  %v380_v1 = vld [vmem:[%s602_s3 + $0x8] ss:$0 sm:$0xff]  ;;  %v381_v2 = vld [vmem:[%s602_s3 + $0x6] ss:$0 sm:$0xff]  ;;  %s400_s25 = smov 8  }
   0x2   :  { %51 = vmatpush.msra.mxu0 %v34_v0  ;;  %v33_v3 = vld [vmem:[%s601_s2 + $0x10] sm:$0xff]  ;;  %256 = vrot.lane.b32.xlu0 %v380_v1, %s398_s13  ;;  %v32_v4 = vld [vmem:[%s601_s2 + $0x8] sm:$0xff]  ;;  %v31_v5 = vld [vmem:[%s601_s2] sm:$0xff]  ;;  %s401_s10 = smov 1   ;;  %s402_s17 = smov 121   ;;  %63 = vst [vmem:[#allocation2 + $0x20] sm:$0xff] %v406_v24 }
   0x3   :  { %204 = vrot.lane.b32.xlu1 %v381_v2, %s399_s16  ;;  %v383_v6 = vld [vmem:[%s602_s3 + $0x7] ss:$0 sm:$0xff]  ;;  %v30_v7 = vld [vmem:[%s603_s0] sm:$0xf]  ;;  %v382_v8 = vld [vmem:[%s602_s3 + $0x8] ss:$0 sm:$0xff] }
   0x4   :  { %52 = vmatpush.msra.mxu0 %v33_v3  ;;  %230 = vrot.lane.b32.xlu2 %v383_v6, %s400_s25  ;;  %v384_v9 = vld [vmem:[%s602_s3 + $0x6] ss:$0 sm:$0xff]  ;;  %v385_v10 = vld [vmem:[%s602_s3 + $0x7] ss:$0 sm:$0xff]  ;;  %v387_v11 = vld [vmem:[%s602_s3 + $0x5] ss:$0 sm:$0xff] }
   0x5   :  { %v386_v12 = vld [vmem:[%s602_s3 + $0x5] ss:$0 sm:$0xff]  ;;  %v389_v13 = vld [vmem:[%s602_s3 + $0x2] ss:$0 sm:$0xff]  ;;  %v390_v15 = vld [vmem:[%s602_s3 + $0x3] ss:$0 sm:$0xff] }
   0x6   :  { %53 = vmatpush.msra.mxu0 %v32_v4  ;;  %v388_v14 = vld [vmem:[%s602_s3 + $0x2] ss:$0 sm:$0xff]  ;;  %v391_v16 = vld [vmem:[%s602_s3 + $0x3] ss:$0 sm:$0xff]  ;;  %s403_s22 = smov 127   ;;  %s404_s27 = smov 119  }
   0x7   :  { %v392_v17 = vld [vmem:[%s602_s3] ss:$0 sm:$0xff]  ;;  %v393_v19 = vld [vmem:[%s602_s3 + $0x1] ss:$0 sm:$0xff]  ;;  %s405_s29 = smov 120   ;;  %59 = vst [vmem:[#allocation2] sm:$0xff] %v406_v24 }
   0x8   :  { %54 = vmatpush.msra.mxu0 %v31_v5  ;;  %v395_v18 = vld [vmem:[%s602_s3] ss:$0 sm:$0xff]  ;;  %v394_v20 = vld [vmem:[%s602_s3 + $0x1] ss:$0 sm:$0xff]  ;;  %60 = vst [vmem:[#allocation2 + $0x8] sm:$0xff] %v406_v24  ;;  %vm186_vm3 = vcmask 1035264  }
   0x9   :  { %366 = vmatmul.msk.f32.vlgmr.msra.gmra.mxu0 %vm35_vm0, %v30_v7  ;;  %v240_v22 = vld [vmem:[%s604_s1] sm:$0xf]  ;;  %61 = vst [vmem:[#allocation2 + $0x10] sm:$0xff] %v406_v24  ;;  %vm157_vm4 = vcmask 1043464   ;;  %vm212_vm5 = vcmask 986112   ;;  %vm79_vm6 = vcmask 1043528  }
   0xa   :  { %270 = vrot.lane.b32.xlu0 %v382_v8, %s398_s13  ;;  %v173_v23 = vld [vmem:[%s604_s1] sm:$0xf]  ;;  %62 = vst [vmem:[#allocation2 + $0x18] sm:$0xff] %v406_v24  ;;  %vm131_vm7 = vcmask 1043512   ;;  %vm105_vm8 = vcmask 1043520   ;;  %vm304_vm9 = vcmask 1043456  }
   0xb   :  { %218 = vrot.lane.b32.xlu1 %v384_v9, %s399_s16  ;;  %174 = vst [vmem:[#allocation2 + $0x24] sm:$0xf] %v173_v23  ;;  %v159_v30 = vld [vmem:[%s604_s1] sm:$0xf]  ;;  %vm300_vm10 = vcmask 588800  }
   0xc   :  { %244 = vrot.lane.b32.xlu2 %v385_v10, %s400_s25  ;;  %64 = vst [vmem:[#allocation2 + $0x28] sm:$0xff] %v406_v24  ;;  %v266_v33 = vld [vmem:[%s604_s1] sm:$0xf] }
   0xd   :  { %65 = vst [vmem:[#allocation2 + $0x30] sm:$0xff] %v406_v24  ;;  %v214_v34 = vld [vmem:[%s604_s1] sm:$0xf] }
   0xe   :  { %66 = vst [vmem:[#allocation2 + $0x38] sm:$0xff] %v406_v24  ;;  %v188_v39 = vld [vmem:[%s604_s1] sm:$0xf] }
   0xf   :  { %67 = vst [vmem:[#allocation2 + $0x40] sm:$0xff] %v406_v24  ;;  %v133_v45 = vld [vmem:[%s604_s1] sm:$0xf] }
  0x10   :  { %v81_v56 = vld [vmem:[%s604_s1] sm:$0xf] }
  0x11   :  { %v107_v62 = vld [vmem:[%s604_s1] sm:$0xf] }
  0x12   :  { %178 = vrot.lane.b32.xlu0 %v387_v11, %s401_s10 }
  0x13   :  { %192 = vrot.lane.b32.xlu1 %v386_v12, %s401_s10 }
  0x14   :  { %123 = vrot.lane.b32.xlu2 %v389_v13, %s402_s17  ;;  %v294_v13 = vld [vmem:[%s605_s5] sm:$0xf] }
  0x1a   :  { %137 = vrot.lane.b32.xlu0 %v388_v14, %s402_s17  ;;  %v407_v14 = vmov 0  }
  0x1b   :  { %149 = vrot.lane.b32.xlu1 %v390_v15, %s403_s22  ;;  %378 = vset.pattern.permute.xlu2 %v407_v14 }
  0x1c   :  { %163 = vrot.lane.b32.xlu2 %v391_v16, %s403_s22  ;;  %379 = vset.pattern.permute.xlu0 %v407_v14 }
  0x22   :  { %71 = vrot.lane.b32.xlu0 %v392_v17, %s404_s27 }
  0x23   :  { %85 = vrot.lane.b32.xlu1 %v395_v18, %s404_s27 }
  0x24   :  { %97 = vrot.lane.b32.xlu2 %v393_v19, %s405_s29 }
  0x2a   :  { %111 = vrot.lane.b32.xlu0 %v394_v20, %s405_s29 }
  0x5e   :  { %v231_v21 = vpop.permute.xlu2 %230 }
  0x66   :  { %v245_v25 = vpop.permute.xlu2 %244 }
  0x67   :  { %v247_v26 = vmul.f32 %v245_v25, %v240_v22 }
  0x69   :  { %249 = vrot.lane.b32.xlu0 %v247_v26, %s405_s29 }
  0x6e   :  { %v124_v27 = vpop.permute.xlu2 %123 }
  0x74   :  { %v257_v28 = vpop.permute.xlu0 %256 }
  0x75   :  { %v205_v29 = vpop.permute.xlu1 %204 }
  0x76   :  { %v164_v31 = vpop.permute.xlu2 %163 }
  0x77   :  { %v166_v32 = vmul.f32 %v164_v31, %v159_v30 }
  0x79   :  { %168 = vrot.lane.b32.xlu0 %v166_v32, %s401_s10 }
  0x7c   :  { %v271_v35 = vpop.permute.xlu0 %270 }
  0x7d   :  { %v273_v36 = vmul.f32 %v271_v35, %v266_v33  ;;  %v219_v37 = vpop.permute.xlu1 %218  ;;  %v279_v35 = vld [vmem:[%s608_s4] sm:$0x3] }
  0x7e   :  { %v221_v38 = vmul.f32 %v219_v37, %v214_v34  ;;  %v98_v51 = vpop.permute.xlu2 %97 }
  0x7f   :  { %275 = vrot.lane.b32.xlu2 %v273_v36, %s404_s27 }
  0x80   :  { %223 = vrot.lane.b32.xlu1 %v221_v38, %s402_s17 }
  0x84   :  { %v179_v40 = vpop.permute.xlu0 %178 }
  0x85   :  { %v193_v41 = vpop.permute.xlu1 %192 }
  0x86   :  { %v56_v42 = vpop.f32.mrf.mxu0  ;;  %v195_v43 = vmul.f32 %v193_v41, %v188_v39 }
  0x87   :  { %172 = vst [vmem:[#allocation2 + $0x20] sm:$0xf] %v56_v42  ;;  %v207_v44 = vmul.f32 %v205_v29, %v56_v42  ;;  %v126_v47 = vmul.f32 %v124_v27, %v56_v42  ;;  %v233_v49 = vmul.f32 %v231_v21, %v56_v42  ;;  %v100_v53 = vmul.f32 %v98_v51, %v56_v42  ;;  %v346_v21 = vld [vmem:[%s606_s6] sm:$0xf] }
  0x88   :  { %197 = vrot.lane.b32.xlu2 %v195_v43, %s403_s22  ;;  %v259_v54 = vmul.f32 %v257_v28, %v56_v42  ;;  %v181_v58 = vmul.f32 %v179_v40, %v56_v42  ;;  %v353_v29 = vld [vmem:[%s607_s7] sm:$0xf] }
  0x89   :  { %209 = vrot.lane.b32.xlu0 %v207_v44, %s402_s17 }
  0x8c   :  { %v138_v46 = vpop.permute.xlu0 %137 }
  0x8d   :  { %v140_v48 = vmul.f32 %v138_v46, %v133_v45  ;;  %v150_v50 = vpop.permute.xlu1 %149 }
  0x8e   :  { %v152_v52 = vmul.f32 %v150_v50, %v56_v42  ;;  %v284_v24 = vld [vmem:[#allocation2 + $0x20] sm:$0xff] }
  0x8f   :  { %142 = vrot.lane.b32.xlu1 %v140_v48, %s399_s16 }
  0x90   :  { %235 = vrot.lane.b32.xlu2 %v233_v49, %s405_s29 }
  0x91   :  { %128 = vrot.lane.b32.xlu0 %v126_v47, %s399_s16 }
  0x94   :  { %v72_v59 = vpop.permute.xlu0 %71 }
  0x95   :  { %v86_v55 = vpop.permute.xlu1 %85  ;;  %v74_v60 = vmul.f32 %v72_v59, %v56_v42 }
  0x96   :  { %v88_v57 = vmul.f32 %v86_v55, %v81_v56 }
  0x97   :  { %261 = vrot.lane.b32.xlu1 %v259_v54, %s404_s27 }
  0x98   :  { %154 = vrot.lane.b32.xlu2 %v152_v52, %s401_s10 }
  0x99   :  { %102 = vrot.lane.b32.xlu0 %v100_v53, %s400_s25 }
  0x9c   :  { %v112_v61 = vpop.permute.xlu0 %111 }
  0x9d   :  { %v114_v63 = vmul.f32 %v112_v61, %v107_v62 }
  0x9f   :  { %183 = vrot.lane.b32.xlu1 %v181_v58, %s403_s22 }
  0xa0   :  { %90 = vrot.lane.b32.xlu2 %v88_v57, %s398_s13 }
  0xa7   :  { %76 = vrot.lane.b32.xlu1 %v74_v60, %s398_s13 }
  0xa8   :  { %297 = vperm.xlu2 %378, %v294_v13  }
  0xaf   :  { %116 = vrot.lane.b32.xlu1 %v114_v63, %s400_s25 }
  0xb0   :  { %349 = vperm.xlu2 %378, %v346_v21  }
  0xb8   :  { %356 = vperm.xlu2 %378, %v353_v29  }
  0xd9   :  { %v276_v0 = vpop.permute.xlu2 %275 }
  0xda   :  { %278 = vst.msk [vmem:[#allocation2 + $0x44] sm:$0xf] %vm264_vm1, %v276_v0 }
  0xdb   :  { %v250_v1 = vpop.permute.xlu0 %249 }
  0xdc   :  { %252 = vst.msk [vmem:[#allocation2 + $0x3c] sm:$0xf] %vm238_vm2, %v250_v1 }
  0xe2   :  { %v198_v2 = vpop.permute.xlu2 %197 }
  0xe3   :  { %200 = vst.msk [vmem:[#allocation2 + $0x2c] sm:$0xf] %vm186_vm3, %v198_v2 }
  0xea   :  { %v236_v3 = vpop.permute.xlu2 %235 }
  0xeb   :  { %239 = vst.msk [vmem:[#allocation2 + $0x38] sm:$0xf] %vm238_vm2, %v236_v3  ;;  %v169_v4 = vpop.permute.xlu0 %168 }
  0xec   :  { %171 = vst.msk [vmem:[#allocation2 + $0x1c] sm:$0xf] %vm157_vm4, %v169_v4 }
  0xf2   :  { %v155_v5 = vpop.permute.xlu2 %154  ;;  %v224_v6 = vpop.permute.xlu1 %223  ;;  %v287_v20 = vld [vmem:[#allocation2 + $0x38] sm:$0xff] }
  0xf3   :  { %158 = vst.msk [vmem:[#allocation2 + $0x18] sm:$0xf] %vm157_vm4, %v155_v5 }
  0xf4   :  { %226 = vst.msk [vmem:[#allocation2 + $0x34] sm:$0xf] %vm212_vm5, %v224_v6 }
  0xfa   :  { %v91_v8 = vpop.permute.xlu2 %90  ;;  %v283_v28 = vld [vmem:[#allocation2 + $0x18] sm:$0xff] }
  0xfb   :  { %v210_v7 = vpop.permute.xlu0 %209  ;;  %93 = vst.msk [vmem:[#allocation2 + $0x4] sm:$0xf] %vm79_vm6, %v91_v8 }
  0xfc   :  { %213 = vst.msk [vmem:[#allocation2 + $0x30] sm:$0xf] %vm212_vm5, %v210_v7 }
 0x101   :  { %v143_v9 = vpop.permute.xlu1 %142 }
 0x102   :  { %145 = vst.msk [vmem:[#allocation2 + $0x14] sm:$0xf] %vm131_vm7, %v143_v9  ;;  %v298_v36 = vpop.permute.xlu2 %297 }
 0x103   :  { %v129_v10 = vpop.permute.xlu0 %128  ;;  %v286_v19 = vld [vmem:[#allocation2 + $0x30] sm:$0xff] }
 0x104   :  { %132 = vst.msk [vmem:[#allocation2 + $0x10] sm:$0xf] %vm131_vm7, %v129_v10  ;;  %v292_v22 = vpack.c.bf16 %v287_v20, %v286_v19 }
 0x109   :  { %v262_v11 = vpop.permute.xlu1 %261 }
 0x10a   :  { %265 = vst.msk [vmem:[#allocation2 + $0x40] sm:$0xf] %vm264_vm1, %v262_v11  ;;  %v350_v54 = vpop.permute.xlu2 %349 }
 0x10b   :  { %v103_v12 = vpop.permute.xlu0 %102  ;;  %v282_v27 = vld [vmem:[#allocation2 + $0x10] sm:$0xff] }
 0x10c   :  { %106 = vst.msk [vmem:[#allocation2 + $0x8] sm:$0xf] %vm105_vm8, %v103_v12  ;;  %v290_v30 = vpack.c.bf16 %v283_v28, %v282_v27 }
 0x111   :  { %v184_v15 = vpop.permute.xlu1 %183  ;;  %v288_v16 = vld [vmem:[#allocation2 + $0x40] sm:$0xff] }
 0x112   :  { %187 = vst.msk [vmem:[#allocation2 + $0x28] sm:$0xf] %vm186_vm3, %v184_v15  ;;  %v293_v17 = vpack.c.bf16 %v288_v16, %v288_v16  ;;  %v357_v62 = vpop.permute.xlu2 %356 }
 0x114   :  { %v306_v18 = vsel %vm304_vm9, %v293_v17, 0 }
 0x115   :  { %311 = vmatpush.bf16.msra.mxu1 %v306_v18 }
 0x119   :  { %312 = vmatpush.bf16.msra.mxu1 %v292_v22  ;;  %v77_v23 = vpop.permute.xlu1 %76  ;;  %v285_v25 = vld [vmem:[#allocation2 + $0x28] sm:$0xff] }
 0x11a   :  { %80 = vst.msk [vmem:[#allocation2] sm:$0xf] %vm79_vm6, %v77_v23  ;;  %v291_v26 = vpack.c.bf16 %v285_v25, %v284_v24 }
 0x11d   :  { %313 = vmatpush.bf16.msra.mxu1 %v291_v26 }
 0x121   :  { %314 = vmatpush.bf16.msra.mxu1 %v290_v30  ;;  %v117_v31 = vpop.permute.xlu1 %116  ;;  %v280_v32 = vld [vmem:[#allocation2] sm:$0xff] }
 0x122   :  { %119 = vst.msk [vmem:[#allocation2 + $0xc] sm:$0xf] %vm105_vm8, %v117_v31 }
 0x129   :  { %v281_v33 = vld [vmem:[#allocation2 + $0x8] sm:$0xff] }
 0x12a   :  { %v289_v34 = vpack.c.bf16 %v281_v33, %v280_v32 }
 0x12c   :  { %315 = vmatpush.bf16.msra.mxu1 %v289_v34 }
 0x12f   :  { %367 = vmatmul.msk.bf16.vlgmr.msra.gmra.mxu1 %vm300_vm10, %v279_v35 }
 0x1ac   :  { %v317_v37 = vpop.f32.mrf.mxu1 }
 0x1ad   :  { %v318_v38 = vadd.f32 %v317_v37, %v298_v36 }
 0x1af   :  { %v321_v39 = vsel %vm304_vm9, %v318_v38, 0.0  ;;  %v325_v40 = vmul.f32 %v318_v38, %v318_v38 }
 0x1b0   :  { %322 = vadd.xlane.f32.xlu0 %v321_v39 }
 0x1b1   :  { %v326_v41 = vsel %vm304_vm9, %v325_v40, 0.0 }
 0x1b2   :  { %327 = vadd.xlane.f32.xlu1 %v326_v41 }
 0x1b4   :  { %v319_v42 = vpop.f32.mrf.mxu1 }
 0x223   :  { %v323_v43 = vpop.xlane.xlu0 %322 }
 0x224   :  { %v324_v44 = vmul.f32 0.0078125, %v323_v43 }
 0x225   :  { %v328_v45 = vpop.xlane.xlu1 %327 }
 0x226   :  { %v330_v46 = vmul.f32 %v324_v44, %v324_v44  ;;  %v329_v47 = vmul.f32 0.0078125, %v328_v45  ;;  %v333_v58 = vsub.f32 %v318_v38, %v324_v44 }
 0x228   :  { %v331_v48 = vsub.f32 %v329_v47, %v330_v46 }
 0x22a   :  { %v332_v49 = vmax.f32 %v331_v48, 0.0 }
 0x22c   :  { %v334_v50 = vadd.f32 1e-05, %v332_v49 }
 0x22e   :  { %396 = vrsqrt.f32 %v334_v50  ;;  %vm341_vm12 = vweird.f32 %v334_v50 }
 0x234   :  { %v397_v51 = vpop.eup %396 }
 0x235   :  { %v336_v52 = vmul.f32 %v397_v51, %v334_v50  ;;  %vm342_vm11 = vweird.f32 %v397_v51 }
 0x236   :  { %vm343_vm13 = vmor %vm341_vm12, %vm342_vm11 }
 0x237   :  { %v337_v53 = vmul.f32 %v397_v51, %v336_v52 }
 0x239   :  { %v338_v55 = vmul.f32 0.5, %v337_v53 }
 0x23b   :  { %v339_v56 = vsub.f32 1.5, %v338_v55 }
 0x23d   :  { %v340_v57 = vmul.f32 %v397_v51, %v339_v56 }
 0x23f   :  { %v344_v59 = vsel %vm343_vm13, %v397_v51, %v340_v57 }
 0x240   :  { %v345_v60 = vmul.f32 %v344_v59, %v333_v58 }
 0x242   :  { %v352_v61 = vmul.f32 %v350_v54, %v345_v60 }
 0x244   :  { %v359_v63 = vadd.f32 %v357_v62, %v352_v61 }
 0x246   :  { %v360_v0 = vmax.f32 %v359_v63, 0.0 }
 0x248   :  { %361 = vst [vmem:[%s609_s8] sm:$0xf] %v360_v0 }

// kernel: rsu6_forward.20
= control target key start
LH: loop header
LB: loop body
LE: loop exit
PB: predicated region body
PF: predicated region fallthrough
CT: control target
= control target key end

     0   :  { %vm36_vm0 = vcmask 1041408   ;;  %vm32_vm1 = vcmask 15360   ;;  %s398_s15 = smov 3   ;;  %s401_s28 = smov 127   ;;  %vm60_vm2 = vcmask 64512   ;;  %vm173_vm3 = vcmask 60416   ;;  %s607_s2 = inlined_call_operand.vmem [shape: f32[2,8], index: 2, kind: input, shape index: {}]   ;;  %s608_s0 = inlined_call_operand.vmem [shape: f32[4,2], index: 0, kind: input, shape index: {}]   ;;  %s609_s3 = inlined_call_operand.vmem [shape: f32[9,8], index: 3, kind: input, shape index: {}]   ;;  %s610_s1 = inlined_call_operand.vmem [shape: f32[4,8], index: 1, kind: input, shape index: {}]   ;;  %s611_s5 = inlined_call_operand.vmem [shape: f32[4,1], index: 5, kind: input, shape index: {}]   ;;  %s612_s6 = inlined_call_operand.vmem [shape: f32[4,1], index: 6, kind: input, shape index: {}]   ;;  %s613_s7 = inlined_call_operand.vmem [shape: f32[4,1], index: 7, kind: input, shape index: {}]   ;;  %s614_s4 = inlined_call_operand.vmem [shape: bf16[4,72], index: 4, kind: input, shape index: {}]   ;;  %s615_s8 = inlined_call_operand.vmem [shape: f32[4,8], index: 8, kind: output, shape index: {}]  }
   0x1   :  { %v31_v0 = vld [vmem:[%s607_s2] sm:$0x3]  ;;  %v380_v2 = vld [vmem:[%s609_s3 + $0x8] ss:$0 sm:$0xff]  ;;  %v381_v3 = vld [vmem:[%s609_s3 + $0x6] ss:$0 sm:$0xff] }
   0x2   :  { %v30_v1 = vld [vmem:[%s608_s0] sm:$0xf]  ;;  %367 = vmatpush.msk.msra.mxu0 %vm36_vm0, %v31_v0  ;;  %v382_v4 = vld [vmem:[%s609_s3 + $0x7] ss:$0 sm:$0xff]  ;;  %257 = vrot.lane.b32.xlu0 %v380_v2, %s398_s15  ;;  %s399_s2 = smov 1   ;;  %s400_s0 = smov 2  }
   0x3   :  { %368 = vmatmul.msk.f32.vlgmr.msra.gmra.mxu0 %vm32_vm1, %v30_v1  ;;  %206 = vrot.lane.b32.xlu1 %v381_v3, %s399_s2  ;;  %v383_v5 = vld [vmem:[%s609_s3 + $0x8] ss:$0 sm:$0xff]  ;;  %v384_v6 = vld [vmem:[%s609_s3 + $0x6] ss:$0 sm:$0xff]  ;;  %v385_v7 = vld [vmem:[%s609_s3 + $0x7] ss:$0 sm:$0xff] }
   0x4   :  { %231 = vrot.lane.b32.xlu2 %v382_v4, %s400_s0  ;;  %v386_v8 = vld [vmem:[%s609_s3 + $0x5] ss:$0 sm:$0xff]  ;;  %v388_v10 = vld [vmem:[%s609_s3 + $0x2] ss:$0 sm:$0xff]  ;;  %v391_v12 = vld [vmem:[%s609_s3 + $0x3] ss:$0 sm:$0xff] }
   0x5   :  { %v387_v9 = vld [vmem:[%s609_s3 + $0x5] ss:$0 sm:$0xff]  ;;  %v389_v11 = vld [vmem:[%s609_s3 + $0x2] ss:$0 sm:$0xff]  ;;  %v390_v13 = vld [vmem:[%s609_s3 + $0x3] ss:$0 sm:$0xff] }
   0x6   :  { %v392_v14 = vld [vmem:[%s609_s3] ss:$0 sm:$0xff]  ;;  %v393_v16 = vld [vmem:[%s609_s3 + $0x1] ss:$0 sm:$0xff]  ;;  %s402_s20 = smov 125   ;;  %s403_s21 = smov 126  }
   0x7   :  { %v395_v15 = vld [vmem:[%s609_s3] ss:$0 sm:$0xff]  ;;  %v394_v17 = vld [vmem:[%s609_s3 + $0x1] ss:$0 sm:$0xff]  ;;  %v404_v19 = vmov 0.0   ;;  %vm265_vm4 = vcmask 35840  }
   0x8   :  { %65 = vst.msk [vmem:[#allocation2 + $0x20] sm:$0xff] %vm60_vm2, %v404_v19  ;;  %v175_v20 = vld [vmem:[%s610_s1] sm:$0xf]  ;;  %vm239_vm5 = vcmask 44032   ;;  %vm188_vm6 = vcmask 52224   ;;  %vm133_vm7 = vcmask 60424  }
   0x9   :  { %176 = vst.msk [vmem:[#allocation2 + $0x24] sm:$0xf] %vm173_vm3, %v175_v20  ;;  %v241_v21 = vld [vmem:[%s610_s1] sm:$0xf]  ;;  %vm81_vm8 = vcmask 60440   ;;  %vm107_vm9 = vcmask 60432  }
   0xa   :  { %271 = vrot.lane.b32.xlu0 %v383_v5, %s398_s15  ;;  %61 = vst.msk [vmem:[#allocation2] sm:$0xff] %vm60_vm2, %v404_v19  ;;  %v160_v25 = vld [vmem:[%s610_s1] sm:$0xf]  ;;  %vm305_vm10 = vcmask 1043456   ;;  %vm301_vm11 = vcmask 588800  }
   0xb   :  { %219 = vrot.lane.b32.xlu1 %v384_v6, %s399_s2  ;;  %62 = vst.msk [vmem:[#allocation2 + $0x8] sm:$0xff] %vm60_vm2, %v404_v19  ;;  %v267_v30 = vld [vmem:[%s610_s1] sm:$0xf] }
   0xc   :  { %245 = vrot.lane.b32.xlu2 %v385_v7, %s400_s0  ;;  %63 = vst.msk [vmem:[#allocation2 + $0x10] sm:$0xff] %vm60_vm2, %v404_v19  ;;  %v215_v31 = vld [vmem:[%s610_s1] sm:$0xf] }
   0xd   :  { %64 = vst.msk [vmem:[#allocation2 + $0x18] sm:$0xff] %vm60_vm2, %v404_v19  ;;  %v190_v38 = vld [vmem:[%s610_s1] sm:$0xf] }
   0xe   :  { %66 = vst.msk [vmem:[#allocation2 + $0x28] sm:$0xff] %vm60_vm2, %v404_v19  ;;  %v135_v43 = vld [vmem:[%s610_s1] sm:$0xf] }
   0xf   :  { %67 = vst.msk [vmem:[#allocation2 + $0x30] sm:$0xff] %vm60_vm2, %v404_v19  ;;  %v83_v53 = vld [vmem:[%s610_s1] sm:$0xf] }
  0x10   :  { %68 = vst.msk [vmem:[#allocation2 + $0x38] sm:$0xff] %vm60_vm2, %v404_v19  ;;  %v109_v59 = vld [vmem:[%s610_s1] sm:$0xf] }
  0x11   :  { %69 = vst.msk [vmem:[#allocation2 + $0x40] sm:$0xff] %vm60_vm2, %v404_v19 }
  0x12   :  { %180 = vrot.lane.b32.xlu0 %v387_v9, %s399_s2 }
  0x13   :  { %194 = vrot.lane.b32.xlu1 %v386_v8, %s399_s2 }
  0x14   :  { %125 = vrot.lane.b32.xlu2 %v388_v10, %s401_s28  ;;  %v295_v10 = vld [vmem:[%s611_s5] sm:$0xf] }
  0x1a   :  { %139 = vrot.lane.b32.xlu0 %v389_v11, %s401_s28  ;;  %v405_v11 = vmov 0  }
  0x1b   :  { %151 = vrot.lane.b32.xlu1 %v391_v12, %s401_s28  ;;  %378 = vset.pattern.permute.xlu2 %v405_v11 }
  0x1c   :  { %164 = vrot.lane.b32.xlu2 %v390_v13, %s401_s28  ;;  %379 = vset.pattern.permute.xlu0 %v405_v11 }
  0x22   :  { %73 = vrot.lane.b32.xlu0 %v392_v14, %s402_s20 }
  0x23   :  { %87 = vrot.lane.b32.xlu1 %v395_v15, %s402_s20 }
  0x24   :  { %99 = vrot.lane.b32.xlu2 %v393_v16, %s403_s21 }
  0x2a   :  { %113 = vrot.lane.b32.xlu0 %v394_v17, %s403_s21 }
  0x5e   :  { %v232_v18 = vpop.permute.xlu2 %231 }
  0x66   :  { %v246_v22 = vpop.permute.xlu2 %245 }
  0x67   :  { %v248_v23 = vmul.f32 %v246_v22, %v241_v21 }
  0x69   :  { %250 = vrot.lane.b32.xlu0 %v248_v23, %s403_s21 }
  0x6e   :  { %v126_v24 = vpop.permute.xlu2 %125 }
  0x74   :  { %v258_v26 = vpop.permute.xlu0 %257 }
  0x75   :  { %v207_v27 = vpop.permute.xlu1 %206 }
  0x76   :  { %v165_v28 = vpop.permute.xlu2 %164 }
  0x77   :  { %v167_v29 = vmul.f32 %v165_v28, %v160_v25 }
  0x79   :  { %169 = vrot.lane.b32.xlu0 %v167_v29, %s399_s2 }
  0x7c   :  { %v272_v32 = vpop.permute.xlu0 %271 }
  0x7d   :  { %v220_v33 = vpop.permute.xlu1 %219  ;;  %v274_v34 = vmul.f32 %v272_v32, %v267_v30  ;;  %v280_v32 = vld [vmem:[%s614_s4] sm:$0x3] }
  0x7e   :  { %v222_v35 = vmul.f32 %v220_v33, %v215_v31  ;;  %v100_v44 = vpop.permute.xlu2 %99 }
  0x7f   :  { %276 = vrot.lane.b32.xlu2 %v274_v34, %s402_s20 }
  0x80   :  { %v57_v36 = vpop.f32.mrf.mxu0  ;;  %224 = vrot.lane.b32.xlu1 %v222_v35, %s401_s28 }
  0x81   :  { %174 = vst.msk [vmem:[#allocation2 + $0x20] sm:$0xf] %vm173_vm3, %v57_v36  ;;  %v209_v37 = vmul.f32 %v207_v27, %v57_v36  ;;  %v128_v42 = vmul.f32 %v126_v24, %v57_v36  ;;  %v234_v47 = vmul.f32 %v232_v18, %v57_v36  ;;  %v102_v48 = vmul.f32 %v100_v44, %v57_v36  ;;  %v347_v18 = vld [vmem:[%s612_s6] sm:$0xf] }
  0x82   :  { %v260_v51 = vmul.f32 %v258_v26, %v57_v36  ;;  %v354_v26 = vld [vmem:[%s613_s7] sm:$0xf] }
  0x83   :  { %211 = vrot.lane.b32.xlu0 %v209_v37, %s401_s28 }
  0x84   :  { %v181_v40 = vpop.permute.xlu0 %180 }
  0x85   :  { %v195_v39 = vpop.permute.xlu1 %194  ;;  %v183_v55 = vmul.f32 %v181_v40, %v57_v36 }
  0x86   :  { %v197_v41 = vmul.f32 %v195_v39, %v190_v38 }
  0x88   :  { %199 = vrot.lane.b32.xlu2 %v197_v41, %s401_s28  ;;  %v285_v21 = vld [vmem:[#allocation2 + $0x20] sm:$0xff] }
  0x8b   :  { %130 = vrot.lane.b32.xlu0 %v128_v42, %s399_s2 }
  0x8c   :  { %v140_v45 = vpop.permute.xlu0 %139 }
  0x8d   :  { %v142_v46 = vmul.f32 %v140_v45, %v135_v43  ;;  %v152_v49 = vpop.permute.xlu1 %151 }
  0x8e   :  { %v154_v50 = vmul.f32 %v152_v49, %v57_v36 }
  0x8f   :  { %144 = vrot.lane.b32.xlu1 %v142_v46, %s399_s2 }
  0x90   :  { %236 = vrot.lane.b32.xlu2 %v234_v47, %s403_s21 }
  0x93   :  { %104 = vrot.lane.b32.xlu0 %v102_v48, %s400_s0 }
  0x94   :  { %v74_v56 = vpop.permute.xlu0 %73 }
  0x95   :  { %v88_v52 = vpop.permute.xlu1 %87  ;;  %v76_v57 = vmul.f32 %v74_v56, %v57_v36 }
  0x96   :  { %v90_v54 = vmul.f32 %v88_v52, %v83_v53 }
  0x97   :  { %262 = vrot.lane.b32.xlu1 %v260_v51, %s402_s20 }
  0x98   :  { %156 = vrot.lane.b32.xlu2 %v154_v50, %s399_s2 }
  0x9c   :  { %v114_v58 = vpop.permute.xlu0 %113 }
  0x9d   :  { %v116_v60 = vmul.f32 %v114_v58, %v109_v59 }
  0x9f   :  { %185 = vrot.lane.b32.xlu1 %v183_v55, %s401_s28 }
  0xa0   :  { %92 = vrot.lane.b32.xlu2 %v90_v54, %s398_s15 }
  0xa7   :  { %78 = vrot.lane.b32.xlu1 %v76_v57, %s398_s15 }
  0xa8   :  { %298 = vperm.xlu2 %378, %v295_v10  }
  0xaf   :  { %118 = vrot.lane.b32.xlu1 %v116_v60, %s400_s0 }
  0xb0   :  { %350 = vperm.xlu2 %378, %v347_v18  }
  0xb8   :  { %357 = vperm.xlu2 %378, %v354_v26  }
  0xd9   :  { %v277_v61 = vpop.permute.xlu2 %276 }
  0xda   :  { %279 = vst.msk [vmem:[#allocation2 + $0x44] sm:$0xf] %vm265_vm4, %v277_v61 }
  0xdb   :  { %v251_v62 = vpop.permute.xlu0 %250 }
  0xdc   :  { %253 = vst.msk [vmem:[#allocation2 + $0x3c] sm:$0xf] %vm239_vm5, %v251_v62 }
  0xe2   :  { %v200_v63 = vpop.permute.xlu2 %199 }
  0xe3   :  { %202 = vst.msk [vmem:[#allocation2 + $0x2c] sm:$0xf] %vm188_vm6, %v200_v63 }
  0xea   :  { %v237_v0 = vpop.permute.xlu2 %236 }
  0xeb   :  { %240 = vst.msk [vmem:[#allocation2 + $0x38] sm:$0xf] %vm239_vm5, %v237_v0  ;;  %v170_v1 = vpop.permute.xlu0 %169 }
  0xec   :  { %172 = vst.msk [vmem:[#allocation2 + $0x1c] sm:$0xf] %vm133_vm7, %v170_v1 }
  0xf2   :  { %v157_v2 = vpop.permute.xlu2 %156  ;;  %v225_v3 = vpop.permute.xlu1 %224  ;;  %v288_v17 = vld [vmem:[#allocation2 + $0x38] sm:$0xff] }
  0xf3   :  { %159 = vst.msk [vmem:[#allocation2 + $0x18] sm:$0xf] %vm133_vm7, %v157_v2 }
  0xf4   :  { %227 = vst.msk [vmem:[#allocation2 + $0x34] sm:$0xf] %vm188_vm6, %v225_v3 }
  0xf5   :  { %v212_v4 = vpop.permute.xlu0 %211 }
  0xf6   :  { %214 = vst.msk [vmem:[#allocation2 + $0x30] sm:$0xf] %vm188_vm6, %v212_v4 }
  0xfa   :  { %v93_v5 = vpop.permute.xlu2 %92  ;;  %v284_v25 = vld [vmem:[#allocation2 + $0x18] sm:$0xff] }
  0xfb   :  { %95 = vst.msk [vmem:[#allocation2 + $0x4] sm:$0xf] %vm81_vm8, %v93_v5 }
  0xfd   :  { %v131_v6 = vpop.permute.xlu0 %130  ;;  %v287_v16 = vld [vmem:[#allocation2 + $0x30] sm:$0xff] }
  0xfe   :  { %134 = vst.msk [vmem:[#allocation2 + $0x10] sm:$0xf] %vm133_vm7, %v131_v6  ;;  %v293_v19 = vpack.c.bf16 %v288_v17, %v287_v16 }
 0x101   :  { %v145_v7 = vpop.permute.xlu1 %144 }
 0x102   :  { %147 = vst.msk [vmem:[#allocation2 + $0x14] sm:$0xf] %vm133_vm7, %v145_v7  ;;  %v299_v33 = vpop.permute.xlu2 %298 }
 0x105   :  { %v105_v8 = vpop.permute.xlu0 %104 }
 0x106   :  { %108 = vst.msk [vmem:[#allocation2 + $0x8] sm:$0xf] %vm107_vm9, %v105_v8 }
 0x109   :  { %v263_v9 = vpop.permute.xlu1 %262  ;;  %v283_v24 = vld [vmem:[#allocation2 + $0x10] sm:$0xff] }
 0x10a   :  { %266 = vst.msk [vmem:[#allocation2 + $0x40] sm:$0xf] %vm265_vm4, %v263_v9  ;;  %v291_v27 = vpack.c.bf16 %v284_v25, %v283_v24  ;;  %v351_v51 = vpop.permute.xlu2 %350 }
 0x111   :  { %v186_v12 = vpop.permute.xlu1 %185  ;;  %v289_v13 = vld [vmem:[#allocation2 + $0x40] sm:$0xff] }
 0x112   :  { %189 = vst.msk [vmem:[#allocation2 + $0x28] sm:$0xf] %vm188_vm6, %v186_v12  ;;  %v294_v14 = vpack.c.bf16 %v289_v13, %v289_v13  ;;  %v358_v59 = vpop.permute.xlu2 %357 }
 0x114   :  { %v307_v15 = vsel %vm305_vm10, %v294_v14, 0 }
 0x115   :  { %312 = vmatpush.bf16.msra.mxu1 %v307_v15 }
 0x119   :  { %313 = vmatpush.bf16.msra.mxu1 %v293_v19  ;;  %v79_v20 = vpop.permute.xlu1 %78  ;;  %v286_v22 = vld [vmem:[#allocation2 + $0x28] sm:$0xff] }
 0x11a   :  { %82 = vst.msk [vmem:[#allocation2] sm:$0xf] %vm81_vm8, %v79_v20  ;;  %v292_v23 = vpack.c.bf16 %v286_v22, %v285_v21 }
 0x11d   :  { %314 = vmatpush.bf16.msra.mxu1 %v292_v23 }
 0x121   :  { %315 = vmatpush.bf16.msra.mxu1 %v291_v27  ;;  %v119_v28 = vpop.permute.xlu1 %118  ;;  %v281_v29 = vld [vmem:[#allocation2] sm:$0xff] }
 0x122   :  { %121 = vst.msk [vmem:[#allocation2 + $0xc] sm:$0xf] %vm107_vm9, %v119_v28 }
 0x129   :  { %v282_v30 = vld [vmem:[#allocation2 + $0x8] sm:$0xff] }
 0x12a   :  { %v290_v31 = vpack.c.bf16 %v282_v30, %v281_v29 }
 0x12c   :  { %316 = vmatpush.bf16.msra.mxu1 %v290_v31 }
 0x12f   :  { %369 = vmatmul.msk.bf16.vlgmr.msra.gmra.mxu1 %vm301_vm11, %v280_v32 }
 0x1ac   :  { %v318_v34 = vpop.f32.mrf.mxu1 }
 0x1ad   :  { %v319_v35 = vadd.f32 %v318_v34, %v299_v33 }
 0x1af   :  { %v322_v36 = vsel %vm173_vm3, %v319_v35, 0.0  ;;  %v326_v37 = vmul.f32 %v319_v35, %v319_v35 }
 0x1b0   :  { %323 = vadd.xlane.f32.xlu0 %v322_v36 }
 0x1b1   :  { %v327_v38 = vsel %vm173_vm3, %v326_v37, 0.0 }
 0x1b2   :  { %328 = vadd.xlane.f32.xlu1 %v327_v38 }
 0x1b4   :  { %v320_v39 = vpop.f32.mrf.mxu1 }
 0x223   :  { %v324_v40 = vpop.xlane.xlu0 %323 }
 0x224   :  { %v325_v41 = vmul.f32 0.125, %v324_v40 }
 0x225   :  { %v329_v42 = vpop.xlane.xlu1 %328 }
 0x226   :  { %v331_v43 = vmul.f32 %v325_v41, %v325_v41  ;;  %v330_v44 = vmul.f32 0.125, %v329_v42  ;;  %v334_v55 = vsub.f32 %v319_v35, %v325_v41 }
 0x228   :  { %v332_v45 = vsub.f32 %v330_v44, %v331_v43 }
 0x22a   :  { %v333_v46 = vmax.f32 %v332_v45, 0.0 }
 0x22c   :  { %v335_v47 = vadd.f32 1e-05, %v333_v46 }
 0x22e   :  { %396 = vrsqrt.f32 %v335_v47  ;;  %vm342_vm13 = vweird.f32 %v335_v47 }
 0x234   :  { %v397_v48 = vpop.eup %396 }
 0x235   :  { %v337_v49 = vmul.f32 %v397_v48, %v335_v47  ;;  %vm343_vm12 = vweird.f32 %v397_v48 }
 0x236   :  { %vm344_vm14 = vmor %vm342_vm13, %vm343_vm12 }
 0x237   :  { %v338_v50 = vmul.f32 %v397_v48, %v337_v49 }
 0x239   :  { %v339_v52 = vmul.f32 0.5, %v338_v50 }
 0x23b   :  { %v340_v53 = vsub.f32 1.5, %v339_v52 }
 0x23d   :  { %v341_v54 = vmul.f32 %v397_v48, %v340_v53 }
 0x23f   :  { %v345_v56 = vsel %vm344_vm14, %v397_v48, %v341_v54 }
 0x240   :  { %v346_v57 = vmul.f32 %v345_v56, %v334_v55 }
 0x242   :  { %v353_v58 = vmul.f32 %v351_v51, %v346_v57 }
 0x244   :  { %v360_v60 = vadd.f32 %v358_v59, %v353_v58 }
 0x246   :  { %v361_v61 = vmax.f32 %v360_v60, 0.0 }
 0x248   :  { %362 = vst.msk [vmem:[%s615_s8] sm:$0xf] %vm173_vm3, %v361_v61 }

// kernel: rsu6_forward.21
= control target key start
LH: loop header
LB: loop body
LE: loop exit
PB: predicated region body
PF: predicated region fallthrough
CT: control target
= control target key end

     0   :  { %vm32_vm0 = vcmask 64512   ;;  %s397_s15 = smov 5   ;;  %s400_s28 = smov 1   ;;  %vm56_vm1 = vcmask 261120   ;;  %vm170_vm2 = vcmask 257024   ;;  %v405_v19 = vmov 0.0   ;;  %s602_s2 = inlined_call_operand.vmem [shape: f32[8,32], index: 2, kind: input, shape index: {}]   ;;  %s603_s0 = inlined_call_operand.vmem [shape: f32[4,8], index: 0, kind: input, shape index: {}]   ;;  %s604_s3 = inlined_call_operand.vmem [shape: f32[9,32], index: 3, kind: input, shape index: {}]   ;;  %s605_s1 = inlined_call_operand.vmem [shape: f32[4,32], index: 1, kind: input, shape index: {}]   ;;  %s606_s5 = inlined_call_operand.vmem [shape: f32[4,1], index: 5, kind: input, shape index: {}]   ;;  %s607_s6 = inlined_call_operand.vmem [shape: f32[4,1], index: 6, kind: input, shape index: {}]   ;;  %s608_s7 = inlined_call_operand.vmem [shape: f32[4,1], index: 7, kind: input, shape index: {}]   ;;  %s609_s4 = inlined_call_operand.vmem [shape: bf16[4,72], index: 4, kind: input, shape index: {}]   ;;  %s610_s8 = inlined_call_operand.vmem [shape: f32[4,32], index: 8, kind: output, shape index: {}]  }
   0x1   :  { %v31_v0 = vld [vmem:[%s602_s2] sm:$0xff]  ;;  %v379_v2 = vld [vmem:[%s604_s3 + $0x8] ss:$0 sm:$0xff]  ;;  %s398_s2 = smov 3   ;;  %s401_s29 = smov 125   ;;  %61 = vst.msk [vmem:[#allocation2 + $0x20] sm:$0xff] %vm56_vm1, %v405_v19 }
   0x2   :  { %v30_v1 = vld [vmem:[%s603_s0] sm:$0xf]  ;;  %51 = vmatpush.msra.mxu0 %v31_v0  ;;  %v380_v3 = vld [vmem:[%s604_s3 + $0x6] ss:$0 sm:$0xff]  ;;  %v381_v4 = vld [vmem:[%s604_s3 + $0x7] ss:$0 sm:$0xff]  ;;  %255 = vrot.lane.b32.xlu0 %v379_v2, %s397_s15 }
   0x3   :  { %365 = vmatmul.msk.f32.vlgmr.msra.gmra.mxu0 %vm32_vm0, %v30_v1  ;;  %203 = vrot.lane.b32.xlu1 %v380_v3, %s398_s2  ;;  %s399_s0 = smov 4   ;;  %v382_v5 = vld [vmem:[%s604_s3 + $0x8] ss:$0 sm:$0xff]  ;;  %v383_v6 = vld [vmem:[%s604_s3 + $0x6] ss:$0 sm:$0xff]  ;;  %s402_s14 = smov 127  }
   0x4   :  { %229 = vrot.lane.b32.xlu2 %v381_v4, %s399_s0  ;;  %v384_v7 = vld [vmem:[%s604_s3 + $0x7] ss:$0 sm:$0xff]  ;;  %v385_v8 = vld [vmem:[%s604_s3 + $0x5] ss:$0 sm:$0xff]  ;;  %v387_v10 = vld [vmem:[%s604_s3 + $0x2] ss:$0 sm:$0xff] }
   0x5   :  { %v386_v9 = vld [vmem:[%s604_s3 + $0x5] ss:$0 sm:$0xff]  ;;  %v388_v11 = vld [vmem:[%s604_s3 + $0x2] ss:$0 sm:$0xff]  ;;  %v390_v12 = vld [vmem:[%s604_s3 + $0x3] ss:$0 sm:$0xff] }
   0x6   :  { %v389_v13 = vld [vmem:[%s604_s3 + $0x3] ss:$0 sm:$0xff]  ;;  %v391_v14 = vld [vmem:[%s604_s3] ss:$0 sm:$0xff]  ;;  %v392_v16 = vld [vmem:[%s604_s3 + $0x1] ss:$0 sm:$0xff] }
   0x7   :  { %v394_v15 = vld [vmem:[%s604_s3] ss:$0 sm:$0xff]  ;;  %s403_s22 = smov 123   ;;  %s404_s23 = smov 124   ;;  %v393_v17 = vld [vmem:[%s604_s3 + $0x1] ss:$0 sm:$0xff] }
   0x8   :  { %v172_v20 = vld [vmem:[%s605_s1] sm:$0xf]  ;;  %57 = vst.msk [vmem:[#allocation2] sm:$0xff] %vm56_vm1, %v405_v19  ;;  %vm263_vm3 = vcmask 216064   ;;  %vm237_vm4 = vcmask 224256   ;;  %vm185_vm5 = vcmask 248832  }
   0x9   :  { %173 = vst.msk [vmem:[#allocation2 + $0x24] sm:$0xf] %vm170_vm2, %v172_v20  ;;  %v239_v21 = vld [vmem:[%s605_s1] sm:$0xf]  ;;  %vm155_vm6 = vcmask 257032   ;;  %vm211_vm7 = vcmask 232448  }
   0xa   :  { %269 = vrot.lane.b32.xlu0 %v382_v5, %s397_s15  ;;  %58 = vst.msk [vmem:[#allocation2 + $0x8] sm:$0xff] %vm56_vm1, %v405_v19  ;;  %v157_v25 = vld [vmem:[%s605_s1] sm:$0xf]  ;;  %vm129_vm8 = vcmask 257048   ;;  %vm77_vm9 = vcmask 257064   ;;  %vm103_vm10 = vcmask 257056  }
   0xb   :  { %217 = vrot.lane.b32.xlu1 %v383_v6, %s398_s2  ;;  %59 = vst.msk [vmem:[#allocation2 + $0x10] sm:$0xff] %vm56_vm1, %v405_v19  ;;  %v265_v30 = vld [vmem:[%s605_s1] sm:$0xf]  ;;  %vm303_vm11 = vcmask 1043456   ;;  %vm299_vm12 = vcmask 588800  }
   0xc   :  { %243 = vrot.lane.b32.xlu2 %v384_v7, %s399_s0  ;;  %60 = vst.msk [vmem:[#allocation2 + $0x18] sm:$0xff] %vm56_vm1, %v405_v19  ;;  %v213_v31 = vld [vmem:[%s605_s1] sm:$0xf] }
   0xd   :  { %62 = vst.msk [vmem:[#allocation2 + $0x28] sm:$0xff] %vm56_vm1, %v405_v19  ;;  %v187_v38 = vld [vmem:[%s605_s1] sm:$0xf] }
   0xe   :  { %63 = vst.msk [vmem:[#allocation2 + $0x30] sm:$0xff] %vm56_vm1, %v405_v19  ;;  %v131_v43 = vld [vmem:[%s605_s1] sm:$0xf] }
   0xf   :  { %64 = vst.msk [vmem:[#allocation2 + $0x38] sm:$0xff] %vm56_vm1, %v405_v19  ;;  %v79_v53 = vld [vmem:[%s605_s1] sm:$0xf] }
  0x10   :  { %65 = vst.msk [vmem:[#allocation2 + $0x40] sm:$0xff] %vm56_vm1, %v405_v19  ;;  %v105_v59 = vld [vmem:[%s605_s1] sm:$0xf] }
  0x12   :  { %177 = vrot.lane.b32.xlu0 %v386_v9, %s400_s28 }
  0x13   :  { %191 = vrot.lane.b32.xlu1 %v385_v8, %s400_s28 }
  0x14   :  { %121 = vrot.lane.b32.xlu2 %v387_v10, %s401_s29  ;;  %v293_v10 = vld [vmem:[%s606_s5] sm:$0xf] }
  0x1a   :  { %135 = vrot.lane.b32.xlu0 %v388_v11, %s401_s29  ;;  %v406_v11 = vmov 0  }
  0x1b   :  { %147 = vrot.lane.b32.xlu1 %v390_v12, %s402_s14  ;;  %377 = vset.pattern.permute.xlu2 %v406_v11 }
  0x1c   :  { %161 = vrot.lane.b32.xlu2 %v389_v13, %s402_s14  ;;  %378 = vset.pattern.permute.xlu0 %v406_v11 }
  0x22   :  { %69 = vrot.lane.b32.xlu0 %v391_v14, %s403_s22 }
  0x23   :  { %83 = vrot.lane.b32.xlu1 %v394_v15, %s403_s22 }
  0x24   :  { %95 = vrot.lane.b32.xlu2 %v392_v16, %s404_s23 }
  0x2a   :  { %109 = vrot.lane.b32.xlu0 %v393_v17, %s404_s23 }
  0x5e   :  { %v230_v18 = vpop.permute.xlu2 %229 }
  0x66   :  { %v244_v22 = vpop.permute.xlu2 %243 }
  0x67   :  { %v246_v23 = vmul.f32 %v244_v22, %v239_v21 }
  0x69   :  { %248 = vrot.lane.b32.xlu0 %v246_v23, %s404_s23 }
  0x6e   :  { %v122_v24 = vpop.permute.xlu2 %121 }
  0x74   :  { %v256_v26 = vpop.permute.xlu0 %255 }
  0x75   :  { %v204_v27 = vpop.permute.xlu1 %203 }
  0x76   :  { %v162_v28 = vpop.permute.xlu2 %161 }
  0x77   :  { %v164_v29 = vmul.f32 %v162_v28, %v157_v25 }
  0x79   :  { %166 = vrot.lane.b32.xlu0 %v164_v29, %s400_s28 }
  0x7c   :  { %v270_v32 = vpop.permute.xlu0 %269 }
  0x7d   :  { %v218_v33 = vpop.permute.xlu1 %217  ;;  %v272_v34 = vmul.f32 %v270_v32, %v265_v30  ;;  %v278_v32 = vld [vmem:[%s609_s4] sm:$0x3] }
  0x7e   :  { %v220_v35 = vmul.f32 %v218_v33, %v213_v31  ;;  %v96_v44 = vpop.permute.xlu2 %95 }
  0x7f   :  { %274 = vrot.lane.b32.xlu2 %v272_v34, %s403_s22 }
  0x80   :  { %v53_v36 = vpop.f32.mrf.mxu0  ;;  %222 = vrot.lane.b32.xlu1 %v220_v35, %s401_s29 }
  0x81   :  { %171 = vst.msk [vmem:[#allocation2 + $0x20] sm:$0xf] %vm170_vm2, %v53_v36  ;;  %v206_v37 = vmul.f32 %v204_v27, %v53_v36  ;;  %v124_v42 = vmul.f32 %v122_v24, %v53_v36  ;;  %v232_v47 = vmul.f32 %v230_v18, %v53_v36  ;;  %v98_v48 = vmul.f32 %v96_v44, %v53_v36  ;;  %v345_v18 = vld [vmem:[%s607_s6] sm:$0xf] }
  0x82   :  { %v258_v51 = vmul.f32 %v256_v26, %v53_v36  ;;  %v352_v26 = vld [vmem:[%s608_s7] sm:$0xf] }
  0x83   :  { %208 = vrot.lane.b32.xlu0 %v206_v37, %s401_s29 }
  0x84   :  { %v178_v40 = vpop.permute.xlu0 %177 }
  0x85   :  { %v192_v39 = vpop.permute.xlu1 %191  ;;  %v180_v55 = vmul.f32 %v178_v40, %v53_v36 }
  0x86   :  { %v194_v41 = vmul.f32 %v192_v39, %v187_v38 }
  0x88   :  { %196 = vrot.lane.b32.xlu2 %v194_v41, %s402_s14  ;;  %v283_v21 = vld [vmem:[#allocation2 + $0x20] sm:$0xff] }
  0x8b   :  { %126 = vrot.lane.b32.xlu0 %v124_v42, %s398_s2 }
  0x8c   :  { %v136_v45 = vpop.permute.xlu0 %135 }
  0x8d   :  { %v138_v46 = vmul.f32 %v136_v45, %v131_v43  ;;  %v148_v49 = vpop.permute.xlu1 %147 }
  0x8e   :  { %v150_v50 = vmul.f32 %v148_v49, %v53_v36 }
  0x8f   :  { %140 = vrot.lane.b32.xlu1 %v138_v46, %s398_s2 }
  0x90   :  { %234 = vrot.lane.b32.xlu2 %v232_v47, %s404_s23 }
  0x93   :  { %100 = vrot.lane.b32.xlu0 %v98_v48, %s399_s0 }
  0x94   :  { %v70_v56 = vpop.permute.xlu0 %69 }
  0x95   :  { %v84_v52 = vpop.permute.xlu1 %83  ;;  %v72_v57 = vmul.f32 %v70_v56, %v53_v36 }
  0x96   :  { %v86_v54 = vmul.f32 %v84_v52, %v79_v53 }
  0x97   :  { %260 = vrot.lane.b32.xlu1 %v258_v51, %s403_s22 }
  0x98   :  { %152 = vrot.lane.b32.xlu2 %v150_v50, %s400_s28 }
  0x9c   :  { %v110_v58 = vpop.permute.xlu0 %109 }
  0x9d   :  { %v112_v60 = vmul.f32 %v110_v58, %v105_v59 }
  0x9f   :  { %182 = vrot.lane.b32.xlu1 %v180_v55, %s402_s14 }
  0xa0   :  { %88 = vrot.lane.b32.xlu2 %v86_v54, %s397_s15 }
  0xa7   :  { %74 = vrot.lane.b32.xlu1 %v72_v57, %s397_s15 }
  0xa8   :  { %296 = vperm.xlu2 %377, %v293_v10  }
  0xaf   :  { %114 = vrot.lane.b32.xlu1 %v112_v60, %s399_s0 }
  0xb0   :  { %348 = vperm.xlu2 %377, %v345_v18  }
  0xb8   :  { %355 = vperm.xlu2 %377, %v352_v26  }
  0xd9   :  { %v275_v61 = vpop.permute.xlu2 %274 }
  0xda   :  { %277 = vst.msk [vmem:[#allocation2 + $0x44] sm:$0xf] %vm263_vm3, %v275_v61 }
  0xdb   :  { %v249_v62 = vpop.permute.xlu0 %248 }
  0xdc   :  { %251 = vst.msk [vmem:[#allocation2 + $0x3c] sm:$0xf] %vm237_vm4, %v249_v62 }
  0xe2   :  { %v197_v63 = vpop.permute.xlu2 %196 }
  0xe3   :  { %199 = vst.msk [vmem:[#allocation2 + $0x2c] sm:$0xf] %vm185_vm5, %v197_v63 }
  0xea   :  { %v235_v0 = vpop.permute.xlu2 %234 }
  0xeb   :  { %238 = vst.msk [vmem:[#allocation2 + $0x38] sm:$0xf] %vm237_vm4, %v235_v0  ;;  %v167_v1 = vpop.permute.xlu0 %166 }
  0xec   :  { %169 = vst.msk [vmem:[#allocation2 + $0x1c] sm:$0xf] %vm155_vm6, %v167_v1 }
  0xf2   :  { %v153_v2 = vpop.permute.xlu2 %152  ;;  %v223_v3 = vpop.permute.xlu1 %222  ;;  %v286_v17 = vld [vmem:[#allocation2 + $0x38] sm:$0xff] }
  0xf3   :  { %156 = vst.msk [vmem:[#allocation2 + $0x18] sm:$0xf] %vm155_vm6, %v153_v2 }
  0xf4   :  { %225 = vst.msk [vmem:[#allocation2 + $0x34] sm:$0xf] %vm211_vm7, %v223_v3 }
  0xf5   :  { %v209_v4 = vpop.permute.xlu0 %208 }
  0xf6   :  { %212 = vst.msk [vmem:[#allocation2 + $0x30] sm:$0xf] %vm211_vm7, %v209_v4 }
  0xfa   :  { %v89_v5 = vpop.permute.xlu2 %88  ;;  %v282_v25 = vld [vmem:[#allocation2 + $0x18] sm:$0xff] }
  0xfb   :  { %91 = vst.msk [vmem:[#allocation2 + $0x4] sm:$0xf] %vm77_vm9, %v89_v5 }
  0xfd   :  { %v127_v6 = vpop.permute.xlu0 %126  ;;  %v285_v16 = vld [vmem:[#allocation2 + $0x30] sm:$0xff] }
  0xfe   :  { %130 = vst.msk [vmem:[#allocation2 + $0x10] sm:$0xf] %vm129_vm8, %v127_v6  ;;  %v291_v19 = vpack.c.bf16 %v286_v17, %v285_v16 }
 0x101   :  { %v141_v7 = vpop.permute.xlu1 %140 }
 0x102   :  { %143 = vst.msk [vmem:[#allocation2 + $0x14] sm:$0xf] %vm129_vm8, %v141_v7  ;;  %v297_v33 = vpop.permute.xlu2 %296 }
 0x105   :  { %v101_v8 = vpop.permute.xlu0 %100 }
 0x106   :  { %104 = vst.msk [vmem:[#allocation2 + $0x8] sm:$0xf] %vm103_vm10, %v101_v8 }
 0x109   :  { %v261_v9 = vpop.permute.xlu1 %260  ;;  %v281_v24 = vld [vmem:[#allocation2 + $0x10] sm:$0xff] }
 0x10a   :  { %264 = vst.msk [vmem:[#allocation2 + $0x40] sm:$0xf] %vm263_vm3, %v261_v9  ;;  %v289_v27 = vpack.c.bf16 %v282_v25, %v281_v24  ;;  %v349_v51 = vpop.permute.xlu2 %348 }
 0x111   :  { %v183_v12 = vpop.permute.xlu1 %182  ;;  %v287_v13 = vld [vmem:[#allocation2 + $0x40] sm:$0xff] }
 0x112   :  { %186 = vst.msk [vmem:[#allocation2 + $0x28] sm:$0xf] %vm185_vm5, %v183_v12  ;;  %v292_v14 = vpack.c.bf16 %v287_v13, %v287_v13  ;;  %v356_v59 = vpop.permute.xlu2 %355 }
 0x114   :  { %v305_v15 = vsel %vm303_vm11, %v292_v14, 0 }
 0x115   :  { %310 = vmatpush.bf16.msra.mxu1 %v305_v15 }
 0x119   :  { %311 = vmatpush.bf16.msra.mxu1 %v291_v19  ;;  %v75_v20 = vpop.permute.xlu1 %74  ;;  %v284_v22 = vld [vmem:[#allocation2 + $0x28] sm:$0xff] }
 0x11a   :  { %78 = vst.msk [vmem:[#allocation2] sm:$0xf] %vm77_vm9, %v75_v20  ;;  %v290_v23 = vpack.c.bf16 %v284_v22, %v283_v21 }
 0x11d   :  { %312 = vmatpush.bf16.msra.mxu1 %v290_v23 }
 0x121   :  { %313 = vmatpush.bf16.msra.mxu1 %v289_v27  ;;  %v115_v28 = vpop.permute.xlu1 %114  ;;  %v279_v29 = vld [vmem:[#allocation2] sm:$0xff] }
 0x122   :  { %117 = vst.msk [vmem:[#allocation2 + $0xc] sm:$0xf] %vm103_vm10, %v115_v28 }
 0x129   :  { %v280_v30 = vld [vmem:[#allocation2 + $0x8] sm:$0xff] }
 0x12a   :  { %v288_v31 = vpack.c.bf16 %v280_v30, %v279_v29 }
 0x12c   :  { %314 = vmatpush.bf16.msra.mxu1 %v288_v31 }
 0x12f   :  { %366 = vmatmul.msk.bf16.vlgmr.msra.gmra.mxu1 %vm299_vm12, %v278_v32 }
 0x1ac   :  { %v316_v34 = vpop.f32.mrf.mxu1 }
 0x1ad   :  { %v317_v35 = vadd.f32 %v316_v34, %v297_v33 }
 0x1af   :  { %v320_v36 = vsel %vm170_vm2, %v317_v35, 0.0  ;;  %v324_v37 = vmul.f32 %v317_v35, %v317_v35 }
 0x1b0   :  { %321 = vadd.xlane.f32.xlu0 %v320_v36 }
 0x1b1   :  { %v325_v38 = vsel %vm170_vm2, %v324_v37, 0.0 }
 0x1b2   :  { %326 = vadd.xlane.f32.xlu1 %v325_v38 }
 0x1b4   :  { %v318_v39 = vpop.f32.mrf.mxu1 }
 0x223   :  { %v322_v40 = vpop.xlane.xlu0 %321 }
 0x224   :  { %v323_v41 = vmul.f32 0.03125, %v322_v40 }
 0x225   :  { %v327_v42 = vpop.xlane.xlu1 %326 }
 0x226   :  { %v329_v43 = vmul.f32 %v323_v41, %v323_v41  ;;  %v328_v44 = vmul.f32 0.03125, %v327_v42  ;;  %v332_v55 = vsub.f32 %v317_v35, %v323_v41 }
 0x228   :  { %v330_v45 = vsub.f32 %v328_v44, %v329_v43 }
 0x22a   :  { %v331_v46 = vmax.f32 %v330_v45, 0.0 }
 0x22c   :  { %v333_v47 = vadd.f32 1e-05, %v331_v46 }
 0x22e   :  { %395 = vrsqrt.f32 %v333_v47  ;;  %vm340_vm14 = vweird.f32 %v333_v47 }
 0x234   :  { %v396_v48 = vpop.eup %395 }
 0x235   :  { %v335_v49 = vmul.f32 %v396_v48, %v333_v47  ;;  %vm341_vm13 = vweird.f32 %v396_v48 }
 0x236   :  { %vm342_vm15 = vmor %vm340_vm14, %vm341_vm13 }
 0x237   :  { %v336_v50 = vmul.f32 %v396_v48, %v335_v49 }
 0x239   :  { %v337_v52 = vmul.f32 0.5, %v336_v50 }
 0x23b   :  { %v338_v53 = vsub.f32 1.5, %v337_v52 }
 0x23d   :  { %v339_v54 = vmul.f32 %v396_v48, %v338_v53 }
 0x23f   :  { %v343_v56 = vsel %vm342_vm15, %v396_v48, %v339_v54 }
 0x240   :  { %v344_v57 = vmul.f32 %v343_v56, %v332_v55 }
 0x242   :  { %v351_v58 = vmul.f32 %v349_v51, %v344_v57 }
 0x244   :  { %v358_v60 = vadd.f32 %v356_v59, %v351_v58 }
 0x246   :  { %v359_v61 = vmax.f32 %v358_v60, 0.0 }
 0x248   :  { %360 = vst.msk [vmem:[%s610_s8] sm:$0xf] %vm170_vm2, %v359_v61 }

// kernel: rsu6_forward.23
= control target key start
LH: loop header
LB: loop body
LE: loop exit
PB: predicated region body
PF: predicated region fallthrough
CT: control target
= control target key end

     0   :  { %14 = vsyncpa [#allocation4], 0  ;;  %s1401_s12 = smov [#allocation3]   ;;  %s1402_s14 = smov 512   ;;  %s2189_s0 = inlined_call_operand.vmem [shape: f32[4,128], index: 0, kind: input, shape index: {}]   ;;  %s2190_s1 = inlined_call_operand.vmem [shape: f32[4,512], index: 1, kind: input, shape index: {}]   ;;  %s2191_s2 = inlined_call_operand.hbm [shape: f32[128,512], index: 2, kind: input, shape index: {}]   ;;  %s2192_s3 = inlined_call_operand.vmem [shape: f32[9,512], index: 3, kind: input, shape index: {}]   ;;  %s2193_s4 = inlined_call_operand.vmem [shape: bf16[3,72], index: 4, kind: input, shape index: {}]   ;;  %s2194_s5 = inlined_call_operand.vmem [shape: f32[3,1], index: 5, kind: input, shape index: {}]   ;;  %s2195_s6 = inlined_call_operand.vmem [shape: f32[3,1], index: 6, kind: input, shape index: {}]   ;;  %s2196_s7 = inlined_call_operand.vmem [shape: f32[3,1], index: 7, kind: input, shape index: {}]   ;;  %s2197_s8 = inlined_call_operand.vmem [shape: f32[3,512], index: 8, kind: input, shape index: {}]   ;;  %s2198_s9 = inlined_call_operand.vmem [shape: f32[3,512], index: 9, kind: output, shape index: {}]  }
   0x1   :  { %s23_s11 = sshll.u32 %s2191_s2, 4  ;;  %s25_s13 = sshll.u32 %s1401_s12, 4  ;;  %s24_s11 = int_to_ptr.hbm [resolvable:$true] %s23_s11  ;;  %s26_s13 = int_to_ptr.vmem [resolvable:$true] %s25_s13 }
   0x2   :  { %s1403_s15 = smov 32  }
   0x3   :  { %31 = dma.hbm_to_vmem [thread:$0]  %s24_s11, 8192, %s26_s13, [#allocation4], %s1402_s14, %s1402_s14, %s1403_s15  }
   0x4   :  { %1399 = dma.done.wait [#allocation4], 8192  }
   0x5   :  { %1400 = vsyncadd [#allocation4], 4294959104  ;;  %v112_v0 = vld [vmem:[#allocation3 + $0x1f0] sm:$0xff]  ;;  %v113_v9 = vld [vmem:[#allocation3 + $0x1f8] sm:$0xff]  ;;  %vm291_vm0 = vcmask 1043456   ;;  %s1404_s21 = smov 113  }
   0x6   :  { %v108_v1 = vld [vmem:[#allocation3 + $0x1d0] sm:$0xff]  ;;  %154 = vmatpush.msra.mxu2 %v112_v0  ;;  %174 = vmatpush.msra.mxu3 %v113_v9  ;;  %v109_v11 = vld [vmem:[#allocation3 + $0x1d8] sm:$0xff]  ;;  %v110_v18 = vld [vmem:[#allocation3 + $0x1e0] sm:$0xff]  ;;  %s1405_s22 = smov 112   ;;  %s1406_s23 = smov 111   ;;  %vm244_vm1 = vcmask 908288  }
   0x7   :  { %v1470_v2 = vld [vmem:[%s2192_s3 + $0x2] ss:$8 sm:$0xf]  ;;  %v1475_v3 = vld [vmem:[%s2192_s3 + $0x1] ss:$8 sm:$0xf]  ;;  %114 = vmatpush.msra.mxu0 %v110_v18 }
   0x8   :  { %v104_v4 = vld [vmem:[#allocation3 + $0x1b0] sm:$0xff]  ;;  %v502_v5 = vperm.slane %v1470_v2, 2  ;;  %v503_v6 = vperm.slane %v1470_v2, 3  ;;  %v395_v7 = vperm.slane %v1475_v3, 2  ;;  %v396_v8 = vperm.slane %v1475_v3, 3  ;;  %155 = vmatpush.msra.mxu2 %v108_v1  ;;  %175 = vmatpush.msra.mxu3 %v109_v11  ;;  %v105_v17 = vld [vmem:[#allocation3 + $0x1b8] sm:$0xff] }
   0x9   :  { %v1484_v10 = vld [vmem:[%s2192_s3] ss:$8 sm:$0xf]  ;;  %v501_v20 = vperm.slane %v1470_v2, 1  ;;  %v394_v21 = vperm.slane %v1475_v3, 1  ;;  %v500_v28 = vperm.slane %v1470_v2, 0 }
   0xa   :  { %v505_v12 = vrot.slane %v503_v6, 4  ;;  %v398_v13 = vrot.slane %v396_v8, 4  ;;  %v287_v14 = vperm.slane %v1484_v10, 2  ;;  %v288_v15 = vperm.slane %v1484_v10, 3  ;;  %v100_v16 = vld [vmem:[#allocation3 + $0x190] sm:$0xff]  ;;  %156 = vmatpush.msra.mxu2 %v104_v4  ;;  %v111_v19 = vld [vmem:[#allocation3 + $0x1e8] sm:$0xff]  ;;  %176 = vmatpush.msra.mxu3 %v105_v17 }
   0xb   :  { %134 = vmatpush.msra.mxu1 %v111_v19  ;;  %v106_v25 = vld [vmem:[#allocation3 + $0x1c0] sm:$0xff]  ;;  %v96_v26 = vld [vmem:[#allocation3 + $0x170] sm:$0xff]  ;;  %v101_v27 = vld [vmem:[#allocation3 + $0x198] sm:$0xff]  ;;  %v286_v29 = vperm.slane %v1484_v10, 1  ;;  %v504_v31 = vrot.slane %v501_v20, 4  ;;  %v393_v32 = vperm.slane %v1475_v3, 0 }
   0xc   :  { %v507_v22 = vsel %vm291_vm0, %v502_v5, %v505_v12  ;;  %v400_v23 = vsel %vm291_vm0, %v395_v7, %v398_v13  ;;  %v290_v24 = vrot.slane %v288_v15, 4  ;;  %157 = vmatpush.msra.mxu2 %v100_v16  ;;  %v397_v33 = vrot.slane %v394_v21, 4  ;;  %v107_v34 = vld [vmem:[#allocation3 + $0x1c8] sm:$0xff]  ;;  %v102_v35 = vld [vmem:[#allocation3 + $0x1a0] sm:$0xff]  ;;  %v92_v36 = vld [vmem:[#allocation3 + $0x150] sm:$0xff]  ;;  %115 = vmatpush.msra.mxu0 %v106_v25  ;;  %s1407_s30 = smov 1  }
   0xd   :  { %510 = vrot.lane.b32.xlu2 %v507_v22, %s1404_s21  ;;  %403 = vrot.lane.b32.xlu1 %v400_v23, %s1405_s22  ;;  %v97_v37 = vld [vmem:[#allocation3 + $0x178] sm:$0xff]  ;;  %v285_v38 = vperm.slane %v1484_v10, 0  ;;  %v289_v39 = vrot.slane %v286_v29, 4  ;;  %v103_v40 = vld [vmem:[#allocation3 + $0x1a8] sm:$0xff]  ;;  %v98_v41 = vld [vmem:[#allocation3 + $0x180] sm:$0xff]  ;;  %v506_v45 = vsel %vm291_vm0, %v500_v28, %v504_v31  ;;  %s1408_s10 = smov 127  }
   0xe   :  { %v293_v30 = vsel %vm291_vm0, %v287_v14, %v290_v24  ;;  %158 = vmatpush.msra.mxu2 %v96_v26  ;;  %177 = vmatpush.msra.mxu3 %v101_v27  ;;  %v88_v42 = vld [vmem:[#allocation3 + $0x130] sm:$0xff]  ;;  %v93_v43 = vld [vmem:[#allocation3 + $0x158] sm:$0xff]  ;;  %v399_v46 = vsel %vm291_vm0, %v393_v32, %v397_v33  ;;  %v99_v50 = vld [vmem:[#allocation3 + $0x188] sm:$0xff]  ;;  %s1409_s15 = smov 15   ;;  %s1411_s18 = smov 16   ;;  %vm352_vm2 = vcmask 916480  }
   0xf   :  { %296 = vrot.lane.b32.xlu0 %v293_v30, %s1406_s23  ;;  %135 = vmatpush.msra.mxu1 %v107_v34  ;;  %v1503_v44 = vld [vmem:[%s2192_s3 + $0x5] ss:$8 sm:$0xf]  ;;  %v1345_v48 = vld [vmem:[%s2192_s3 + $0x3] ss:$8 sm:$0xf]  ;;  %v292_v52 = vsel %vm291_vm0, %v285_v38, %v289_v39 }
  0x10   :  { %116 = vmatpush.msra.mxu0 %v102_v35  ;;  %159 = vmatpush.msra.mxu2 %v92_v36  ;;  %v737_v47 = vperm.slane %v1503_v44, 1  ;;  %v84_v49 = vld [vmem:[#allocation3 + $0x110] sm:$0xff]  ;;  %v608_v51 = vperm.slane %v1345_v48, 1  ;;  %v89_v53 = vld [vmem:[#allocation3 + $0x138] sm:$0xff]  ;;  %v610_v54 = vperm.slane %v1345_v48, 3  ;;  %v94_v56 = vld [vmem:[#allocation3 + $0x160] sm:$0xff] }
  0x11   :  { %178 = vmatpush.msra.mxu3 %v97_v37  ;;  %136 = vmatpush.msra.mxu1 %v103_v40  ;;  %v80_v55 = vld [vmem:[#allocation3 + $0xf0] sm:$0xff]  ;;  %v95_v57 = vld [vmem:[#allocation3 + $0x168] sm:$0xff]  ;;  %v85_v58 = vld [vmem:[#allocation3 + $0x118] sm:$0xff]  ;;  %v736_v59 = vperm.slane %v1503_v44, 0  ;;  %v607_v61 = vperm.slane %v1345_v48, 0  ;;  %v609_v0 = vperm.slane %v1345_v48, 2 }
  0x12   :  { %117 = vmatpush.msra.mxu0 %v98_v41  ;;  %160 = vmatpush.msra.mxu2 %v88_v42  ;;  %v740_v60 = vrot.slane %v737_v47, 4  ;;  %v611_v62 = vrot.slane %v608_v51, 4  ;;  %v76_v63 = vld [vmem:[#allocation3 + $0xd0] sm:$0xff]  ;;  %v90_v1 = vld [vmem:[#allocation3 + $0x140] sm:$0xff]  ;;  %v612_v2 = vrot.slane %v610_v54, 4  ;;  %v91_v3 = vld [vmem:[#allocation3 + $0x148] sm:$0xff] }
  0x13   :  { %179 = vmatpush.msra.mxu3 %v93_v43  ;;  %137 = vmatpush.msra.mxu1 %v99_v50  ;;  %v81_v4 = vld [vmem:[#allocation3 + $0xf8] sm:$0xff]  ;;  %v72_v6 = vld [vmem:[#allocation3 + $0xb0] sm:$0xff]  ;;  %v86_v7 = vld [vmem:[#allocation3 + $0x120] sm:$0xff]  ;;  %v739_v14 = vperm.slane %v1503_v44, 3  ;;  %v738_v29 = vperm.slane %v1503_v44, 2  ;;  %vm459_vm3 = vcmask 924672  }
  0x14   :  { %161 = vmatpush.msra.mxu2 %v84_v49  ;;  %118 = vmatpush.msra.mxu0 %v94_v56  ;;  %v1349_v5 = vld [vmem:[%s2192_s3 + $0x6] ss:$8 sm:$0xf]  ;;  %v742_v8 = vsel %vm291_vm0, %v736_v59, %v740_v60  ;;  %v613_v9 = vsel %vm291_vm0, %v607_v61, %v611_v62  ;;  %v614_v15 = vsel %vm291_vm0, %v609_v0, %v612_v2  ;;  %v1530_v31 = vld [vmem:[%s2192_s3 + $0x20] ss:$8 sm:$0xf] }
  0x15   :  { %508 = vrot.lane.b32.xlu2 %v506_v45, %s1404_s21  ;;  %401 = vrot.lane.b32.xlu1 %v399_v46, %s1405_s22  ;;  %v844_v10 = vperm.slane %v1349_v5, 3  ;;  %v842_v11 = vperm.slane %v1349_v5, 1  ;;  %v68_v12 = vld [vmem:[#allocation3 + $0x90] sm:$0xff]  ;;  %v87_v13 = vld [vmem:[#allocation3 + $0x128] sm:$0xff]  ;;  %v77_v16 = vld [vmem:[#allocation3 + $0xd8] sm:$0xff]  ;;  %v843_v22 = vperm.slane %v1349_v5, 2 }
  0x16   :  { %180 = vmatpush.msra.mxu3 %v89_v53  ;;  %162 = vmatpush.msra.mxu2 %v80_v55  ;;  %v64_v17 = vld [vmem:[#allocation3 + $0x70] sm:$0xff]  ;;  %v82_v18 = vld [vmem:[#allocation3 + $0x100] sm:$0xff]  ;;  %v83_v19 = vld [vmem:[#allocation3 + $0x108] sm:$0xff]  ;;  %v841_v24 = vperm.slane %v1349_v5, 0  ;;  %v741_v30 = vrot.slane %v739_v14, 4  ;;  %v1052_v39 = vperm.slane %v1530_v31, 1 }
  0x17   :  { %294 = vrot.lane.b32.xlu0 %v292_v52, %s1406_s23  ;;  %138 = vmatpush.msra.mxu1 %v95_v57  ;;  %v60_v20 = vld [vmem:[#allocation3 + $0x50] sm:$0xff]  ;;  %v73_v21 = vld [vmem:[#allocation3 + $0xb8] sm:$0xff]  ;;  %v846_v23 = vrot.slane %v844_v10, 4  ;;  %v845_v25 = vrot.slane %v842_v11, 4  ;;  %v78_v26 = vld [vmem:[#allocation3 + $0xe0] sm:$0xff]  ;;  %v1051_v49 = vperm.slane %v1530_v31, 0 }
  0x18   :  { %181 = vmatpush.msra.mxu3 %v85_v58  ;;  %163 = vmatpush.msra.mxu2 %v76_v63  ;;  %v79_v27 = vld [vmem:[#allocation3 + $0xe8] sm:$0xff]  ;;  %v69_v28 = vld [vmem:[#allocation3 + $0x98] sm:$0xff]  ;;  %v56_v33 = vld [vmem:[#allocation3 + $0x30] sm:$0xff]  ;;  %v743_v41 = vsel %vm291_vm0, %v738_v29, %v741_v30  ;;  %v1055_v50 = vrot.slane %v1052_v39, 4  ;;  %v1054_v0 = vperm.slane %v1530_v31, 3  ;;  %vm566_vm4 = vcmask 1039360  }
  0x19   :  { %119 = vmatpush.msra.mxu0 %v90_v1  ;;  %139 = vmatpush.msra.mxu1 %v91_v3  ;;  %v1351_v32 = vld [vmem:[%s2192_s3 + $0x7] ss:$8 sm:$0xf]  ;;  %v848_v35 = vsel %vm291_vm0, %v843_v22, %v846_v23  ;;  %v847_v36 = vsel %vm291_vm0, %v841_v24, %v845_v25  ;;  %v49_v45 = vld [vmem:[%s2189_s0] sm:$0xf]  ;;  %s1410_s0 = smov 17  }
  0x1a   :  { %182 = vmatpush.msra.mxu3 %v81_v4  ;;  %164 = vmatpush.msra.mxu2 %v72_v6  ;;  %v74_v34 = vld [vmem:[#allocation3 + $0xc0] sm:$0xff]  ;;  %v75_v37 = vld [vmem:[#allocation3 + $0xc8] sm:$0xff]  ;;  %v52_v38 = vld [vmem:[#allocation3 + $0x10] sm:$0xff]  ;;  %v949_v40 = vperm.slane %v1351_v32, 3  ;;  %v947_v43 = vperm.slane %v1351_v32, 1  ;;  %v948_v51 = vperm.slane %v1351_v32, 2  ;;  %v1057_v60 = vsel %vm291_vm0, %v1051_v49, %v1055_v50 }
  0x1b   :  { %120 = vmatpush.msra.mxu0 %v86_v7  ;;  %140 = vmatpush.msra.mxu1 %v87_v13  ;;  %v65_v42 = vld [vmem:[#allocation3 + $0x78] sm:$0xff]  ;;  %v70_v44 = vld [vmem:[#allocation3 + $0xa0] sm:$0xff]  ;;  %v71_v46 = vld [vmem:[#allocation3 + $0xa8] sm:$0xff]  ;;  %v946_v55 = vperm.slane %v1351_v32, 0  ;;  %v1053_v6 = vperm.slane %v1530_v31, 2  ;;  %v1056_v7 = vrot.slane %v1054_v0, 4 }
  0x1c   :  { %165 = vmatpush.msra.mxu2 %v68_v12  ;;  %183 = vmatpush.msra.mxu3 %v77_v16  ;;  %v61_v47 = vld [vmem:[#allocation3 + $0x58] sm:$0xff]  ;;  %v66_v48 = vld [vmem:[#allocation3 + $0x80] sm:$0xff]  ;;  %v951_v52 = vrot.slane %v949_v40, 4  ;;  %v67_v53 = vld [vmem:[#allocation3 + $0x88] sm:$0xff]  ;;  %v950_v56 = vrot.slane %v947_v43, 4  ;;  %vm268_vm5 = vcmask 138240  }
  0x1d   :  { %744 = vrot.lane.b32.xlu2 %v742_v8, %s1407_s30  ;;  %615 = vrot.lane.b32.xlu1 %v613_v9, %s1408_s10  ;;  %v57_v54 = vld [vmem:[#allocation3 + $0x38] sm:$0xff]  ;;  %v62_v57 = vld [vmem:[#allocation3 + $0x60] sm:$0xff]  ;;  %v63_v58 = vld [vmem:[#allocation3 + $0x68] sm:$0xff]  ;;  %v1058_v11 = vsel %vm291_vm0, %v1053_v6, %v1056_v7  ;;  %vm483_vm6 = vcmask 121856   ;;  %vm590_vm7 = vcmask 7168   ;;  %vm376_vm8 = vcmask 130048  }
  0x1e   :  { %166 = vmatpush.msra.mxu2 %v64_v17  ;;  %121 = vmatpush.msra.mxu0 %v82_v18  ;;  %v53_v59 = vld [vmem:[#allocation3 + $0x18] sm:$0xff]  ;;  %v953_v61 = vsel %vm291_vm0, %v948_v51, %v951_v52  ;;  %v952_v62 = vsel %vm291_vm0, %v946_v55, %v950_v56  ;;  %v58_v63 = vld [vmem:[#allocation3 + $0x40] sm:$0xff]  ;;  %v59_v1 = vld [vmem:[#allocation3 + $0x48] sm:$0xff]  ;;  %vm730_vm9 = vcmask 1035264   ;;  %vm890_vm10 = vcmask 924676  }
  0x1f   :  { %617 = vrot.lane.b32.xlu0 %v614_v15, %s1408_s10  ;;  %141 = vmatpush.msra.mxu1 %v83_v19  ;;  %v54_v2 = vld [vmem:[#allocation3 + $0x20] sm:$0xff]  ;;  %v55_v3 = vld [vmem:[#allocation3 + $0x28] sm:$0xff]  ;;  %vm1045_vm11 = vcmask 904192   ;;  %vm835_vm12 = vcmask 920576   ;;  %vm940_vm13 = vcmask 912384   ;;  %vm785_vm14 = vcmask 1039364  }
  0x20   :  { %184 = vmatpush.msra.mxu3 %v73_v21  ;;  %167 = vmatpush.msra.mxu2 %v60_v20  ;;  %v1352_v4 = vld [vmem:[%s2192_s3 + $0x20] ss:$8 sm:$0xf]  ;;  %v1348_v12 = vld [vmem:[%s2192_s3 + $0x6] ss:$8 sm:$0xf] }
  0x21   :  { %122 = vmatpush.msra.mxu0 %v78_v26  ;;  %142 = vmatpush.msra.mxu1 %v79_v27  ;;  %v50_v5 = vld [vmem:[#allocation3] sm:$0xff]  ;;  %v51_v8 = vld [vmem:[#allocation3 + $0x8] sm:$0xff]  ;;  %v1002_v9 = vperm.slane %v1352_v4, 2  ;;  %v1001_v10 = vperm.slane %v1352_v4, 1  ;;  %v791_v13 = vperm.slane %v1348_v12, 1  ;;  %v1000_v14 = vperm.slane %v1352_v4, 0 }
  0x22   :  { %185 = vmatpush.msra.mxu3 %v69_v28  ;;  %168 = vmatpush.msra.mxu2 %v56_v33  ;;  %v1003_v15 = vperm.slane %v1352_v4, 3  ;;  %v1350_v16 = vld [vmem:[%s2192_s3 + $0x7] ss:$8 sm:$0xf]  ;;  %v793_v18 = vperm.slane %v1348_v12, 3  ;;  %v792_v19 = vperm.slane %v1348_v12, 2 }
  0x23   :  { %123 = vmatpush.msra.mxu0 %v74_v34  ;;  %143 = vmatpush.msra.mxu1 %v75_v37  ;;  %v896_v17 = vperm.slane %v1350_v16, 1  ;;  %v1346_v20 = vld [vmem:[%s2192_s3 + $0x5] ss:$8 sm:$0xf]  ;;  %v898_v22 = vperm.slane %v1350_v16, 3  ;;  %v897_v23 = vperm.slane %v1350_v16, 2 }
  0x24   :  { %169 = vmatpush.msra.mxu2 %v52_v38  ;;  %186 = vmatpush.msra.mxu3 %v65_v42  ;;  %v686_v21 = vperm.slane %v1346_v20, 1  ;;  %v790_v24 = vperm.slane %v1348_v12, 0  ;;  %v688_v25 = vperm.slane %v1346_v20, 3  ;;  %v687_v26 = vperm.slane %v1346_v20, 2  ;;  %v1620_v56 = vld [vmem:[%s2190_s1 + $0x8] sm:$0xff] }
  0x25   :  { %851 = vrot.lane.b32.xlu2 %v848_v35, %s1409_s15  ;;  %849 = vrot.lane.b32.xlu1 %v847_v36, %s1409_s15  ;;  %v1342_v27 = vld [vmem:[%s2192_s3 + $0x2] ss:$8 sm:$0xf]  ;;  %v895_v30 = vperm.slane %v1350_v16, 0  ;;  %v685_v37 = vperm.slane %v1346_v20, 0  ;;  %vm995_vm15 = vcmask 916484  }
  0x26   :  { %124 = vmatpush.msra.mxu0 %v70_v44  ;;  %170 = vmatmul.f32.vlgmr.msra.gmra.mxu2 %v49_v45  ;;  %v449_v28 = vperm.slane %v1342_v27, 2  ;;  %v448_v29 = vperm.slane %v1342_v27, 1  ;;  %v1344_v31 = vld [vmem:[%s2192_s3 + $0x3] ss:$8 sm:$0xf]  ;;  %v450_v34 = vperm.slane %v1342_v27, 3 }
  0x27   :  { %746 = vrot.lane.b32.xlu0 %v743_v41, %s1407_s30  ;;  %144 = vmatpush.msra.mxu1 %v71_v46  ;;  %v556_v32 = vperm.slane %v1344_v31, 2  ;;  %v555_v33 = vperm.slane %v1344_v31, 1  ;;  %v230_v36 = vld [vmem:[%s2192_s3] ss:$8 sm:$0xf]  ;;  %v557_v39 = vperm.slane %v1344_v31, 3 }
  0x28   :  { %187 = vmatpush.msra.mxu3 %v61_v47  ;;  %125 = vmatpush.msra.mxu0 %v66_v48  ;;  %v233_v38 = vperm.slane %v230_v36, 1  ;;  %v1340_v41 = vld [vmem:[%s2192_s3 + $0x1] ss:$8 sm:$0xf]  ;;  %v235_v42 = vperm.slane %v230_v36, 3  ;;  %v234_v44 = vperm.slane %v230_v36, 2 }
  0x29   :  { %145 = vmatpush.msra.mxu1 %v67_v53  ;;  %v341_v43 = vperm.slane %v1340_v41, 1  ;;  %v343_v46 = vperm.slane %v1340_v41, 3  ;;  %v447_v47 = vperm.slane %v1342_v27, 0  ;;  %v342_v48 = vperm.slane %v1340_v41, 2 }
  0x2a   :  { %188 = vmatpush.msra.mxu3 %v57_v54  ;;  %126 = vmatpush.msra.mxu0 %v62_v57  ;;  %v340_v53 = vperm.slane %v1340_v41, 0  ;;  %v232_v54 = vperm.slane %v230_v36, 0  ;;  %v554_v55 = vperm.slane %v1344_v31, 0 }
  0x2b   :  { %146 = vmatpush.msra.mxu1 %v63_v58 }
  0x2c   :  { %189 = vmatpush.msra.mxu3 %v53_v59  ;;  %127 = vmatpush.msra.mxu0 %v58_v63 }
  0x2d   :  { %1059 = vrot.lane.b32.xlu2 %v1057_v60, %s1410_s0  ;;  %956 = vrot.lane.b32.xlu1 %v953_v61, %s1411_s18 }
  0x2e   :  { %190 = vmatmul.f32.vlgmr.msra.gmra.mxu3 %v49_v45  ;;  %147 = vmatpush.msra.mxu1 %v59_v1 }
  0x2f   :  { %954 = vrot.lane.b32.xlu0 %v952_v62, %s1411_s18  ;;  %128 = vmatpush.msra.mxu0 %v54_v2 }
  0x30   :  { %148 = vmatpush.msra.mxu1 %v55_v3 }
  0x31   :  { %129 = vmatpush.msra.mxu0 %v50_v5  ;;  %v1636_v5 = vld [vmem:[%s2190_s1] sm:$0xff] }
  0x32   :  { %130 = vmatmul.f32.vlgmr.msra.gmra.mxu0 %v49_v45  ;;  %149 = vmatpush.msra.mxu1 %v51_v8 }
  0x33   :  { %150 = vmatmul.f32.vlgmr.msra.gmra.mxu1 %v49_v45 }
  0x35   :  { %1008 = vrot.lane.b32.xlu2 %v1002_v9, %s1410_s0  ;;  %1006 = vrot.lane.b32.xlu1 %v1001_v10, %s1410_s0 }
  0x37   :  { %1061 = vrot.lane.b32.xlu0 %v1058_v11, %s1410_s0 }
  0x3d   :  { %796 = vrot.lane.b32.xlu2 %v791_v13, %s1409_s15  ;;  %1004 = vrot.lane.b32.xlu1 %v1000_v14, %s1410_s0  ;;  %v1412_v14 = vmov 0.0  }
  0x3e   :  { %212 = vst [vmem:[#allocation2 + $0x90] sm:$0xff] %v1412_v14 }
  0x3f   :  { %1010 = vrot.lane.b32.xlu0 %v1003_v15, %s1410_s0  ;;  %194 = vst [vmem:[#allocation2] sm:$0xff] %v1412_v14 }
  0x40   :  { %195 = vst [vmem:[#allocation2 + $0x8] sm:$0xff] %v1412_v14 }
  0x41   :  { %196 = vst [vmem:[#allocation2 + $0x10] sm:$0xff] %v1412_v14 }
  0x42   :  { %197 = vst [vmem:[#allocation2 + $0x18] sm:$0xff] %v1412_v14 }
  0x43   :  { %198 = vst [vmem:[#allocation2 + $0x20] sm:$0xff] %v1412_v14 }
  0x44   :  { %199 = vst [vmem:[#allocation2 + $0x28] sm:$0xff] %v1412_v14 }
  0x45   :  { %901 = vrot.lane.b32.xlu2 %v896_v17, %s1411_s18  ;;  %800 = vrot.lane.b32.xlu1 %v793_v18, %s1409_s15  ;;  %200 = vst [vmem:[#allocation2 + $0x30] sm:$0xff] %v1412_v14 }
  0x46   :  { %201 = vst [vmem:[#allocation2 + $0x38] sm:$0xff] %v1412_v14 }
  0x47   :  { %798 = vrot.lane.b32.xlu0 %v792_v19, %s1409_s15  ;;  %202 = vst [vmem:[#allocation2 + $0x40] sm:$0xff] %v1412_v14 }
  0x48   :  { %203 = vst [vmem:[#allocation2 + $0x48] sm:$0xff] %v1412_v14 }
  0x49   :  { %204 = vst [vmem:[#allocation2 + $0x50] sm:$0xff] %v1412_v14 }
  0x4a   :  { %205 = vst [vmem:[#allocation2 + $0x58] sm:$0xff] %v1412_v14 }
  0x4b   :  { %206 = vst [vmem:[#allocation2 + $0x60] sm:$0xff] %v1412_v14 }
  0x4c   :  { %207 = vst [vmem:[#allocation2 + $0x68] sm:$0xff] %v1412_v14 }
  0x4d   :  { %691 = vrot.lane.b32.xlu2 %v686_v21, %s1407_s30  ;;  %905 = vrot.lane.b32.xlu1 %v898_v22, %s1411_s18  ;;  %208 = vst [vmem:[#allocation2 + $0x70] sm:$0xff] %v1412_v14 }
  0x4e   :  { %209 = vst [vmem:[#allocation2 + $0x78] sm:$0xff] %v1412_v14 }
  0x4f   :  { %903 = vrot.lane.b32.xlu0 %v897_v23, %s1411_s18  ;;  %210 = vst [vmem:[#allocation2 + $0x80] sm:$0xff] %v1412_v14 }
  0x50   :  { %211 = vst [vmem:[#allocation2 + $0x88] sm:$0xff] %v1412_v14 }
  0x51   :  { %213 = vst [vmem:[#allocation2 + $0x98] sm:$0xff] %v1412_v14 }
  0x52   :  { %214 = vst [vmem:[#allocation2 + $0xa0] sm:$0xff] %v1412_v14 }
  0x53   :  { %215 = vst [vmem:[#allocation2 + $0xa8] sm:$0xff] %v1412_v14 }
  0x54   :  { %216 = vst [vmem:[#allocation2 + $0xb0] sm:$0xff] %v1412_v14 }
  0x55   :  { %794 = vrot.lane.b32.xlu2 %v790_v24, %s1409_s15  ;;  %695 = vrot.lane.b32.xlu1 %v688_v25, %s1407_s30  ;;  %217 = vst [vmem:[#allocation2 + $0xb8] sm:$0xff] %v1412_v14 }
  0x56   :  { %218 = vst [vmem:[#allocation2 + $0xc0] sm:$0xff] %v1412_v14 }
  0x57   :  { %693 = vrot.lane.b32.xlu0 %v687_v26, %s1407_s30  ;;  %219 = vst [vmem:[#allocation2 + $0xc8] sm:$0xff] %v1412_v14 }
  0x58   :  { %220 = vst [vmem:[#allocation2 + $0xd0] sm:$0xff] %v1412_v14 }
  0x59   :  { %221 = vst [vmem:[#allocation2 + $0xd8] sm:$0xff] %v1412_v14 }
  0x5a   :  { %222 = vst [vmem:[#allocation2 + $0xe0] sm:$0xff] %v1412_v14 }
  0x5b   :  { %223 = vst [vmem:[#allocation2 + $0xe8] sm:$0xff] %v1412_v14 }
  0x5c   :  { %224 = vst [vmem:[#allocation2 + $0xf0] sm:$0xff] %v1412_v14 }
  0x5d   :  { %455 = vrot.lane.b32.xlu2 %v449_v28, %s1404_s21  ;;  %453 = vrot.lane.b32.xlu1 %v448_v29, %s1404_s21  ;;  %225 = vst [vmem:[#allocation2 + $0xf8] sm:$0xff] %v1412_v14 }
  0x5e   :  { %226 = vst [vmem:[#allocation2 + $0x100] sm:$0xff] %v1412_v14 }
  0x5f   :  { %899 = vrot.lane.b32.xlu0 %v895_v30, %s1411_s18  ;;  %227 = vst [vmem:[#allocation2 + $0x108] sm:$0xff] %v1412_v14 }
  0x60   :  { %228 = vst [vmem:[#allocation2 + $0x110] sm:$0xff] %v1412_v14 }
  0x61   :  { %229 = vst [vmem:[#allocation2 + $0x118] sm:$0xff] %v1412_v14 }
  0x65   :  { %562 = vrot.lane.b32.xlu2 %v556_v32, %s1408_s10  ;;  %560 = vrot.lane.b32.xlu1 %v555_v33, %s1408_s10 }
  0x67   :  { %457 = vrot.lane.b32.xlu0 %v450_v34, %s1404_s21  ;;  %v1594_v35 = vpop.permute.xlu2 %510 }
  0x68   :  { %v513_v4 = vrot.slane %v1594_v35, 4 }
  0x6a   :  { %v516_v15 = vsel %vm459_vm3, %v1594_v35, %v513_v4 }
  0x6b   :  { %v520_v17 = vmul.f32 %v516_v15, %v1620_v56 }
  0x6d   :  { %689 = vrot.lane.b32.xlu1 %v685_v37, %s1407_s30  ;;  %238 = vrot.lane.b32.xlu2 %v233_v38, %s1406_s23 }
  0x6f   :  { %564 = vrot.lane.b32.xlu0 %v557_v39, %s1408_s10  ;;  %v1602_v40 = vpop.permute.xlu2 %508 }
  0x70   :  { %v512_v18 = vrot.slane %v1602_v40, 4 }
  0x72   :  { %v514_v27 = vsel %vm291_vm0, %v512_v18, %v513_v4 }
  0x73   :  { %v515_v30 = vsel %vm459_vm3, %v1602_v40, %v514_v27 }
  0x74   :  { %v519_v35 = vmul.f32 %v515_v30, %v1636_v5 }
  0x75   :  { %242 = vrot.lane.b32.xlu1 %v235_v42, %s1406_s23  ;;  %346 = vrot.lane.b32.xlu2 %v341_v43, %s1405_s22 }
  0x77   :  { %240 = vrot.lane.b32.xlu0 %v234_v44, %s1406_s23  ;;  %v1610_v45 = vpop.permute.xlu2 %744 }
  0x7d   :  { %350 = vrot.lane.b32.xlu1 %v343_v46, %s1405_s22  ;;  %451 = vrot.lane.b32.xlu2 %v447_v47, %s1404_s21 }
  0x7f   :  { %348 = vrot.lane.b32.xlu0 %v342_v48, %s1405_s22  ;;  %v1615_v49 = vpop.permute.xlu2 %851  ;;  %v404_v50 = vpop.permute.xlu1 %403 }
  0x80   :  { %v406_v57 = vrot.slane %v404_v50, 4 }
  0x81   :  { %v297_v51 = vpop.permute.xlu0 %296 }
  0x82   :  { %v299_v52 = vrot.slane %v297_v51, 4  ;;  %v409_v61 = vsel %vm352_vm2, %v404_v50, %v406_v57 }
  0x83   :  { %v413_v1 = vmul.f32 %v1620_v56, %v409_v61 }
  0x84   :  { %v302_v58 = vsel %vm244_vm1, %v297_v51, %v299_v52 }
  0x85   :  { %v306_v59 = vmul.f32 %v1620_v56, %v302_v58  ;;  %344 = vrot.lane.b32.xlu2 %v340_v53, %s1405_s22  ;;  %236 = vrot.lane.b32.xlu1 %v232_v54, %s1406_s23 }
  0x87   :  { %312 = vst [vmem:[#allocation1 + $0x11] ss:$2 sm:$0xff] %v306_v59  ;;  %558 = vrot.lane.b32.xlu0 %v554_v55, %s1408_s10  ;;  %v402_v60 = vpop.permute.xlu1 %401  ;;  %v1628_v62 = vpop.permute.xlu2 %1059 }
  0x88   :  { %v405_v2 = vrot.slane %v402_v60, 4 }
  0x89   :  { %v295_v63 = vpop.permute.xlu0 %294 }
  0x8a   :  { %v298_v0 = vrot.slane %v295_v63, 4  ;;  %v407_v10 = vsel %vm291_vm0, %v405_v2, %v406_v57 }
  0x8b   :  { %v408_v16 = vsel %vm352_vm2, %v402_v60, %v407_v10 }
  0x8c   :  { %v300_v3 = vsel %vm291_vm0, %v298_v0, %v299_v52  ;;  %v412_v19 = vmul.f32 %v1636_v5, %v408_v16 }
  0x8d   :  { %v301_v6 = vsel %vm244_vm1, %v295_v63, %v300_v3 }
  0x8e   :  { %v1639_v7 = vld.sshfl [vmem:[#allocation1 + $0x10] sm:$0xff pattern:$0x75316420]  ;;  %v1641_v8 = vld.sshfl [vmem:[#allocation1 + $0x18] sm:$0xff pattern:$0x75316420]  ;;  %v305_v9 = vmul.f32 %v1636_v5, %v301_v6 }
  0x8f   :  { %419 = vst [vmem:[#allocation1 + $0x11] ss:$2 sm:$0xff] %v413_v1  ;;  %v616_v11 = vpop.permute.xlu1 %615  ;;  %v1645_v12 = vpop.permute.xlu2 %1008 }
  0x90   :  { %310 = vst [vmem:[#allocation1 + $0x1] ss:$2 sm:$0xff] %v305_v9  ;;  %v619_v31 = vrot.slane %v616_v11, 4 }
  0x91   :  { %v618_v13 = vpop.permute.xlu0 %617 }
  0x92   :  { %v620_v20 = vrot.slane %v618_v13, 4 }
  0x94   :  { %v623_v29 = vsel %vm566_vm4, %v618_v13, %v620_v20  ;;  %v621_v40 = vsel %vm291_vm0, %v619_v31, %v620_v20 }
  0x95   :  { %v627_v32 = vmul.f32 %v623_v29, %v1620_v56  ;;  %v622_v42 = vsel %vm566_vm4, %v616_v11, %v621_v40  ;;  %v748_v11 = vrot.slane %v1610_v45, 4  ;;  %v854_v29 = vrot.slane %v1615_v49, 4 }
  0x96   :  { %v1658_v21 = vld.sshfl [vmem:[#allocation1 + $0x10] sm:$0xff pattern:$0x75316420]  ;;  %v1660_v22 = vld.sshfl [vmem:[#allocation1 + $0x18] sm:$0xff pattern:$0x75316420]  ;;  %v626_v46 = vmul.f32 %v622_v42, %v1636_v5 }
  0x97   :  { %526 = vst [vmem:[#allocation1 + $0x11] ss:$2 sm:$0xff] %v520_v17  ;;  %v1662_v23 = vld.sshfl [vmem:[#allocation1] sm:$0xff pattern:$0x75316420]  ;;  %v1664_v24 = vpop.permute.xlu1 %849  ;;  %v1668_v26 = vpop.permute.xlu2 %796  ;;  %v750_v42 = vsel %vm590_vm7, %v748_v11, %v1610_v45 }
  0x98   :  { %v1666_v25 = vld.sshfl [vmem:[#allocation1 + $0x8] sm:$0xff pattern:$0x75316420]  ;;  %v853_v30 = vrot.slane %v1664_v24, 4 }
  0x99   :  { %417 = vst [vmem:[#allocation1 + $0x1] ss:$2 sm:$0xff] %v412_v19  ;;  %v1672_v28 = vpop.permute.xlu0 %746 }
  0x9a   :  { %v749_v10 = vrot.slane %v1672_v28, 4 }
  0x9c   :  { %v751_v15 = vsel %vm291_vm0, %v748_v11, %v749_v10 }
  0x9d   :  { %v752_v27 = vsel %vm590_vm7, %v751_v15, %v1672_v28  ;;  %v856_v28 = vsel %vm291_vm0, %v853_v30, %v854_v29 }
  0x9e   :  { %v1682_v33 = vld.sshfl [vmem:[#allocation1 + $0x10] sm:$0xff pattern:$0x75316420]  ;;  %v1684_v34 = vld.sshfl [vmem:[#allocation1 + $0x18] sm:$0xff pattern:$0x75316420]  ;;  %v756_v14 = vmul.f32 %v752_v27, %v1620_v56 }
  0x9f   :  { %633 = vst [vmem:[#allocation1 + $0x11] ss:$2 sm:$0xff] %v627_v32  ;;  %v1691_v38 = vpop.permute.xlu2 %901  ;;  %v1693_v39 = vpop.permute.xlu1 %956 }
  0xa0   :  { %v1687_v36 = vld.sshfl [vmem:[#allocation1] sm:$0xff pattern:$0x75316420]  ;;  %v1689_v37 = vld.sshfl [vmem:[#allocation1 + $0x8] sm:$0xff pattern:$0x75316420] }
  0xa1   :  { %524 = vst [vmem:[#allocation1 + $0x1] ss:$2 sm:$0xff] %v519_v35  ;;  %v1696_v41 = vpop.permute.xlu0 %954 }
  0xa6   :  { %v1703_v43 = vld.sshfl [vmem:[#allocation1 + $0x10] sm:$0xff pattern:$0x75316420]  ;;  %v1705_v44 = vld.sshfl [vmem:[#allocation1 + $0x18] sm:$0xff pattern:$0x75316420] }
  0xa7   :  { %669 = vst [vmem:[#allocation1 + $0x11] ss:$2 sm:$0xff] %v1620_v56  ;;  %v1713_v50 = vpop.permute.xlu2 %691  ;;  %v1715_v51 = vpop.permute.xlu1 %1006 }
  0xa8   :  { %v1709_v47 = vld.sshfl [vmem:[#allocation1] sm:$0xff pattern:$0x75316420]  ;;  %v1711_v48 = vld.sshfl [vmem:[#allocation1 + $0x8] sm:$0xff pattern:$0x75316420] }
  0xa9   :  { %631 = vst [vmem:[#allocation1 + $0x1] ss:$2 sm:$0xff] %v626_v46  ;;  %v1717_v52 = vpop.permute.xlu0 %1061  ;;  %v1720_v53 = vpop.f32.mrf.mxu2 }
  0xaa   :  { %660 = vst [vmem:[#allocation2 + $0x90] sm:$0xf] %v1720_v53 }
  0xae   :  { %v672_v54 = vld.sshfl [vmem:[#allocation1 + $0x10] sm:$0xff pattern:$0x75316420]  ;;  %v673_v32 = vld.sshfl [vmem:[#allocation1 + $0x18] sm:$0xff pattern:$0x75316420] }
  0xaf   :  { %680 = vst [vmem:[#allocation2 + $0x90] sm:$0xf0] %v672_v54  ;;  %v795_v55 = vpop.permute.xlu2 %794  ;;  %v1005_v57 = vpop.permute.xlu1 %1004 }
  0xb0   :  { %v802_v58 = vsel %vm483_vm6, %v795_v55, %v1668_v26  ;;  %v1012_v59 = vsel %vm268_vm5, %v1005_v57, %v1715_v51  ;;  %v1733_v61 = vpop.f32.mrf.mxu0  ;;  %v1736_v63 = vpop.f32.mrf.mxu1  ;;  %v1767_v13 = vld.sshfl [vmem:[#allocation1] sm:$0xff pattern:$0x75316420]  ;;  %v1778_v19 = vld.sshfl [vmem:[#allocation1 + $0x8] sm:$0xff pattern:$0x75316420] }
  0xb1   :  { %v1731_v60 = vpop.permute.xlu0 %1010  ;;  %v1019_v0 = vmul.f32 %v1005_v57, %v1733_v61  ;;  %v1020_v1 = vmul.f32 %v1012_v59, %v1736_v63  ;;  %v810_v2 = vmul.f32 %v802_v58, %v1736_v63  ;;  %v809_v9 = vmul.f32 %v795_v55, %v1733_v61  ;;  %658 = vst [vmem:[#allocation2 + $0x80] sm:$0xf] %v1733_v61  ;;  %v1792_v31 = vpop.f32.mrf.mxu3 }
  0xb2   :  { %667 = vst [vmem:[#allocation1 + $0x1] ss:$2 sm:$0xff] %v1636_v5  ;;  %v857_v55 = vsel %vm483_vm6, %v856_v28, %v1615_v49 }
  0xb3   :  { %1027 = vrot.lane.b32.xlu1 %v1019_v0, %s1406_s23  ;;  %1029 = vrot.lane.b32.xlu2 %v1020_v1, %s1406_s23  ;;  %659 = vst [vmem:[#allocation2 + $0x88] sm:$0xf] %v1736_v63  ;;  %v755_v0 = vmul.f32 %v750_v42, %v1636_v5  ;;  %v959_v1 = vrot.slane %v1693_v39, 4  ;;  %v861_v45 = vmul.f32 %v857_v55, %v1620_v56  ;;  %v1063_v42 = vrot.slane %v1628_v62, 4 }
  0xb4   :  { %819 = vrot.lane.b32.xlu0 %v810_v2, %s1404_s21  ;;  %661 = vst [vmem:[#allocation2 + $0x98] sm:$0xf] %v1792_v31  ;;  %v958_v2 = vrot.slane %v1696_v41, 4 }
  0xb5   :  { %681 = vst [vmem:[#allocation2 + $0x98] sm:$0xf0] %v673_v32 }
  0xb6   :  { %762 = vst [vmem:[#allocation1 + $0x11] ss:$2 sm:$0xff] %v756_v14  ;;  %v961_v10 = vsel %vm291_vm0, %v958_v2, %v959_v1  ;;  %v960_v1 = vsel %vm376_vm8, %v958_v2, %v1696_v41 }
  0xb7   :  { %v1750_v3 = vpop.permute.xlu2 %455  ;;  %v1752_v4 = vpop.permute.xlu1 %800  ;;  %v962_v32 = vsel %vm376_vm8, %v961_v10, %v1693_v39  ;;  %v965_v2 = vmul.f32 %v960_v1, %v1636_v5 }
  0xb9   :  { %v1755_v6 = vpop.permute.xlu0 %798  ;;  %v670_v57 = vld.sshfl [vmem:[#allocation1] sm:$0xff pattern:$0x75316420]  ;;  %v671_v58 = vld.sshfl [vmem:[#allocation1 + $0x8] sm:$0xff pattern:$0x75316420] }
  0xba   :  { %v803_v16 = vsel %vm483_vm6, %v1668_v26, %v1755_v6  ;;  %678 = vst [vmem:[#allocation2 + $0x80] sm:$0xf0] %v670_v57 }
  0xbb   :  { %817 = vrot.lane.b32.xlu2 %v809_v9, %s1404_s21  ;;  %v811_v26 = vmul.f32 %v803_v16, %v1720_v53  ;;  %679 = vst [vmem:[#allocation2 + $0x88] sm:$0xf0] %v671_v58  ;;  %v855_v16 = vsel %vm483_vm6, %v853_v30, %v1664_v24  ;;  %v1014_v58 = vsel %vm268_vm5, %v1645_v12, %v1731_v60 }
  0xbc   :  { %760 = vst [vmem:[#allocation1 + $0x1] ss:$2 sm:$0xff] %v755_v0  ;;  %v860_v28 = vmul.f32 %v855_v16, %v1636_v5  ;;  %v1022_v41 = vmul.f32 %v1014_v58, %v1792_v31 }
  0xbd   :  { %v1814_v9 = vld.sshfl [vmem:[#allocation1 + $0x10] sm:$0xff pattern:$0x75316420]  ;;  %v1816_v49 = vld.sshfl [vmem:[#allocation1 + $0x18] sm:$0xff pattern:$0x75316420] }
  0xbe   :  { %867 = vst [vmem:[#allocation1 + $0x11] ss:$2 sm:$0xff] %v861_v45  ;;  %v1013_v45 = vsel %vm268_vm5, %v1715_v51, %v1645_v12 }
  0xbf   :  { %v1774_v17 = vpop.permute.xlu2 %562  ;;  %v1776_v18 = vpop.permute.xlu1 %905 }
  0xc1   :  { %v1781_v20 = vpop.permute.xlu0 %903 }
  0xc3   :  { %821 = vrot.lane.b32.xlu2 %v811_v26, %s1404_s21  ;;  %v1835_v24 = vld.sshfl [vmem:[#allocation1] sm:$0xff pattern:$0x75316420]  ;;  %v1837_v30 = vld.sshfl [vmem:[#allocation1 + $0x8] sm:$0xff pattern:$0x75316420] }
  0xc4   :  { %865 = vst [vmem:[#allocation1 + $0x1] ss:$2 sm:$0xff] %v860_v28 }
  0xc5   :  { %v1841_v39 = vld.sshfl [vmem:[#allocation1 + $0x10] sm:$0xff pattern:$0x75316420]  ;;  %v871_v55 = vld.sshfl [vmem:[#allocation1 + $0x18] sm:$0xff pattern:$0x75316420] }
  0xc7   :  { %v696_v35 = vpop.permute.xlu1 %695  ;;  %v1798_v40 = vpop.permute.xlu2 %238 }
  0xc9   :  { %v1802_v46 = vpop.permute.xlu0 %693 }
  0xca   :  { %v699_v54 = vsel %vm590_vm7, %v1802_v46, %v696_v35  ;;  %v1064_v35 = vrot.slane %v1717_v52, 4 }
  0xcb   :  { %v707_v59 = vmul.f32 %v699_v54, %v1792_v31  ;;  %v966_v54 = vmul.f32 %v962_v32, %v1620_v56  ;;  %v868_v51 = vld.sshfl [vmem:[#allocation1] sm:$0xff pattern:$0x75316420] }
  0xcc   :  { %v1066_v57 = vsel %vm291_vm0, %v1063_v42, %v1064_v35  ;;  %v909_v35 = vsel %vm376_vm8, %v1781_v20, %v1776_v18  ;;  %v1305_v18 = vld [vmem:[%s2197_s8 + $0x8] sm:$0x77] }
  0xcd   :  { %718 = vrot.lane.b32.xlu2 %v707_v59, %s1408_s10  ;;  %972 = vst [vmem:[#allocation1 + $0x11] ss:$2 sm:$0xff] %v966_v54 }
  0xcf   :  { %v1819_v11 = vpop.permute.xlu1 %453  ;;  %v1821_v15 = vpop.permute.xlu2 %346 }
  0xd1   :  { %v900_v27 = vpop.permute.xlu0 %899 }
  0xd2   :  { %v907_v26 = vsel %vm376_vm8, %v900_v27, %v1691_v38  ;;  %v914_v29 = vmul.f32 %v900_v27, %v1733_v61  ;;  %v1021_v27 = vmul.f32 %v1013_v45, %v1720_v53 }
  0xd3   :  { %v915_v14 = vmul.f32 %v907_v26, %v1736_v63  ;;  %v1067_v26 = vsel %vm268_vm5, %v1066_v57, %v1717_v52 }
  0xd4   :  { %922 = vrot.lane.b32.xlu0 %v914_v29, %s1405_s22  ;;  %v869_v29 = vld.sshfl [vmem:[#allocation1 + $0x8] sm:$0xff pattern:$0x75316420]  ;;  %v1071_v32 = vmul.f32 %v1067_v26, %v1620_v56  ;;  %v975_v52 = vld.sshfl [vmem:[#allocation1 + $0x10] sm:$0xff pattern:$0x75316420]  ;;  %v1065_v56 = vsel %vm268_vm5, %v1063_v42, %v1628_v62  ;;  %v908_v42 = vsel %vm376_vm8, %v1691_v38, %v1781_v20 }
  0xd5   :  { %924 = vrot.lane.b32.xlu1 %v915_v14, %s1405_s22  ;;  %878 = vrot.lane.b32.xlu2 %v871_v55, %s1404_s21  ;;  %970 = vst [vmem:[#allocation1 + $0x1] ss:$2 sm:$0xff] %v965_v2  ;;  %v804_v14 = vsel %vm483_vm6, %v1755_v6, %v1752_v4  ;;  %v976_v28 = vld.sshfl [vmem:[#allocation1 + $0x18] sm:$0xff pattern:$0x75316420]  ;;  %v917_v6 = vmul.f32 %v909_v35, %v1792_v31 }
  0xd6   :  { %1077 = vst [vmem:[#allocation1 + $0x11] ss:$2 sm:$0xff] %v1071_v32  ;;  %v812_v4 = vmul.f32 %v804_v14, %v1792_v31  ;;  %v1070_v58 = vmul.f32 %v1065_v56, %v1636_v5  ;;  %v698_v5 = vsel %vm590_vm7, %v1713_v50, %v1802_v46  ;;  %v461_v32 = vsel %vm459_vm3, %v1819_v11, %v1750_v3 }
  0xd7   :  { %v1848_v59 = vpop.permute.xlu1 %560  ;;  %v452_v0 = vpop.permute.xlu2 %451  ;;  %v706_v26 = vmul.f32 %v698_v5, %v1720_v53 }
  0xd8   :  { %v1859_v16 = vsel %vm459_vm3, %v452_v0, %v1819_v11 }
  0xd9   :  { %v1855_v10 = vpop.permute.xlu0 %457 }
  0xda   :  { %v462_v60 = vsel %vm459_vm3, %v1750_v3, %v1855_v10 }
  0xdb   :  { %v469_v12 = vmul.f32 %v462_v60, %v1720_v53 }
  0xdc   :  { %1031 = vrot.lane.b32.xlu0 %v1021_v27, %s1406_s23  ;;  %v973_v0 = vld.sshfl [vmem:[#allocation1] sm:$0xff pattern:$0x75316420]  ;;  %v974_v62 = vld.sshfl [vmem:[#allocation1 + $0x8] sm:$0xff pattern:$0x75316420]  ;;  %v916_v27 = vmul.f32 %v908_v42, %v1720_v53 }
  0xdd   :  { %1033 = vrot.lane.b32.xlu1 %v1022_v41, %s1406_s23  ;;  %479 = vrot.lane.b32.xlu2 %v469_v12, %s1409_s15  ;;  %1075 = vst [vmem:[#allocation1 + $0x1] ss:$2 sm:$0xff] %v1070_v58  ;;  %v1080_v1 = vld.sshfl [vmem:[#allocation1 + $0x10] sm:$0xff pattern:$0x75316420]  ;;  %v470_v58 = vmul.f32 %v1855_v10, %v1792_v31 }
  0xde   :  { %v1081_v45 = vld.sshfl [vmem:[#allocation1 + $0x18] sm:$0xff pattern:$0x75316420]  ;;  %v1304_v41 = vld [vmem:[%s2197_s8] sm:$0x77] }
  0xdf   :  { %v1880_v54 = vpop.permute.xlu1 %689  ;;  %v345_v55 = vpop.permute.xlu2 %344  ;;  %1310 = vst [vmem:[#allocation1 + $0x10] ss:$2 sm:$0xff] %v1305_v18 }
  0xe0   :  { %v1886_v57 = vsel %vm352_vm2, %v345_v55, %v1821_v15 }
  0xe4   :  { %823 = vrot.lane.b32.xlu0 %v812_v4, %s1404_s21  ;;  %v1078_v38 = vld.sshfl [vmem:[#allocation1] sm:$0xff pattern:$0x75316420]  ;;  %v1079_v20 = vld.sshfl [vmem:[#allocation1 + $0x8] sm:$0xff pattern:$0x75316420]  ;;  %v704_v4 = vmul.f32 %v1880_v54, %v1733_v61 }
  0xe5   :  { %928 = vrot.lane.b32.xlu1 %v917_v6, %s1405_s22  ;;  %874 = vrot.lane.b32.xlu2 %v869_v29, %s1404_s21  ;;  %1308 = vst [vmem:[#allocation1] ss:$2 sm:$0xff] %v1304_v41  ;;  %v565_v29 = vpop.permute.xlu0 %564 }
  0xe6   :  { %v569_v11 = vsel %vm566_vm4, %v1774_v17, %v565_v29 }
  0xe7   :  { %v1903_v60 = vpop.permute.xlu1 %242  ;;  %v576_v35 = vmul.f32 %v569_v11, %v1720_v53 }
  0xec   :  { %926 = vrot.lane.b32.xlu0 %v916_v27, %s1405_s22 }
  0xed   :  { %716 = vrot.lane.b32.xlu1 %v706_v26, %s1408_s10  ;;  %981 = vrot.lane.b32.xlu2 %v975_v52, %s1405_s22  ;;  %v241_v14 = vpop.permute.xlu0 %240  ;;  %v360_v26 = vmul.f32 %v1886_v57, %v1733_v61 }
  0xef   :  { %v1913_v46 = vpop.permute.xlu1 %350 }
  0xf4   :  { %771 = vrot.lane.b32.xlu0 %v1814_v9, %s1408_s10  ;;  %v568_v9 = vsel %vm566_vm4, %v1848_v59, %v1774_v17 }
  0xf5   :  { %773 = vrot.lane.b32.xlu1 %v1816_v49, %s1408_s10  ;;  %977 = vrot.lane.b32.xlu2 %v973_v0, %s1405_s22  ;;  %v575_v49 = vmul.f32 %v568_v9, %v1736_v63 }
  0xf7   :  { %v237_v2 = vpop.permute.xlu1 %236 }
  0xf8   :  { %v1922_v12 = vsel %vm244_vm1, %v237_v2, %v1798_v40 }
  0xfc   :  { %983 = vrot.lane.b32.xlu0 %v976_v28, %s1405_s22 }
  0xfd   :  { %876 = vrot.lane.b32.xlu1 %v1841_v39, %s1404_s21  ;;  %1086 = vrot.lane.b32.xlu2 %v1080_v1, %s1406_s23  ;;  %v468_v39 = vmul.f32 %v461_v32, %v1736_v63  ;;  %v363_v32 = vmul.f32 %v1913_v46, %v1792_v31 }
 0x104   :  { %979 = vrot.lane.b32.xlu0 %v974_v62, %s1405_s22 }
 0x105   :  { %872 = vrot.lane.b32.xlu1 %v868_v51, %s1404_s21  ;;  %584 = vrot.lane.b32.xlu2 %v575_v49, %s1407_s30  ;;  %v349_v51 = vpop.permute.xlu0 %348 }
 0x10c   :  { %1088 = vrot.lane.b32.xlu0 %v1081_v45, %s1406_s23 }
 0x10d   :  { %477 = vrot.lane.b32.xlu1 %v468_v39, %s1409_s15  ;;  %v1941_v52 = vpop.permute.xlu2 %1029  ;;  %642 = vrot.lane.b32.xlu2 %v1703_v43, %s1407_s30  ;;  %v1955_v28 = vpop.permute.xlu0 %558 }
 0x114   :  { %1082 = vrot.lane.b32.xlu0 %v1078_v38, %s1406_s23 }
 0x115   :  { %1084 = vrot.lane.b32.xlu1 %v1079_v20, %s1406_s23  ;;  %v818_v3 = vpop.permute.xlu2 %817  ;;  %767 = vrot.lane.b32.xlu2 %v1835_v24, %s1408_s10  ;;  %v246_v24 = vsel %vm244_vm1, %v1798_v40, %v241_v14 }
 0x11c   :  { %533 = vrot.lane.b32.xlu0 %v1711_v48, %s1409_s15 }
 0x11d   :  { %535 = vrot.lane.b32.xlu1 %v1682_v33, %s1409_s15  ;;  %v1957_v43 = vpop.permute.xlu2 %821  ;;  %537 = vrot.lane.b32.xlu2 %v1684_v34, %s1409_s15  ;;  %v253_v33 = vmul.f32 %v246_v24, %v1736_v63  ;;  %v697_v34 = vsel %vm590_vm7, %v1880_v54, %v1713_v50  ;;  %v577_v54 = vmul.f32 %v565_v29, %v1792_v31 }
 0x11e   :  { %v705_v6 = vmul.f32 %v697_v34, %v1736_v63 }
 0x124   :  { %586 = vrot.lane.b32.xlu0 %v576_v35, %s1407_s30 }
 0x125   :  { %640 = vrot.lane.b32.xlu1 %v1778_v19, %s1407_s30  ;;  %v1028_v48 = vpop.permute.xlu1 %1027  ;;  %262 = vrot.lane.b32.xlu2 %v253_v33, %s1410_s0 }
 0x126   :  { %v1035_v17 = vsel %vm244_vm1, %v1028_v48, %v1941_v52  ;;  %v820_v55 = vpop.permute.xlu0 %819 }
 0x127   :  { %1042 = vst [vmem:[#allocation2 + $0x100] sm:$0xf] %v1035_v17  ;;  %v825_v40 = vsel %vm459_vm3, %v818_v3, %v820_v55  ;;  %v826_v56 = vsel %vm459_vm3, %v820_v55, %v1957_v43  ;;  %v1977_v19 = vpop.permute.xlu2 %718 }
 0x128   :  { %832 = vst [vmem:[#allocation2 + $0xc0] sm:$0xf] %v825_v40 }
 0x129   :  { %833 = vst [vmem:[#allocation2 + $0xc8] sm:$0xf] %v826_v56 }
 0x12a   :  { %731 = vst.msk [vmem:[#allocation2 + $0xb8] sm:$0xf] %vm730_vm9, %v1977_v19  ;;  %vm1100_vm9 = vcmask 908292  }
 0x12c   :  { %712 = vrot.lane.b32.xlu0 %v704_v4, %s1408_s10 }
 0x12d   :  { %714 = vrot.lane.b32.xlu1 %v705_v6, %s1408_s10  ;;  %321 = vrot.lane.b32.xlu2 %v1639_v7, %s1410_s0  ;;  %v247_v7 = vsel %vm244_vm1, %v241_v14, %v1903_v60 }
 0x12f   :  { %v1987_v50 = vpop.permute.xlu2 %878 }
 0x130   :  { %891 = vst.msk [vmem:[#allocation2 + $0xd8] sm:$0xf0] %vm890_vm10, %v1987_v50  ;;  %vm653_vm10 = vcmask 1047564  }
 0x134   :  { %769 = vrot.lane.b32.xlu0 %v1837_v30, %s1408_s10  ;;  %v254_v30 = vmul.f32 %v247_v7, %v1720_v53 }
 0x135   :  { %481 = vrot.lane.b32.xlu1 %v470_v58, %s1409_s15  ;;  %426 = vrot.lane.b32.xlu2 %v1689_v37, %s1411_s18  ;;  %v255_v37 = vmul.f32 %v1903_v60, %v1792_v31 }
 0x137   :  { %v1998_v18 = vpop.permute.xlu2 %479 }
 0x13c   :  { %588 = vrot.lane.b32.xlu0 %v577_v54, %s1407_s30 }
 0x13d   :  { %644 = vrot.lane.b32.xlu1 %v1705_v44, %s1407_s30  ;;  %531 = vrot.lane.b32.xlu2 %v1709_v47, %s1409_s15  ;;  %v354_v44 = vsel %vm352_vm2, %v1821_v15, %v349_v51  ;;  %v355_v47 = vsel %vm352_vm2, %v349_v51, %v1913_v46 }
 0x13e   :  { %v361_v1 = vmul.f32 %v354_v44, %v1736_v63 }
 0x13f   :  { %v2008_v10 = vpop.permute.xlu2 %874 }
 0x144   :  { %264 = vrot.lane.b32.xlu0 %v254_v30, %s1410_s0 }
 0x145   :  { %319 = vrot.lane.b32.xlu1 %v1666_v25, %s1410_s0  ;;  %266 = vrot.lane.b32.xlu2 %v255_v37, %s1410_s0  ;;  %v362_v25 = vmul.f32 %v355_v47, %v1720_v53  ;;  %v467_v53 = vmul.f32 %v1859_v16, %v1733_v61 }
 0x146   :  { %v923_v0 = vpop.permute.xlu0 %922 }
 0x147   :  { %v925_v62 = vpop.permute.xlu1 %924  ;;  %v2022_v45 = vpop.permute.xlu2 %981 }
 0x148   :  { %v930_v42 = vsel %vm352_vm2, %v923_v0, %v925_v62 }
 0x149   :  { %937 = vst [vmem:[#allocation2 + $0xe0] sm:$0xf] %v930_v42 }
 0x14c   :  { %370 = vrot.lane.b32.xlu0 %v361_v1, %s1411_s18 }
 0x14d   :  { %372 = vrot.lane.b32.xlu1 %v362_v25, %s1411_s18  ;;  %430 = vrot.lane.b32.xlu2 %v1660_v22, %s1411_s18  ;;  %v567_v22 = vsel %vm566_vm4, %v1955_v28, %v1848_v59 }
 0x14e   :  { %v1032_v15 = vpop.permute.xlu0 %1031 }
 0x14f   :  { %v1036_v5 = vsel %vm244_vm1, %v1941_v52, %v1032_v15  ;;  %v1034_v60 = vpop.permute.xlu1 %1033  ;;  %v978_v27 = vpop.permute.xlu2 %977  ;;  %v252_v52 = vmul.f32 %v1922_v12, %v1733_v61 }
 0x150   :  { %1043 = vst [vmem:[#allocation2 + $0x108] sm:$0xf] %v1036_v5  ;;  %v1037_v63 = vsel %vm244_vm1, %v1032_v15, %v1034_v60  ;;  %v1122_v15 = vld [vmem:[#allocation2 + $0x98] sm:$0xff] }
 0x151   :  { %1044 = vst [vmem:[#allocation2 + $0x110] sm:$0xf] %v1037_v63 }
 0x152   :  { %1046 = vst.msk [vmem:[#allocation2 + $0x118] sm:$0xf] %vm1045_vm11, %v1034_v60  ;;  %vm332_vm11 = vcmask 1047692  }
 0x154   :  { %428 = vrot.lane.b32.xlu0 %v1658_v21, %s1411_s18  ;;  %v574_v21 = vmul.f32 %v567_v22, %v1733_v61 }
 0x155   :  { %475 = vrot.lane.b32.xlu1 %v467_v53, %s1409_s15  ;;  %368 = vrot.lane.b32.xlu2 %v360_v26, %s1411_s18 }
 0x156   :  { %v824_v41 = vpop.permute.xlu0 %823 }
 0x157   :  { %v827_v38 = vsel %vm459_vm3, %v1957_v43, %v824_v41  ;;  %836 = vst.msk [vmem:[#allocation2 + $0xd8] sm:$0xf] %vm835_vm12, %v824_v41  ;;  %v929_v16 = vpop.permute.xlu1 %928  ;;  %v1087_v20 = vpop.permute.xlu2 %1086  ;;  %vm439_vm12 = vcmask 1047684  }
 0x158   :  { %834 = vst [vmem:[#allocation2 + $0xd0] sm:$0xf] %v827_v38 }
 0x159   :  { %941 = vst.msk [vmem:[#allocation2 + $0xf8] sm:$0xf] %vm940_vm13, %v929_v16 }
 0x15c   :  { %582 = vrot.lane.b32.xlu0 %v574_v21, %s1407_s30 }
 0x15d   :  { %638 = vrot.lane.b32.xlu1 %v1767_v13, %s1407_s30 }
 0x15e   :  { %v927_v57 = vpop.permute.xlu0 %926  ;;  %v1130_v44 = vld [vmem:[#allocation2 + $0xd8] sm:$0xff] }
 0x15f   :  { %v931_v59 = vsel %vm352_vm2, %v925_v62, %v927_v57  ;;  %v932_v2 = vsel %vm352_vm2, %v927_v57, %v929_v16  ;;  %v2051_v29 = vpop.permute.xlu1 %716  ;;  %v2056_v49 = vpop.permute.xlu2 %584 }
 0x160   :  { %938 = vst [vmem:[#allocation2 + $0xe8] sm:$0xf] %v931_v59  ;;  %v722_v9 = vsel %vm566_vm4, %v2051_v29, %v1977_v19 }
 0x161   :  { %939 = vst [vmem:[#allocation2 + $0xf0] sm:$0xf] %v932_v2 }
 0x162   :  { %729 = vst [vmem:[#allocation2 + $0xb0] sm:$0xf] %v722_v9 }
 0x164   :  { %323 = vrot.lane.b32.xlu0 %v1641_v8, %s1410_s0 }
 0x165   :  { %374 = vrot.lane.b32.xlu1 %v363_v32, %s1411_s18 }
 0x166   :  { %v2063_v13 = vpop.permute.xlu0 %771 }
 0x167   :  { %v774_v39 = vpop.permute.xlu1 %773  ;;  %v2069_v51 = vpop.permute.xlu2 %642 }
 0x168   :  { %v777_v14 = vsel %vm566_vm4, %v2063_v13, %v774_v39  ;;  %786 = vst.msk [vmem:[#allocation2 + $0xb8] sm:$0xf0] %vm785_vm14, %v774_v39 }
 0x169   :  { %784 = vst [vmem:[#allocation2 + $0xb0] sm:$0xf0] %v777_v14 }
 0x16c   :  { %260 = vrot.lane.b32.xlu0 %v252_v52, %s1410_s0 }
 0x16d   :  { %317 = vrot.lane.b32.xlu1 %v1662_v23, %s1410_s0 }
 0x16e   :  { %v984_v8 = vpop.permute.xlu0 %983 }
 0x16f   :  { %v987_v31 = vsel %vm352_vm2, %v2022_v45, %v984_v8  ;;  %996 = vst.msk [vmem:[#allocation2 + $0xf8] sm:$0xf0] %vm995_vm15, %v984_v8  ;;  %v877_v46 = vpop.permute.xlu1 %876  ;;  %v2080_v12 = vpop.permute.xlu2 %767  ;;  %v1126_v42 = vld [vmem:[#allocation2 + $0xb8] sm:$0xff] }
 0x170   :  { %994 = vst [vmem:[#allocation2 + $0xf0] sm:$0xf0] %v987_v31  ;;  %v881_v3 = vsel %vm459_vm3, %v2008_v10, %v877_v46  ;;  %v882_v61 = vsel %vm459_vm3, %v877_v46, %v1987_v50  ;;  %v1150_v63 = vpack.c.bf16 %v1126_v42, %v1122_v15 }
 0x171   :  { %888 = vst [vmem:[#allocation2 + $0xc8] sm:$0xf0] %v881_v3 }
 0x172   :  { %889 = vst [vmem:[#allocation2 + $0xd0] sm:$0xf0] %v882_v61 }
 0x174   :  { %424 = vrot.lane.b32.xlu0 %v1687_v36, %s1411_s18 }
 0x176   :  { %v980_v23 = vpop.permute.xlu0 %979  ;;  %v1134_v7 = vld [vmem:[#allocation2 + $0xf8] sm:$0xff] }
 0x177   :  { %v985_v11 = vsel %vm352_vm2, %v978_v27, %v980_v23  ;;  %v986_v28 = vsel %vm352_vm2, %v980_v23, %v2022_v45  ;;  %v873_v43 = vpop.permute.xlu1 %872  ;;  %v538_v24 = vpop.permute.xlu2 %537  ;;  %v1133_v0 = vld [vmem:[#allocation2 + $0xf0] sm:$0xff]  ;;  %v1154_v62 = vpack.c.bf16 %v1134_v7, %v1130_v44  ;;  %vm384_vm2 = vcmask 1043584  }
 0x178   :  { %992 = vst [vmem:[#allocation2 + $0xe0] sm:$0xf0] %v985_v11  ;;  %v880_v35 = vsel %vm459_vm3, %v873_v43, %v2008_v10  ;;  %v1125_v45 = vld [vmem:[#allocation2 + $0xb0] sm:$0xff]  ;;  %v1128_v39 = vld [vmem:[#allocation2 + $0xc8] sm:$0xff]  ;;  %vm491_vm3 = vcmask 1043576  }
 0x179   :  { %993 = vst [vmem:[#allocation2 + $0xe8] sm:$0xf0] %v986_v28  ;;  %v1129_v37 = vld [vmem:[#allocation2 + $0xd0] sm:$0xff] }
 0x17a   :  { %887 = vst [vmem:[#allocation2 + $0xc0] sm:$0xf0] %v880_v35  ;;  %v1153_v47 = vpack.c.bf16 %v1133_v0, %v1129_v37  ;;  %v1121_v27 = vld [vmem:[#allocation2 + $0x90] sm:$0xff] }
 0x17b   :  { %v1149_v26 = vpack.c.bf16 %v1125_v45, %v1121_v27 }
 0x17e   :  { %v1089_v33 = vpop.permute.xlu0 %1088 }
 0x17f   :  { %v1092_v48 = vsel %vm244_vm1, %v1087_v20, %v1089_v33  ;;  %1101 = vst.msk [vmem:[#allocation2 + $0x118] sm:$0xf0] %vm1100_vm9, %v1089_v33  ;;  %v2090_v36 = vpop.permute.xlu1 %477  ;;  %v2095_v55 = vpop.permute.xlu2 %262  ;;  %v1131_v57 = vld [vmem:[#allocation2 + $0xe0] sm:$0xff] }
 0x180   :  { %1099 = vst [vmem:[#allocation2 + $0x110] sm:$0xf0] %v1092_v48  ;;  %v485_v17 = vsel %vm483_vm6, %v2090_v36, %v1998_v18  ;;  %v1132_v2 = vld [vmem:[#allocation2 + $0xe8] sm:$0xff] }
 0x181   :  { %494 = vst [vmem:[#allocation2 + $0x50] sm:$0xf] %v485_v17  ;;  %v1152_v8 = vpack.c.bf16 %v1132_v2, %v1128_v39 }
 0x186   :  { %v1083_v34 = vpop.permute.xlu0 %1082  ;;  %v1138_v40 = vld [vmem:[#allocation2 + $0x118] sm:$0xff] }
 0x187   :  { %v1085_v56 = vpop.permute.xlu1 %1084  ;;  %v1158_v19 = vpack.c.bf16 %v1138_v40, %v1138_v40  ;;  %v1137_v4 = vld [vmem:[#allocation2 + $0x110] sm:$0xff]  ;;  %v2100_v30 = vpop.permute.xlu2 %321 }
 0x188   :  { %v1090_v6 = vsel %vm244_vm1, %v1083_v34, %v1085_v56  ;;  %v1091_v50 = vsel %vm244_vm1, %v1085_v56, %v1087_v20  ;;  %v1157_v58 = vpack.c.bf16 %v1137_v4, %v1137_v4  ;;  %v1127_v20 = vld [vmem:[#allocation2 + $0xc0] sm:$0xff]  ;;  %vm546_vm1 = vcmask 1047676  }
 0x189   :  { %1097 = vst [vmem:[#allocation2 + $0x100] sm:$0xf0] %v1090_v6  ;;  %v1179_v54 = vsel %vm291_vm0, %v1158_v19, 0  ;;  %v1151_v32 = vpack.c.bf16 %v1131_v57, %v1127_v20 }
 0x18a   :  { %1098 = vst [vmem:[#allocation2 + $0x108] sm:$0xf0] %v1091_v50  ;;  %1223 = vmatpush.bf16.msrb.mxu3 %v1179_v54  ;;  %v1176_v10 = vsel %vm291_vm0, %v1157_v58, 0  ;;  %v1119_v50 = vld [vmem:[#allocation2 + $0x80] sm:$0xff]  ;;  %v1120_v54 = vld [vmem:[#allocation2 + $0x88] sm:$0xff] }
 0x18b   :  { %1210 = vmatpush.bf16.msrb.mxu2 %v1176_v10 }
 0x18e   :  { %v534_v1 = vpop.permute.xlu0 %533  ;;  %1224 = vmatpush.bf16.msrb.mxu3 %v1154_v62 }
 0x18f   :  { %v536_v25 = vpop.permute.xlu1 %535  ;;  %1211 = vmatpush.bf16.msrb.mxu2 %v1153_v47  ;;  %v2105_v38 = vpop.permute.xlu2 %426 }
 0x190   :  { %v540_v5 = vsel %vm483_vm6, %v534_v1, %v536_v25  ;;  %v541_v60 = vsel %vm483_vm6, %v536_v25, %v538_v24  ;;  %v1135_v53 = vld [vmem:[#allocation2 + $0x100] sm:$0xff] }
 0x191   :  { %549 = vst [vmem:[#allocation2 + $0x50] sm:$0xf0] %v540_v5  ;;  %v1155_v41 = vpack.c.bf16 %v1135_v53, %v1135_v53  ;;  %v1136_v22 = vld [vmem:[#allocation2 + $0x108] sm:$0xff] }
 0x192   :  { %550 = vst [vmem:[#allocation2 + $0x58] sm:$0xf0] %v541_v60  ;;  %1225 = vmatpush.bf16.msrb.mxu3 %v1150_v63  ;;  %v1156_v16 = vpack.c.bf16 %v1136_v22, %v1136_v22  ;;  %v1159_v22 = vld [vmem:[%s2194_s5] sm:$0x7] }
 0x193   :  { %1212 = vmatpush.bf16.msrb.mxu2 %v1149_v26  ;;  %v1170_v21 = vsel %vm291_vm0, %v1155_v41, 0  ;;  %v1413_v41 = vmov 0  }
 0x194   :  { %1184 = vmatpush.bf16.msrb.mxu0 %v1170_v21  ;;  %v1173_v59 = vsel %vm291_vm0, %v1156_v16, 0  ;;  %1371 = vset.pattern.permute.xlu1 %v1413_v41 }
 0x195   :  { %1197 = vmatpush.bf16.msrb.mxu1 %v1173_v59  ;;  %1372 = vset.pattern.permute.xlu0 %v1413_v41 }
 0x196   :  { %v587_v9 = vpop.permute.xlu0 %586  ;;  %1162 = vperm.xlu1 %1371, %v1159_v22  }
 0x197   :  { %v592_v14 = vsel %vm590_vm7, %v2056_v49, %v587_v9  ;;  %v2111_v52 = vpop.permute.xlu1 %640  ;;  %v532_v46 = vpop.permute.xlu2 %531 }
 0x198   :  { %601 = vst [vmem:[#allocation2 + $0x70] sm:$0xf] %v592_v14  ;;  %v647_v31 = vsel %vm590_vm7, %v2111_v52, %v2069_v51  ;;  %1185 = vmatpush.bf16.msrb.mxu0 %v1151_v32  ;;  %v539_v3 = vsel %vm483_vm6, %v532_v46, %v534_v1  ;;  %v1113_v43 = vld [vmem:[#allocation2 + $0x50] sm:$0xff] }
 0x199   :  { %656 = vst [vmem:[#allocation2 + $0x70] sm:$0xf0] %v647_v31  ;;  %1198 = vmatpush.bf16.msrb.mxu1 %v1152_v8 }
 0x19a   :  { %547 = vst.msk [vmem:[#allocation2 + $0x40] sm:$0xf0] %vm546_vm1, %v532_v46 }
 0x19b   :  { %548 = vst [vmem:[#allocation2 + $0x48] sm:$0xf0] %v539_v3 }
 0x19e   :  { %v713_v61 = vpop.permute.xlu0 %712 }
 0x19f   :  { %v715_v23 = vpop.permute.xlu1 %714  ;;  %v267_v33 = vpop.permute.xlu2 %266 }
 0x1a0   :  { %v720_v11 = vsel %vm566_vm4, %v713_v61, %v715_v23  ;;  %v721_v28 = vsel %vm566_vm4, %v715_v23, %v2051_v29  ;;  %v1117_v35 = vld [vmem:[#allocation2 + $0x70] sm:$0xff] }
 0x1a1   :  { %727 = vst [vmem:[#allocation2 + $0xa0] sm:$0xf] %v720_v11  ;;  %v1145_v24 = vpack.c.bf16 %v1117_v35, %v1113_v43  ;;  %v1290_v11 = vld [vmem:[%s2196_s7] sm:$0x7] }
 0x1a2   :  { %728 = vst [vmem:[#allocation2 + $0xa8] sm:$0xf] %v721_v28 }
 0x1a3   :  { %1213 = vmatpush.bf16.msrb.mxu2 %v1145_v24 }
 0x1a6   :  { %v770_v48 = vpop.permute.xlu0 %769 }
 0x1a7   :  { %v775_v17 = vsel %vm566_vm4, %v2080_v12, %v770_v48  ;;  %v776_v34 = vsel %vm566_vm4, %v770_v48, %v2063_v13  ;;  %v482_v40 = vpop.permute.xlu1 %481  ;;  %v431_v29 = vpop.permute.xlu2 %430  ;;  %vm598_vm4 = vcmask 1043464  }
 0x1a8   :  { %782 = vst [vmem:[#allocation2 + $0xa0] sm:$0xf0] %v775_v17  ;;  %v486_v56 = vsel %vm483_vm6, %v1998_v18, %v482_v40 }
 0x1a9   :  { %783 = vst [vmem:[#allocation2 + $0xa8] sm:$0xf0] %v776_v34 }
 0x1aa   :  { %495 = vst [vmem:[#allocation2 + $0x58] sm:$0xf] %v486_v56 }
 0x1ae   :  { %v589_v19 = vpop.permute.xlu0 %588 }
 0x1af   :  { %v593_v4 = vsel %vm590_vm7, %v587_v9, %v589_v19  ;;  %v645_v6 = vpop.permute.xlu1 %644  ;;  %v1123_v58 = vld [vmem:[#allocation2 + $0xa0] sm:$0xff]  ;;  %v369_v18 = vpop.permute.xlu2 %368  ;;  %v1102_v9 = vld [vmem:[%s2193_s4] sm:$0x3] }
 0x1b0   :  { %602 = vst [vmem:[#allocation2 + $0x78] sm:$0xf] %v593_v4  ;;  %v648_v12 = vsel %vm590_vm7, %v2069_v51, %v645_v6  ;;  %v1147_v13 = vpack.c.bf16 %v1123_v58, %v1119_v50  ;;  %v1124_v7 = vld [vmem:[#allocation2 + $0xa8] sm:$0xff] }
 0x1b1   :  { %657 = vst [vmem:[#allocation2 + $0x78] sm:$0xf0] %v648_v12  ;;  %v1148_v10 = vpack.c.bf16 %v1124_v7, %v1120_v54  ;;  %v1114_v47 = vld [vmem:[#allocation2 + $0x58] sm:$0xff] }
 0x1b2   :  { %1186 = vmatpush.bf16.msrb.mxu0 %v1147_v13  ;;  %385 = vst.msk [vmem:[#allocation2 + $0x20] sm:$0xf] %vm384_vm2, %v369_v18 }
 0x1b3   :  { %1199 = vmatpush.bf16.msrb.mxu1 %v1148_v10 }
 0x1b6   :  { %v265_v37 = vpop.permute.xlu0 %264 }
 0x1b7   :  { %v270_v0 = vsel %vm268_vm5, %v2095_v55, %v265_v37  ;;  %v271_v44 = vsel %vm268_vm5, %v265_v37, %v267_v33  ;;  %v2132_v62 = vpop.permute.xlu1 %319 }
 0x1b8   :  { %279 = vst [vmem:[#allocation2 + $0x10] sm:$0xf] %v270_v0  ;;  %v326_v51 = vsel %vm268_vm5, %v2132_v62, %v2100_v30  ;;  %v1118_v42 = vld [vmem:[#allocation2 + $0x78] sm:$0xff] }
 0x1b9   :  { %280 = vst [vmem:[#allocation2 + $0x18] sm:$0xf] %v271_v44  ;;  %v1146_v1 = vpack.c.bf16 %v1118_v42, %v1114_v47 }
 0x1ba   :  { %335 = vst [vmem:[#allocation2 + $0x10] sm:$0xf0] %v326_v51 }
 0x1bb   :  { %1226 = vmatpush.bf16.msrb.mxu3 %v1146_v1 }
 0x1be   :  { %v371_v45 = vpop.permute.xlu0 %370 }
 0x1bf   :  { %v377_v25 = vsel %vm376_vm8, %v369_v18, %v371_v45  ;;  %v373_v15 = vpop.permute.xlu1 %372 }
 0x1c0   :  { %386 = vst [vmem:[#allocation2 + $0x28] sm:$0xf] %v377_v25  ;;  %v378_v5 = vsel %vm376_vm8, %v371_v45, %v373_v15 }
 0x1c1   :  { %387 = vst [vmem:[#allocation2 + $0x30] sm:$0xf] %v378_v5 }
 0x1c6   :  { %v429_v60 = vpop.permute.xlu0 %428 }
 0x1c7   :  { %v433_v63 = vsel %vm376_vm8, %v2105_v38, %v429_v60  ;;  %v434_v27 = vsel %vm376_vm8, %v429_v60, %v431_v29  ;;  %v476_v53 = vpop.permute.xlu1 %475 }
 0x1c8   :  { %442 = vst [vmem:[#allocation2 + $0x30] sm:$0xf0] %v433_v63  ;;  %v484_v26 = vsel %vm483_vm6, %v476_v53, %v2090_v36  ;;  %v1105_v36 = vld [vmem:[#allocation2 + $0x10] sm:$0xff]  ;;  %vm1165_vm6 = vcmask 588800  }
 0x1c9   :  { %443 = vst [vmem:[#allocation2 + $0x38] sm:$0xf0] %v434_v27 }
 0x1ca   :  { %492 = vst.msk [vmem:[#allocation2 + $0x40] sm:$0xf] %vm491_vm3, %v476_v53 }
 0x1cb   :  { %493 = vst [vmem:[#allocation2 + $0x48] sm:$0xf] %v484_v26 }
 0x1ce   :  { %v583_v16 = vpop.permute.xlu0 %582 }
 0x1cf   :  { %v591_v21 = vsel %vm590_vm7, %v583_v16, %v2056_v49  ;;  %599 = vst.msk [vmem:[#allocation2 + $0x60] sm:$0xf] %vm598_vm4, %v583_v16  ;;  %v639_v20 = vpop.permute.xlu1 %638  ;;  %v1109_v57 = vld [vmem:[#allocation2 + $0x30] sm:$0xff]  ;;  %v1280_v49 = vld [vmem:[%s2195_s6] sm:$0x7] }
 0x1d0   :  { %600 = vst [vmem:[#allocation2 + $0x68] sm:$0xf] %v591_v21  ;;  %v646_v59 = vsel %vm590_vm7, %v639_v20, %v2111_v52  ;;  %v1141_v2 = vpack.c.bf16 %v1109_v57, %v1105_v36  ;;  %1283 = vperm.xlu1 %1371, %v1280_v49   ;;  %vm276_vm7 = vcmask 1043592  }
 0x1d1   :  { %654 = vst.msk [vmem:[#allocation2 + $0x60] sm:$0xf0] %vm653_vm10, %v639_v20  ;;  %v1111_v8 = vld [vmem:[#allocation2 + $0x40] sm:$0xff] }
 0x1d2   :  { %655 = vst [vmem:[#allocation2 + $0x68] sm:$0xf0] %v646_v59  ;;  %1214 = vmatpush.bf16.msrb.mxu2 %v1141_v2  ;;  %v1112_v3 = vld [vmem:[#allocation2 + $0x48] sm:$0xff] }
 0x1d5   :  { %1356 = vmatmul.msk.bf16.vlgmr.msrb.gmra.mxu2 %vm1165_vm6, %v1102_v9 }
 0x1d6   :  { %v324_v32 = vpop.permute.xlu0 %323 }
 0x1d7   :  { %v327_v39 = vsel %vm268_vm5, %v2100_v30, %v324_v32  ;;  %v375_v14 = vpop.permute.xlu1 %374 }
 0x1d8   :  { %336 = vst [vmem:[#allocation2 + $0x18] sm:$0xf0] %v327_v39  ;;  %v379_v52 = vsel %vm376_vm8, %v373_v15, %v375_v14  ;;  %v1115_v31 = vld [vmem:[#allocation2 + $0x60] sm:$0xff]  ;;  %1293 = vperm.xlu1 %1371, %v1290_v11  }
 0x1d9   :  { %388 = vst [vmem:[#allocation2 + $0x38] sm:$0xf] %v379_v52  ;;  %v1143_v46 = vpack.c.bf16 %v1115_v31, %v1111_v8  ;;  %v1116_v61 = vld [vmem:[#allocation2 + $0x68] sm:$0xff] }
 0x1da   :  { %v1144_v23 = vpack.c.bf16 %v1116_v61, %v1112_v3 }
 0x1db   :  { %1187 = vmatpush.bf16.msrb.mxu0 %v1143_v46 }
 0x1dc   :  { %1200 = vmatpush.bf16.msrb.mxu1 %v1144_v23 }
 0x1de   :  { %v261_v28 = vpop.permute.xlu0 %260 }
 0x1df   :  { %v269_v30 = vsel %vm268_vm5, %v261_v28, %v2095_v55  ;;  %277 = vst.msk [vmem:[#allocation2] sm:$0xf] %vm276_vm7, %v261_v28  ;;  %v318_v43 = vpop.permute.xlu1 %317  ;;  %v1106_v35 = vld [vmem:[#allocation2 + $0x18] sm:$0xff] }
 0x1e0   :  { %278 = vst [vmem:[#allocation2 + $0x8] sm:$0xf] %v269_v30  ;;  %v325_v24 = vsel %vm268_vm5, %v318_v43, %v2132_v62  ;;  %v1110_v33 = vld [vmem:[#allocation2 + $0x38] sm:$0xff]  ;;  %vm1233_vm5 = vcmask 1042432  }
 0x1e1   :  { %333 = vst.msk [vmem:[#allocation2] sm:$0xf0] %vm332_vm11, %v318_v43  ;;  %v1142_v48 = vpack.c.bf16 %v1110_v33, %v1106_v35 }
 0x1e2   :  { %334 = vst [vmem:[#allocation2 + $0x8] sm:$0xf0] %v325_v24 }
 0x1e3   :  { %1227 = vmatpush.bf16.msrb.mxu3 %v1142_v48 }
 0x1e6   :  { %v425_v17 = vpop.permute.xlu0 %424  ;;  %1357 = vmatmul.msk.bf16.vlgmr.msrb.gmra.mxu3 %vm1165_vm6, %v1102_v9 }
 0x1e7   :  { %v432_v34 = vsel %vm376_vm8, %v425_v17, %v2105_v38  ;;  %440 = vst.msk [vmem:[#allocation2 + $0x20] sm:$0xf0] %vm439_vm12, %v425_v17 }
 0x1e8   :  { %441 = vst [vmem:[#allocation2 + $0x28] sm:$0xf0] %v432_v34  ;;  %v1103_v55 = vld [vmem:[#allocation2] sm:$0xff] }
 0x1e9   :  { %v1104_v29 = vld [vmem:[#allocation2 + $0x8] sm:$0xff] }
 0x1ee   :  { %v1107_v40 = vld [vmem:[#allocation2 + $0x20] sm:$0xff] }
 0x1ef   :  { %v1139_v56 = vpack.c.bf16 %v1107_v40, %v1103_v55  ;;  %v1108_v19 = vld [vmem:[#allocation2 + $0x28] sm:$0xff] }
 0x1f0   :  { %v1140_v4 = vpack.c.bf16 %v1108_v19, %v1104_v29 }
 0x1f1   :  { %1188 = vmatpush.bf16.msrb.mxu0 %v1139_v56 }
 0x1f2   :  { %1201 = vmatpush.bf16.msrb.mxu1 %v1140_v4 }
 0x1f4   :  { %1354 = vmatmul.msk.bf16.vlgmr.msrb.gmra.mxu0 %vm1165_vm6, %v1102_v9 }
 0x1f5   :  { %1355 = vmatmul.msk.bf16.vlgmr.msrb.gmra.mxu1 %vm1165_vm6, %v1102_v9 }
 0x208   :  { %v1163_v12 = vpop.permute.xlu1 %1162 }
 0x242   :  { %v1284_v8 = vpop.permute.xlu1 %1283 }
 0x24a   :  { %v1294_v40 = vpop.permute.xlu1 %1293 }
 0x258   :  { %v1216_v6 = vpop.f32.mrf.mxu2 }
 0x259   :  { %v1217_v13 = vadd.f32 %v1216_v6, %v1163_v12 }
 0x25b   :  { %v1246_v62 = vmul.f32 %v1217_v13, %v1217_v13  ;;  %v1237_v45 = vsel %vm1233_vm5, %v1217_v13, 0.0 }
 0x25d   :  { %v1251_v53 = vsel %vm1233_vm5, %v1246_v62, 0.0 }
 0x260   :  { %v1218_v50 = vpop.f32.mrf.mxu2 }
 0x269   :  { %v1229_v58 = vpop.f32.mrf.mxu3 }
 0x26a   :  { %v1230_v18 = vadd.f32 %v1229_v58, %v1163_v12 }
 0x26c   :  { %v1247_v25 = vmul.f32 %v1230_v18, %v1230_v18  ;;  %v1239_v27 = vsel %vm1233_vm5, %v1230_v18, 0.0 }
 0x26e   :  { %v1253_v16 = vsel %vm1233_vm5, %v1247_v25, 0.0 }
 0x271   :  { %v1190_v38 = vpop.f32.mrf.mxu0  ;;  %v1231_v54 = vpop.f32.mrf.mxu3 }
 0x272   :  { %v1191_v7 = vadd.f32 %v1190_v38, %v1163_v12  ;;  %v1203_v10 = vpop.f32.mrf.mxu1  ;;  %v1314_v38 = vld.sshfl [vmem:[#allocation1 + $0x18] sm:$0xff pattern:$0x75316420] }
 0x273   :  { %v1204_v37 = vadd.f32 %v1203_v10, %v1163_v12  ;;  %v1311_v10 = vld.sshfl [vmem:[#allocation1] sm:$0xff pattern:$0x75316420] }
 0x274   :  { %v1234_v0 = vsel %vm1233_vm5, %v1191_v7, 0.0  ;;  %v1244_v44 = vmul.f32 %v1191_v7, %v1191_v7 }
 0x275   :  { %v1235_v51 = vsel %vm1233_vm5, %v1204_v37, 0.0  ;;  %v1245_v47 = vmul.f32 %v1204_v37, %v1204_v37 }
 0x276   :  { %v1236_v42 = vadd.f32 %v1235_v51, %v1234_v0  ;;  %v1248_v1 = vsel %vm1233_vm5, %v1244_v44, 0.0 }
 0x277   :  { %v1249_v15 = vsel %vm1233_vm5, %v1245_v47, 0.0 }
 0x278   :  { %v1238_v5 = vadd.f32 %v1237_v45, %v1236_v42  ;;  %v1250_v60 = vadd.f32 %v1249_v15, %v1248_v1 }
 0x279   :  { %v1192_v63 = vpop.f32.mrf.mxu0 }
 0x27a   :  { %v1205_v26 = vpop.f32.mrf.mxu1  ;;  %v1240_v41 = vadd.f32 %v1239_v27, %v1238_v5  ;;  %v1252_v22 = vadd.f32 %v1251_v53, %v1250_v60 }
 0x27c   :  { %1241 = vadd.xlane.f32.xlu2 %v1240_v41  ;;  %v1254_v21 = vadd.f32 %v1253_v16, %v1252_v22 }
 0x27e   :  { %1255 = vadd.xlane.f32.xlu0 %v1254_v21 }
 0x2ef   :  { %v1242_v20 = vpop.xlane.xlu2 %1241 }
 0x2f0   :  { %v1243_v36 = vmul.f32 0.001953125, %v1242_v20 }
 0x2f1   :  { %v1256_v57 = vpop.xlane.xlu0 %1255 }
 0x2f2   :  { %v1257_v59 = vmul.f32 0.001953125, %v1256_v57  ;;  %v1258_v2 = vmul.f32 %v1243_v36, %v1243_v36  ;;  %v1261_v61 = vsub.f32 %v1191_v7, %v1243_v36  ;;  %v1262_v23 = vsub.f32 %v1204_v37, %v1243_v36 }
 0x2f3   :  { %v1263_v11 = vsub.f32 %v1217_v13, %v1243_v36  ;;  %v1264_v28 = vsub.f32 %v1230_v18, %v1243_v36  ;;  %v1312_v13 = vld.sshfl [vmem:[#allocation1 + $0x8] sm:$0xff pattern:$0x75316420]  ;;  %v1313_v18 = vld.sshfl [vmem:[#allocation1 + $0x10] sm:$0xff pattern:$0x75316420] }
 0x2f4   :  { %v1259_v9 = vsub.f32 %v1257_v59, %v1258_v2 }
 0x2f6   :  { %v1260_v49 = vmax.f32 %v1259_v9, 0.0 }
 0x2f8   :  { %v1265_v32 = vadd.f32 1e-05, %v1260_v49 }
 0x2fa   :  { %1373 = vrsqrt.f32 %v1265_v32  ;;  %vm1272_vm13 = vweird.f32 %v1265_v32 }
 0x300   :  { %v1374_v39 = vpop.eup %1373 }
 0x301   :  { %v1267_v14 = vmul.f32 %v1374_v39, %v1265_v32  ;;  %vm1273_vm8 = vweird.f32 %v1374_v39 }
 0x302   :  { %vm1274_vm14 = vmor %vm1272_vm13, %vm1273_vm8 }
 0x303   :  { %v1268_v52 = vmul.f32 %v1374_v39, %v1267_v14 }
 0x305   :  { %v1269_v31 = vmul.f32 0.5, %v1268_v52 }
 0x307   :  { %v1270_v46 = vsub.f32 1.5, %v1269_v31 }
 0x309   :  { %v1271_v3 = vmul.f32 %v1374_v39, %v1270_v46 }
 0x30b   :  { %v1275_v30 = vsel %vm1274_vm14, %v1374_v39, %v1271_v3 }
 0x30c   :  { %v1276_v43 = vmul.f32 %v1275_v30, %v1261_v61  ;;  %v1277_v35 = vmul.f32 %v1275_v30, %v1262_v23  ;;  %v1278_v24 = vmul.f32 %v1275_v30, %v1263_v11  ;;  %v1279_v33 = vmul.f32 %v1275_v30, %v1264_v28 }
 0x30e   :  { %v1286_v48 = vmul.f32 %v1284_v8, %v1276_v43  ;;  %v1287_v17 = vmul.f32 %v1284_v8, %v1277_v35  ;;  %v1288_v34 = vmul.f32 %v1284_v8, %v1278_v24  ;;  %v1289_v55 = vmul.f32 %v1284_v8, %v1279_v33 }
 0x310   :  { %v1296_v56 = vadd.f32 %v1294_v40, %v1286_v48  ;;  %v1297_v29 = vadd.f32 %v1294_v40, %v1287_v17  ;;  %v1298_v19 = vadd.f32 %v1294_v40, %v1288_v34  ;;  %v1299_v4 = vadd.f32 %v1294_v40, %v1289_v55 }
 0x312   :  { %v1300_v6 = vmax.f32 %v1296_v56, 0.0  ;;  %v1301_v50 = vmax.f32 %v1297_v29, 0.0  ;;  %v1302_v58 = vmax.f32 %v1298_v19, 0.0  ;;  %v1303_v12 = vmax.f32 %v1299_v4, 0.0 }
 0x314   :  { %v1320_v54 = vadd.f32 %v1312_v13, %v1301_v50  ;;  %v1322_v7 = vadd.f32 %v1314_v38, %v1303_v12  ;;  %v1319_v37 = vadd.f32 %v1311_v10, %v1300_v6  ;;  %v1321_v0 = vadd.f32 %v1313_v18, %v1302_v58 }
 0x316   :  { %v1327_v44 = vrot.slane %v1320_v54, 4  ;;  %v1328_v62 = vrot.slane %v1322_v7, 4 }
 0x318   :  { %v1329_v51 = vsel %vm291_vm0, %v1319_v37, %v1327_v44  ;;  %v1330_v47 = vsel %vm291_vm0, %v1321_v0, %v1328_v62 }
 0x319   :  { %1333 = vst [vmem:[%s2198_s9] sm:$0x77] %v1329_v51 }
 0x31a   :  { %1334 = vst [vmem:[%s2198_s9 + $0x8] sm:$0x77] %v1330_v47 }
 0x31b   :  { %1339 = vsyncpa [#allocation4], 1 }

</bundles_post_ra>
